<compile_context>
chip_gen: v7x
topology: tpu7x:2x2x1
jax: 0.10.0
libtpu: 0.0.40
codegen_flags: <defaults>
</compile_context>

<pallas_src>
import functools

import jax
import jax.numpy as jnp
from jax import lax
from jax.experimental import pallas as pl
from jax.experimental.pallas import tpu as pltpu


def _relu(x):
    return jnp.maximum(x, 0.0)


def sdne_tile_kernel(a_ref, at_ref, w1t_ref, w1b_ref, b1_ref, w2_ref, b2_ref,
                     wd1_ref, bd1_ref, wd2l_ref, wd2r_ref, bd2l_ref, bd2r_ref,
                     s_out_ref, v_out_ref, *, beta, n_valid, tm, mask_rows, col_chunk):
    a_bf = a_ref[...]                       # [tm, N] bf16 rows of A
    at_bf = at_ref[...]                     # [tm, N] bf16 rows of A^T

    # ----- encoder: Linear+ReLU, Linear+ReLU (bf16 MXU inputs, f32 accumulation).
    # w1 is split at the A|A^T concat boundary -> two dots summed.
    h1 = _relu(jnp.dot(a_bf, w1t_ref[...], preferred_element_type=jnp.float32)
               + jnp.dot(at_bf, w1b_ref[...], preferred_element_type=jnp.float32)
               + b1_ref[...])                                                   # [tm, H1]
    Y = _relu(jnp.dot(h1.astype(jnp.bfloat16), w2_ref[...],
                      preferred_element_type=jnp.float32) + b2_ref[...])        # [tm, H2]

    # ----- decoder first layer -----
    d1 = _relu(jnp.dot(Y.astype(jnp.bfloat16), wd1_ref[...],
                       preferred_element_type=jnp.float32) + bd1_ref[...])      # [tm, H1]
    d1_bf = d1.astype(jnp.bfloat16)

    if mask_rows:   # static flag: only present when N was padded to a tile multiple
        row = pl.program_id(0) * tm + lax.broadcasted_iota(jnp.int32, (tm, 1), 0)
        valid = (row < n_valid).astype(jnp.float32)                             # [tm, 1]
    else:
        valid = None

    beta2 = beta * beta

    def half_loss2(a_half_bf, wd2_ref, bd2_ref):
        # Decoder output half, processed in <=col_chunk-lane column chunks so no
        # [tm, 2N] f32 slab (A_hat / diff / bsq) is ever live at once.
        ncols = wd2_ref.shape[1]
        total = jnp.float32(0.0)
        for c0 in range(0, ncols, col_chunk):       # static chunk loop
            c1 = min(c0 + col_chunk, ncols)
            a_c = a_half_bf[:, c0:c1].astype(jnp.float32)   # exact for 0/1 adjacency
            a_hat = _relu(jnp.dot(d1_bf, wd2_ref[:, c0:c1],
                                  preferred_element_type=jnp.float32)
                          + bd2_ref[:, c0:c1])
            diff = a_c - a_hat
            sq = diff * diff
            bsq = jnp.where(a_c != 0.0, beta2 * sq, sq)     # beta fused, no beta_matrix
            if valid is not None:
                bsq = bsq * valid
            total = total + jnp.sum(bsq)
        return total

    loss2_part = (half_loss2(a_bf, wd2l_ref, bd2l_ref)
                  + half_loss2(at_bf, wd2r_ref, bd2r_ref))

    # Per-tile partial reductions for loss_1st (everything decomposes row-wise).
    Ym = Y if valid is None else Y * valid
    emb_part = jnp.sum(Ym * Ym)                          # scalar: sum_i ||Y_i||^2
    s_part = jnp.sum(Ym, axis=0, keepdims=True)          # [1, H2]

    s_out_ref[0] = s_part
    lane = lax.broadcasted_iota(jnp.int32, (1, 128), 1)
    v_out_ref[0] = (jnp.where(lane == 0, loss2_part, 0.0)
                    + jnp.where(lane == 1, emb_part, 0.0))


def _round_up(x, m):
    return (x + m - 1) // m * m


def _pick_col_chunk(n):
    if n <= 512:
        return n
    for cc in (512, 384, 256, 128):
        if n % cc == 0:
            return cc
    return n   # non-128-aligned N: fall back to full-width half


def _vmem_plan(n, h1, col_chunk, weight_bytes):
    """Generation-aware VMEM budget: cap limit, per-tile-row bytes, tile budget."""
    try:
        cap = int(pltpu.get_tpu_info().vmem_capacity_bytes)
    except Exception:
        cap = 64 << 20
    # 64 MiB parts (v7x) -> cap at ~48 MiB; 128 MiB parts (v5e/v6e) -> ~100 MiB.
    limit_cap = (48 << 20) if cap <= (64 << 20) else (100 << 20)
    per_row = (
        2 * (2 * n) * 2          # A / A^T bf16 tiles, double-buffered by BlockSpec
        + 4 * n + 2 * n          # Y f32 + bf16 copy
        + (4 + 2) * 2 * h1       # h1 / d1 f32 + bf16 copies
        + 4 * col_chunk          # f32 cast of the active adjacency chunk
        + 4 * 4 * col_chunk      # A_hat / diff / sq / bsq chunks (f32)
        + 256                    # slack
    )
    overhead = 2 * weight_bytes + (6 << 20)   # weights (assume double-buffered) + scratch
    tile_budget = max(limit_cap - overhead, 8 << 20)
    return limit_cap, per_row, overhead, tile_budget


def _choose_tile_rows(n, per_row, tile_budget, tm_override):
    if tm_override is not None:
        tm = max(128, _round_up(int(tm_override), 128))
        return min(tm, _round_up(n, 128))
    n_pad8 = _round_up(n, 8)
    if n_pad8 <= 512:
        return n_pad8                     # single tile; grid=(1,)
    tm = (tile_budget // per_row) // 128 * 128
    tm = int(max(128, min(1024, tm)))
    tm = min(tm, _round_up(n, 128))
    # Prefer an even grid length so v7x's two TensorCores split the "parallel"
    # axis evenly (harmless no-op on single-core v5e/v6e).
    while tm > 128 and pl.cdiv(n, tm) > 1 and pl.cdiv(n, tm) % 2 == 1:
        tm -= 128
    return tm


def sdne_forward(A, params, beta, *, tm=None):
    """Pallas implementation of SDNEModel.forward(A, L) (L is unused by the model)."""
    w1, b1, w2, b2, wd1, bd1, wd2, bd2 = params
    N = A.shape[0]
    H1 = w1.shape[1]
    H2 = w2.shape[1]
    if H2 != N:
        raise ValueError("hidden_layers[-1] must equal N (PyTorch loss_1st broadcast quirk)")
    if w1.shape[0] != 2 * N or wd2.shape[1] != 2 * N:
        raise ValueError("encoder input / decoder output dims must be 2*N")

    # Stream the adjacency in bf16 (exact for 0/1 adjacency matrices); never
    # materialize A_pro = concat(A, A^T) in HBM.  A^T is a cheap bf16 transpose.
    # TODO(synk): if A can hold non-bf16-representable weights, stream it in f32.
    A_bf = A.astype(jnp.bfloat16)
    AT_bf = A_bf.T

    col_chunk = _pick_col_chunk(N)

    # bf16 weights for the MXU, split at the concat boundary; biases stay f32.
    w1t = w1[:N].astype(jnp.bfloat16)
    w1b = w1[N:].astype(jnp.bfloat16)
    w2b = w2.astype(jnp.bfloat16)
    wd1b = wd1.astype(jnp.bfloat16)
    wd2l = wd2[:, :N].astype(jnp.bfloat16)
    wd2r = wd2[:, N:].astype(jnp.bfloat16)
    b1f = b1.reshape(1, -1).astype(jnp.float32)
    b2f = b2.reshape(1, -1).astype(jnp.float32)
    bd1f = bd1.reshape(1, -1).astype(jnp.float32)
    bd2f = bd2.reshape(1, -1).astype(jnp.float32)
    bd2l, bd2r = bd2f[:, :N], bd2f[:, N:]

    weight_bytes = sum(int(x.size) * x.dtype.itemsize
                       for x in (w1t, w1b, w2b, wd1b, wd2l, wd2r,
                                 b1f, b2f, bd1f, bd2l, bd2r))

    limit_cap, per_row, overhead, tile_budget = _vmem_plan(N, H1, col_chunk, weight_bytes)
    tm_rows = _choose_tile_rows(N, per_row, tile_budget, tm)
    Np = _round_up(N, tm_rows)
    grid = (Np // tm_rows,)
    mask_rows = (Np != N)

    if Np != N:
        A_bf = jnp.pad(A_bf, ((0, Np - N), (0, 0)))
        AT_bf = jnp.pad(AT_bf, ((0, Np - N), (0, 0)))

    est = tm_rows * per_row + overhead + (4 << 20)
    vmem_limit = int(min(limit_cap, max(32 << 20, est)))

    kernel = functools.partial(sdne_tile_kernel, beta=float(beta), n_valid=N,
                               tm=tm_rows, mask_rows=mask_rows, col_chunk=col_chunk)

    out_shapes = (
        jax.ShapeDtypeStruct((grid[0], 1, H2), jnp.float32),    # per-tile row-sum of Y
        jax.ShapeDtypeStruct((grid[0], 1, 128), jnp.float32),   # lane0 = loss2, lane1 = emb
    )
    out_specs = (
        pl.BlockSpec((1, 1, H2), lambda i: (i, 0, 0)),
        pl.BlockSpec((1, 1, 128), lambda i: (i, 0, 0)),
    )

    def run(single_buffer_weights):
        if single_buffer_weights:
            def const(shape):
                return pl.BlockSpec(shape, lambda i: (0,) * len(shape),
                                    pipeline_mode=pl.Buffered(1))
        else:
            def const(shape):
                return pl.BlockSpec(shape, lambda i: (0,) * len(shape))
        in_specs = [
            pl.BlockSpec((tm_rows, N), lambda i: (i, 0)),   # A row tile (bf16)
            pl.BlockSpec((tm_rows, N), lambda i: (i, 0)),   # A^T row tile (bf16)
            const(w1t.shape), const(w1b.shape), const(b1f.shape),
            const(w2b.shape), const(b2f.shape),
            const(wd1b.shape), const(bd1f.shape),
            const(wd2l.shape), const(wd2r.shape),
            const(bd2l.shape), const(bd2r.shape),
        ]
        return pl.pallas_call(
            kernel,
            grid=grid,
            in_specs=in_specs,
            out_specs=out_specs,
            out_shape=out_shapes,
            compiler_params=pltpu.CompilerParams(
                dimension_semantics=("parallel",),
                vmem_limit_bytes=vmem_limit),
        )(A_bf, AT_bf, w1t, w1b, b1f, w2b, b2f, wd1b, bd1f, wd2l, wd2r, bd2l, bd2r)

    try:
        s_parts, v_parts = run(True)
    except Exception:
        # Fallback: some Pallas versions reject single-buffered (Buffered(1)) inputs.
        s_parts, v_parts = run(False)

    # Tiny final reduction (O(G * H2)) in plain JAX.
    s = jnp.sum(s_parts[:, 0, :], axis=0)                  # [H2] = sum_i Y_i
    loss_2nd = jnp.sum(v_parts[:, 0, 0]) / N               # mean over rows
    emb_sum = jnp.sum(v_parts[:, 0, 1])                    # sum_i ||Y_i||^2
    # sum(emb_norm - 2 * Y Y^T + Y^T) with H2 == N:
    loss_1st = N * emb_sum - 2.0 * jnp.dot(s, s) + jnp.sum(s)
    return loss_2nd + loss_1st


def sdne_reference(A, params, beta):
    """Pure-JAX f32 reference mirroring the PyTorch forward exactly."""
    w1, b1, w2, b2, wd1, bd1, wd2, bd2 = params
    A_pro = jnp.concatenate([A, A.T], axis=1)
    beta_matrix = jnp.where(A_pro != 0.0, beta, 1.0).astype(jnp.float32)
    h1 = jax.nn.relu(A_pro @ w1 + b1)
    Y = jax.nn.relu(h1 @ w2 + b2)
    d1 = jax.nn.relu(Y @ wd1 + bd1)
    A_hat = jax.nn.relu(d1 @ wd2 + bd2)
    loss_2nd = jnp.mean(jnp.sum(((A_pro - A_hat) * beta_matrix) ** 2, axis=1))
    emb_norm = jnp.sum(Y * Y, axis=1, keepdims=True)
    loss_1st = jnp.sum(emb_norm - 2.0 * (Y @ Y.T) + Y.T)
    return loss_2nd + loss_1st


def sdne_reference_bf16(A, params, beta):
    """Matched-precision reference: bf16 matmul inputs, f32 accumulation, sum identities."""
    w1, b1, w2, b2, wd1, bd1, wd2, bd2 = params

    def mm(x, w):
        return jnp.dot(x.astype(jnp.bfloat16), w.astype(jnp.bfloat16),
                       preferred_element_type=jnp.float32)

    A_pro = jnp.concatenate([A, A.T], axis=1).astype(jnp.float32)
    h1 = jax.nn.relu(mm(A_pro, w1) + b1)
    Y = jax.nn.relu(mm(h1, w2) + b2)
    d1 = jax.nn.relu(mm(Y, wd1) + bd1)
    A_hat = jax.nn.relu(mm(d1, wd2) + bd2)
    diff = A_pro - A_hat
    sq = diff * diff
    bsq = jnp.where(A_pro != 0.0, beta * beta * sq, sq)
    loss_2nd = jnp.mean(jnp.sum(bsq, axis=1))
    s = jnp.sum(Y, axis=0)
    N = A.shape[0]
    loss_1st = N * jnp.sum(Y * Y) - 2.0 * jnp.dot(s, s) + jnp.sum(s)
    return loss_2nd + loss_1st


def init_linear(key, fan_in, fan_out):
    """Deterministic Linear init (uniform(-1/sqrt(fan_in), 1/sqrt(fan_in)), like PyTorch).
    Weights stored [in, out] (transposed vs torch) so the kernel computes x @ W + b."""
    kw, kb = jax.random.split(key)
    bound = 1.0 / (fan_in ** 0.5)
    w = jax.random.uniform(kw, (fan_in, fan_out), jnp.float32, -bound, bound)
    b = jax.random.uniform(kb, (1, fan_out), jnp.float32, -bound, bound)
    return w, b


if __name__ == "__main__":
    N = 256                      # number of graph nodes (A is [N, N])
    hidden_layers = [64, N]      # last hidden dim must equal N (loss_1st quirk)
    alpha, beta = 1e-5, 5.0      # alpha is unused by the forward pass, as in PyTorch

    key = jax.random.PRNGKey(0)
    ka, k1, k2, k3, k4 = jax.random.split(key, 5)

    # Sparse-ish 0/1 adjacency matrix; Laplacian-placeholder L is unused by forward.
    A = (jax.random.uniform(ka, (N, N)) > 0.7).astype(jnp.float32)
    L = jnp.zeros((N, N), jnp.float32)   # unused, kept for interface parity

    # encoder: Linear(2N -> 64), ReLU, Linear(64 -> N), ReLU
    w1, b1 = init_linear(k1, 2 * N, hidden_layers[0])
    w2, b2 = init_linear(k2, hidden_layers[0], hidden_layers[1])
    # decoder: Linear(N -> 64), ReLU, Linear(64 -> 2N), ReLU
    wd1, bd1 = init_linear(k3, hidden_layers[1], hidden_layers[0])
    wd2, bd2 = init_linear(k4, hidden_layers[0], 2 * N)
    params = (w1, b1, w2, b2, wd1, bd1, wd2, bd2)

    # Default tiling: one big row tile (grid=(1,)) for this small N.
    loss = jax.block_until_ready(sdne_forward(A, params, beta))
    # Also exercise the multi-tile, megacore-parallel path (tm=128 -> grid=(2,)).
    loss_tiled = jax.block_until_ready(sdne_forward(A, params, beta, tm=128))

    ref_match = sdne_reference_bf16(A, params, beta)   # same matmul precision
    ref_f32 = sdne_reference(A, params, beta)          # exact PyTorch-equivalent math

    if not jnp.allclose(loss, ref_match, rtol=5e-3, atol=1e-2):
        raise AssertionError(f"Pallas loss {loss} != matched-precision ref {ref_match}")
    if not jnp.allclose(loss_tiled, ref_match, rtol=5e-3, atol=1e-2):
        raise AssertionError(f"tiled Pallas loss {loss_tiled} != matched-precision ref {ref_match}")
    if not jnp.allclose(loss, ref_f32, rtol=5e-2, atol=2.0):
        raise AssertionError(f"Pallas loss {loss} != f32 reference {ref_f32}")

    print("KERNEL_OK")
</pallas_src>

<mosaic_0001>
module attributes {stable_mosaic.version = 11 : i64} {
  func.func @sdne_tile_kernel(%arg0: i32, %arg1: memref<256x256xbf16, #tpu.memory_space<vmem>>, %arg2: memref<256x256xbf16, #tpu.memory_space<vmem>>, %arg3: memref<256x64xbf16, #tpu.memory_space<vmem>>, %arg4: memref<256x64xbf16, #tpu.memory_space<vmem>>, %arg5: memref<1x64xf32, #tpu.memory_space<vmem>>, %arg6: memref<64x256xbf16, #tpu.memory_space<vmem>>, %arg7: memref<1x256xf32, #tpu.memory_space<vmem>>, %arg8: memref<256x64xbf16, #tpu.memory_space<vmem>>, %arg9: memref<1x64xf32, #tpu.memory_space<vmem>>, %arg10: memref<64x256xbf16, #tpu.memory_space<vmem>>, %arg11: memref<64x256xbf16, #tpu.memory_space<vmem>>, %arg12: memref<1x256xf32, #tpu.memory_space<vmem>>, %arg13: memref<1x256xf32, #tpu.memory_space<vmem>>, %arg14: memref<1x1x256xf32, #tpu.memory_space<vmem>>, %arg15: memref<1x1x128xf32, #tpu.memory_space<vmem>>) attributes {dimension_semantics = [#tpu.dimension_semantics<parallel>], iteration_bounds = array<i64: 1>, scalar_prefetch = 0 : i64, scratch_operands = 0 : i64, tpu.core_type = #tpu.core_type<tc>, window_params = [{transform_indices = @transform_0, window_bounds = array<i64: 256, 256>}, {transform_indices = @transform_1, window_bounds = array<i64: 256, 256>}, {pipeline_mode = #tpu.pipeline_mode<synchronous>, transform_indices = @transform_2, window_bounds = array<i64: 256, 64>}, {pipeline_mode = #tpu.pipeline_mode<synchronous>, transform_indices = @transform_3, window_bounds = array<i64: 256, 64>}, {pipeline_mode = #tpu.pipeline_mode<synchronous>, transform_indices = @transform_4, window_bounds = array<i64: 1, 64>}, {pipeline_mode = #tpu.pipeline_mode<synchronous>, transform_indices = @transform_5, window_bounds = array<i64: 64, 256>}, {pipeline_mode = #tpu.pipeline_mode<synchronous>, transform_indices = @transform_6, window_bounds = array<i64: 1, 256>}, {pipeline_mode = #tpu.pipeline_mode<synchronous>, transform_indices = @transform_7, window_bounds = array<i64: 256, 64>}, {pipeline_mode = #tpu.pipeline_mode<synchronous>, transform_indices = @transform_8, window_bounds = array<i64: 1, 64>}, {pipeline_mode = #tpu.pipeline_mode<synchronous>, transform_indices = @transform_9, window_bounds = array<i64: 64, 256>}, {pipeline_mode = #tpu.pipeline_mode<synchronous>, transform_indices = @transform_10, window_bounds = array<i64: 64, 256>}, {pipeline_mode = #tpu.pipeline_mode<synchronous>, transform_indices = @transform_11, window_bounds = array<i64: 1, 256>}, {pipeline_mode = #tpu.pipeline_mode<synchronous>, transform_indices = @transform_12, window_bounds = array<i64: 1, 256>}, {transform_indices = @transform_13, window_bounds = array<i64: 1, 1, 256>}, {transform_indices = @transform_14, window_bounds = array<i64: 1, 1, 128>}]} {
    %c0 = arith.constant 0 : index
    %c0_0 = arith.constant 0 : index
    %0 = vector.load %arg1[%c0, %c0_0] : memref<256x256xbf16, #tpu.memory_space<vmem>>, vector<256x256xbf16>
    %c0_1 = arith.constant 0 : index
    %c0_2 = arith.constant 0 : index
    %1 = vector.load %arg2[%c0_1, %c0_2] : memref<256x256xbf16, #tpu.memory_space<vmem>>, vector<256x256xbf16>
    %c0_3 = arith.constant 0 : index
    %c0_4 = arith.constant 0 : index
    %2 = vector.load %arg3[%c0_3, %c0_4] : memref<256x64xbf16, #tpu.memory_space<vmem>>, vector<256x64xbf16>
    %cst = arith.constant dense<0.000000e+00> : vector<256x64xf32>
    %3 = tpu.matmul %0, %2, %cst {dimension_numbers = #tpu.dot_dimension_numbers<[1], [0], [0], [1], [0, 0, 1, 1], [], []>} : vector<256x256xbf16>, vector<256x64xbf16>, vector<256x64xf32> -> vector<256x64xf32>
    %c0_5 = arith.constant 0 : index
    %c0_6 = arith.constant 0 : index
    %4 = vector.load %arg4[%c0_5, %c0_6] : memref<256x64xbf16, #tpu.memory_space<vmem>>, vector<256x64xbf16>
    %cst_7 = arith.constant dense<0.000000e+00> : vector<256x64xf32>
    %5 = tpu.matmul %1, %4, %cst_7 {dimension_numbers = #tpu.dot_dimension_numbers<[1], [0], [0], [1], [0, 0, 1, 1], [], []>} : vector<256x256xbf16>, vector<256x64xbf16>, vector<256x64xf32> -> vector<256x64xf32>
    %6 = arith.addf %3, %5 : vector<256x64xf32>
    %c0_8 = arith.constant 0 : index
    %c0_9 = arith.constant 0 : index
    %7 = vector.load %arg5[%c0_8, %c0_9] : memref<1x64xf32, #tpu.memory_space<vmem>>, vector<1x64xf32>
    %8 = vector.broadcast %7 : vector<1x64xf32> to vector<256x64xf32>
    %9 = arith.addf %6, %8 : vector<256x64xf32>
    %cst_10 = arith.constant 0.000000e+00 : f32
    %10 = vector.broadcast %cst_10 : f32 to vector<256x64xf32>
    %11 = arith.maximumf %9, %10 : vector<256x64xf32>
    %12 = arith.truncf %11 : vector<256x64xf32> to vector<256x64xbf16>
    %c0_11 = arith.constant 0 : index
    %c0_12 = arith.constant 0 : index
    %13 = vector.load %arg6[%c0_11, %c0_12] : memref<64x256xbf16, #tpu.memory_space<vmem>>, vector<64x256xbf16>
    %cst_13 = arith.constant dense<0.000000e+00> : vector<256x256xf32>
    %14 = tpu.matmul %12, %13, %cst_13 {dimension_numbers = #tpu.dot_dimension_numbers<[1], [0], [0], [1], [0, 0, 1, 1], [], []>} : vector<256x64xbf16>, vector<64x256xbf16>, vector<256x256xf32> -> vector<256x256xf32>
    %c0_14 = arith.constant 0 : index
    %c0_15 = arith.constant 0 : index
    %15 = vector.load %arg7[%c0_14, %c0_15] : memref<1x256xf32, #tpu.memory_space<vmem>>, vector<1x256xf32>
    %16 = vector.broadcast %15 : vector<1x256xf32> to vector<256x256xf32>
    %17 = arith.addf %14, %16 : vector<256x256xf32>
    %cst_16 = arith.constant 0.000000e+00 : f32
    %18 = vector.broadcast %cst_16 : f32 to vector<256x256xf32>
    %19 = arith.maximumf %17, %18 : vector<256x256xf32>
    %20 = arith.truncf %19 : vector<256x256xf32> to vector<256x256xbf16>
    %c0_17 = arith.constant 0 : index
    %c0_18 = arith.constant 0 : index
    %21 = vector.load %arg8[%c0_17, %c0_18] : memref<256x64xbf16, #tpu.memory_space<vmem>>, vector<256x64xbf16>
    %cst_19 = arith.constant dense<0.000000e+00> : vector<256x64xf32>
    %22 = tpu.matmul %20, %21, %cst_19 {dimension_numbers = #tpu.dot_dimension_numbers<[1], [0], [0], [1], [0, 0, 1, 1], [], []>} : vector<256x256xbf16>, vector<256x64xbf16>, vector<256x64xf32> -> vector<256x64xf32>
    %c0_20 = arith.constant 0 : index
    %c0_21 = arith.constant 0 : index
    %23 = vector.load %arg9[%c0_20, %c0_21] : memref<1x64xf32, #tpu.memory_space<vmem>>, vector<1x64xf32>
    %24 = vector.broadcast %23 : vector<1x64xf32> to vector<256x64xf32>
    %25 = arith.addf %22, %24 : vector<256x64xf32>
    %cst_22 = arith.constant 0.000000e+00 : f32
    %26 = vector.broadcast %cst_22 : f32 to vector<256x64xf32>
    %27 = arith.maximumf %25, %26 : vector<256x64xf32>
    %28 = arith.truncf %27 : vector<256x64xf32> to vector<256x64xbf16>
    %29 = arith.extf %0 : vector<256x256xbf16> to vector<256x256xf32>
    %c0_23 = arith.constant 0 : index
    %c0_24 = arith.constant 0 : index
    %30 = vector.load %arg10[%c0_23, %c0_24] : memref<64x256xbf16, #tpu.memory_space<vmem>>, vector<64x256xbf16>
    %cst_25 = arith.constant dense<0.000000e+00> : vector<256x256xf32>
    %31 = tpu.matmul %28, %30, %cst_25 {dimension_numbers = #tpu.dot_dimension_numbers<[1], [0], [0], [1], [0, 0, 1, 1], [], []>} : vector<256x64xbf16>, vector<64x256xbf16>, vector<256x256xf32> -> vector<256x256xf32>
    %c0_26 = arith.constant 0 : index
    %c0_27 = arith.constant 0 : index
    %32 = vector.load %arg12[%c0_26, %c0_27] : memref<1x256xf32, #tpu.memory_space<vmem>>, vector<1x256xf32>
    %33 = vector.broadcast %32 : vector<1x256xf32> to vector<256x256xf32>
    %34 = arith.addf %31, %33 : vector<256x256xf32>
    %cst_28 = arith.constant 0.000000e+00 : f32
    %35 = vector.broadcast %cst_28 : f32 to vector<256x256xf32>
    %36 = arith.maximumf %34, %35 : vector<256x256xf32>
    %37 = arith.subf %29, %36 : vector<256x256xf32>
    %38 = arith.mulf %37, %37 : vector<256x256xf32>
    %cst_29 = arith.constant 0.000000e+00 : f32
    %39 = vector.broadcast %cst_29 : f32 to vector<256x256xf32>
    %40 = arith.cmpf one, %29, %39 : vector<256x256xf32>
    %cst_30 = arith.constant 2.500000e+01 : f32
    %41 = vector.broadcast %cst_30 : f32 to vector<256x256xf32>
    %42 = arith.mulf %41, %38 : vector<256x256xf32>
    %43 = arith.select %40, %42, %38 : vector<256x256xi1>, vector<256x256xf32>
    %44 = vector.shape_cast %43 : vector<256x256xf32> to vector<1x256x256xf32>
    %cst_31 = arith.constant dense<0.000000e+00> : vector<1xf32>
    %45 = vector.multi_reduction <add>, %44, %cst_31 [1, 2] : vector<1x256x256xf32> to vector<1xf32>
    %46 = vector.shape_cast %45 : vector<1xf32> to vector<1x1x1xf32>
    %47 = vector.extract %46[0, 0, 0] : f32 from vector<1x1x1xf32>
    %cst_32 = arith.constant 0.000000e+00 : f32
    %48 = arith.addf %cst_32, %47 : f32
    %49 = arith.extf %1 : vector<256x256xbf16> to vector<256x256xf32>
    %c0_33 = arith.constant 0 : index
    %c0_34 = arith.constant 0 : index
    %50 = vector.load %arg11[%c0_33, %c0_34] : memref<64x256xbf16, #tpu.memory_space<vmem>>, vector<64x256xbf16>
    %cst_35 = arith.constant dense<0.000000e+00> : vector<256x256xf32>
    %51 = tpu.matmul %28, %50, %cst_35 {dimension_numbers = #tpu.dot_dimension_numbers<[1], [0], [0], [1], [0, 0, 1, 1], [], []>} : vector<256x64xbf16>, vector<64x256xbf16>, vector<256x256xf32> -> vector<256x256xf32>
    %c0_36 = arith.constant 0 : index
    %c0_37 = arith.constant 0 : index
    %52 = vector.load %arg13[%c0_36, %c0_37] : memref<1x256xf32, #tpu.memory_space<vmem>>, vector<1x256xf32>
    %53 = vector.broadcast %52 : vector<1x256xf32> to vector<256x256xf32>
    %54 = arith.addf %51, %53 : vector<256x256xf32>
    %cst_38 = arith.constant 0.000000e+00 : f32
    %55 = vector.broadcast %cst_38 : f32 to vector<256x256xf32>
    %56 = arith.maximumf %54, %55 : vector<256x256xf32>
    %57 = arith.subf %49, %56 : vector<256x256xf32>
    %58 = arith.mulf %57, %57 : vector<256x256xf32>
    %cst_39 = arith.constant 0.000000e+00 : f32
    %59 = vector.broadcast %cst_39 : f32 to vector<256x256xf32>
    %60 = arith.cmpf one, %49, %59 : vector<256x256xf32>
    %cst_40 = arith.constant 2.500000e+01 : f32
    %61 = vector.broadcast %cst_40 : f32 to vector<256x256xf32>
    %62 = arith.mulf %61, %58 : vector<256x256xf32>
    %63 = arith.select %60, %62, %58 : vector<256x256xi1>, vector<256x256xf32>
    %64 = vector.shape_cast %63 : vector<256x256xf32> to vector<1x256x256xf32>
    %cst_41 = arith.constant dense<0.000000e+00> : vector<1xf32>
    %65 = vector.multi_reduction <add>, %64, %cst_41 [1, 2] : vector<1x256x256xf32> to vector<1xf32>
    %66 = vector.shape_cast %65 : vector<1xf32> to vector<1x1x1xf32>
    %67 = vector.extract %66[0, 0, 0] : f32 from vector<1x1x1xf32>
    %cst_42 = arith.constant 0.000000e+00 : f32
    %68 = arith.addf %cst_42, %67 : f32
    %69 = arith.addf %48, %68 : f32
    %70 = arith.mulf %19, %19 : vector<256x256xf32>
    %71 = vector.shape_cast %70 : vector<256x256xf32> to vector<1x256x256xf32>
    %cst_43 = arith.constant dense<0.000000e+00> : vector<1xf32>
    %72 = vector.multi_reduction <add>, %71, %cst_43 [1, 2] : vector<1x256x256xf32> to vector<1xf32>
    %73 = vector.shape_cast %72 : vector<1xf32> to vector<1x1x1xf32>
    %74 = vector.extract %73[0, 0, 0] : f32 from vector<1x1x1xf32>
    %cst_44 = arith.constant dense<0.000000e+00> : vector<256xf32>
    %75 = vector.multi_reduction <add>, %19, %cst_44 [0] : vector<256x256xf32> to vector<256xf32>
    %76 = vector.shape_cast %75 : vector<256xf32> to vector<1x256xf32>
    %c0_45 = arith.constant 0 : index
    %c0_46 = arith.constant 0 : index
    %c0_47 = arith.constant 0 : index
    %77 = vector.load %arg14[%c0_45, %c0_46, %c0_47] : memref<1x1x256xf32, #tpu.memory_space<vmem>>, vector<1x1x256xf32>
    %78 = vector.shape_cast %77 : vector<1x1x256xf32> to vector<1x256xf32>
    %79 = vector.shape_cast %76 : vector<1x256xf32> to vector<1x1x256xf32>
    tpu.vector_store %arg14[%c0_45, %c0_46, %c0_47], %79 {strides = array<i32>} : memref<1x1x256xf32, #tpu.memory_space<vmem>>, vector<1x1x256xf32>,
    %80 = tpu.iota {dimensions = array<i32: 1>} : vector<1x128xi32>
    %c0_i32 = arith.constant 0 : i32
    %81 = vector.broadcast %c0_i32 : i32 to vector<1x128xi32>
    %82 = arith.cmpi eq, %80, %81 : vector<1x128xi32>
    %cst_48 = arith.constant 0.000000e+00 : f32
    %83 = vector.broadcast %69 : f32 to vector<1x128xf32>
    %84 = vector.broadcast %cst_48 : f32 to vector<1x128xf32>
    %85 = arith.select %82, %83, %84 : vector<1x128xi1>, vector<1x128xf32>
    %c1_i32 = arith.constant 1 : i32
    %86 = vector.broadcast %c1_i32 : i32 to vector<1x128xi32>
    %87 = arith.cmpi eq, %80, %86 : vector<1x128xi32>
    %cst_49 = arith.constant 0.000000e+00 : f32
    %88 = vector.broadcast %74 : f32 to vector<1x128xf32>
    %89 = vector.broadcast %cst_49 : f32 to vector<1x128xf32>
    %90 = arith.select %87, %88, %89 : vector<1x128xi1>, vector<1x128xf32>
    %91 = arith.addf %85, %90 : vector<1x128xf32>
    %c0_50 = arith.constant 0 : index
    %c0_51 = arith.constant 0 : index
    %c0_52 = arith.constant 0 : index
    %92 = vector.load %arg15[%c0_50, %c0_51, %c0_52] : memref<1x1x128xf32, #tpu.memory_space<vmem>>, vector<1x1x128xf32>
    %93 = vector.shape_cast %92 : vector<1x1x128xf32> to vector<1x128xf32>
    %94 = vector.shape_cast %91 : vector<1x128xf32> to vector<1x1x128xf32>
    tpu.vector_store %arg15[%c0_50, %c0_51, %c0_52], %94 {strides = array<i32>} : memref<1x1x128xf32, #tpu.memory_space<vmem>>, vector<1x1x128xf32>,
    return
  }
  func.func @transform_0(%arg0: i32) -> (i32, i32) {
    %c0_i32 = arith.constant 0 : i32
    %c0_i32_0 = arith.constant 0 : i32
    return %arg0, %c0_i32 : i32, i32
  }
  func.func @transform_1(%arg0: i32) -> (i32, i32) {
    %c0_i32 = arith.constant 0 : i32
    %c0_i32_0 = arith.constant 0 : i32
    return %arg0, %c0_i32 : i32, i32
  }
  func.func @transform_2(%arg0: i32) -> (i32, i32) {
    %c0_i32 = arith.constant 0 : i32
    %c0_i32_0 = arith.constant 0 : i32
    %c0_i32_1 = arith.constant 0 : i32
    return %c0_i32, %c0_i32_0 : i32, i32
  }
  func.func @transform_3(%arg0: i32) -> (i32, i32) {
    %c0_i32 = arith.constant 0 : i32
    %c0_i32_0 = arith.constant 0 : i32
    %c0_i32_1 = arith.constant 0 : i32
    return %c0_i32, %c0_i32_0 : i32, i32
  }
  func.func @transform_4(%arg0: i32) -> (i32, i32) {
    %c0_i32 = arith.constant 0 : i32
    %c0_i32_0 = arith.constant 0 : i32
    %c0_i32_1 = arith.constant 0 : i32
    return %c0_i32, %c0_i32_0 : i32, i32
  }
  func.func @transform_5(%arg0: i32) -> (i32, i32) {
    %c0_i32 = arith.constant 0 : i32
    %c0_i32_0 = arith.constant 0 : i32
    %c0_i32_1 = arith.constant 0 : i32
    return %c0_i32, %c0_i32_0 : i32, i32
  }
  func.func @transform_6(%arg0: i32) -> (i32, i32) {
    %c0_i32 = arith.constant 0 : i32
    %c0_i32_0 = arith.constant 0 : i32
    %c0_i32_1 = arith.constant 0 : i32
    return %c0_i32, %c0_i32_0 : i32, i32
  }
  func.func @transform_7(%arg0: i32) -> (i32, i32) {
    %c0_i32 = arith.constant 0 : i32
    %c0_i32_0 = arith.constant 0 : i32
    %c0_i32_1 = arith.constant 0 : i32
    return %c0_i32, %c0_i32_0 : i32, i32
  }
  func.func @transform_8(%arg0: i32) -> (i32, i32) {
    %c0_i32 = arith.constant 0 : i32
    %c0_i32_0 = arith.constant 0 : i32
    %c0_i32_1 = arith.constant 0 : i32
    return %c0_i32, %c0_i32_0 : i32, i32
  }
  func.func @transform_9(%arg0: i32) -> (i32, i32) {
    %c0_i32 = arith.constant 0 : i32
    %c0_i32_0 = arith.constant 0 : i32
    %c0_i32_1 = arith.constant 0 : i32
    return %c0_i32, %c0_i32_0 : i32, i32
  }
  func.func @transform_10(%arg0: i32) -> (i32, i32) {
    %c0_i32 = arith.constant 0 : i32
    %c0_i32_0 = arith.constant 0 : i32
    %c0_i32_1 = arith.constant 0 : i32
    return %c0_i32, %c0_i32_0 : i32, i32
  }
  func.func @transform_11(%arg0: i32) -> (i32, i32) {
    %c0_i32 = arith.constant 0 : i32
    %c0_i32_0 = arith.constant 0 : i32
    %c0_i32_1 = arith.constant 0 : i32
    return %c0_i32, %c0_i32_0 : i32, i32
  }
  func.func @transform_12(%arg0: i32) -> (i32, i32) {
    %c0_i32 = arith.constant 0 : i32
    %c0_i32_0 = arith.constant 0 : i32
    %c0_i32_1 = arith.constant 0 : i32
    return %c0_i32, %c0_i32_0 : i32, i32
  }
  func.func @transform_13(%arg0: i32) -> (i32, i32, i32) {
    %c0_i32 = arith.constant 0 : i32
    %c0_i32_0 = arith.constant 0 : i32
    %c0_i32_1 = arith.constant 0 : i32
    return %arg0, %c0_i32, %c0_i32_0 : i32, i32, i32
  }
  func.func @transform_14(%arg0: i32) -> (i32, i32, i32) {
    %c0_i32 = arith.constant 0 : i32
    %c0_i32_0 = arith.constant 0 : i32
    %c0_i32_1 = arith.constant 0 : i32
    return %arg0, %c0_i32, %c0_i32_0 : i32, i32, i32
  }
}

module attributes {stable_mosaic.version = 11 : i64} {
  func.func @sdne_tile_kernel(%arg0: i32, %arg1: memref<256x256xbf16, #tpu.memory_space<vmem>>, %arg2: memref<256x256xbf16, #tpu.memory_space<vmem>>, %arg3: memref<256x64xbf16, #tpu.memory_space<vmem>>, %arg4: memref<256x64xbf16, #tpu.memory_space<vmem>>, %arg5: memref<1x64xf32, #tpu.memory_space<vmem>>, %arg6: memref<64x256xbf16, #tpu.memory_space<vmem>>, %arg7: memref<1x256xf32, #tpu.memory_space<vmem>>, %arg8: memref<256x64xbf16, #tpu.memory_space<vmem>>, %arg9: memref<1x64xf32, #tpu.memory_space<vmem>>, %arg10: memref<64x256xbf16, #tpu.memory_space<vmem>>, %arg11: memref<64x256xbf16, #tpu.memory_space<vmem>>, %arg12: memref<1x256xf32, #tpu.memory_space<vmem>>, %arg13: memref<1x256xf32, #tpu.memory_space<vmem>>, %arg14: memref<1x1x256xf32, #tpu.memory_space<vmem>>, %arg15: memref<1x1x128xf32, #tpu.memory_space<vmem>>) attributes {dimension_semantics = [#tpu.dimension_semantics<parallel>], iteration_bounds = array<i64: 1>, scalar_prefetch = 0 : i64, scratch_operands = 0 : i64, tpu.core_type = #tpu.core_type<tc>, window_params = [{transform_indices = @transform_0, window_bounds = array<i64: 256, 256>}, {transform_indices = @transform_1, window_bounds = array<i64: 256, 256>}, {pipeline_mode = #tpu.pipeline_mode<synchronous>, transform_indices = @transform_2, window_bounds = array<i64: 256, 64>}, {pipeline_mode = #tpu.pipeline_mode<synchronous>, transform_indices = @transform_3, window_bounds = array<i64: 256, 64>}, {pipeline_mode = #tpu.pipeline_mode<synchronous>, transform_indices = @transform_4, window_bounds = array<i64: 1, 64>}, {pipeline_mode = #tpu.pipeline_mode<synchronous>, transform_indices = @transform_5, window_bounds = array<i64: 64, 256>}, {pipeline_mode = #tpu.pipeline_mode<synchronous>, transform_indices = @transform_6, window_bounds = array<i64: 1, 256>}, {pipeline_mode = #tpu.pipeline_mode<synchronous>, transform_indices = @transform_7, window_bounds = array<i64: 256, 64>}, {pipeline_mode = #tpu.pipeline_mode<synchronous>, transform_indices = @transform_8, window_bounds = array<i64: 1, 64>}, {pipeline_mode = #tpu.pipeline_mode<synchronous>, transform_indices = @transform_9, window_bounds = array<i64: 64, 256>}, {pipeline_mode = #tpu.pipeline_mode<synchronous>, transform_indices = @transform_10, window_bounds = array<i64: 64, 256>}, {pipeline_mode = #tpu.pipeline_mode<synchronous>, transform_indices = @transform_11, window_bounds = array<i64: 1, 256>}, {pipeline_mode = #tpu.pipeline_mode<synchronous>, transform_indices = @transform_12, window_bounds = array<i64: 1, 256>}, {transform_indices = @transform_13, window_bounds = array<i64: 1, 1, 256>}, {transform_indices = @transform_14, window_bounds = array<i64: 1, 1, 128>}]} {
    %c0 = arith.constant 0 : index
    %c0_0 = arith.constant 0 : index
    %0 = vector.load %arg1[%c0, %c0_0] : memref<256x256xbf16, #tpu.memory_space<vmem>>, vector<256x256xbf16>
    %c0_1 = arith.constant 0 : index
    %c0_2 = arith.constant 0 : index
    %1 = vector.load %arg2[%c0_1, %c0_2] : memref<256x256xbf16, #tpu.memory_space<vmem>>, vector<256x256xbf16>
    %c0_3 = arith.constant 0 : index
    %c0_4 = arith.constant 0 : index
    %2 = vector.load %arg3[%c0_3, %c0_4] : memref<256x64xbf16, #tpu.memory_space<vmem>>, vector<256x64xbf16>
    %cst = arith.constant dense<0.000000e+00> : vector<256x64xf32>
    %3 = tpu.matmul %0, %2, %cst {dimension_numbers = #tpu.dot_dimension_numbers<[1], [0], [0], [1], [0, 0, 1, 1], [], []>} : vector<256x256xbf16>, vector<256x64xbf16>, vector<256x64xf32> -> vector<256x64xf32>
    %c0_5 = arith.constant 0 : index
    %c0_6 = arith.constant 0 : index
    %4 = vector.load %arg4[%c0_5, %c0_6] : memref<256x64xbf16, #tpu.memory_space<vmem>>, vector<256x64xbf16>
    %cst_7 = arith.constant dense<0.000000e+00> : vector<256x64xf32>
    %5 = tpu.matmul %1, %4, %cst_7 {dimension_numbers = #tpu.dot_dimension_numbers<[1], [0], [0], [1], [0, 0, 1, 1], [], []>} : vector<256x256xbf16>, vector<256x64xbf16>, vector<256x64xf32> -> vector<256x64xf32>
    %6 = arith.addf %3, %5 : vector<256x64xf32>
    %c0_8 = arith.constant 0 : index
    %c0_9 = arith.constant 0 : index
    %7 = vector.load %arg5[%c0_8, %c0_9] : memref<1x64xf32, #tpu.memory_space<vmem>>, vector<1x64xf32>
    %8 = vector.broadcast %7 : vector<1x64xf32> to vector<256x64xf32>
    %9 = arith.addf %6, %8 : vector<256x64xf32>
    %cst_10 = arith.constant 0.000000e+00 : f32
    %10 = vector.broadcast %cst_10 : f32 to vector<256x64xf32>
    %11 = arith.maximumf %9, %10 : vector<256x64xf32>
    %12 = arith.truncf %11 : vector<256x64xf32> to vector<256x64xbf16>
    %c0_11 = arith.constant 0 : index
    %c0_12 = arith.constant 0 : index
    %13 = vector.load %arg6[%c0_11, %c0_12] : memref<64x256xbf16, #tpu.memory_space<vmem>>, vector<64x256xbf16>
    %cst_13 = arith.constant dense<0.000000e+00> : vector<256x256xf32>
    %14 = tpu.matmul %12, %13, %cst_13 {dimension_numbers = #tpu.dot_dimension_numbers<[1], [0], [0], [1], [0, 0, 1, 1], [], []>} : vector<256x64xbf16>, vector<64x256xbf16>, vector<256x256xf32> -> vector<256x256xf32>
    %c0_14 = arith.constant 0 : index
    %c0_15 = arith.constant 0 : index
    %15 = vector.load %arg7[%c0_14, %c0_15] : memref<1x256xf32, #tpu.memory_space<vmem>>, vector<1x256xf32>
    %16 = vector.broadcast %15 : vector<1x256xf32> to vector<256x256xf32>
    %17 = arith.addf %14, %16 : vector<256x256xf32>
    %cst_16 = arith.constant 0.000000e+00 : f32
    %18 = vector.broadcast %cst_16 : f32 to vector<256x256xf32>
    %19 = arith.maximumf %17, %18 : vector<256x256xf32>
    %20 = arith.truncf %19 : vector<256x256xf32> to vector<256x256xbf16>
    %c0_17 = arith.constant 0 : index
    %c0_18 = arith.constant 0 : index
    %21 = vector.load %arg8[%c0_17, %c0_18] : memref<256x64xbf16, #tpu.memory_space<vmem>>, vector<256x64xbf16>
    %cst_19 = arith.constant dense<0.000000e+00> : vector<256x64xf32>
    %22 = tpu.matmul %20, %21, %cst_19 {dimension_numbers = #tpu.dot_dimension_numbers<[1], [0], [0], [1], [0, 0, 1, 1], [], []>} : vector<256x256xbf16>, vector<256x64xbf16>, vector<256x64xf32> -> vector<256x64xf32>
    %c0_20 = arith.constant 0 : index
    %c0_21 = arith.constant 0 : index
    %23 = vector.load %arg9[%c0_20, %c0_21] : memref<1x64xf32, #tpu.memory_space<vmem>>, vector<1x64xf32>
    %24 = vector.broadcast %23 : vector<1x64xf32> to vector<256x64xf32>
    %25 = arith.addf %22, %24 : vector<256x64xf32>
    %cst_22 = arith.constant 0.000000e+00 : f32
    %26 = vector.broadcast %cst_22 : f32 to vector<256x64xf32>
    %27 = arith.maximumf %25, %26 : vector<256x64xf32>
    %28 = arith.truncf %27 : vector<256x64xf32> to vector<256x64xbf16>
    %29 = arith.extf %0 : vector<256x256xbf16> to vector<256x256xf32>
    %c0_23 = arith.constant 0 : index
    %c0_24 = arith.constant 0 : index
    %30 = vector.load %arg10[%c0_23, %c0_24] : memref<64x256xbf16, #tpu.memory_space<vmem>>, vector<64x256xbf16>
    %cst_25 = arith.constant dense<0.000000e+00> : vector<256x256xf32>
    %31 = tpu.matmul %28, %30, %cst_25 {dimension_numbers = #tpu.dot_dimension_numbers<[1], [0], [0], [1], [0, 0, 1, 1], [], []>} : vector<256x64xbf16>, vector<64x256xbf16>, vector<256x256xf32> -> vector<256x256xf32>
    %c0_26 = arith.constant 0 : index
    %c0_27 = arith.constant 0 : index
    %32 = vector.load %arg12[%c0_26, %c0_27] : memref<1x256xf32, #tpu.memory_space<vmem>>, vector<1x256xf32>
    %33 = vector.broadcast %32 : vector<1x256xf32> to vector<256x256xf32>
    %34 = arith.addf %31, %33 : vector<256x256xf32>
    %cst_28 = arith.constant 0.000000e+00 : f32
    %35 = vector.broadcast %cst_28 : f32 to vector<256x256xf32>
    %36 = arith.maximumf %34, %35 : vector<256x256xf32>
    %37 = arith.subf %29, %36 : vector<256x256xf32>
    %38 = arith.mulf %37, %37 : vector<256x256xf32>
    %cst_29 = arith.constant 0.000000e+00 : f32
    %39 = vector.broadcast %cst_29 : f32 to vector<256x256xf32>
    %40 = arith.cmpf one, %29, %39 : vector<256x256xf32>
    %cst_30 = arith.constant 2.500000e+01 : f32
    %41 = vector.broadcast %cst_30 : f32 to vector<256x256xf32>
    %42 = arith.mulf %41, %38 : vector<256x256xf32>
    %43 = arith.select %40, %42, %38 : vector<256x256xi1>, vector<256x256xf32>
    %44 = vector.shape_cast %43 : vector<256x256xf32> to vector<1x256x256xf32>
    %cst_31 = arith.constant dense<0.000000e+00> : vector<1xf32>
    %45 = vector.multi_reduction <add>, %44, %cst_31 [1, 2] : vector<1x256x256xf32> to vector<1xf32>
    %46 = vector.shape_cast %45 : vector<1xf32> to vector<1x1x1xf32>
    %47 = vector.extract %46[0, 0, 0] : f32 from vector<1x1x1xf32>
    %cst_32 = arith.constant 0.000000e+00 : f32
    %48 = arith.addf %cst_32, %47 : f32
    %49 = arith.extf %1 : vector<256x256xbf16> to vector<256x256xf32>
    %c0_33 = arith.constant 0 : index
    %c0_34 = arith.constant 0 : index
    %50 = vector.load %arg11[%c0_33, %c0_34] : memref<64x256xbf16, #tpu.memory_space<vmem>>, vector<64x256xbf16>
    %cst_35 = arith.constant dense<0.000000e+00> : vector<256x256xf32>
    %51 = tpu.matmul %28, %50, %cst_35 {dimension_numbers = #tpu.dot_dimension_numbers<[1], [0], [0], [1], [0, 0, 1, 1], [], []>} : vector<256x64xbf16>, vector<64x256xbf16>, vector<256x256xf32> -> vector<256x256xf32>
    %c0_36 = arith.constant 0 : index
    %c0_37 = arith.constant 0 : index
    %52 = vector.load %arg13[%c0_36, %c0_37] : memref<1x256xf32, #tpu.memory_space<vmem>>, vector<1x256xf32>
    %53 = vector.broadcast %52 : vector<1x256xf32> to vector<256x256xf32>
    %54 = arith.addf %51, %53 : vector<256x256xf32>
    %cst_38 = arith.constant 0.000000e+00 : f32
    %55 = vector.broadcast %cst_38 : f32 to vector<256x256xf32>
    %56 = arith.maximumf %54, %55 : vector<256x256xf32>
    %57 = arith.subf %49, %56 : vector<256x256xf32>
    %58 = arith.mulf %57, %57 : vector<256x256xf32>
    %cst_39 = arith.constant 0.000000e+00 : f32
    %59 = vector.broadcast %cst_39 : f32 to vector<256x256xf32>
    %60 = arith.cmpf one, %49, %59 : vector<256x256xf32>
    %cst_40 = arith.constant 2.500000e+01 : f32
    %61 = vector.broadcast %cst_40 : f32 to vector<256x256xf32>
    %62 = arith.mulf %61, %58 : vector<256x256xf32>
    %63 = arith.select %60, %62, %58 : vector<256x256xi1>, vector<256x256xf32>
    %64 = vector.shape_cast %63 : vector<256x256xf32> to vector<1x256x256xf32>
    %cst_41 = arith.constant dense<0.000000e+00> : vector<1xf32>
    %65 = vector.multi_reduction <add>, %64, %cst_41 [1, 2] : vector<1x256x256xf32> to vector<1xf32>
    %66 = vector.shape_cast %65 : vector<1xf32> to vector<1x1x1xf32>
    %67 = vector.extract %66[0, 0, 0] : f32 from vector<1x1x1xf32>
    %cst_42 = arith.constant 0.000000e+00 : f32
    %68 = arith.addf %cst_42, %67 : f32
    %69 = arith.addf %48, %68 : f32
    %70 = arith.mulf %19, %19 : vector<256x256xf32>
    %71 = vector.shape_cast %70 : vector<256x256xf32> to vector<1x256x256xf32>
    %cst_43 = arith.constant dense<0.000000e+00> : vector<1xf32>
    %72 = vector.multi_reduction <add>, %71, %cst_43 [1, 2] : vector<1x256x256xf32> to vector<1xf32>
    %73 = vector.shape_cast %72 : vector<1xf32> to vector<1x1x1xf32>
    %74 = vector.extract %73[0, 0, 0] : f32 from vector<1x1x1xf32>
    %cst_44 = arith.constant dense<0.000000e+00> : vector<256xf32>
    %75 = vector.multi_reduction <add>, %19, %cst_44 [0] : vector<256x256xf32> to vector<256xf32>
    %76 = vector.shape_cast %75 : vector<256xf32> to vector<1x256xf32>
    %c0_45 = arith.constant 0 : index
    %c0_46 = arith.constant 0 : index
    %c0_47 = arith.constant 0 : index
    %77 = vector.load %arg14[%c0_45, %c0_46, %c0_47] : memref<1x1x256xf32, #tpu.memory_space<vmem>>, vector<1x1x256xf32>
    %78 = vector.shape_cast %77 : vector<1x1x256xf32> to vector<1x256xf32>
    %79 = vector.shape_cast %76 : vector<1x256xf32> to vector<1x1x256xf32>
    tpu.vector_store %arg14[%c0_45, %c0_46, %c0_47], %79 {strides = array<i32>} : memref<1x1x256xf32, #tpu.memory_space<vmem>>, vector<1x1x256xf32>,
    %80 = tpu.iota {dimensions = array<i32: 1>} : vector<1x128xi32>
    %c0_i32 = arith.constant 0 : i32
    %81 = vector.broadcast %c0_i32 : i32 to vector<1x128xi32>
    %82 = arith.cmpi eq, %80, %81 : vector<1x128xi32>
    %cst_48 = arith.constant 0.000000e+00 : f32
    %83 = vector.broadcast %69 : f32 to vector<1x128xf32>
    %84 = vector.broadcast %cst_48 : f32 to vector<1x128xf32>
    %85 = arith.select %82, %83, %84 : vector<1x128xi1>, vector<1x128xf32>
    %c1_i32 = arith.constant 1 : i32
    %86 = vector.broadcast %c1_i32 : i32 to vector<1x128xi32>
    %87 = arith.cmpi eq, %80, %86 : vector<1x128xi32>
    %cst_49 = arith.constant 0.000000e+00 : f32
    %88 = vector.broadcast %74 : f32 to vector<1x128xf32>
    %89 = vector.broadcast %cst_49 : f32 to vector<1x128xf32>
    %90 = arith.select %87, %88, %89 : vector<1x128xi1>, vector<1x128xf32>
    %91 = arith.addf %85, %90 : vector<1x128xf32>
    %c0_50 = arith.constant 0 : index
    %c0_51 = arith.constant 0 : index
    %c0_52 = arith.constant 0 : index
    %92 = vector.load %arg15[%c0_50, %c0_51, %c0_52] : memref<1x1x128xf32, #tpu.memory_space<vmem>>, vector<1x1x128xf32>
    %93 = vector.shape_cast %92 : vector<1x1x128xf32> to vector<1x128xf32>
    %94 = vector.shape_cast %91 : vector<1x128xf32> to vector<1x1x128xf32>
    tpu.vector_store %arg15[%c0_50, %c0_51, %c0_52], %94 {strides = array<i32>} : memref<1x1x128xf32, #tpu.memory_space<vmem>>, vector<1x1x128xf32>,
    return
  }
  func.func @transform_0(%arg0: i32) -> (i32, i32) {
    %c0_i32 = arith.constant 0 : i32
    %c0_i32_0 = arith.constant 0 : i32
    return %arg0, %c0_i32 : i32, i32
  }
  func.func @transform_1(%arg0: i32) -> (i32, i32) {
    %c0_i32 = arith.constant 0 : i32
    %c0_i32_0 = arith.constant 0 : i32
    return %arg0, %c0_i32 : i32, i32
  }
  func.func @transform_2(%arg0: i32) -> (i32, i32) {
    %c0_i32 = arith.constant 0 : i32
    %c0_i32_0 = arith.constant 0 : i32
    %c0_i32_1 = arith.constant 0 : i32
    return %c0_i32, %c0_i32_0 : i32, i32
  }
  func.func @transform_3(%arg0: i32) -> (i32, i32) {
    %c0_i32 = arith.constant 0 : i32
    %c0_i32_0 = arith.constant 0 : i32
    %c0_i32_1 = arith.constant 0 : i32
    return %c0_i32, %c0_i32_0 : i32, i32
  }
  func.func @transform_4(%arg0: i32) -> (i32, i32) {
    %c0_i32 = arith.constant 0 : i32
    %c0_i32_0 = arith.constant 0 : i32
    %c0_i32_1 = arith.constant 0 : i32
    return %c0_i32, %c0_i32_0 : i32, i32
  }
  func.func @transform_5(%arg0: i32) -> (i32, i32) {
    %c0_i32 = arith.constant 0 : i32
    %c0_i32_0 = arith.constant 0 : i32
    %c0_i32_1 = arith.constant 0 : i32
    return %c0_i32, %c0_i32_0 : i32, i32
  }
  func.func @transform_6(%arg0: i32) -> (i32, i32) {
    %c0_i32 = arith.constant 0 : i32
    %c0_i32_0 = arith.constant 0 : i32
    %c0_i32_1 = arith.constant 0 : i32
    return %c0_i32, %c0_i32_0 : i32, i32
  }
  func.func @transform_7(%arg0: i32) -> (i32, i32) {
    %c0_i32 = arith.constant 0 : i32
    %c0_i32_0 = arith.constant 0 : i32
    %c0_i32_1 = arith.constant 0 : i32
    return %c0_i32, %c0_i32_0 : i32, i32
  }
  func.func @transform_8(%arg0: i32) -> (i32, i32) {
    %c0_i32 = arith.constant 0 : i32
    %c0_i32_0 = arith.constant 0 : i32
    %c0_i32_1 = arith.constant 0 : i32
    return %c0_i32, %c0_i32_0 : i32, i32
  }
  func.func @transform_9(%arg0: i32) -> (i32, i32) {
    %c0_i32 = arith.constant 0 : i32
    %c0_i32_0 = arith.constant 0 : i32
    %c0_i32_1 = arith.constant 0 : i32
    return %c0_i32, %c0_i32_0 : i32, i32
  }
  func.func @transform_10(%arg0: i32) -> (i32, i32) {
    %c0_i32 = arith.constant 0 : i32
    %c0_i32_0 = arith.constant 0 : i32
    %c0_i32_1 = arith.constant 0 : i32
    return %c0_i32, %c0_i32_0 : i32, i32
  }
  func.func @transform_11(%arg0: i32) -> (i32, i32) {
    %c0_i32 = arith.constant 0 : i32
    %c0_i32_0 = arith.constant 0 : i32
    %c0_i32_1 = arith.constant 0 : i32
    return %c0_i32, %c0_i32_0 : i32, i32
  }
  func.func @transform_12(%arg0: i32) -> (i32, i32) {
    %c0_i32 = arith.constant 0 : i32
    %c0_i32_0 = arith.constant 0 : i32
    %c0_i32_1 = arith.constant 0 : i32
    return %c0_i32, %c0_i32_0 : i32, i32
  }
  func.func @transform_13(%arg0: i32) -> (i32, i32, i32) {
    %c0_i32 = arith.constant 0 : i32
    %c0_i32_0 = arith.constant 0 : i32
    %c0_i32_1 = arith.constant 0 : i32
    return %arg0, %c0_i32, %c0_i32_0 : i32, i32, i32
  }
  func.func @transform_14(%arg0: i32) -> (i32, i32, i32) {
    %c0_i32 = arith.constant 0 : i32
    %c0_i32_0 = arith.constant 0 : i32
    %c0_i32_1 = arith.constant 0 : i32
    return %arg0, %c0_i32, %c0_i32_0 : i32, i32, i32
  }
}

</mosaic_0001>

<bundles_post_ra>
// kernel: tpu_custom_call.1
= control target key start
LH: loop header
LB: loop body
LE: loop exit
PB: predicated region body
PF: predicated region fallthrough
CT: control target
= control target key end

     0   :  { %20 = vsyncpa [#allocation3], 0  ;;  %s7171_s0 = inlined_call_operand.vmem [shape: bf16[256,256], index: 0, kind: input, shape index: {}]   ;;  %s7172_s1 = inlined_call_operand.vmem [shape: bf16[256,256], index: 1, kind: input, shape index: {}]   ;;  %s7173_s2 = inlined_call_operand.vmem [shape: bf16[256,64], index: 2, kind: input, shape index: {}]   ;;  %s7174_s3 = inlined_call_operand.vmem [shape: bf16[256,64], index: 3, kind: input, shape index: {}]   ;;  %s7175_s4 = inlined_call_operand.vmem [shape: f32[1,64], index: 4, kind: input, shape index: {}]   ;;  %s7176_s5 = inlined_call_operand.hbm [shape: bf16[64,256], index: 5, kind: input, shape index: {}]   ;;  %s7177_s6 = inlined_call_operand.vmem [shape: f32[1,256], index: 6, kind: input, shape index: {}]   ;;  %s7178_s7 = inlined_call_operand.vmem [shape: bf16[256,64], index: 7, kind: input, shape index: {}]   ;;  %s7179_s8 = inlined_call_operand.vmem [shape: f32[1,64], index: 8, kind: input, shape index: {}]   ;;  %s7180_s9 = inlined_call_operand.hbm [shape: bf16[64,256], index: 9, kind: input, shape index: {}]   ;;  %s7181_s10 = inlined_call_operand.hbm [shape: bf16[64,256], index: 10, kind: input, shape index: {}]   ;;  %s7182_s11 = inlined_call_operand.vmem [shape: f32[1,256], index: 11, kind: input, shape index: {}]   ;;  %s7183_s12 = inlined_call_operand.vmem [shape: f32[1,256], index: 12, kind: input, shape index: {}]   ;;  %s7184_s13 = inlined_call_operand.hbm [shape: f32[1,1,256], index: 13, kind: output, shape index: {0}]   ;;  %s7185_s14 = inlined_call_operand.hbm [shape: f32[1,1,128], index: 14, kind: output, shape index: {1}]  }
   0x1   :  { %21 = vsyncpa [#allocation6], 0 }
   0x2   :  { %22 = vsyncpa [#allocation4], 0 }
   0x3   :  { %23 = vsyncpa [#allocation10], 0  ;;  %s4618_s29 = smov [#allocation5]   ;;  %s4619_s15 = smov [#allocation2]  }
   0x4   :  { %s57_s30 = sshll.u32 %s4618_s29, 4  ;;  %s39_s16 = sshll.u32 %s4619_s15, 4  ;;  %s58_s30 = int_to_ptr.vmem [resolvable:$true] %s57_s30  ;;  %s4702_s16 = int_to_ptr.vmem [resolvable:$true] %s39_s16 }
   0x5   :  { %s4500_s19 = scalar_lea.hbm %s7180_s9, 1024 }
   0x6   :  { %p4501_p0 = scmp.ne.s32.totalorder %s7180_s9, %s4500_s19  ;;  %p4504_p1 = scmp.lt.u32.totalorder %s4500_s19, %s7180_s9 }
   0x8   :  { %p4506_p2 = pnand %p4504_p1, %p4501_p0 }
   0xa   :  { %4509 = shalt.err (!%p4506_p2)
}
   0xb   :  { %s4510_s24 = scalar_lea.vmem %s58_s30, 1024  ;;  %p4515_p4 = scmp.lt.s32.totalorder %s58_s30, %s58_s30 }
   0xc   :  { %p4511_p3 = scmp.ne.s32.totalorder %s58_s30, %s4510_s24  ;;  %p4516_p5 = scmp.lt.s32.totalorder %s4510_s24, %s4510_s24 }
   0xe   :  { %p4517_p6 = por %p4516_p5, %p4515_p4 }
  0x10   :  { %p4518_p7 = pnand %p4517_p6, %p4511_p3 }
  0x12   :  { %4521 = shalt.err (!%p4518_p7)
}
  0x13   :  { %s4620_s25 = smov 128   ;;  %s4621_s26 = smov 8  }
  0x14   :  { %63 = dma.hbm_to_vmem [thread:$0]  %s7180_s9, 1024, %s58_s30, [#allocation6], %s4620_s25, %s4620_s25, %s4621_s26  }
  0x15   :  { %s4522_s17 = scalar_lea.hbm %s7176_s5, 1024 }
  0x16   :  { %p4523_p8 = scmp.ne.s32.totalorder %s7176_s5, %s4522_s17  ;;  %p4526_p9 = scmp.lt.u32.totalorder %s4522_s17, %s7176_s5 }
  0x18   :  { %p4528_p10 = pnand %p4526_p9, %p4523_p8 }
  0x1a   :  { %4531 = shalt.err (!%p4528_p10)
}
  0x1b   :  { %s4532_s22 = scalar_lea.vmem %s4702_s16, 1024  ;;  %p4537_p12 = scmp.lt.s32.totalorder %s4702_s16, %s4702_s16 }
  0x1c   :  { %p4533_p11 = scmp.ne.s32.totalorder %s4702_s16, %s4532_s22  ;;  %p4538_p13 = scmp.lt.s32.totalorder %s4532_s22, %s4532_s22 }
  0x1e   :  { %p4539_p0 = por %p4538_p13, %p4537_p12 }
  0x20   :  { %p4540_p1 = pnand %p4539_p0, %p4533_p11 }
  0x22   :  { %4543 = shalt.err (!%p4540_p1)
}
  0x23   :  { %45 = dma.hbm_to_vmem [thread:$0]  %s7176_s5, 1024, %s4702_s16, [#allocation3], %s4620_s25, %s4620_s25, %s4621_s26  }
  0x24   :  { %s4622_s23 = smov [#allocation7]   ;;  %s4544_s29 = scalar_lea.hbm %s7181_s10, 1024 }
  0x25   :  { %s69_s24 = sshll.u32 %s4622_s23, 4  ;;  %p4545_p2 = scmp.ne.s32.totalorder %s7181_s10, %s4544_s29  ;;  %s70_s24 = int_to_ptr.vmem [resolvable:$true] %s69_s24 }
  0x26   :  { %p4548_p3 = scmp.lt.u32.totalorder %s4544_s29, %s7181_s10 }
  0x28   :  { %p4550_p4 = pnand %p4548_p3, %p4545_p2 }
  0x2a   :  { %4553 = shalt.err (!%p4550_p4)
}
  0x2b   :  { %s4554_s20 = scalar_lea.vmem %s70_s24, 1024  ;;  %p4559_p6 = scmp.lt.s32.totalorder %s70_s24, %s70_s24 }
  0x2c   :  { %p4555_p5 = scmp.ne.s32.totalorder %s70_s24, %s4554_s20  ;;  %p4560_p7 = scmp.lt.s32.totalorder %s4554_s20, %s4554_s20 }
  0x2e   :  { %p4561_p8 = por %p4560_p7, %p4559_p6 }
  0x30   :  { %p4562_p9 = pnand %p4561_p8, %p4555_p5 }
  0x32   :  { %4565 = shalt.err (!%p4562_p9)
}
  0x33   :  { %75 = dma.hbm_to_vmem [thread:$0]  %s7181_s10, 1024, %s70_s24, [#allocation6], %s4620_s25, %s4620_s25, %s4621_s26  }
  0x34   :  { %4610 = dma.done.wait [#allocation3], 1024  }
  0x35   :  { %4611 = vsyncadd [#allocation3], 4294966272 }
  0x36   :  { %4612 = dma.done.wait [#allocation6], 2048  }
  0x37   :  { %4613 = vsyncadd [#allocation6], 4294965248  ;;  %v4288_v0 = vld [vmem:[%s7174_s3 + $0x40] sm:$0xff]   ;;  %v4292_v4 = vld [vmem:[%s7174_s3 + $0x48] sm:$0xff]   ;;  %vm1199_vm0 = vcmask 523264  }
  0x38   :  { %v4289_v1 = vld [vmem:[%s7173_s2 + $0x40] sm:$0xff]   ;;  %3937 = vmatprep.subr.bf16.mxu0 %v4288_v0  ;;  %v4293_v5 = vld [vmem:[%s7173_s2 + $0x48] sm:$0xff]   ;;  %v4296_v8 = vld [vmem:[%s7174_s3 + $0x50] sm:$0xff]  }
  0x39   :  { %v4290_v2 = vld [vmem:[%s7174_s3] sm:$0xff]   ;;  %4049 = vmatprep.subr.bf16.mxu1 %v4289_v1  ;;  %v4294_v6 = vld [vmem:[%s7174_s3 + $0x8] sm:$0xff]   ;;  %v4297_v9 = vld [vmem:[%s7173_s2 + $0x50] sm:$0xff]  }
  0x3a   :  { %v4291_v3 = vld [vmem:[%s7173_s2] sm:$0xff]   ;;  %3938 = vmatpush3.bf16.msra.mxu0 %v4290_v2  ;;  %v4295_v7 = vld [vmem:[%s7173_s2 + $0x8] sm:$0xff]   ;;  %v4298_v10 = vld [vmem:[%s7174_s3 + $0x10] sm:$0xff]  }
  0x3b   :  { %4050 = vmatpush3.bf16.msra.mxu1 %v4291_v3  ;;  %3939 = vmatprep.subr.bf16.mxu0 %v4292_v4  ;;  %v4299_v11 = vld [vmem:[%s7173_s2 + $0x10] sm:$0xff]   ;;  %v4300_v12 = vld [vmem:[%s7174_s3 + $0x58] sm:$0xff]   ;;  %v4304_v16 = vld [vmem:[%s7174_s3 + $0x60] sm:$0xff]  }
  0x3c   :  { %4051 = vmatprep.subr.bf16.mxu1 %v4293_v5  ;;  %v4301_v13 = vld [vmem:[%s7173_s2 + $0x58] sm:$0xff]   ;;  %v4305_v17 = vld [vmem:[%s7173_s2 + $0x60] sm:$0xff]   ;;  %v4308_v20 = vld [vmem:[%s7174_s3 + $0x68] sm:$0xff]  }
  0x3d   :  { %v4302_v14 = vld [vmem:[%s7174_s3 + $0x18] sm:$0xff]   ;;  %v4306_v18 = vld [vmem:[%s7174_s3 + $0x20] sm:$0xff]   ;;  %v4309_v21 = vld [vmem:[%s7173_s2 + $0x68] sm:$0xff]  }
  0x3e   :  { %3940 = vmatpush3.bf16.msra.mxu0 %v4294_v6  ;;  %v4303_v15 = vld [vmem:[%s7173_s2 + $0x18] sm:$0xff]   ;;  %v4307_v19 = vld [vmem:[%s7173_s2 + $0x20] sm:$0xff]   ;;  %v4310_v22 = vld [vmem:[%s7174_s3 + $0x28] sm:$0xff]  }
  0x3f   :  { %4052 = vmatpush3.bf16.msra.mxu1 %v4295_v7  ;;  %3941 = vmatprep.subr.bf16.mxu0 %v4296_v8  ;;  %v4311_v23 = vld [vmem:[%s7173_s2 + $0x28] sm:$0xff]   ;;  %v4312_v24 = vld [vmem:[%s7174_s3 + $0x70] sm:$0xff]   ;;  %v4316_v28 = vld [vmem:[%s7174_s3 + $0x78] sm:$0xff]  }
  0x40   :  { %4053 = vmatprep.subr.bf16.mxu1 %v4297_v9  ;;  %v4313_v25 = vld [vmem:[%s7173_s2 + $0x70] sm:$0xff]   ;;  %v4317_v29 = vld [vmem:[%s7173_s2 + $0x78] sm:$0xff]   ;;  %v122_v32 = vld [vmem:[%s7172_s1] sm:$0xff] }
  0x41   :  { %v4314_v26 = vld [vmem:[%s7174_s3 + $0x30] sm:$0xff]   ;;  %v4318_v30 = vld [vmem:[%s7174_s3 + $0x38] sm:$0xff]   ;;  %v123_v33 = vld [vmem:[%s7172_s1 + $0x8] sm:$0xff] }
  0x42   :  { %3942 = vmatpush3.bf16.msra.mxu0 %v4298_v10  ;;  %v4315_v27 = vld [vmem:[%s7173_s2 + $0x30] sm:$0xff]   ;;  %v4319_v31 = vld [vmem:[%s7173_s2 + $0x38] sm:$0xff]   ;;  %v90_v34 = vld [vmem:[%s7171_s0] sm:$0xff]  ;;  %v3752_v35 = vcombine.high %v122_v32, %v123_v33  ;;  %v3751_v37 = vcombine.low %v122_v32, %v123_v33 }
  0x43   :  { %4054 = vmatpush3.bf16.msra.mxu1 %v4299_v11  ;;  %3943 = vmatprep.subr.bf16.mxu0 %v4300_v12  ;;  %v91_v36 = vld [vmem:[%s7171_s0 + $0x8] sm:$0xff]  ;;  %v124_v38 = vld [vmem:[%s7172_s1 + $0x10] sm:$0xff]  ;;  %v125_v39 = vld [vmem:[%s7172_s1 + $0x18] sm:$0xff] }
  0x44   :  { %4055 = vmatprep.subr.bf16.mxu1 %v4301_v13  ;;  %v3800_v40 = vcombine.high %v90_v34, %v91_v36  ;;  %v3799_v41 = vcombine.low %v90_v34, %v91_v36  ;;  %v3754_v42 = vcombine.high %v124_v38, %v125_v39  ;;  %v92_v43 = vld [vmem:[%s7171_s0 + $0x10] sm:$0xff]  ;;  %v93_v44 = vld [vmem:[%s7171_s0 + $0x18] sm:$0xff]  ;;  %506 = vmatprep.mubr.bf16.mxu0 %v3752_v35  ;;  %v126_v46 = vld [vmem:[%s7172_s1 + $0x20] sm:$0xff] }
  0x45   :  { %v3802_v45 = vcombine.high %v92_v43, %v93_v44  ;;  %v127_v47 = vld [vmem:[%s7172_s1 + $0x28] sm:$0xff]  ;;  %v94_v48 = vld [vmem:[%s7171_s0 + $0x20] sm:$0xff]  ;;  %v3753_v50 = vcombine.low %v124_v38, %v125_v39  ;;  %v3801_v51 = vcombine.low %v92_v43, %v93_v44  ;;  %v128_v54 = vld [vmem:[%s7172_s1 + $0x30] sm:$0xff] }
  0x46   :  { %3944 = vmatpush3.bf16.msra.mxu0 %v4302_v14  ;;  %923 = vmatprep.mubr.bf16.mxu1 %v3800_v40  ;;  %v95_v49 = vld [vmem:[%s7171_s0 + $0x28] sm:$0xff]  ;;  %v3756_v52 = vcombine.high %v126_v46, %v127_v47  ;;  %v129_v55 = vld [vmem:[%s7172_s1 + $0x38] sm:$0xff]  ;;  %v96_v56 = vld [vmem:[%s7171_s0 + $0x30] sm:$0xff]  ;;  %v3755_v58 = vcombine.low %v126_v46, %v127_v47 }
  0x47   :  { %4056 = vmatpush3.bf16.msra.mxu1 %v4303_v15  ;;  %3945 = vmatprep.subr.bf16.mxu0 %v4304_v16  ;;  %v3804_v53 = vcombine.high %v94_v48, %v95_v49  ;;  %v97_v57 = vld [vmem:[%s7171_s0 + $0x38] sm:$0xff]  ;;  %v3803_v59 = vcombine.low %v94_v48, %v95_v49  ;;  %v3758_v60 = vcombine.high %v128_v54, %v129_v55  ;;  %v4372_v62 = vld [vmem:[#allocation2] ss:$8 sps:$4 sm:$0xff]   ;;  %v4374_v63 = vld [vmem:[#allocation2 + $0x4] ss:$8 sps:$4 sm:$0xff]  }
  0x48   :  { %4057 = vmatprep.subr.bf16.mxu1 %v4305_v17  ;;  %v3806_v61 = vcombine.high %v96_v56, %v97_v57  ;;  %v130_v0 = vld [vmem:[%s7172_s1 + $0x40] sm:$0xff]  ;;  %v131_v1 = vld [vmem:[%s7172_s1 + $0x48] sm:$0xff]  ;;  %v4387_v4 = vld [vmem:[#allocation2 + $0x10] ss:$8 sps:$4 sm:$0xff]   ;;  %v3757_v6 = vcombine.low %v128_v54, %v129_v55  ;;  %v3805_v7 = vcombine.low %v96_v56, %v97_v57 }
  0x49   :  { %v98_v2 = vld [vmem:[%s7171_s0 + $0x40] sm:$0xff]  ;;  %v99_v3 = vld [vmem:[%s7171_s0 + $0x48] sm:$0xff]  ;;  %v4389_v5 = vld [vmem:[#allocation2 + $0x14] ss:$8 sps:$4 sm:$0xff]   ;;  %v3760_v8 = vcombine.high %v130_v0, %v131_v1 }
  0x4a   :  { %3946 = vmatpush3.bf16.msra.mxu0 %v4306_v18  ;;  %v4392_v9 = vld [vmem:[#allocation2 + $0x24] ss:$8 sps:$4 sm:$0xff]   ;;  %v3808_v10 = vcombine.high %v98_v2, %v99_v3  ;;  %v4390_v11 = vld [vmem:[#allocation2 + $0x20] ss:$8 sps:$4 sm:$0xff]   ;;  %v4395_v12 = vld [vmem:[#allocation2 + $0x34] ss:$8 sps:$4 sm:$0xff]   ;;  %v3759_v18 = vcombine.low %v130_v0, %v131_v1 }
  0x4b   :  { %4058 = vmatpush3.bf16.msra.mxu1 %v4307_v19  ;;  %3947 = vmatprep.subr.bf16.mxu0 %v4308_v20  ;;  %v132_v13 = vld [vmem:[%s7172_s1 + $0x50] sm:$0xff]  ;;  %v133_v14 = vld [vmem:[%s7172_s1 + $0x58] sm:$0xff]  ;;  %v3807_v19 = vcombine.low %v98_v2, %v99_v3  ;;  %v138_v38 = vld [vmem:[%s7172_s1 + $0x80] sm:$0xff] }
  0x4c   :  { %4059 = vmatprep.subr.bf16.mxu1 %v4309_v21  ;;  %v4393_v15 = vld [vmem:[#allocation2 + $0x30] ss:$8 sps:$4 sm:$0xff]   ;;  %v3762_v20 = vcombine.high %v132_v13, %v133_v14  ;;  %v139_v39 = vld [vmem:[%s7172_s1 + $0x88] sm:$0xff]  ;;  %v106_v40 = vld [vmem:[%s7171_s0 + $0x80] sm:$0xff] }
  0x4d   :  { %v100_v16 = vld [vmem:[%s7171_s0 + $0x50] sm:$0xff]  ;;  %v101_v17 = vld [vmem:[%s7171_s0 + $0x58] sm:$0xff]  ;;  %v3768_v44 = vcombine.high %v138_v38, %v139_v39  ;;  %v142_v54 = vld [vmem:[%s7172_s1 + $0xa0] sm:$0xff] }
  0x4e   :  { %3948 = vmatpush3.bf16.msra.mxu0 %v4310_v22  ;;  %v3810_v21 = vcombine.high %v100_v16, %v101_v17  ;;  %v134_v22 = vld [vmem:[%s7172_s1 + $0x60] sm:$0xff]  ;;  %v104_v32 = vld [vmem:[%s7171_s0 + $0x70] sm:$0xff]  ;;  %v105_v33 = vld [vmem:[%s7171_s0 + $0x78] sm:$0xff] }
  0x4f   :  { %4060 = vmatpush3.bf16.msra.mxu1 %v4311_v23  ;;  %3949 = vmatprep.subr.bf16.mxu0 %v4312_v24  ;;  %v135_v23 = vld [vmem:[%s7172_s1 + $0x68] sm:$0xff]  ;;  %v102_v24 = vld [vmem:[%s7171_s0 + $0x60] sm:$0xff]  ;;  %v3813_v43 = vcombine.low %v104_v32, %v105_v33  ;;  %v140_v46 = vld [vmem:[%s7172_s1 + $0x90] sm:$0xff] }
  0x50   :  { %4061 = vmatprep.subr.bf16.mxu1 %v4313_v25  ;;  %v103_v25 = vld [vmem:[%s7171_s0 + $0x68] sm:$0xff]  ;;  %v3763_v34 = vcombine.low %v134_v22, %v135_v23  ;;  %v141_v47 = vld [vmem:[%s7172_s1 + $0x98] sm:$0xff]  ;;  %v108_v48 = vld [vmem:[%s7171_s0 + $0x90] sm:$0xff] }
  0x51   :  { %v3811_v35 = vcombine.low %v102_v24, %v103_v25  ;;  %v109_v49 = vld [vmem:[%s7171_s0 + $0x98] sm:$0xff]  ;;  %v143_v55 = vld [vmem:[%s7172_s1 + $0xa8] sm:$0xff]  ;;  %v110_v56 = vld [vmem:[%s7171_s0 + $0xa0] sm:$0xff] }
  0x52   :  { %3950 = vmatpush3.bf16.msra.mxu0 %v4314_v26  ;;  %v3761_v26 = vcombine.low %v132_v13, %v133_v14  ;;  %v111_v57 = vld [vmem:[%s7171_s0 + $0xa8] sm:$0xff]  ;;  %v112_v0 = vld [vmem:[%s7171_s0 + $0xb0] sm:$0xff]  ;;  %v113_v1 = vld [vmem:[%s7171_s0 + $0xb8] sm:$0xff]  ;;  %v3771_v2 = vcombine.low %v142_v54, %v143_v55 }
  0x53   :  { %4062 = vmatpush3.bf16.msra.mxu1 %v4315_v27  ;;  %3951 = vmatprep.subr.bf16.mxu0 %v4316_v28  ;;  %v3809_v27 = vcombine.low %v100_v16, %v101_v17  ;;  %v3764_v28 = vcombine.high %v134_v22, %v135_v23  ;;  %v3819_v3 = vcombine.low %v110_v56, %v111_v57  ;;  %v148_v14 = vld [vmem:[%s7172_s1 + $0xd0] sm:$0xff]  ;;  %v117_v17 = vld [vmem:[%s7171_s0 + $0xd8] sm:$0xff]  ;;  %v150_v22 = vld [vmem:[%s7172_s1 + $0xe0] sm:$0xff] }
  0x54   :  { %4063 = vmatprep.subr.bf16.mxu1 %v4317_v29  ;;  %v3812_v29 = vcombine.high %v102_v24, %v103_v25  ;;  %v116_v16 = vld [vmem:[%s7171_s0 + $0xd0] sm:$0xff]  ;;  %v151_v23 = vld [vmem:[%s7172_s1 + $0xe8] sm:$0xff]  ;;  %v118_v24 = vld [vmem:[%s7171_s0 + $0xe0] sm:$0xff] }
  0x55   :  { %v119_v25 = vld [vmem:[%s7171_s0 + $0xe8] sm:$0xff] }
  0x56   :  { %3952 = vmatpush3.bf16.msra.mxu0 %v4318_v30  ;;  %v136_v30 = vld [vmem:[%s7172_s1 + $0x70] sm:$0xff] }
  0x57   :  { %4064 = vmatpush3.bf16.msra.mxu1 %v4319_v31  ;;  %1248 = vmatprep.subr.bf16.mxu0 %v4374_v63  ;;  %v137_v31 = vld [vmem:[%s7172_s1 + $0x78] sm:$0xff] }
  0x58   :  { %v3766_v36 = vcombine.high %v136_v30, %v137_v31  ;;  %v145_v63 = vld [vmem:[%s7172_s1 + $0xb8] sm:$0xff] }
  0x59   :  { %507 = vmatmul.mubr.bf16.vlgmr.msra.gmra.mrb[0].mxu0 %v3751_v37  ;;  %v3814_v37 = vcombine.high %v104_v32, %v105_v33  ;;  %v120_v32 = vld [vmem:[%s7171_s0 + $0xf0] sm:$0xff]  ;;  %v121_v33 = vld [vmem:[%s7171_s0 + $0xf8] sm:$0xff] }
  0x5a   :  { %924 = vmatmul.mubr.bf16.vlgmr.msra.gmra.mrb[0].mxu1 %v3799_v41  ;;  %514 = vmatprep.mubr.bf16.mxu0 %v3754_v42  ;;  %v107_v41 = vld [vmem:[%s7171_s0 + $0x88] sm:$0xff]  ;;  %v3765_v42 = vcombine.low %v136_v30, %v137_v31  ;;  %v152_v30 = vld [vmem:[%s7172_s1 + $0xf0] sm:$0xff]  ;;  %v153_v31 = vld [vmem:[%s7172_s1 + $0xf8] sm:$0xff] }
  0x5b   :  { %931 = vmatprep.mubr.bf16.mxu1 %v3802_v45  ;;  %1249 = vmatpush1.bf16.msra.mxu0 %v4372_v62  ;;  %v3816_v45 = vcombine.high %v106_v40, %v107_v41  ;;  %v144_v62 = vld [vmem:[%s7172_s1 + $0xb0] sm:$0xff] }
  0x5c   :  { %1250 = vmatprep.subr.bf16.mxu0 %v4389_v5  ;;  %v3822_v5 = vcombine.high %v112_v0, %v113_v1 }
  0x5f   :  { %1251 = vmatpush1.bf16.msra.mxu0 %v4387_v4  ;;  %v3774_v4 = vcombine.high %v144_v62, %v145_v63 }
  0x60   :  { %1252 = vmatprep.subr.bf16.mxu0 %v4392_v9  ;;  %v115_v9 = vld [vmem:[%s7171_s0 + $0xc8] sm:$0xff] }
  0x61   :  { %515 = vmatmul.mubr.bf16.gmra.mrb[4].mxu0 %v3753_v50  ;;  %v3767_v50 = vcombine.low %v138_v38, %v139_v39  ;;  %v3781_v38 = vcombine.low %v152_v30, %v153_v31  ;;  %v3829_v39 = vcombine.low %v120_v32, %v121_v33 }
  0x62   :  { %932 = vmatmul.mubr.bf16.gmra.mrb[4].mxu1 %v3801_v51  ;;  %522 = vmatprep.mubr.bf16.mxu0 %v3756_v52  ;;  %v3815_v51 = vcombine.low %v106_v40, %v107_v41  ;;  %v3770_v52 = vcombine.high %v140_v46, %v141_v47  ;;  %v4623_v40 = vmov 0   ;;  %v4396_v41 = vld [vmem:[%s7178_s7 + $0x40] sm:$0xff]  }
  0x63   :  { %939 = vmatprep.mubr.bf16.mxu1 %v3804_v53  ;;  %1253 = vmatpush1.bf16.msra.mxu0 %v4390_v11  ;;  %v3818_v53 = vcombine.high %v108_v48, %v109_v49  ;;  %v3821_v11 = vcombine.low %v112_v0, %v113_v1 }
  0x64   :  { %1254 = vmatprep.subr.bf16.mxu0 %v4395_v12  ;;  %4161 = vmatprep.subr.bf16.mxu1 %v4396_v41 }
  0x67   :  { %1255 = vmatpush1.bf16.msra.mxu0 %v4393_v15  ;;  %v149_v15 = vld [vmem:[%s7172_s1 + $0xd8] sm:$0xff] }
  0x69   :  { %523 = vmatmul.mubr.bf16.gmra.mrb[8].mxu0 %v3755_v58  ;;  %v3769_v58 = vcombine.low %v140_v46, %v141_v47 }
  0x6a   :  { %940 = vmatmul.mubr.bf16.gmra.mrb[8].mxu1 %v3803_v59  ;;  %530 = vmatprep.mubr.bf16.mxu0 %v3758_v60  ;;  %v3817_v59 = vcombine.low %v108_v48, %v109_v49  ;;  %v3772_v60 = vcombine.high %v142_v54, %v143_v55 }
  0x6b   :  { %947 = vmatprep.mubr.bf16.mxu1 %v3806_v61  ;;  %v3820_v61 = vcombine.high %v110_v56, %v111_v57  ;;  %v4398_v57 = vld [vmem:[%s7178_s7 + $0x48] sm:$0xff]  }
  0x71   :  { %531 = vmatmul.mubr.bf16.gmra.mrb[12].mxu0 %v3757_v6  ;;  %v146_v6 = vld [vmem:[%s7172_s1 + $0xc0] sm:$0xff] }
  0x72   :  { %948 = vmatmul.mubr.bf16.gmra.mrb[12].mxu1 %v3805_v7  ;;  %538 = vmatprep.mubr.bf16.mxu0 %v3760_v8  ;;  %v147_v7 = vld [vmem:[%s7172_s1 + $0xc8] sm:$0xff]  ;;  %v114_v8 = vld [vmem:[%s7171_s0 + $0xc0] sm:$0xff] }
  0x73   :  { %955 = vmatprep.mubr.bf16.mxu1 %v3808_v10  ;;  %v3773_v10 = vcombine.low %v144_v62, %v145_v63  ;;  %v3776_v12 = vcombine.high %v146_v6, %v147_v7  ;;  %v3824_v13 = vcombine.high %v114_v8, %v115_v9  ;;  %v4401_v63 = vld [vmem:[%s7178_s7 + $0x10] sm:$0xff]  }
  0x79   :  { %539 = vmatmul.mubr.bf16.gmra.mrb[16].mxu0 %v3759_v18  ;;  %v3775_v18 = vcombine.low %v146_v6, %v147_v7 }
  0x7a   :  { %956 = vmatmul.mubr.bf16.gmra.mrb[16].mxu1 %v3807_v19  ;;  %546 = vmatprep.mubr.bf16.mxu0 %v3762_v20  ;;  %v3823_v19 = vcombine.low %v114_v8, %v115_v9  ;;  %v3778_v20 = vcombine.high %v148_v14, %v149_v15 }
  0x7b   :  { %963 = vmatprep.mubr.bf16.mxu1 %v3810_v21  ;;  %v3826_v21 = vcombine.high %v116_v16, %v117_v17 }
  0x81   :  { %547 = vmatmul.mubr.bf16.gmra.mrb[20].mxu0 %v3761_v26  ;;  %v3777_v26 = vcombine.low %v148_v14, %v149_v15  ;;  %v4403_v14 = vld [vmem:[%s7178_s7 + $0x18] sm:$0xff]  }
  0x82   :  { %964 = vmatmul.mubr.bf16.gmra.mrb[20].mxu1 %v3809_v27  ;;  %554 = vmatprep.mubr.bf16.mxu0 %v3764_v28  ;;  %v3825_v27 = vcombine.low %v116_v16, %v117_v17  ;;  %v3780_v28 = vcombine.high %v150_v22, %v151_v23 }
  0x83   :  { %971 = vmatprep.mubr.bf16.mxu1 %v3812_v29  ;;  %v3828_v29 = vcombine.high %v118_v24, %v119_v25 }
  0x89   :  { %555 = vmatmul.mubr.bf16.gmra.mrb[24].mxu0 %v3763_v34  ;;  %v3779_v34 = vcombine.low %v150_v22, %v151_v23  ;;  %v4405_v22 = vld [vmem:[%s7178_s7 + $0x20] sm:$0xff]  }
  0x8a   :  { %972 = vmatmul.mubr.bf16.gmra.mrb[24].mxu1 %v3811_v35  ;;  %562 = vmatprep.mubr.bf16.mxu0 %v3766_v36  ;;  %v3827_v35 = vcombine.low %v118_v24, %v119_v25  ;;  %v3782_v36 = vcombine.high %v152_v30, %v153_v31 }
  0x8b   :  { %979 = vmatprep.mubr.bf16.mxu1 %v3814_v37  ;;  %v3830_v37 = vcombine.high %v120_v32, %v121_v33 }
  0x91   :  { %563 = vmatmul.mubr.bf16.gmra.mrb[28].mxu0 %v3765_v42  ;;  %v4397_v42 = vld [vmem:[%s7178_s7] sm:$0xff]  }
  0x92   :  { %980 = vmatmul.mubr.bf16.gmra.mrb[28].mxu1 %v3813_v43  ;;  %570 = vmatprep.mubr.bf16.mxu0 %v3768_v44 }
  0x93   :  { %987 = vmatprep.mubr.bf16.mxu1 %v3816_v45  ;;  %4162 = vmatpush3.bf16.msra.mxu1 %v4397_v42  ;;  %v4408_v42 = vld [vmem:[%s7178_s7 + $0x70] sm:$0xff]  }
  0x94   :  { %4163 = vmatprep.subr.bf16.mxu1 %v4398_v57 }
  0x99   :  { %571 = vmatmul.mubr.bf16.gmra.mrb[32].mxu0 %v3767_v50 }
  0x9a   :  { %988 = vmatmul.mubr.bf16.gmra.mrb[32].mxu1 %v3815_v51  ;;  %578 = vmatprep.mubr.bf16.mxu0 %v3770_v52  ;;  %v5052_v52 = vld [vmem:[%s7175_s4] ss:$0 sm:$0xff] }
  0x9b   :  { %995 = vmatprep.mubr.bf16.mxu1 %v3818_v53 }
  0xa1   :  { %579 = vmatmul.mubr.bf16.gmra.mrb[36].mxu0 %v3769_v58  ;;  %v4399_v58 = vld [vmem:[%s7178_s7 + $0x8] sm:$0xff]  }
  0xa2   :  { %996 = vmatmul.mubr.bf16.gmra.mrb[36].mxu1 %v3817_v59  ;;  %586 = vmatprep.mubr.bf16.mxu0 %v3772_v60 }
  0xa3   :  { %1003 = vmatprep.mubr.bf16.mxu1 %v3820_v61  ;;  %v4400_v61 = vld [vmem:[%s7178_s7 + $0x50] sm:$0xff]   ;;  %4164 = vmatpush3.bf16.msra.mxu1 %v4399_v58 }
  0xa4   :  { %4165 = vmatprep.subr.bf16.mxu1 %v4400_v61 }
  0xa7   :  { %4166 = vmatpush3.bf16.msra.mxu1 %v4401_v63 }
  0xa9   :  { %587 = vmatmul.mubr.bf16.gmra.mrb[40].mxu0 %v3771_v2 }
  0xaa   :  { %1004 = vmatmul.mubr.bf16.gmra.mrb[40].mxu1 %v3819_v3  ;;  %594 = vmatprep.mubr.bf16.mxu0 %v3774_v4  ;;  %v4402_v3 = vld [vmem:[%s7178_s7 + $0x58] sm:$0xff]  }
  0xab   :  { %1011 = vmatprep.mubr.bf16.mxu1 %v3822_v5  ;;  %4167 = vmatprep.subr.bf16.mxu1 %v4402_v3 }
  0xac   :  { %4168 = vmatpush3.bf16.msra.mxu1 %v4403_v14 }
  0xb1   :  { %595 = vmatmul.mubr.bf16.gmra.mrb[44].mxu0 %v3773_v10 }
  0xb2   :  { %1012 = vmatmul.mubr.bf16.gmra.mrb[44].mxu1 %v3821_v11  ;;  %602 = vmatprep.mubr.bf16.mxu0 %v3776_v12 }
  0xb3   :  { %1019 = vmatprep.mubr.bf16.mxu1 %v3824_v13 }
  0xb9   :  { %603 = vmatmul.mubr.bf16.gmra.mrb[48].mxu0 %v3775_v18  ;;  %v4404_v18 = vld [vmem:[%s7178_s7 + $0x60] sm:$0xff]  }
  0xba   :  { %1020 = vmatmul.mubr.bf16.gmra.mrb[48].mxu1 %v3823_v19  ;;  %610 = vmatprep.mubr.bf16.mxu0 %v3778_v20 }
  0xbb   :  { %1027 = vmatprep.mubr.bf16.mxu1 %v3826_v21  ;;  %4169 = vmatprep.subr.bf16.mxu1 %v4404_v18 }
  0xbc   :  { %4170 = vmatpush3.bf16.msra.mxu1 %v4405_v22 }
  0xc1   :  { %611 = vmatmul.mubr.bf16.gmra.mrb[52].mxu0 %v3777_v26  ;;  %v4406_v26 = vld [vmem:[%s7178_s7 + $0x68] sm:$0xff]  }
  0xc2   :  { %1028 = vmatmul.mubr.bf16.gmra.mrb[52].mxu1 %v3825_v27  ;;  %618 = vmatprep.mubr.bf16.mxu0 %v3780_v28 }
  0xc3   :  { %1035 = vmatprep.mubr.bf16.mxu1 %v3828_v29  ;;  %4171 = vmatprep.subr.bf16.mxu1 %v4406_v26 }
  0xc9   :  { %619 = vmatmul.mubr.bf16.gmra.mrb[56].mxu0 %v3779_v34 }
  0xca   :  { %1036 = vmatmul.mubr.bf16.gmra.mrb[56].mxu1 %v3827_v35  ;;  %626 = vmatprep.mubr.bf16.mxu0 %v3782_v36 }
  0xcb   :  { %1043 = vmatprep.mubr.bf16.mxu1 %v3830_v37  ;;  %v4407_v37 = vld [vmem:[%s7178_s7 + $0x28] sm:$0xff]  }
  0xcc   :  { %4172 = vmatpush3.bf16.msra.mxu1 %v4407_v37 }
  0xcd   :  { %4173 = vmatprep.subr.bf16.mxu1 %v4408_v42 }
  0xd1   :  { %627 = vmatmul.mubr.bf16.gmra.mrb[60].mxu0 %v3781_v38 }
  0xd2   :  { %1044 = vmatmul.mubr.bf16.gmra.mrb[60].mxu1 %v3829_v39  ;;  %1280 = vmatprep.mubr.bf16.mxu0 %v4623_v40 }
 0x12c   :  { %v3953_v43 = vpop.f32.mrb[0].mxu0 }
 0x12d   :  { %v4065_v44 = vpop.f32.mrb[0].mxu1  ;;  %v3954_v45 = vpop.f32.mrb[1].mxu0 }
 0x12e   :  { %v3955_v46 = vadd.f32 %v3954_v45, %v3953_v43  ;;  %v4066_v47 = vpop.f32.mrb[1].mxu1  ;;  %v3956_v48 = vpop.f32.mrb[2].mxu0 }
 0x12f   :  { %v4067_v49 = vadd.f32 %v4066_v47, %v4065_v44  ;;  %v4068_v50 = vpop.f32.mrb[2].mxu1  ;;  %v3957_v51 = vpop.f32.mrb[3].mxu0 }
 0x130   :  { %v3958_v53 = vadd.f32 %v3957_v51, %v3956_v48  ;;  %v4069_v54 = vpop.f32.mrb[3].mxu1 }
 0x131   :  { %v926_v55 = vadd.f32 %v4067_v49, %v3955_v46  ;;  %v4070_v56 = vadd.f32 %v4069_v54, %v4068_v50  ;;  %v4409_v46 = vld [vmem:[%s7178_s7 + $0x30] sm:$0xff]   ;;  %v4410_v50 = vld [vmem:[%s7178_s7 + $0x78] sm:$0xff]  }
 0x132   :  { %4174 = vmatpush3.bf16.msra.mxu1 %v4409_v46 }
 0x133   :  { %v1059_v59 = vadd.f32 %v5052_v52, %v926_v55  ;;  %v929_v60 = vadd.f32 %v4070_v56, %v3958_v53  ;;  %4175 = vmatprep.subr.bf16.mxu1 %v4410_v50 }
 0x134   :  { %v3959_v62 = vpop.f32.mrb[4].mxu0 }
 0x135   :  { %v1060_v0 = vadd.f32 %v5052_v52, %v929_v60  ;;  %v4071_v1 = vpop.f32.mrb[4].mxu1  ;;  %v3960_v2 = vpop.f32.mrb[5].mxu0  ;;  %v1091_v7 = vmax.f32 %v1059_v59, 0.0 }
 0x136   :  { %v3961_v4 = vadd.f32 %v3960_v2, %v3959_v62  ;;  %v4072_v5 = vpop.f32.mrb[5].mxu1  ;;  %v3962_v6 = vpop.f32.mrb[6].mxu0  ;;  %v4411_v62 = vld [vmem:[%s7178_s7 + $0x38] sm:$0xff]  }
 0x137   :  { %v1092_v8 = vmax.f32 %v1060_v0, 0.0  ;;  %v4073_v9 = vadd.f32 %v4072_v5, %v4071_v1  ;;  %v4074_v10 = vpop.f32.mrb[6].mxu1  ;;  %v3963_v11 = vpop.f32.mrb[7].mxu0  ;;  %4176 = vmatpush3.bf16.msra.mxu1 %v4411_v62 }
 0x138   :  { %v3964_v12 = vadd.f32 %v3963_v11, %v3962_v6  ;;  %v4075_v13 = vpop.f32.mrb[7].mxu1 }
 0x139   :  { %v1123_v15 = vpack.c.bf16 %v1092_v8, %v1091_v7  ;;  %v934_v16 = vadd.f32 %v4073_v9, %v3961_v4  ;;  %v4076_v17 = vadd.f32 %v4075_v13, %v4074_v10 }
 0x13b   :  { %v1061_v19 = vadd.f32 %v5052_v52, %v934_v16  ;;  %v937_v20 = vadd.f32 %v4076_v17, %v3964_v12  ;;  %3856 = vmatmul.mubr.msk.bf16.vlgmr.msra.gmra.mrb[64].mxu0 %vm1199_vm0, %v1123_v15 }
 0x13c   :  { %v3965_v21 = vpop.f32.mrb[8].mxu0  ;;  %1290 = vmatprep.mubr.bf16.mxu0 %v4623_v40 }
 0x13d   :  { %v1062_v23 = vadd.f32 %v5052_v52, %v937_v20  ;;  %v4077_v24 = vpop.f32.mrb[8].mxu1  ;;  %v3966_v25 = vpop.f32.mrb[9].mxu0  ;;  %v1093_v30 = vmax.f32 %v1061_v19, 0.0 }
 0x13e   :  { %v3967_v27 = vadd.f32 %v3966_v25, %v3965_v21  ;;  %v4078_v28 = vpop.f32.mrb[9].mxu1  ;;  %v3968_v29 = vpop.f32.mrb[10].mxu0 }
 0x13f   :  { %v1094_v31 = vmax.f32 %v1062_v23, 0.0  ;;  %v4079_v32 = vadd.f32 %v4078_v28, %v4077_v24  ;;  %v4080_v33 = vpop.f32.mrb[10].mxu1  ;;  %v3969_v34 = vpop.f32.mrb[11].mxu0 }
 0x140   :  { %v3970_v35 = vadd.f32 %v3969_v34, %v3968_v29  ;;  %v4081_v36 = vpop.f32.mrb[11].mxu1 }
 0x141   :  { %v1124_v38 = vpack.c.bf16 %v1094_v31, %v1093_v30  ;;  %v942_v39 = vadd.f32 %v4079_v32, %v3967_v27  ;;  %v4082_v41 = vadd.f32 %v4081_v36, %v4080_v33 }
 0x143   :  { %v1063_v43 = vadd.f32 %v5052_v52, %v942_v39  ;;  %v945_v44 = vadd.f32 %v4082_v41, %v3970_v35  ;;  %3857 = vmatmul.mubr.msk.bf16.gmra.mrb[68].mxu0 %vm1199_vm0, %v1124_v38 }
 0x144   :  { %v3971_v45 = vpop.f32.mrb[12].mxu0  ;;  %1300 = vmatprep.mubr.bf16.mxu0 %v4623_v40 }
 0x145   :  { %v1064_v47 = vadd.f32 %v5052_v52, %v945_v44  ;;  %v4083_v48 = vpop.f32.mrb[12].mxu1  ;;  %v3972_v49 = vpop.f32.mrb[13].mxu0  ;;  %v1095_v55 = vmax.f32 %v1063_v43, 0.0 }
 0x146   :  { %v3973_v51 = vadd.f32 %v3972_v49, %v3971_v45  ;;  %v4084_v53 = vpop.f32.mrb[13].mxu1  ;;  %v3974_v54 = vpop.f32.mrb[14].mxu0 }
 0x147   :  { %v1096_v56 = vmax.f32 %v1064_v47, 0.0  ;;  %v4085_v57 = vadd.f32 %v4084_v53, %v4083_v48  ;;  %v4086_v58 = vpop.f32.mrb[14].mxu1  ;;  %v3975_v59 = vpop.f32.mrb[15].mxu0 }
 0x148   :  { %v3976_v60 = vadd.f32 %v3975_v59, %v3974_v54  ;;  %v4087_v61 = vpop.f32.mrb[15].mxu1 }
 0x149   :  { %v1125_v63 = vpack.c.bf16 %v1096_v56, %v1095_v55  ;;  %v950_v0 = vadd.f32 %v4085_v57, %v3973_v51  ;;  %v4088_v1 = vadd.f32 %v4087_v61, %v4086_v58 }
 0x14b   :  { %v1065_v2 = vadd.f32 %v5052_v52, %v950_v0  ;;  %v953_v3 = vadd.f32 %v4088_v1, %v3976_v60  ;;  %3858 = vmatmul.mubr.msk.bf16.gmra.mrb[72].mxu0 %vm1199_vm0, %v1125_v63 }
 0x14c   :  { %v3977_v4 = vpop.f32.mrb[16].mxu0  ;;  %1310 = vmatprep.mubr.bf16.mxu0 %v4623_v40 }
 0x14d   :  { %v1066_v5 = vadd.f32 %v5052_v52, %v953_v3  ;;  %v4089_v6 = vpop.f32.mrb[16].mxu1  ;;  %v3978_v7 = vpop.f32.mrb[17].mxu0  ;;  %v1097_v11 = vmax.f32 %v1065_v2, 0.0 }
 0x14e   :  { %v3979_v8 = vadd.f32 %v3978_v7, %v3977_v4  ;;  %v4090_v9 = vpop.f32.mrb[17].mxu1  ;;  %v3980_v10 = vpop.f32.mrb[18].mxu0 }
 0x14f   :  { %v1098_v12 = vmax.f32 %v1066_v5, 0.0  ;;  %v4091_v13 = vadd.f32 %v4090_v9, %v4089_v6  ;;  %v4092_v14 = vpop.f32.mrb[18].mxu1  ;;  %v3981_v15 = vpop.f32.mrb[19].mxu0 }
 0x150   :  { %v3982_v16 = vadd.f32 %v3981_v15, %v3980_v10  ;;  %v4093_v17 = vpop.f32.mrb[19].mxu1 }
 0x151   :  { %v1126_v18 = vpack.c.bf16 %v1098_v12, %v1097_v11  ;;  %v958_v19 = vadd.f32 %v4091_v13, %v3979_v8  ;;  %v4094_v20 = vadd.f32 %v4093_v17, %v4092_v14 }
 0x153   :  { %v1067_v21 = vadd.f32 %v5052_v52, %v958_v19  ;;  %v961_v22 = vadd.f32 %v4094_v20, %v3982_v16  ;;  %3859 = vmatmul.mubr.msk.bf16.gmra.mrb[76].mxu0 %vm1199_vm0, %v1126_v18 }
 0x154   :  { %v3983_v23 = vpop.f32.mrb[20].mxu0  ;;  %1320 = vmatprep.mubr.bf16.mxu0 %v4623_v40 }
 0x155   :  { %v1068_v24 = vadd.f32 %v5052_v52, %v961_v22  ;;  %v4095_v25 = vpop.f32.mrb[20].mxu1  ;;  %v3984_v26 = vpop.f32.mrb[21].mxu0  ;;  %v1099_v30 = vmax.f32 %v1067_v21, 0.0 }
 0x156   :  { %v3985_v27 = vadd.f32 %v3984_v26, %v3983_v23  ;;  %v4096_v28 = vpop.f32.mrb[21].mxu1  ;;  %v3986_v29 = vpop.f32.mrb[22].mxu0 }
 0x157   :  { %v1100_v31 = vmax.f32 %v1068_v24, 0.0  ;;  %v4097_v32 = vadd.f32 %v4096_v28, %v4095_v25  ;;  %v4098_v33 = vpop.f32.mrb[22].mxu1  ;;  %v3987_v34 = vpop.f32.mrb[23].mxu0 }
 0x158   :  { %v3988_v35 = vadd.f32 %v3987_v34, %v3986_v29  ;;  %v4099_v36 = vpop.f32.mrb[23].mxu1 }
 0x159   :  { %v1127_v37 = vpack.c.bf16 %v1100_v31, %v1099_v30  ;;  %v966_v38 = vadd.f32 %v4097_v32, %v3985_v27  ;;  %v4100_v39 = vadd.f32 %v4099_v36, %v4098_v33 }
 0x15b   :  { %v1069_v41 = vadd.f32 %v5052_v52, %v966_v38  ;;  %v969_v42 = vadd.f32 %v4100_v39, %v3988_v35  ;;  %3860 = vmatmul.mubr.msk.bf16.gmra.mrb[80].mxu0 %vm1199_vm0, %v1127_v37 }
 0x15c   :  { %v3989_v43 = vpop.f32.mrb[24].mxu0  ;;  %1330 = vmatprep.mubr.bf16.mxu0 %v4623_v40 }
 0x15d   :  { %v1070_v44 = vadd.f32 %v5052_v52, %v969_v42  ;;  %v4101_v45 = vpop.f32.mrb[24].mxu1  ;;  %v3990_v46 = vpop.f32.mrb[25].mxu0  ;;  %v1101_v50 = vmax.f32 %v1069_v41, 0.0 }
 0x15e   :  { %v3991_v47 = vadd.f32 %v3990_v46, %v3989_v43  ;;  %v4102_v48 = vpop.f32.mrb[25].mxu1  ;;  %v3992_v49 = vpop.f32.mrb[26].mxu0 }
 0x15f   :  { %v1102_v51 = vmax.f32 %v1070_v44, 0.0  ;;  %v4103_v53 = vadd.f32 %v4102_v48, %v4101_v45  ;;  %v4104_v54 = vpop.f32.mrb[26].mxu1  ;;  %v3993_v55 = vpop.f32.mrb[27].mxu0 }
 0x160   :  { %v3994_v56 = vadd.f32 %v3993_v55, %v3992_v49  ;;  %v4105_v57 = vpop.f32.mrb[27].mxu1 }
 0x161   :  { %v1128_v58 = vpack.c.bf16 %v1102_v51, %v1101_v50  ;;  %v974_v59 = vadd.f32 %v4103_v53, %v3991_v47  ;;  %v4106_v60 = vadd.f32 %v4105_v57, %v4104_v54 }
 0x163   :  { %v1071_v61 = vadd.f32 %v5052_v52, %v974_v59  ;;  %v977_v62 = vadd.f32 %v4106_v60, %v3994_v56  ;;  %3861 = vmatmul.mubr.msk.bf16.gmra.mrb[84].mxu0 %vm1199_vm0, %v1128_v58 }
 0x164   :  { %v3995_v63 = vpop.f32.mrb[28].mxu0  ;;  %1340 = vmatprep.mubr.bf16.mxu0 %v4623_v40 }
 0x165   :  { %v1072_v0 = vadd.f32 %v5052_v52, %v977_v62  ;;  %v4107_v1 = vpop.f32.mrb[28].mxu1  ;;  %v3996_v2 = vpop.f32.mrb[29].mxu0  ;;  %v1103_v6 = vmax.f32 %v1071_v61, 0.0 }
 0x166   :  { %v3997_v3 = vadd.f32 %v3996_v2, %v3995_v63  ;;  %v4108_v4 = vpop.f32.mrb[29].mxu1  ;;  %v3998_v5 = vpop.f32.mrb[30].mxu0 }
 0x167   :  { %v1104_v7 = vmax.f32 %v1072_v0, 0.0  ;;  %v4109_v8 = vadd.f32 %v4108_v4, %v4107_v1  ;;  %v4110_v9 = vpop.f32.mrb[30].mxu1  ;;  %v3999_v10 = vpop.f32.mrb[31].mxu0 }
 0x168   :  { %v4000_v11 = vadd.f32 %v3999_v10, %v3998_v5  ;;  %v4111_v12 = vpop.f32.mrb[31].mxu1 }
 0x169   :  { %v1129_v13 = vpack.c.bf16 %v1104_v7, %v1103_v6  ;;  %v982_v14 = vadd.f32 %v4109_v8, %v3997_v3  ;;  %v4112_v15 = vadd.f32 %v4111_v12, %v4110_v9 }
 0x16b   :  { %v1073_v16 = vadd.f32 %v5052_v52, %v982_v14  ;;  %v985_v17 = vadd.f32 %v4112_v15, %v4000_v11  ;;  %3862 = vmatmul.mubr.msk.bf16.gmra.mrb[88].mxu0 %vm1199_vm0, %v1129_v13 }
 0x16c   :  { %v4001_v18 = vpop.f32.mrb[32].mxu0  ;;  %1350 = vmatprep.mubr.bf16.mxu0 %v4623_v40 }
 0x16d   :  { %v1074_v19 = vadd.f32 %v5052_v52, %v985_v17  ;;  %v4113_v20 = vpop.f32.mrb[32].mxu1  ;;  %v4002_v21 = vpop.f32.mrb[33].mxu0  ;;  %v1105_v25 = vmax.f32 %v1073_v16, 0.0 }
 0x16e   :  { %v4003_v22 = vadd.f32 %v4002_v21, %v4001_v18  ;;  %v4114_v23 = vpop.f32.mrb[33].mxu1  ;;  %v4004_v24 = vpop.f32.mrb[34].mxu0 }
 0x16f   :  { %v1106_v26 = vmax.f32 %v1074_v19, 0.0  ;;  %v4115_v27 = vadd.f32 %v4114_v23, %v4113_v20  ;;  %v4116_v28 = vpop.f32.mrb[34].mxu1  ;;  %v4005_v29 = vpop.f32.mrb[35].mxu0 }
 0x170   :  { %v4006_v30 = vadd.f32 %v4005_v29, %v4004_v24  ;;  %v4117_v31 = vpop.f32.mrb[35].mxu1 }
 0x171   :  { %v1130_v32 = vpack.c.bf16 %v1106_v26, %v1105_v25  ;;  %v990_v33 = vadd.f32 %v4115_v27, %v4003_v22  ;;  %v4118_v34 = vadd.f32 %v4117_v31, %v4116_v28 }
 0x173   :  { %v1075_v35 = vadd.f32 %v5052_v52, %v990_v33  ;;  %v993_v36 = vadd.f32 %v4118_v34, %v4006_v30  ;;  %3863 = vmatmul.mubr.msk.bf16.gmra.mrb[92].mxu0 %vm1199_vm0, %v1130_v32 }
 0x174   :  { %v4007_v37 = vpop.f32.mrb[36].mxu0  ;;  %1360 = vmatprep.mubr.bf16.mxu0 %v4623_v40 }
 0x175   :  { %v1076_v38 = vadd.f32 %v5052_v52, %v993_v36  ;;  %v4119_v39 = vpop.f32.mrb[36].mxu1  ;;  %v4008_v41 = vpop.f32.mrb[37].mxu0  ;;  %v1107_v45 = vmax.f32 %v1075_v35, 0.0 }
 0x176   :  { %v4009_v42 = vadd.f32 %v4008_v41, %v4007_v37  ;;  %v4120_v43 = vpop.f32.mrb[37].mxu1  ;;  %v4010_v44 = vpop.f32.mrb[38].mxu0 }
 0x177   :  { %v1108_v46 = vmax.f32 %v1076_v38, 0.0  ;;  %v4121_v47 = vadd.f32 %v4120_v43, %v4119_v39  ;;  %v4122_v48 = vpop.f32.mrb[38].mxu1  ;;  %v4011_v49 = vpop.f32.mrb[39].mxu0 }
 0x178   :  { %v4012_v50 = vadd.f32 %v4011_v49, %v4010_v44  ;;  %v4123_v51 = vpop.f32.mrb[39].mxu1 }
 0x179   :  { %v1131_v53 = vpack.c.bf16 %v1108_v46, %v1107_v45  ;;  %v998_v54 = vadd.f32 %v4121_v47, %v4009_v42  ;;  %v4124_v55 = vadd.f32 %v4123_v51, %v4122_v48 }
 0x17b   :  { %v1077_v56 = vadd.f32 %v5052_v52, %v998_v54  ;;  %v1001_v57 = vadd.f32 %v4124_v55, %v4012_v50  ;;  %3864 = vmatmul.mubr.msk.bf16.gmra.mrb[96].mxu0 %vm1199_vm0, %v1131_v53 }
 0x17c   :  { %v4013_v58 = vpop.f32.mrb[40].mxu0  ;;  %1370 = vmatprep.mubr.bf16.mxu0 %v4623_v40 }
 0x17d   :  { %v1078_v59 = vadd.f32 %v5052_v52, %v1001_v57  ;;  %v4125_v60 = vpop.f32.mrb[40].mxu1  ;;  %v4014_v61 = vpop.f32.mrb[41].mxu0  ;;  %v1109_v1 = vmax.f32 %v1077_v56, 0.0 }
 0x17e   :  { %v4015_v62 = vadd.f32 %v4014_v61, %v4013_v58  ;;  %v4126_v63 = vpop.f32.mrb[41].mxu1  ;;  %v4016_v0 = vpop.f32.mrb[42].mxu0 }
 0x17f   :  { %v1110_v2 = vmax.f32 %v1078_v59, 0.0  ;;  %v4127_v3 = vadd.f32 %v4126_v63, %v4125_v60  ;;  %v4128_v4 = vpop.f32.mrb[42].mxu1  ;;  %v4017_v5 = vpop.f32.mrb[43].mxu0 }
 0x180   :  { %v4018_v6 = vadd.f32 %v4017_v5, %v4016_v0  ;;  %v4129_v7 = vpop.f32.mrb[43].mxu1 }
 0x181   :  { %v1132_v8 = vpack.c.bf16 %v1110_v2, %v1109_v1  ;;  %v1006_v9 = vadd.f32 %v4127_v3, %v4015_v62  ;;  %v4130_v10 = vadd.f32 %v4129_v7, %v4128_v4 }
 0x183   :  { %v1079_v11 = vadd.f32 %v5052_v52, %v1006_v9  ;;  %v1009_v12 = vadd.f32 %v4130_v10, %v4018_v6  ;;  %3865 = vmatmul.mubr.msk.bf16.gmra.mrb[100].mxu0 %vm1199_vm0, %v1132_v8 }
 0x184   :  { %v4019_v13 = vpop.f32.mrb[44].mxu0  ;;  %1380 = vmatprep.mubr.bf16.mxu0 %v4623_v40 }
 0x185   :  { %v1080_v14 = vadd.f32 %v5052_v52, %v1009_v12  ;;  %v4131_v15 = vpop.f32.mrb[44].mxu1  ;;  %v4020_v16 = vpop.f32.mrb[45].mxu0  ;;  %v1111_v20 = vmax.f32 %v1079_v11, 0.0 }
 0x186   :  { %v4021_v17 = vadd.f32 %v4020_v16, %v4019_v13  ;;  %v4132_v18 = vpop.f32.mrb[45].mxu1  ;;  %v4022_v19 = vpop.f32.mrb[46].mxu0 }
 0x187   :  { %v1112_v21 = vmax.f32 %v1080_v14, 0.0  ;;  %v4133_v22 = vadd.f32 %v4132_v18, %v4131_v15  ;;  %v4134_v23 = vpop.f32.mrb[46].mxu1  ;;  %v4023_v24 = vpop.f32.mrb[47].mxu0 }
 0x188   :  { %v4024_v25 = vadd.f32 %v4023_v24, %v4022_v19  ;;  %v4135_v26 = vpop.f32.mrb[47].mxu1 }
 0x189   :  { %v1133_v27 = vpack.c.bf16 %v1112_v21, %v1111_v20  ;;  %v1014_v28 = vadd.f32 %v4133_v22, %v4021_v17  ;;  %v4136_v29 = vadd.f32 %v4135_v26, %v4134_v23 }
 0x18b   :  { %v1081_v30 = vadd.f32 %v5052_v52, %v1014_v28  ;;  %v1017_v31 = vadd.f32 %v4136_v29, %v4024_v25  ;;  %3866 = vmatmul.mubr.msk.bf16.gmra.mrb[104].mxu0 %vm1199_vm0, %v1133_v27 }
 0x18c   :  { %v4025_v32 = vpop.f32.mrb[48].mxu0  ;;  %1390 = vmatprep.mubr.bf16.mxu0 %v4623_v40 }
 0x18d   :  { %v1082_v33 = vadd.f32 %v5052_v52, %v1017_v31  ;;  %v4137_v34 = vpop.f32.mrb[48].mxu1  ;;  %v4026_v35 = vpop.f32.mrb[49].mxu0  ;;  %v1113_v39 = vmax.f32 %v1081_v30, 0.0 }
 0x18e   :  { %v4027_v36 = vadd.f32 %v4026_v35, %v4025_v32  ;;  %v4138_v37 = vpop.f32.mrb[49].mxu1  ;;  %v4028_v38 = vpop.f32.mrb[50].mxu0 }
 0x18f   :  { %v1114_v41 = vmax.f32 %v1082_v33, 0.0  ;;  %v4139_v42 = vadd.f32 %v4138_v37, %v4137_v34  ;;  %v4140_v43 = vpop.f32.mrb[50].mxu1  ;;  %v4029_v44 = vpop.f32.mrb[51].mxu0 }
 0x190   :  { %v4030_v45 = vadd.f32 %v4029_v44, %v4028_v38  ;;  %v4141_v46 = vpop.f32.mrb[51].mxu1 }
 0x191   :  { %v1134_v47 = vpack.c.bf16 %v1114_v41, %v1113_v39  ;;  %v1022_v48 = vadd.f32 %v4139_v42, %v4027_v36  ;;  %v4142_v49 = vadd.f32 %v4141_v46, %v4140_v43 }
 0x193   :  { %v1083_v50 = vadd.f32 %v5052_v52, %v1022_v48  ;;  %v1025_v51 = vadd.f32 %v4142_v49, %v4030_v45  ;;  %3867 = vmatmul.mubr.msk.bf16.gmra.mrb[108].mxu0 %vm1199_vm0, %v1134_v47 }
 0x194   :  { %v4031_v53 = vpop.f32.mrb[52].mxu0  ;;  %1400 = vmatprep.mubr.bf16.mxu0 %v4623_v40 }
 0x195   :  { %v1084_v54 = vadd.f32 %v5052_v52, %v1025_v51  ;;  %v4143_v55 = vpop.f32.mrb[52].mxu1  ;;  %v4032_v56 = vpop.f32.mrb[53].mxu0  ;;  %v1115_v60 = vmax.f32 %v1083_v50, 0.0  ;;  %v7186_v51 = vlaneseq }
 0x196   :  { %v4033_v57 = vadd.f32 %v4032_v56, %v4031_v53  ;;  %v4144_v58 = vpop.f32.mrb[53].mxu1  ;;  %v4034_v59 = vpop.f32.mrb[54].mxu0  ;;  %v4412_v53 = vld [vmem:[#allocation5] ss:$8 sps:$4 sm:$0xff]   ;;  %v4417_v56 = vld [vmem:[#allocation7 + $0x4] ss:$8 sps:$4 sm:$0xff]  }
 0x197   :  { %v1116_v61 = vmax.f32 %v1084_v54, 0.0  ;;  %v4145_v62 = vadd.f32 %v4144_v58, %v4143_v55  ;;  %v4146_v63 = vpop.f32.mrb[54].mxu1  ;;  %v4035_v0 = vpop.f32.mrb[55].mxu0  ;;  %v4414_v54 = vld [vmem:[#allocation5 + $0x4] ss:$8 sps:$4 sm:$0xff]   ;;  %v5161_v55 = vshrl.u32 %v7186_v51, 7  ;;  %2827 = vmatprep.subr.bf16.mxu1 %v4417_v56 }
 0x198   :  { %v4036_v1 = vadd.f32 %v4035_v0, %v4034_v59  ;;  %v4147_v2 = vpop.f32.mrb[55].mxu1  ;;  %2053 = vmatprep.subr.bf16.mxu0 %v4414_v54  ;;  %vm3708_vm1 = vcmp.lt.s32.totalorder %v7186_v51, 256  ;;  %v5519_v51 = vld [vmem:[%s7171_s0 + $0x58] sm:$0xff] }
 0x199   :  { %v1135_v3 = vpack.c.bf16 %v1116_v61, %v1115_v60  ;;  %v1030_v4 = vadd.f32 %v4145_v62, %v4033_v57  ;;  %v4148_v5 = vadd.f32 %v4147_v2, %v4146_v63  ;;  %2054 = vmatpush1.bf16.msra.mxu0 %v4412_v53  ;;  %v5164_v57 = vsub.s32 0, %v5161_v55  ;;  %v4432_v53 = vld [vmem:[#allocation5 + $0x34] ss:$8 sps:$4 sm:$0xff]   ;;  %7232 = vst [vmem:[#allocation17_spill] sm:$0xff] %v5519_v51 }
 0x19a   :  { %v5170_v58 = vsub.s32 1, %v5161_v55 }
 0x19b   :  { %v1085_v6 = vadd.f32 %v5052_v52, %v1030_v4  ;;  %v1033_v7 = vadd.f32 %v4148_v5, %v4036_v1  ;;  %3868 = vmatmul.mubr.msk.bf16.gmra.mrb[112].mxu0 %vm1199_vm0, %v1135_v3 }
 0x19c   :  { %v4037_v8 = vpop.f32.mrb[56].mxu0  ;;  %1410 = vmatprep.mubr.bf16.mxu0 %v4623_v40 }
 0x19d   :  { %v1086_v9 = vadd.f32 %v5052_v52, %v1033_v7  ;;  %v4149_v10 = vpop.f32.mrb[56].mxu1  ;;  %v4038_v11 = vpop.f32.mrb[57].mxu0  ;;  %v1117_v15 = vmax.f32 %v1085_v6, 0.0 }
 0x19e   :  { %v4039_v12 = vadd.f32 %v4038_v11, %v4037_v8  ;;  %v4150_v13 = vpop.f32.mrb[57].mxu1  ;;  %v4040_v14 = vpop.f32.mrb[58].mxu0 }
 0x19f   :  { %v1118_v16 = vmax.f32 %v1086_v9, 0.0  ;;  %v4151_v17 = vadd.f32 %v4150_v13, %v4149_v10  ;;  %v4152_v18 = vpop.f32.mrb[58].mxu1  ;;  %v4041_v19 = vpop.f32.mrb[59].mxu0 }
 0x1a0   :  { %v4042_v20 = vadd.f32 %v4041_v19, %v4040_v14  ;;  %v4153_v21 = vpop.f32.mrb[59].mxu1 }
 0x1a1   :  { %v1136_v22 = vpack.c.bf16 %v1118_v16, %v1117_v15  ;;  %v1038_v23 = vadd.f32 %v4151_v17, %v4039_v12  ;;  %v4154_v24 = vadd.f32 %v4153_v21, %v4152_v18  ;;  %v4415_v18 = vld [vmem:[#allocation7] ss:$8 sps:$4 sm:$0xff]  }
 0x1a3   :  { %v1087_v25 = vadd.f32 %v5052_v52, %v1038_v23  ;;  %v1041_v26 = vadd.f32 %v4154_v24, %v4042_v20  ;;  %3869 = vmatmul.mubr.msk.bf16.gmra.mrb[116].mxu0 %vm1199_vm0, %v1136_v22 }
 0x1a4   :  { %v4043_v27 = vpop.f32.mrb[60].mxu0  ;;  %1420 = vmatprep.mubr.bf16.mxu0 %v4623_v40 }
 0x1a5   :  { %v1088_v28 = vadd.f32 %v5052_v52, %v1041_v26  ;;  %v4155_v29 = vpop.f32.mrb[60].mxu1  ;;  %v4044_v30 = vpop.f32.mrb[61].mxu0  ;;  %v1119_v34 = vmax.f32 %v1087_v25, 0.0 }
 0x1a6   :  { %v4045_v31 = vadd.f32 %v4044_v30, %v4043_v27  ;;  %v4156_v32 = vpop.f32.mrb[61].mxu1  ;;  %v4046_v33 = vpop.f32.mrb[62].mxu0 }
 0x1a7   :  { %v1120_v35 = vmax.f32 %v1088_v28, 0.0  ;;  %v4157_v36 = vadd.f32 %v4156_v32, %v4155_v29  ;;  %v4158_v37 = vpop.f32.mrb[62].mxu1  ;;  %v4047_v38 = vpop.f32.mrb[63].mxu0  ;;  %v4420_v32 = vld [vmem:[#allocation5 + $0x14] ss:$8 sps:$4 sm:$0xff]  }
 0x1a8   :  { %v4048_v39 = vadd.f32 %v4047_v38, %v4046_v33  ;;  %v4159_v41 = vpop.f32.mrb[63].mxu1  ;;  %2055 = vmatprep.subr.bf16.mxu0 %v4420_v32 }
 0x1a9   :  { %v1137_v42 = vpack.c.bf16 %v1120_v35, %v1119_v34  ;;  %v1046_v43 = vadd.f32 %v4157_v36, %v4045_v31  ;;  %v4160_v44 = vadd.f32 %v4159_v41, %v4158_v37  ;;  %v4418_v31 = vld [vmem:[#allocation5 + $0x10] ss:$8 sps:$4 sm:$0xff]   ;;  %v4423_v37 = vld [vmem:[#allocation7 + $0x14] ss:$8 sps:$4 sm:$0xff]  }
 0x1aa   :  { %v4421_v36 = vld [vmem:[#allocation7 + $0x10] ss:$8 sps:$4 sm:$0xff]   ;;  %2056 = vmatpush1.bf16.msra.mxu0 %v4418_v31 }
 0x1ab   :  { %v1089_v45 = vadd.f32 %v5052_v52, %v1046_v43  ;;  %v1049_v46 = vadd.f32 %v4160_v44, %v4048_v39  ;;  %3870 = vmatmul.mubr.msk.bf16.gmra.mrb[120].mxu0 %vm1199_vm0, %v1137_v42  ;;  %v4426_v42 = vld [vmem:[#allocation5 + $0x24] ss:$8 sps:$4 sm:$0xff]  }
 0x1ac   :  { %1430 = vmatprep.mubr.bf16.mxu0 %v4623_v40  ;;  %2057 = vmatprep.subr.bf16.mxu0 %v4426_v42 }
 0x1ad   :  { %v1090_v47 = vadd.f32 %v5052_v52, %v1049_v46  ;;  %v1121_v48 = vmax.f32 %v1089_v45, 0.0  ;;  %v1147_v52 = vld [vmem:[%s7177_s6] sm:$0x3] }
 0x1ae   :  { %v5173_v59 = vrot.slane %v1147_v52, %v5164_v57  ;;  %v5176_v60 = vrot.slane %v1147_v52, %v5170_v58  ;;  %v4424_v46 = vld [vmem:[#allocation5 + $0x20] ss:$8 sps:$4 sm:$0xff]  }
 0x1af   :  { %v1122_v49 = vmax.f32 %v1090_v47, 0.0  ;;  %v4429_v47 = vld [vmem:[#allocation7 + $0x24] ss:$8 sps:$4 sm:$0xff]   ;;  %2058 = vmatpush1.bf16.msra.mxu0 %v4424_v46 }
 0x1b0   :  { %2059 = vmatprep.subr.bf16.mxu0 %v4432_v53 }
 0x1b1   :  { %v1138_v50 = vpack.c.bf16 %v1122_v49, %v1121_v48 }
 0x1b3   :  { %3871 = vmatmul.mubr.msk.bf16.gmra.mrb[124].mxu0 %vm1199_vm0, %v1138_v50 }
 0x1b4   :  { %2085 = vmatprep.mubr.bf16.mxu0 %v4623_v40 }
 0x20e   :  { %v1282_v61 = vpop.f32.mrb[64].mxu0 }
 0x20f   :  { %v1283_v62 = vadd.f32 %v1282_v61, %v5173_v59  ;;  %v1284_v63 = vpop.f32.mrb[65].mxu0 }
 0x210   :  { %v1285_v0 = vadd.f32 %v1284_v63, %v5176_v60  ;;  %v1286_v1 = vpop.f32.mrb[66].mxu0 }
 0x211   :  { %v1441_v2 = vmax.f32 %v1283_v62, 0.0  ;;  %v1287_v3 = vadd.f32 %v1286_v1, %v5173_v59  ;;  %v1288_v4 = vpop.f32.mrb[67].mxu0  ;;  %v4427_v62 = vld [vmem:[#allocation7 + $0x20] ss:$8 sps:$4 sm:$0xff]   ;;  %v4435_v1 = vld [vmem:[#allocation7 + $0x34] ss:$8 sps:$4 sm:$0xff]  }
 0x212   :  { %v1442_v5 = vmax.f32 %v1285_v0, 0.0  ;;  %v1289_v6 = vadd.f32 %v1288_v4, %v5176_v60 }
 0x213   :  { %v3478_v7 = vmul.f32 %v1441_v2, %v1441_v2  ;;  %v1443_v8 = vmax.f32 %v1287_v3, 0.0 }
 0x214   :  { %v3479_v9 = vmul.f32 %v1442_v5, %v1442_v5  ;;  %v1444_v10 = vmax.f32 %v1289_v6, 0.0 }
 0x215   :  { %v1505_v11 = vpack.c.bf16 %v1443_v8, %v1441_v2  ;;  %v3480_v12 = vmul.f32 %v1443_v8, %v1443_v8  ;;  %v3614_v13 = vadd.f32 %v1443_v8, %v1441_v2 }
 0x216   :  { %v3542_v14 = vadd.f32 %v3479_v9, %v3478_v7  ;;  %v3651_v15 = vadd.f32 %v1444_v10, %v1442_v5  ;;  %v1292_v16 = vpop.f32.mrb[68].mxu0  ;;  %v1506_v17 = vpack.c.bf16 %v1444_v10, %v1442_v5  ;;  %v3481_v22 = vmul.f32 %v1444_v10, %v1444_v10  ;;  %v4430_v7 = vld [vmem:[#allocation5 + $0x30] ss:$8 sps:$4 sm:$0xff]  }
 0x217   :  { %v1293_v19 = vadd.f32 %v1292_v16, %v5173_v59  ;;  %v1294_v20 = vpop.f32.mrb[69].mxu0  ;;  %2060 = vmatpush1.bf16.msra.mxu0 %v4430_v7 }
 0x218   :  { %v3543_v21 = vadd.f32 %v3542_v14, %v3480_v12  ;;  %v1295_v23 = vadd.f32 %v1294_v20, %v5176_v60  ;;  %v1296_v24 = vpop.f32.mrb[70].mxu0  ;;  %1704 = vmatprep.mubr.bf16.mxu1 %v1506_v17  ;;  %v4433_v14 = vld [vmem:[#allocation7 + $0x30] ss:$8 sps:$4 sm:$0xff]  }
 0x219   :  { %v1445_v25 = vmax.f32 %v1293_v19, 0.0  ;;  %v1297_v26 = vadd.f32 %v1296_v24, %v5173_v59  ;;  %v1298_v27 = vpop.f32.mrb[71].mxu0  ;;  %1705 = vmatmul.mubr.bf16.vlgmr.msra.gmra.mrb[64].mxu1 %v1505_v11 }
 0x21a   :  { %v3544_v28 = vadd.f32 %v3543_v21, %v3481_v22  ;;  %v1446_v29 = vmax.f32 %v1295_v23, 0.0  ;;  %v1299_v30 = vadd.f32 %v1298_v27, %v5176_v60  ;;  %2828 = vmatpush1.bf16.msra.mxu1 %v4415_v18 }
 0x21b   :  { %v3482_v33 = vmul.f32 %v1445_v25, %v1445_v25  ;;  %v3615_v34 = vadd.f32 %v3614_v13, %v1445_v25  ;;  %v1447_v35 = vmax.f32 %v1297_v26, 0.0  ;;  %2829 = vmatprep.subr.bf16.mxu1 %v4423_v37 }
 0x21c   :  { %v3483_v38 = vmul.f32 %v1446_v29, %v1446_v29  ;;  %v3652_v39 = vadd.f32 %v3651_v15, %v1446_v29  ;;  %v1448_v41 = vmax.f32 %v1299_v30, 0.0 }
 0x21d   :  { %v3545_v43 = vadd.f32 %v3544_v28, %v3482_v33  ;;  %v3616_v44 = vadd.f32 %v3615_v34, %v1447_v35  ;;  %v1507_v45 = vpack.c.bf16 %v1447_v35, %v1445_v25  ;;  %v3484_v56 = vmul.f32 %v1447_v35, %v1447_v35 }
 0x21e   :  { %v3653_v48 = vadd.f32 %v3652_v39, %v1448_v41  ;;  %v1302_v49 = vpop.f32.mrb[72].mxu0  ;;  %v1508_v50 = vpack.c.bf16 %v1448_v41, %v1446_v29  ;;  %2830 = vmatpush1.bf16.msra.mxu1 %v4421_v36  ;;  %v3485_v3 = vmul.f32 %v1448_v41, %v1448_v41 }
 0x21f   :  { %v3546_v54 = vadd.f32 %v3545_v43, %v3483_v38  ;;  %v1303_v52 = vadd.f32 %v1302_v49, %v5173_v59  ;;  %v1304_v61 = vpop.f32.mrb[73].mxu0  ;;  %2831 = vmatprep.subr.bf16.mxu1 %v4429_v47 }
 0x220   :  { %v1305_v63 = vadd.f32 %v1304_v61, %v5176_v60  ;;  %v1306_v0 = vpop.f32.mrb[74].mxu0  ;;  %1712 = vmatprep.mubr.bf16.mxu1 %v1508_v50 }
 0x221   :  { %v3547_v2 = vadd.f32 %v3546_v54, %v3484_v56  ;;  %v1449_v4 = vmax.f32 %v1303_v52, 0.0  ;;  %v1307_v5 = vadd.f32 %v1306_v0, %v5173_v59  ;;  %v1308_v6 = vpop.f32.mrb[75].mxu0  ;;  %1713 = vmatmul.mubr.bf16.gmra.mrb[68].mxu1 %v1507_v45 }
 0x222   :  { %v1450_v8 = vmax.f32 %v1305_v63, 0.0  ;;  %v1309_v9 = vadd.f32 %v1308_v6, %v5176_v60  ;;  %2832 = vmatpush1.bf16.msra.mxu1 %v4427_v62 }
 0x223   :  { %v3548_v10 = vadd.f32 %v3547_v2, %v3485_v3  ;;  %v3486_v11 = vmul.f32 %v1449_v4, %v1449_v4  ;;  %v3617_v12 = vadd.f32 %v3616_v44, %v1449_v4  ;;  %v1451_v13 = vmax.f32 %v1307_v5, 0.0  ;;  %2833 = vmatprep.subr.bf16.mxu1 %v4435_v1 }
 0x224   :  { %v3487_v15 = vmul.f32 %v1450_v8, %v1450_v8  ;;  %v3654_v16 = vadd.f32 %v3653_v48, %v1450_v8  ;;  %v1452_v17 = vmax.f32 %v1309_v9, 0.0 }
 0x225   :  { %v3549_v18 = vadd.f32 %v3548_v10, %v3486_v11  ;;  %v3618_v19 = vadd.f32 %v3617_v12, %v1451_v13  ;;  %v1509_v20 = vpack.c.bf16 %v1451_v13, %v1449_v4  ;;  %v3488_v25 = vmul.f32 %v1451_v13, %v1451_v13 }
 0x226   :  { %v3655_v21 = vadd.f32 %v3654_v16, %v1452_v17  ;;  %v1312_v22 = vpop.f32.mrb[76].mxu0  ;;  %v1510_v23 = vpack.c.bf16 %v1452_v17, %v1450_v8  ;;  %2834 = vmatpush1.bf16.msra.mxu1 %v4433_v14  ;;  %v3489_v31 = vmul.f32 %v1452_v17, %v1452_v17 }
 0x227   :  { %v3550_v24 = vadd.f32 %v3549_v18, %v3487_v15  ;;  %v1313_v26 = vadd.f32 %v1312_v22, %v5173_v59  ;;  %v1314_v27 = vpop.f32.mrb[77].mxu0 }
 0x228   :  { %v1315_v28 = vadd.f32 %v1314_v27, %v5176_v60  ;;  %v1316_v29 = vpop.f32.mrb[78].mxu0  ;;  %1720 = vmatprep.mubr.bf16.mxu1 %v1510_v23 }
 0x229   :  { %v3551_v30 = vadd.f32 %v3550_v24, %v3488_v25  ;;  %v1453_v32 = vmax.f32 %v1313_v26, 0.0  ;;  %v1317_v33 = vadd.f32 %v1316_v29, %v5173_v59  ;;  %v1318_v34 = vpop.f32.mrb[79].mxu0  ;;  %1721 = vmatmul.mubr.bf16.gmra.mrb[72].mxu1 %v1509_v20 }
 0x22a   :  { %v1454_v35 = vmax.f32 %v1315_v28, 0.0  ;;  %v1319_v36 = vadd.f32 %v1318_v34, %v5176_v60 }
 0x22b   :  { %v3552_v37 = vadd.f32 %v3551_v30, %v3489_v31  ;;  %v3490_v38 = vmul.f32 %v1453_v32, %v1453_v32  ;;  %v3619_v39 = vadd.f32 %v3618_v19, %v1453_v32  ;;  %v1455_v41 = vmax.f32 %v1317_v33, 0.0 }
 0x22c   :  { %v3491_v42 = vmul.f32 %v1454_v35, %v1454_v35  ;;  %v3656_v43 = vadd.f32 %v3655_v21, %v1454_v35  ;;  %v1456_v44 = vmax.f32 %v1319_v36, 0.0 }
 0x22d   :  { %v3553_v45 = vadd.f32 %v3552_v37, %v3490_v38  ;;  %v3620_v46 = vadd.f32 %v3619_v39, %v1455_v41  ;;  %v1511_v47 = vpack.c.bf16 %v1455_v41, %v1453_v32  ;;  %v3492_v54 = vmul.f32 %v1455_v41, %v1455_v41 }
 0x22e   :  { %v3657_v48 = vadd.f32 %v3656_v43, %v1456_v44  ;;  %v1322_v49 = vpop.f32.mrb[80].mxu0  ;;  %v1512_v50 = vpack.c.bf16 %v1456_v44, %v1454_v35  ;;  %v3493_v0 = vmul.f32 %v1456_v44, %v1456_v44 }
 0x22f   :  { %v3554_v53 = vadd.f32 %v3553_v45, %v3491_v42  ;;  %v1323_v56 = vadd.f32 %v1322_v49, %v5173_v59  ;;  %v1324_v52 = vpop.f32.mrb[81].mxu0 }
 0x230   :  { %v1325_v61 = vadd.f32 %v1324_v52, %v5176_v60  ;;  %v1326_v62 = vpop.f32.mrb[82].mxu0  ;;  %1728 = vmatprep.mubr.bf16.mxu1 %v1512_v50 }
 0x231   :  { %v3555_v63 = vadd.f32 %v3554_v53, %v3492_v54  ;;  %v1457_v1 = vmax.f32 %v1323_v56, 0.0  ;;  %v1327_v2 = vadd.f32 %v1326_v62, %v5173_v59  ;;  %v1328_v3 = vpop.f32.mrb[83].mxu0  ;;  %1729 = vmatmul.mubr.bf16.gmra.mrb[76].mxu1 %v1511_v47 }
 0x232   :  { %v1458_v4 = vmax.f32 %v1325_v61, 0.0  ;;  %v1329_v5 = vadd.f32 %v1328_v3, %v5176_v60 }
 0x233   :  { %v3556_v6 = vadd.f32 %v3555_v63, %v3493_v0  ;;  %v3494_v7 = vmul.f32 %v1457_v1, %v1457_v1  ;;  %v3621_v8 = vadd.f32 %v3620_v46, %v1457_v1  ;;  %v1459_v9 = vmax.f32 %v1327_v2, 0.0 }
 0x234   :  { %v3495_v10 = vmul.f32 %v1458_v4, %v1458_v4  ;;  %v3658_v11 = vadd.f32 %v3657_v48, %v1458_v4  ;;  %v1460_v12 = vmax.f32 %v1329_v5, 0.0 }
 0x235   :  { %v3557_v13 = vadd.f32 %v3556_v6, %v3494_v7  ;;  %v3622_v14 = vadd.f32 %v3621_v8, %v1459_v9  ;;  %v1513_v15 = vpack.c.bf16 %v1459_v9, %v1457_v1  ;;  %v3496_v20 = vmul.f32 %v1459_v9, %v1459_v9 }
 0x236   :  { %v3659_v16 = vadd.f32 %v3658_v11, %v1460_v12  ;;  %v1332_v17 = vpop.f32.mrb[84].mxu0  ;;  %v1514_v18 = vpack.c.bf16 %v1460_v12, %v1458_v4  ;;  %v3497_v26 = vmul.f32 %v1460_v12, %v1460_v12 }
 0x237   :  { %v3558_v19 = vadd.f32 %v3557_v13, %v3495_v10  ;;  %v1333_v21 = vadd.f32 %v1332_v17, %v5173_v59  ;;  %v1334_v22 = vpop.f32.mrb[85].mxu0 }
 0x238   :  { %v1335_v23 = vadd.f32 %v1334_v22, %v5176_v60  ;;  %v1336_v24 = vpop.f32.mrb[86].mxu0  ;;  %1736 = vmatprep.mubr.bf16.mxu1 %v1514_v18 }
 0x239   :  { %v3559_v25 = vadd.f32 %v3558_v19, %v3496_v20  ;;  %v1461_v27 = vmax.f32 %v1333_v21, 0.0  ;;  %v1337_v28 = vadd.f32 %v1336_v24, %v5173_v59  ;;  %v1338_v29 = vpop.f32.mrb[87].mxu0  ;;  %1737 = vmatmul.mubr.bf16.gmra.mrb[80].mxu1 %v1513_v15 }
 0x23a   :  { %v1462_v30 = vmax.f32 %v1335_v23, 0.0  ;;  %v1339_v31 = vadd.f32 %v1338_v29, %v5176_v60 }
 0x23b   :  { %v3560_v32 = vadd.f32 %v3559_v25, %v3497_v26  ;;  %v3498_v33 = vmul.f32 %v1461_v27, %v1461_v27  ;;  %v3623_v34 = vadd.f32 %v3622_v14, %v1461_v27  ;;  %v1463_v35 = vmax.f32 %v1337_v28, 0.0 }
 0x23c   :  { %v3499_v36 = vmul.f32 %v1462_v30, %v1462_v30  ;;  %v3660_v37 = vadd.f32 %v3659_v16, %v1462_v30  ;;  %v1464_v38 = vmax.f32 %v1339_v31, 0.0 }
 0x23d   :  { %v3561_v39 = vadd.f32 %v3560_v32, %v3498_v33  ;;  %v3624_v41 = vadd.f32 %v3623_v34, %v1463_v35  ;;  %v1515_v42 = vpack.c.bf16 %v1463_v35, %v1461_v27  ;;  %v3500_v47 = vmul.f32 %v1463_v35, %v1463_v35 }
 0x23e   :  { %v3661_v43 = vadd.f32 %v3660_v37, %v1464_v38  ;;  %v1342_v44 = vpop.f32.mrb[88].mxu0  ;;  %v1516_v45 = vpack.c.bf16 %v1464_v38, %v1462_v30  ;;  %v3501_v56 = vmul.f32 %v1464_v38, %v1464_v38 }
 0x23f   :  { %v3562_v46 = vadd.f32 %v3561_v39, %v3499_v36  ;;  %v1343_v48 = vadd.f32 %v1342_v44, %v5173_v59  ;;  %v1344_v49 = vpop.f32.mrb[89].mxu0 }
 0x240   :  { %v1345_v50 = vadd.f32 %v1344_v49, %v5176_v60  ;;  %v1346_v53 = vpop.f32.mrb[90].mxu0  ;;  %1744 = vmatprep.mubr.bf16.mxu1 %v1516_v45 }
 0x241   :  { %v3563_v54 = vadd.f32 %v3562_v46, %v3500_v47  ;;  %v1465_v52 = vmax.f32 %v1343_v48, 0.0  ;;  %v1347_v61 = vadd.f32 %v1346_v53, %v5173_v59  ;;  %v1348_v62 = vpop.f32.mrb[91].mxu0  ;;  %1745 = vmatmul.mubr.bf16.gmra.mrb[84].mxu1 %v1515_v42 }
 0x242   :  { %v1466_v63 = vmax.f32 %v1345_v50, 0.0  ;;  %v1349_v0 = vadd.f32 %v1348_v62, %v5176_v60 }
 0x243   :  { %v3564_v1 = vadd.f32 %v3563_v54, %v3501_v56  ;;  %v3502_v2 = vmul.f32 %v1465_v52, %v1465_v52  ;;  %v3625_v3 = vadd.f32 %v3624_v41, %v1465_v52  ;;  %v1467_v4 = vmax.f32 %v1347_v61, 0.0 }
 0x244   :  { %v3503_v5 = vmul.f32 %v1466_v63, %v1466_v63  ;;  %v3662_v6 = vadd.f32 %v3661_v43, %v1466_v63  ;;  %v1468_v7 = vmax.f32 %v1349_v0, 0.0 }
 0x245   :  { %v3565_v8 = vadd.f32 %v3564_v1, %v3502_v2  ;;  %v3626_v9 = vadd.f32 %v3625_v3, %v1467_v4  ;;  %v1517_v10 = vpack.c.bf16 %v1467_v4, %v1465_v52  ;;  %v3504_v15 = vmul.f32 %v1467_v4, %v1467_v4 }
 0x246   :  { %v3663_v11 = vadd.f32 %v3662_v6, %v1468_v7  ;;  %v1352_v12 = vpop.f32.mrb[92].mxu0  ;;  %v1518_v13 = vpack.c.bf16 %v1468_v7, %v1466_v63  ;;  %v3505_v21 = vmul.f32 %v1468_v7, %v1468_v7 }
 0x247   :  { %v3566_v14 = vadd.f32 %v3565_v8, %v3503_v5  ;;  %v1353_v16 = vadd.f32 %v1352_v12, %v5173_v59  ;;  %v1354_v17 = vpop.f32.mrb[93].mxu0 }
 0x248   :  { %v1355_v18 = vadd.f32 %v1354_v17, %v5176_v60  ;;  %v1356_v19 = vpop.f32.mrb[94].mxu0  ;;  %1752 = vmatprep.mubr.bf16.mxu1 %v1518_v13 }
 0x249   :  { %v3567_v20 = vadd.f32 %v3566_v14, %v3504_v15  ;;  %v1469_v22 = vmax.f32 %v1353_v16, 0.0  ;;  %v1357_v23 = vadd.f32 %v1356_v19, %v5173_v59  ;;  %v1358_v24 = vpop.f32.mrb[95].mxu0  ;;  %1753 = vmatmul.mubr.bf16.gmra.mrb[88].mxu1 %v1517_v10 }
 0x24a   :  { %v1470_v25 = vmax.f32 %v1355_v18, 0.0  ;;  %v1359_v26 = vadd.f32 %v1358_v24, %v5176_v60 }
 0x24b   :  { %v3568_v27 = vadd.f32 %v3567_v20, %v3505_v21  ;;  %v3506_v28 = vmul.f32 %v1469_v22, %v1469_v22  ;;  %v3627_v29 = vadd.f32 %v3626_v9, %v1469_v22  ;;  %v1471_v30 = vmax.f32 %v1357_v23, 0.0 }
 0x24c   :  { %v3507_v31 = vmul.f32 %v1470_v25, %v1470_v25  ;;  %v3664_v32 = vadd.f32 %v3663_v11, %v1470_v25  ;;  %v1472_v33 = vmax.f32 %v1359_v26, 0.0 }
 0x24d   :  { %v3569_v34 = vadd.f32 %v3568_v27, %v3506_v28  ;;  %v3628_v35 = vadd.f32 %v3627_v29, %v1471_v30  ;;  %v1519_v36 = vpack.c.bf16 %v1471_v30, %v1469_v22  ;;  %v3508_v42 = vmul.f32 %v1471_v30, %v1471_v30 }
 0x24e   :  { %v3665_v37 = vadd.f32 %v3664_v32, %v1472_v33  ;;  %v1362_v38 = vpop.f32.mrb[96].mxu0  ;;  %v1520_v39 = vpack.c.bf16 %v1472_v33, %v1470_v25  ;;  %v3509_v48 = vmul.f32 %v1472_v33, %v1472_v33 }
 0x24f   :  { %v3570_v41 = vadd.f32 %v3569_v34, %v3507_v31  ;;  %v1363_v43 = vadd.f32 %v1362_v38, %v5173_v59  ;;  %v1364_v44 = vpop.f32.mrb[97].mxu0 }
 0x250   :  { %v1365_v45 = vadd.f32 %v1364_v44, %v5176_v60  ;;  %v1366_v46 = vpop.f32.mrb[98].mxu0  ;;  %1760 = vmatprep.mubr.bf16.mxu1 %v1520_v39 }
 0x251   :  { %v3571_v47 = vadd.f32 %v3570_v41, %v3508_v42  ;;  %v1473_v49 = vmax.f32 %v1363_v43, 0.0  ;;  %v1367_v50 = vadd.f32 %v1366_v46, %v5173_v59  ;;  %v1368_v53 = vpop.f32.mrb[99].mxu0  ;;  %1761 = vmatmul.mubr.bf16.gmra.mrb[92].mxu1 %v1519_v36 }
 0x252   :  { %v1474_v54 = vmax.f32 %v1365_v45, 0.0  ;;  %v1369_v56 = vadd.f32 %v1368_v53, %v5176_v60 }
 0x253   :  { %v3572_v52 = vadd.f32 %v3571_v47, %v3509_v48  ;;  %v3510_v61 = vmul.f32 %v1473_v49, %v1473_v49  ;;  %v3629_v62 = vadd.f32 %v3628_v35, %v1473_v49  ;;  %v1475_v63 = vmax.f32 %v1367_v50, 0.0 }
 0x254   :  { %v3511_v0 = vmul.f32 %v1474_v54, %v1474_v54  ;;  %v3666_v1 = vadd.f32 %v3665_v37, %v1474_v54  ;;  %v1476_v2 = vmax.f32 %v1369_v56, 0.0 }
 0x255   :  { %v3573_v3 = vadd.f32 %v3572_v52, %v3510_v61  ;;  %v3630_v4 = vadd.f32 %v3629_v62, %v1475_v63  ;;  %v1521_v5 = vpack.c.bf16 %v1475_v63, %v1473_v49  ;;  %v3512_v10 = vmul.f32 %v1475_v63, %v1475_v63 }
 0x256   :  { %v3667_v6 = vadd.f32 %v3666_v1, %v1476_v2  ;;  %v1372_v7 = vpop.f32.mrb[100].mxu0  ;;  %v1522_v8 = vpack.c.bf16 %v1476_v2, %v1474_v54  ;;  %v3513_v16 = vmul.f32 %v1476_v2, %v1476_v2 }
 0x257   :  { %v3574_v9 = vadd.f32 %v3573_v3, %v3511_v0  ;;  %v1373_v11 = vadd.f32 %v1372_v7, %v5173_v59  ;;  %v1374_v12 = vpop.f32.mrb[101].mxu0 }
 0x258   :  { %v1375_v13 = vadd.f32 %v1374_v12, %v5176_v60  ;;  %v1376_v14 = vpop.f32.mrb[102].mxu0  ;;  %1768 = vmatprep.mubr.bf16.mxu1 %v1522_v8 }
 0x259   :  { %v3575_v15 = vadd.f32 %v3574_v9, %v3512_v10  ;;  %v1477_v17 = vmax.f32 %v1373_v11, 0.0  ;;  %v1377_v18 = vadd.f32 %v1376_v14, %v5173_v59  ;;  %v1378_v19 = vpop.f32.mrb[103].mxu0  ;;  %1769 = vmatmul.mubr.bf16.gmra.mrb[96].mxu1 %v1521_v5 }
 0x25a   :  { %v1478_v20 = vmax.f32 %v1375_v13, 0.0  ;;  %v1379_v21 = vadd.f32 %v1378_v19, %v5176_v60 }
 0x25b   :  { %v3576_v22 = vadd.f32 %v3575_v15, %v3513_v16  ;;  %v3514_v23 = vmul.f32 %v1477_v17, %v1477_v17  ;;  %v3631_v24 = vadd.f32 %v3630_v4, %v1477_v17  ;;  %v1479_v25 = vmax.f32 %v1377_v18, 0.0 }
 0x25c   :  { %v3515_v26 = vmul.f32 %v1478_v20, %v1478_v20  ;;  %v3668_v27 = vadd.f32 %v3667_v6, %v1478_v20  ;;  %v1480_v28 = vmax.f32 %v1379_v21, 0.0 }
 0x25d   :  { %v3577_v29 = vadd.f32 %v3576_v22, %v3514_v23  ;;  %v3632_v30 = vadd.f32 %v3631_v24, %v1479_v25  ;;  %v1523_v31 = vpack.c.bf16 %v1479_v25, %v1477_v17  ;;  %v3516_v36 = vmul.f32 %v1479_v25, %v1479_v25 }
 0x25e   :  { %v3669_v32 = vadd.f32 %v3668_v27, %v1480_v28  ;;  %v1382_v33 = vpop.f32.mrb[104].mxu0  ;;  %v1524_v34 = vpack.c.bf16 %v1480_v28, %v1478_v20  ;;  %v3517_v43 = vmul.f32 %v1480_v28, %v1480_v28 }
 0x25f   :  { %v3578_v35 = vadd.f32 %v3577_v29, %v3515_v26  ;;  %v1383_v37 = vadd.f32 %v1382_v33, %v5173_v59  ;;  %v1384_v38 = vpop.f32.mrb[105].mxu0 }
 0x260   :  { %v1385_v39 = vadd.f32 %v1384_v38, %v5176_v60  ;;  %v1386_v41 = vpop.f32.mrb[106].mxu0  ;;  %1776 = vmatprep.mubr.bf16.mxu1 %v1524_v34 }
 0x261   :  { %v3579_v42 = vadd.f32 %v3578_v35, %v3516_v36  ;;  %v1481_v44 = vmax.f32 %v1383_v37, 0.0  ;;  %v1387_v45 = vadd.f32 %v1386_v41, %v5173_v59  ;;  %v1388_v46 = vpop.f32.mrb[107].mxu0  ;;  %1777 = vmatmul.mubr.bf16.gmra.mrb[100].mxu1 %v1523_v31 }
 0x262   :  { %v1482_v47 = vmax.f32 %v1385_v39, 0.0  ;;  %v1389_v48 = vadd.f32 %v1388_v46, %v5176_v60 }
 0x263   :  { %v3580_v49 = vadd.f32 %v3579_v42, %v3517_v43  ;;  %v3518_v50 = vmul.f32 %v1481_v44, %v1481_v44  ;;  %v3633_v53 = vadd.f32 %v3632_v30, %v1481_v44  ;;  %v1483_v54 = vmax.f32 %v1387_v45, 0.0 }
 0x264   :  { %v3519_v56 = vmul.f32 %v1482_v47, %v1482_v47  ;;  %v3670_v52 = vadd.f32 %v3669_v32, %v1482_v47  ;;  %v1484_v61 = vmax.f32 %v1389_v48, 0.0 }
 0x265   :  { %v3581_v62 = vadd.f32 %v3580_v49, %v3518_v50  ;;  %v3634_v63 = vadd.f32 %v3633_v53, %v1483_v54  ;;  %v1525_v0 = vpack.c.bf16 %v1483_v54, %v1481_v44  ;;  %v3520_v5 = vmul.f32 %v1483_v54, %v1483_v54 }
 0x266   :  { %v3671_v1 = vadd.f32 %v3670_v52, %v1484_v61  ;;  %v1392_v2 = vpop.f32.mrb[108].mxu0  ;;  %v1526_v3 = vpack.c.bf16 %v1484_v61, %v1482_v47  ;;  %v3521_v11 = vmul.f32 %v1484_v61, %v1484_v61 }
 0x267   :  { %v3582_v4 = vadd.f32 %v3581_v62, %v3519_v56  ;;  %v1393_v6 = vadd.f32 %v1392_v2, %v5173_v59  ;;  %v1394_v7 = vpop.f32.mrb[109].mxu0 }
 0x268   :  { %v1395_v8 = vadd.f32 %v1394_v7, %v5176_v60  ;;  %v1396_v9 = vpop.f32.mrb[110].mxu0  ;;  %1784 = vmatprep.mubr.bf16.mxu1 %v1526_v3 }
 0x269   :  { %v3583_v10 = vadd.f32 %v3582_v4, %v3520_v5  ;;  %v1485_v12 = vmax.f32 %v1393_v6, 0.0  ;;  %v1397_v13 = vadd.f32 %v1396_v9, %v5173_v59  ;;  %v1398_v14 = vpop.f32.mrb[111].mxu0  ;;  %1785 = vmatmul.mubr.bf16.gmra.mrb[104].mxu1 %v1525_v0 }
 0x26a   :  { %v1486_v15 = vmax.f32 %v1395_v8, 0.0  ;;  %v1399_v16 = vadd.f32 %v1398_v14, %v5176_v60 }
 0x26b   :  { %v3584_v17 = vadd.f32 %v3583_v10, %v3521_v11  ;;  %v3522_v18 = vmul.f32 %v1485_v12, %v1485_v12  ;;  %v3635_v19 = vadd.f32 %v3634_v63, %v1485_v12  ;;  %v1487_v20 = vmax.f32 %v1397_v13, 0.0 }
 0x26c   :  { %v3523_v21 = vmul.f32 %v1486_v15, %v1486_v15  ;;  %v3672_v22 = vadd.f32 %v3671_v1, %v1486_v15  ;;  %v1488_v23 = vmax.f32 %v1399_v16, 0.0 }
 0x26d   :  { %v3585_v24 = vadd.f32 %v3584_v17, %v3522_v18  ;;  %v3636_v25 = vadd.f32 %v3635_v19, %v1487_v20  ;;  %v1527_v26 = vpack.c.bf16 %v1487_v20, %v1485_v12  ;;  %v3524_v31 = vmul.f32 %v1487_v20, %v1487_v20 }
 0x26e   :  { %v3673_v27 = vadd.f32 %v3672_v22, %v1488_v23  ;;  %v1402_v28 = vpop.f32.mrb[112].mxu0  ;;  %v1528_v29 = vpack.c.bf16 %v1488_v23, %v1486_v15  ;;  %v3525_v37 = vmul.f32 %v1488_v23, %v1488_v23 }
 0x26f   :  { %v3586_v30 = vadd.f32 %v3585_v24, %v3523_v21  ;;  %v1403_v32 = vadd.f32 %v1402_v28, %v5173_v59  ;;  %v1404_v33 = vpop.f32.mrb[113].mxu0 }
 0x270   :  { %v1405_v34 = vadd.f32 %v1404_v33, %v5176_v60  ;;  %v1406_v35 = vpop.f32.mrb[114].mxu0  ;;  %1792 = vmatprep.mubr.bf16.mxu1 %v1528_v29 }
 0x271   :  { %v3587_v36 = vadd.f32 %v3586_v30, %v3524_v31  ;;  %v1489_v38 = vmax.f32 %v1403_v32, 0.0  ;;  %v1407_v39 = vadd.f32 %v1406_v35, %v5173_v59  ;;  %v1408_v41 = vpop.f32.mrb[115].mxu0  ;;  %1793 = vmatmul.mubr.bf16.gmra.mrb[108].mxu1 %v1527_v26 }
 0x272   :  { %v1490_v42 = vmax.f32 %v1405_v34, 0.0  ;;  %v1409_v43 = vadd.f32 %v1408_v41, %v5176_v60 }
 0x273   :  { %v3588_v44 = vadd.f32 %v3587_v36, %v3525_v37  ;;  %v3526_v45 = vmul.f32 %v1489_v38, %v1489_v38  ;;  %v3637_v46 = vadd.f32 %v3636_v25, %v1489_v38  ;;  %v1491_v47 = vmax.f32 %v1407_v39, 0.0 }
 0x274   :  { %v3527_v48 = vmul.f32 %v1490_v42, %v1490_v42  ;;  %v3674_v49 = vadd.f32 %v3673_v27, %v1490_v42  ;;  %v1492_v50 = vmax.f32 %v1409_v43, 0.0 }
 0x275   :  { %v3589_v53 = vadd.f32 %v3588_v44, %v3526_v45  ;;  %v3638_v54 = vadd.f32 %v3637_v46, %v1491_v47  ;;  %v1529_v56 = vpack.c.bf16 %v1491_v47, %v1489_v38  ;;  %v3528_v0 = vmul.f32 %v1491_v47, %v1491_v47 }
 0x276   :  { %v3675_v52 = vadd.f32 %v3674_v49, %v1492_v50  ;;  %v1412_v61 = vpop.f32.mrb[116].mxu0  ;;  %v1530_v62 = vpack.c.bf16 %v1492_v50, %v1490_v42  ;;  %v3529_v6 = vmul.f32 %v1492_v50, %v1492_v50 }
 0x277   :  { %v3590_v63 = vadd.f32 %v3589_v53, %v3527_v48  ;;  %v1413_v1 = vadd.f32 %v1412_v61, %v5173_v59  ;;  %v1414_v2 = vpop.f32.mrb[117].mxu0 }
 0x278   :  { %v1415_v3 = vadd.f32 %v1414_v2, %v5176_v60  ;;  %v1416_v4 = vpop.f32.mrb[118].mxu0  ;;  %1800 = vmatprep.mubr.bf16.mxu1 %v1530_v62 }
 0x279   :  { %v3591_v5 = vadd.f32 %v3590_v63, %v3528_v0  ;;  %v1493_v7 = vmax.f32 %v1413_v1, 0.0  ;;  %v1417_v8 = vadd.f32 %v1416_v4, %v5173_v59  ;;  %v1418_v9 = vpop.f32.mrb[119].mxu0  ;;  %1801 = vmatmul.mubr.bf16.gmra.mrb[112].mxu1 %v1529_v56 }
 0x27a   :  { %v1494_v10 = vmax.f32 %v1415_v3, 0.0  ;;  %v1419_v11 = vadd.f32 %v1418_v9, %v5176_v60 }
 0x27b   :  { %v3592_v12 = vadd.f32 %v3591_v5, %v3529_v6  ;;  %v3530_v13 = vmul.f32 %v1493_v7, %v1493_v7  ;;  %v3639_v14 = vadd.f32 %v3638_v54, %v1493_v7  ;;  %v1495_v15 = vmax.f32 %v1417_v8, 0.0 }
 0x27c   :  { %v3531_v16 = vmul.f32 %v1494_v10, %v1494_v10  ;;  %v3676_v17 = vadd.f32 %v3675_v52, %v1494_v10  ;;  %v1496_v18 = vmax.f32 %v1419_v11, 0.0 }
 0x27d   :  { %v3593_v19 = vadd.f32 %v3592_v12, %v3530_v13  ;;  %v3640_v20 = vadd.f32 %v3639_v14, %v1495_v15  ;;  %v1531_v21 = vpack.c.bf16 %v1495_v15, %v1493_v7  ;;  %v3532_v26 = vmul.f32 %v1495_v15, %v1495_v15 }
 0x27e   :  { %v3677_v22 = vadd.f32 %v3676_v17, %v1496_v18  ;;  %v1422_v23 = vpop.f32.mrb[120].mxu0  ;;  %v1532_v24 = vpack.c.bf16 %v1496_v18, %v1494_v10  ;;  %v3533_v32 = vmul.f32 %v1496_v18, %v1496_v18 }
 0x27f   :  { %v3594_v25 = vadd.f32 %v3593_v19, %v3531_v16  ;;  %v1423_v27 = vadd.f32 %v1422_v23, %v5173_v59  ;;  %v1424_v28 = vpop.f32.mrb[121].mxu0 }
 0x280   :  { %v1425_v29 = vadd.f32 %v1424_v28, %v5176_v60  ;;  %v1426_v30 = vpop.f32.mrb[122].mxu0  ;;  %1808 = vmatprep.mubr.bf16.mxu1 %v1532_v24 }
 0x281   :  { %v3595_v31 = vadd.f32 %v3594_v25, %v3532_v26  ;;  %v1497_v33 = vmax.f32 %v1423_v27, 0.0  ;;  %v1427_v34 = vadd.f32 %v1426_v30, %v5173_v59  ;;  %v1428_v35 = vpop.f32.mrb[123].mxu0  ;;  %1809 = vmatmul.mubr.bf16.gmra.mrb[116].mxu1 %v1531_v21  ;;  %v4624_v25 = vmov 1966171168  }
 0x282   :  { %v1498_v36 = vmax.f32 %v1425_v29, 0.0  ;;  %v1429_v37 = vadd.f32 %v1428_v35, %v5176_v60  ;;  %v3692_v26 = vunpack.c.l.s4 %v4624_v25 }
 0x283   :  { %v3596_v38 = vadd.f32 %v3595_v31, %v3533_v32  ;;  %v3534_v39 = vmul.f32 %v1497_v33, %v1497_v33  ;;  %v3641_v41 = vadd.f32 %v3640_v20, %v1497_v33  ;;  %v1499_v42 = vmax.f32 %v1427_v34, 0.0 }
 0x284   :  { %v3535_v43 = vmul.f32 %v1498_v36, %v1498_v36  ;;  %v3678_v44 = vadd.f32 %v3677_v22, %v1498_v36  ;;  %v1500_v45 = vmax.f32 %v1429_v37, 0.0  ;;  %v3693_v32 = vunpack.c.0.s8 %v3692_v26 }
 0x285   :  { %v3597_v46 = vadd.f32 %v3596_v38, %v3534_v39  ;;  %v3642_v47 = vadd.f32 %v3641_v41, %v1499_v42  ;;  %v1533_v48 = vpack.c.bf16 %v1499_v42, %v1497_v33  ;;  %v3536_v56 = vmul.f32 %v1499_v42, %v1499_v42 }
 0x286   :  { %v3679_v49 = vadd.f32 %v3678_v44, %v1500_v45  ;;  %v1432_v50 = vpop.f32.mrb[124].mxu0  ;;  %v1534_v53 = vpack.c.bf16 %v1500_v45, %v1498_v36  ;;  %v3537_v1 = vmul.f32 %v1500_v45, %v1500_v45  ;;  %v3696_v37 = vsub.s32 %v3693_v32, %v5161_v55 }
 0x287   :  { %v3598_v54 = vadd.f32 %v3597_v46, %v3535_v43  ;;  %v1433_v52 = vadd.f32 %v1432_v50, %v5173_v59  ;;  %v1434_v61 = vpop.f32.mrb[125].mxu0  ;;  %v5248_v43 = vld [vmem:[%s7179_s8] ss:$0 sm:$0xff] }
 0x288   :  { %v1435_v62 = vadd.f32 %v1434_v61, %v5176_v60  ;;  %v1436_v63 = vpop.f32.mrb[126].mxu0  ;;  %1816 = vmatprep.mubr.bf16.mxu1 %v1534_v53 }
 0x289   :  { %v3599_v0 = vadd.f32 %v3598_v54, %v3536_v56  ;;  %v1501_v2 = vmax.f32 %v1433_v52, 0.0  ;;  %v1437_v3 = vadd.f32 %v1436_v63, %v5173_v59  ;;  %v1438_v4 = vpop.f32.mrb[127].mxu0  ;;  %1817 = vmatmul.mubr.bf16.gmra.mrb[120].mxu1 %v1533_v48 }
 0x28a   :  { %v1502_v5 = vmax.f32 %v1435_v62, 0.0  ;;  %v1439_v6 = vadd.f32 %v1438_v4, %v5176_v60 }
 0x28b   :  { %v3600_v7 = vadd.f32 %v3599_v0, %v3537_v1  ;;  %v3538_v8 = vmul.f32 %v1501_v2, %v1501_v2  ;;  %v3643_v9 = vadd.f32 %v3642_v47, %v1501_v2  ;;  %v1503_v10 = vmax.f32 %v1437_v3, 0.0 }
 0x28c   :  { %v3539_v11 = vmul.f32 %v1502_v5, %v1502_v5  ;;  %v3680_v12 = vadd.f32 %v3679_v49, %v1502_v5  ;;  %v1504_v13 = vmax.f32 %v1439_v6, 0.0 }
 0x28d   :  { %v3644_v14 = vadd.f32 %v3643_v9, %v1503_v10  ;;  %v1535_v15 = vpack.c.bf16 %v1503_v10, %v1501_v2  ;;  %v3601_v16 = vadd.f32 %v3600_v7, %v3538_v8  ;;  %v3540_v20 = vmul.f32 %v1503_v10, %v1503_v10 }
 0x28e   :  { %v3681_v17 = vadd.f32 %v3680_v12, %v1504_v13  ;;  %v1536_v18 = vpack.c.bf16 %v1504_v13, %v1502_v5  ;;  %v3541_v60 = vmul.f32 %v1504_v13, %v1504_v13 }
 0x28f   :  { %v3645_v19 = vrot.slane %v3644_v14, 4  ;;  %v3602_v59 = vadd.f32 %v3601_v16, %v3539_v11 }
 0x290   :  { %v3682_v21 = vrot.slane %v3681_v17, 4  ;;  %1824 = vmatprep.mubr.bf16.mxu1 %v1536_v18 }
 0x291   :  { %v3646_v22 = vadd.f32 %v3645_v19, %v3644_v14  ;;  %1825 = vmatmul.mubr.bf16.gmra.mrb[124].mxu1 %v1535_v15  ;;  %v3603_v23 = vadd.f32 %v3602_v59, %v3540_v20 }
 0x292   :  { %v3683_v24 = vadd.f32 %v3682_v21, %v3681_v17  ;;  %2859 = vmatprep.mubr.bf16.mxu1 %v4623_v40 }
 0x293   :  { %v3647_v27 = vrot.slane %v3646_v22, 2  ;;  %v3604_v28 = vadd.f32 %v3603_v23, %v3541_v60 }
 0x294   :  { %v3684_v29 = vrot.slane %v3683_v24, 2 }
 0x295   :  { %v3648_v30 = vadd.f32 %v3647_v27, %v3646_v22  ;;  %3605 = vadd.xlane.f32.xlu1 %v3604_v28 }
 0x296   :  { %v3685_v31 = vadd.f32 %v3684_v29, %v3683_v24 }
 0x297   :  { %v3649_v33 = vrot.slane %v3648_v30, 1 }
 0x298   :  { %v3686_v34 = vrot.slane %v3685_v31, 1 }
 0x299   :  { %v3650_v35 = vadd.f32 %v3649_v33, %v3648_v30 }
 0x29a   :  { %v3687_v36 = vadd.f32 %v3686_v34, %v3685_v31 }
 0x29c   :  { %v3690_v38 = vcombine.low %v3650_v35, %v3687_v36 }
 0x29e   :  { %v3697_v39 = vrot.slane %v3690_v38, %v3696_v37 }
 0x2a0   :  { %v3704_v41 = vrot.slane %v3697_v39, %v3696_v37 }
 0x2a2   :  { %3710 = vst.msk [vmem:[#allocation8] sm:$0x3] %vm3708_vm1, %v3704_v41 }
 0x2ec   :  { %v4177_v42 = vpop.f32.mrb[64].mxu1 }
 0x2ed   :  { %v4178_v44 = vpop.f32.mrb[65].mxu1 }
 0x2ee   :  { %v4179_v45 = vadd.f32 %v4178_v44, %v4177_v42  ;;  %v4180_v46 = vpop.f32.mrb[66].mxu1 }
 0x2ef   :  { %v4181_v47 = vpop.f32.mrb[67].mxu1 }
 0x2f0   :  { %v1707_v48 = vadd.f32 %v4179_v45, %v5248_v43  ;;  %v4182_v49 = vadd.f32 %v4181_v47, %v4180_v46 }
 0x2f2   :  { %v1710_v55 = vadd.f32 %v4182_v49, %v5248_v43  ;;  %v1833_v50 = vmax.f32 %v1707_v48, 0.0 }
 0x2f4   :  { %v1834_v53 = vmax.f32 %v1710_v55, 0.0  ;;  %v4183_v54 = vpop.f32.mrb[68].mxu1 }
 0x2f5   :  { %v4184_v56 = vpop.f32.mrb[69].mxu1 }
 0x2f6   :  { %v1865_v52 = vpack.c.bf16 %v1834_v53, %v1833_v50  ;;  %v4185_v61 = vadd.f32 %v4184_v56, %v4183_v54  ;;  %v4186_v62 = vpop.f32.mrb[70].mxu1 }
 0x2f7   :  { %v4187_v63 = vpop.f32.mrb[71].mxu1 }
 0x2f8   :  { %v1715_v0 = vadd.f32 %v4185_v61, %v5248_v43  ;;  %v4188_v1 = vadd.f32 %v4187_v63, %v4186_v62  ;;  %3897 = vmatmul.mubr.msk.bf16.vlgmr.msra.gmra.mrb[128].mxu0 %vm1199_vm0, %v1865_v52  ;;  %3921 = vmatmul.mubr.msk.bf16.vlgmr.msra.gmra.mrb[128].mxu1 %vm1199_vm0, %v1865_v52 }
 0x2f9   :  { %2095 = vmatprep.mubr.bf16.mxu0 %v4623_v40  ;;  %2869 = vmatprep.mubr.bf16.mxu1 %v4623_v40 }
 0x2fa   :  { %v1718_v2 = vadd.f32 %v4188_v1, %v5248_v43  ;;  %v1835_v3 = vmax.f32 %v1715_v0, 0.0 }
 0x2fc   :  { %v1836_v4 = vmax.f32 %v1718_v2, 0.0  ;;  %v4189_v5 = vpop.f32.mrb[72].mxu1 }
 0x2fd   :  { %v4190_v6 = vpop.f32.mrb[73].mxu1 }
 0x2fe   :  { %v1866_v7 = vpack.c.bf16 %v1836_v4, %v1835_v3  ;;  %v4191_v8 = vadd.f32 %v4190_v6, %v4189_v5  ;;  %v4192_v9 = vpop.f32.mrb[74].mxu1 }
 0x2ff   :  { %v4193_v10 = vpop.f32.mrb[75].mxu1 }
 0x300   :  { %v1723_v11 = vadd.f32 %v4191_v8, %v5248_v43  ;;  %v4194_v12 = vadd.f32 %v4193_v10, %v4192_v9  ;;  %3898 = vmatmul.mubr.msk.bf16.gmra.mrb[132].mxu0 %vm1199_vm0, %v1866_v7  ;;  %3922 = vmatmul.mubr.msk.bf16.gmra.mrb[132].mxu1 %vm1199_vm0, %v1866_v7 }
 0x301   :  { %2105 = vmatprep.mubr.bf16.mxu0 %v4623_v40  ;;  %2879 = vmatprep.mubr.bf16.mxu1 %v4623_v40 }
 0x302   :  { %v1726_v13 = vadd.f32 %v4194_v12, %v5248_v43  ;;  %v1837_v14 = vmax.f32 %v1723_v11, 0.0 }
 0x304   :  { %v1838_v15 = vmax.f32 %v1726_v13, 0.0  ;;  %v4195_v16 = vpop.f32.mrb[76].mxu1 }
 0x305   :  { %v4196_v17 = vpop.f32.mrb[77].mxu1 }
 0x306   :  { %v1867_v18 = vpack.c.bf16 %v1838_v15, %v1837_v14  ;;  %v4197_v19 = vadd.f32 %v4196_v17, %v4195_v16  ;;  %v4198_v20 = vpop.f32.mrb[78].mxu1 }
 0x307   :  { %v4199_v59 = vpop.f32.mrb[79].mxu1 }
 0x308   :  { %v1731_v21 = vadd.f32 %v4197_v19, %v5248_v43  ;;  %v4200_v22 = vadd.f32 %v4199_v59, %v4198_v20  ;;  %3899 = vmatmul.mubr.msk.bf16.gmra.mrb[136].mxu0 %vm1199_vm0, %v1867_v18  ;;  %3923 = vmatmul.mubr.msk.bf16.gmra.mrb[136].mxu1 %vm1199_vm0, %v1867_v18 }
 0x309   :  { %2115 = vmatprep.mubr.bf16.mxu0 %v4623_v40  ;;  %2889 = vmatprep.mubr.bf16.mxu1 %v4623_v40 }
 0x30a   :  { %v1734_v60 = vadd.f32 %v4200_v22, %v5248_v43  ;;  %v1839_v23 = vmax.f32 %v1731_v21, 0.0 }
 0x30c   :  { %v1840_v24 = vmax.f32 %v1734_v60, 0.0  ;;  %v4201_v25 = vpop.f32.mrb[80].mxu1 }
 0x30d   :  { %v4202_v26 = vpop.f32.mrb[81].mxu1 }
 0x30e   :  { %v1868_v27 = vpack.c.bf16 %v1840_v24, %v1839_v23  ;;  %v4203_v28 = vadd.f32 %v4202_v26, %v4201_v25  ;;  %v4204_v29 = vpop.f32.mrb[82].mxu1 }
 0x30f   :  { %v4205_v30 = vpop.f32.mrb[83].mxu1 }
 0x310   :  { %v1739_v31 = vadd.f32 %v4203_v28, %v5248_v43  ;;  %v4206_v32 = vadd.f32 %v4205_v30, %v4204_v29  ;;  %3900 = vmatmul.mubr.msk.bf16.gmra.mrb[140].mxu0 %vm1199_vm0, %v1868_v27  ;;  %3924 = vmatmul.mubr.msk.bf16.gmra.mrb[140].mxu1 %vm1199_vm0, %v1868_v27 }
 0x311   :  { %2125 = vmatprep.mubr.bf16.mxu0 %v4623_v40  ;;  %2899 = vmatprep.mubr.bf16.mxu1 %v4623_v40 }
 0x312   :  { %v1742_v33 = vadd.f32 %v4206_v32, %v5248_v43  ;;  %v1841_v34 = vmax.f32 %v1739_v31, 0.0 }
 0x314   :  { %v1842_v35 = vmax.f32 %v1742_v33, 0.0  ;;  %v4207_v36 = vpop.f32.mrb[84].mxu1 }
 0x315   :  { %v4208_v37 = vpop.f32.mrb[85].mxu1 }
 0x316   :  { %v1869_v38 = vpack.c.bf16 %v1842_v35, %v1841_v34  ;;  %v4209_v39 = vadd.f32 %v4208_v37, %v4207_v36  ;;  %v4210_v41 = vpop.f32.mrb[86].mxu1 }
 0x317   :  { %v4211_v42 = vpop.f32.mrb[87].mxu1 }
 0x318   :  { %v1747_v44 = vadd.f32 %v4209_v39, %v5248_v43  ;;  %v4212_v45 = vadd.f32 %v4211_v42, %v4210_v41  ;;  %3901 = vmatmul.mubr.msk.bf16.gmra.mrb[144].mxu0 %vm1199_vm0, %v1869_v38  ;;  %3925 = vmatmul.mubr.msk.bf16.gmra.mrb[144].mxu1 %vm1199_vm0, %v1869_v38 }
 0x319   :  { %2135 = vmatprep.mubr.bf16.mxu0 %v4623_v40  ;;  %2909 = vmatprep.mubr.bf16.mxu1 %v4623_v40 }
 0x31a   :  { %v1750_v46 = vadd.f32 %v4212_v45, %v5248_v43  ;;  %v1843_v47 = vmax.f32 %v1747_v44, 0.0 }
 0x31c   :  { %v1844_v48 = vmax.f32 %v1750_v46, 0.0  ;;  %v4213_v49 = vpop.f32.mrb[88].mxu1 }
 0x31d   :  { %v4214_v55 = vpop.f32.mrb[89].mxu1 }
 0x31e   :  { %v1870_v50 = vpack.c.bf16 %v1844_v48, %v1843_v47  ;;  %v4215_v53 = vadd.f32 %v4214_v55, %v4213_v49  ;;  %v4216_v54 = vpop.f32.mrb[90].mxu1 }
 0x31f   :  { %v4217_v56 = vpop.f32.mrb[91].mxu1 }
 0x320   :  { %v1755_v52 = vadd.f32 %v4215_v53, %v5248_v43  ;;  %v4218_v61 = vadd.f32 %v4217_v56, %v4216_v54  ;;  %3902 = vmatmul.mubr.msk.bf16.gmra.mrb[148].mxu0 %vm1199_vm0, %v1870_v50  ;;  %3926 = vmatmul.mubr.msk.bf16.gmra.mrb[148].mxu1 %vm1199_vm0, %v1870_v50 }
 0x321   :  { %2145 = vmatprep.mubr.bf16.mxu0 %v4623_v40  ;;  %2919 = vmatprep.mubr.bf16.mxu1 %v4623_v40 }
 0x322   :  { %v1758_v62 = vadd.f32 %v4218_v61, %v5248_v43  ;;  %v1845_v63 = vmax.f32 %v1755_v52, 0.0 }
 0x324   :  { %v1846_v0 = vmax.f32 %v1758_v62, 0.0  ;;  %v4219_v1 = vpop.f32.mrb[92].mxu1 }
 0x325   :  { %v4220_v2 = vpop.f32.mrb[93].mxu1 }
 0x326   :  { %v1871_v3 = vpack.c.bf16 %v1846_v0, %v1845_v63  ;;  %v4221_v4 = vadd.f32 %v4220_v2, %v4219_v1  ;;  %v4222_v5 = vpop.f32.mrb[94].mxu1 }
 0x327   :  { %v4223_v6 = vpop.f32.mrb[95].mxu1 }
 0x328   :  { %v1763_v7 = vadd.f32 %v4221_v4, %v5248_v43  ;;  %v4224_v8 = vadd.f32 %v4223_v6, %v4222_v5  ;;  %3903 = vmatmul.mubr.msk.bf16.gmra.mrb[152].mxu0 %vm1199_vm0, %v1871_v3  ;;  %3927 = vmatmul.mubr.msk.bf16.gmra.mrb[152].mxu1 %vm1199_vm0, %v1871_v3 }
 0x329   :  { %2155 = vmatprep.mubr.bf16.mxu0 %v4623_v40  ;;  %2929 = vmatprep.mubr.bf16.mxu1 %v4623_v40 }
 0x32a   :  { %v1766_v9 = vadd.f32 %v4224_v8, %v5248_v43  ;;  %v1847_v10 = vmax.f32 %v1763_v7, 0.0 }
 0x32c   :  { %v1848_v11 = vmax.f32 %v1766_v9, 0.0  ;;  %v4225_v12 = vpop.f32.mrb[96].mxu1 }
 0x32d   :  { %v4226_v13 = vpop.f32.mrb[97].mxu1 }
 0x32e   :  { %v1872_v14 = vpack.c.bf16 %v1848_v11, %v1847_v10  ;;  %v4227_v15 = vadd.f32 %v4226_v13, %v4225_v12  ;;  %v4228_v16 = vpop.f32.mrb[98].mxu1 }
 0x32f   :  { %v4229_v17 = vpop.f32.mrb[99].mxu1 }
 0x330   :  { %v1771_v18 = vadd.f32 %v4227_v15, %v5248_v43  ;;  %v4230_v19 = vadd.f32 %v4229_v17, %v4228_v16  ;;  %3904 = vmatmul.mubr.msk.bf16.gmra.mrb[156].mxu0 %vm1199_vm0, %v1872_v14  ;;  %3928 = vmatmul.mubr.msk.bf16.gmra.mrb[156].mxu1 %vm1199_vm0, %v1872_v14 }
 0x331   :  { %2165 = vmatprep.mubr.bf16.mxu0 %v4623_v40  ;;  %2939 = vmatprep.mubr.bf16.mxu1 %v4623_v40 }
 0x332   :  { %v1774_v20 = vadd.f32 %v4230_v19, %v5248_v43  ;;  %v1849_v59 = vmax.f32 %v1771_v18, 0.0 }
 0x334   :  { %v1850_v21 = vmax.f32 %v1774_v20, 0.0  ;;  %v4231_v22 = vpop.f32.mrb[100].mxu1 }
 0x335   :  { %v4232_v60 = vpop.f32.mrb[101].mxu1 }
 0x336   :  { %v1873_v23 = vpack.c.bf16 %v1850_v21, %v1849_v59  ;;  %v4233_v24 = vadd.f32 %v4232_v60, %v4231_v22  ;;  %v4234_v25 = vpop.f32.mrb[102].mxu1 }
 0x337   :  { %v4235_v26 = vpop.f32.mrb[103].mxu1 }
 0x338   :  { %v1779_v27 = vadd.f32 %v4233_v24, %v5248_v43  ;;  %v4236_v28 = vadd.f32 %v4235_v26, %v4234_v25  ;;  %3905 = vmatmul.mubr.msk.bf16.gmra.mrb[160].mxu0 %vm1199_vm0, %v1873_v23  ;;  %3929 = vmatmul.mubr.msk.bf16.gmra.mrb[160].mxu1 %vm1199_vm0, %v1873_v23 }
 0x339   :  { %2175 = vmatprep.mubr.bf16.mxu0 %v4623_v40  ;;  %2949 = vmatprep.mubr.bf16.mxu1 %v4623_v40 }
 0x33a   :  { %v1782_v29 = vadd.f32 %v4236_v28, %v5248_v43  ;;  %v1851_v30 = vmax.f32 %v1779_v27, 0.0 }
 0x33c   :  { %v1852_v31 = vmax.f32 %v1782_v29, 0.0  ;;  %v4237_v32 = vpop.f32.mrb[104].mxu1 }
 0x33d   :  { %v4238_v33 = vpop.f32.mrb[105].mxu1 }
 0x33e   :  { %v1874_v34 = vpack.c.bf16 %v1852_v31, %v1851_v30  ;;  %v4239_v35 = vadd.f32 %v4238_v33, %v4237_v32  ;;  %v4240_v36 = vpop.f32.mrb[106].mxu1 }
 0x33f   :  { %v4241_v37 = vpop.f32.mrb[107].mxu1 }
 0x340   :  { %v1787_v38 = vadd.f32 %v4239_v35, %v5248_v43  ;;  %v4242_v39 = vadd.f32 %v4241_v37, %v4240_v36  ;;  %3906 = vmatmul.mubr.msk.bf16.gmra.mrb[164].mxu0 %vm1199_vm0, %v1874_v34  ;;  %3930 = vmatmul.mubr.msk.bf16.gmra.mrb[164].mxu1 %vm1199_vm0, %v1874_v34 }
 0x341   :  { %2185 = vmatprep.mubr.bf16.mxu0 %v4623_v40  ;;  %2959 = vmatprep.mubr.bf16.mxu1 %v4623_v40 }
 0x342   :  { %v1790_v41 = vadd.f32 %v4242_v39, %v5248_v43  ;;  %v1853_v42 = vmax.f32 %v1787_v38, 0.0 }
 0x344   :  { %v1854_v44 = vmax.f32 %v1790_v41, 0.0  ;;  %v4243_v45 = vpop.f32.mrb[108].mxu1  ;;  %v1953_v41 = vld [vmem:[%s7182_s11] sm:$0x3] }
 0x345   :  { %v4244_v46 = vpop.f32.mrb[109].mxu1 }
 0x346   :  { %v1875_v47 = vpack.c.bf16 %v1854_v44, %v1853_v42  ;;  %v4245_v48 = vadd.f32 %v4244_v46, %v4243_v45  ;;  %v4246_v49 = vpop.f32.mrb[110].mxu1  ;;  %v2775_v42 = vld [vmem:[%s7183_s12] sm:$0x3]  ;;  %v5357_v44 = vrot.slane %v1953_v41, %v5164_v57  ;;  %v5363_v46 = vrot.slane %v1953_v41, %v5170_v58  ;;  %v5547_v41 = vld [vmem:[%s7171_s0 + $0x68] sm:$0xff] }
 0x347   :  { %v4247_v55 = vpop.f32.mrb[111].mxu1  ;;  %v5360_v45 = vrot.slane %v2775_v42, %v5164_v57  ;;  %v5379_v57 = vld [vmem:[%s7171_s0 + $0x8] sm:$0xff]  ;;  %7236 = vst [vmem:[#allocation21_spill] sm:$0xff] %v5547_v41 }
 0x348   :  { %v1795_v50 = vadd.f32 %v4245_v48, %v5248_v43  ;;  %v4248_v53 = vadd.f32 %v4247_v55, %v4246_v49  ;;  %3907 = vmatmul.mubr.msk.bf16.gmra.mrb[168].mxu0 %vm1199_vm0, %v1875_v47  ;;  %3931 = vmatmul.mubr.msk.bf16.gmra.mrb[168].mxu1 %vm1199_vm0, %v1875_v47  ;;  %v5368_v47 = vld [vmem:[%s7172_s1] sm:$0xff] }
 0x349   :  { %2195 = vmatprep.mubr.bf16.mxu0 %v4623_v40  ;;  %2969 = vmatprep.mubr.bf16.mxu1 %v4623_v40  ;;  %v7189_v48 = vunpack.c.l.bf16 %v5368_v47  ;;  %v7187_v55 = vunpack.c.h.bf16 %v5368_v47 }
 0x34a   :  { %v1798_v54 = vadd.f32 %v4248_v53, %v5248_v43  ;;  %v1855_v56 = vmax.f32 %v1795_v50, 0.0  ;;  %v5374_v50 = vrot.slane %v2775_v42, %v5170_v58  ;;  %v7190_v53 = vunpack.c.l.bf16 %v5379_v57  ;;  %v5393_v58 = vld [vmem:[%s7171_s0 + $0x10] sm:$0xff]  ;;  %v5533_v42 = vld [vmem:[%s7171_s0 + $0x60] sm:$0xff] }
 0x34b   :  { %7234 = vst [vmem:[#allocation19_spill] sm:$0xff] %v5533_v42  ;;  %vm5608_vm3 = vcmp.ne.f32.partialorder %v7189_v48, 0.0  ;;  %vm5636_vm5 = vcmp.ne.f32.partialorder %v7187_v55, 0.0 }
 0x34c   :  { %v1856_v52 = vmax.f32 %v1798_v54, 0.0  ;;  %v4249_v61 = vpop.f32.mrb[112].mxu1  ;;  %v5385_v54 = vld [vmem:[%s7172_s1 + $0x8] sm:$0xff]  ;;  %vm5656_vm6 = vcmp.ne.f32.partialorder %v7190_v53, 0.0 }
 0x34d   :  { %v4250_v62 = vpop.f32.mrb[113].mxu1 }
 0x34e   :  { %v1876_v63 = vpack.c.bf16 %v1856_v52, %v1855_v56  ;;  %v4251_v0 = vadd.f32 %v4250_v62, %v4249_v61  ;;  %v4252_v1 = vpop.f32.mrb[114].mxu1  ;;  %v7192_v56 = vunpack.c.l.bf16 %v5385_v54  ;;  %v7197_v52 = vunpack.c.h.bf16 %v5379_v57 }
 0x34f   :  { %v4253_v2 = vpop.f32.mrb[115].mxu1 }
 0x350   :  { %v1803_v3 = vadd.f32 %v4251_v0, %v5248_v43  ;;  %v4254_v4 = vadd.f32 %v4253_v2, %v4252_v1  ;;  %3908 = vmatmul.mubr.msk.bf16.gmra.mrb[172].mxu0 %vm1199_vm0, %v1876_v63  ;;  %3932 = vmatmul.mubr.msk.bf16.gmra.mrb[172].mxu1 %vm1199_vm0, %v1876_v63  ;;  %v5399_v63 = vld [vmem:[%s7172_s1 + $0x10] sm:$0xff]  ;;  %vm5662_vm7 = vcmp.ne.f32.partialorder %v7192_v56, 0.0  ;;  %vm5672_vm8 = vcmp.ne.f32.partialorder %v7197_v52, 0.0 }
 0x351   :  { %2205 = vmatprep.mubr.bf16.mxu0 %v4623_v40  ;;  %2979 = vmatprep.mubr.bf16.mxu1 %v4623_v40  ;;  %v7266_v52 = vunpack.c.l.bf16 %v5368_v47 }
 0x352   :  { %v1806_v5 = vadd.f32 %v4254_v4, %v5248_v43  ;;  %v1857_v6 = vmax.f32 %v1803_v3, 0.0  ;;  %v5407_v3 = vld [vmem:[%s7171_s0 + $0x18] sm:$0xff] }
 0x354   :  { %v1858_v7 = vmax.f32 %v1806_v5, 0.0  ;;  %v4255_v8 = vpop.f32.mrb[116].mxu1  ;;  %v5413_v5 = vld [vmem:[%s7172_s1 + $0x18] sm:$0xff] }
 0x355   :  { %v4256_v9 = vpop.f32.mrb[117].mxu1 }
 0x356   :  { %v1877_v10 = vpack.c.bf16 %v1858_v7, %v1857_v6  ;;  %v4257_v11 = vadd.f32 %v4256_v9, %v4255_v8  ;;  %v4258_v12 = vpop.f32.mrb[118].mxu1  ;;  %v5421_v9 = vld [vmem:[%s7171_s0 + $0x20] sm:$0xff] }
 0x357   :  { %v4259_v13 = vpop.f32.mrb[119].mxu1 }
 0x358   :  { %v1811_v14 = vadd.f32 %v4257_v11, %v5248_v43  ;;  %v4260_v15 = vadd.f32 %v4259_v13, %v4258_v12  ;;  %3909 = vmatmul.mubr.msk.bf16.gmra.mrb[176].mxu0 %vm1199_vm0, %v1877_v10  ;;  %3933 = vmatmul.mubr.msk.bf16.gmra.mrb[176].mxu1 %vm1199_vm0, %v1877_v10  ;;  %v5427_v11 = vld [vmem:[%s7172_s1 + $0x20] sm:$0xff]  ;;  %v5649_v10 = vld [vmem:[%s7172_s1 + $0x90] sm:$0xff] }
 0x359   :  { %2215 = vmatprep.mubr.bf16.mxu0 %v4623_v40  ;;  %2989 = vmatprep.mubr.bf16.mxu1 %v4623_v40  ;;  %7255 = vst [vmem:[#allocation32_spill] sm:$0xff] %v5649_v10 }
 0x35a   :  { %v1814_v16 = vadd.f32 %v4260_v15, %v5248_v43  ;;  %v1859_v17 = vmax.f32 %v1811_v14, 0.0  ;;  %v5435_v15 = vld [vmem:[%s7171_s0 + $0x28] sm:$0xff] }
 0x35c   :  { %v1860_v18 = vmax.f32 %v1814_v16, 0.0  ;;  %v4261_v19 = vpop.f32.mrb[120].mxu1 }
 0x35d   :  { %v4262_v20 = vpop.f32.mrb[121].mxu1 }
 0x35e   :  { %v1878_v59 = vpack.c.bf16 %v1860_v18, %v1859_v17  ;;  %v4263_v21 = vadd.f32 %v4262_v20, %v4261_v19  ;;  %v4264_v22 = vpop.f32.mrb[122].mxu1  ;;  %v5441_v17 = vld [vmem:[%s7172_s1 + $0x28] sm:$0xff] }
 0x35f   :  { %v4265_v60 = vpop.f32.mrb[123].mxu1  ;;  %v5615_v20 = vld [vmem:[%s7171_s0 + $0x88] sm:$0xff] }
 0x360   :  { %v1819_v23 = vadd.f32 %v4263_v21, %v5248_v43  ;;  %v4266_v24 = vadd.f32 %v4265_v60, %v4264_v22  ;;  %3910 = vmatmul.mubr.msk.bf16.gmra.mrb[180].mxu0 %vm1199_vm0, %v1878_v59  ;;  %3934 = vmatmul.mubr.msk.bf16.gmra.mrb[180].mxu1 %vm1199_vm0, %v1878_v59  ;;  %v5449_v59 = vld [vmem:[%s7171_s0 + $0x30] sm:$0xff]  ;;  %v5595_v21 = vld [vmem:[%s7172_s1 + $0x80] sm:$0xff]  ;;  %7248 = vst [vmem:[#allocation29_spill] sm:$0xff] %v5615_v20  ;;  %v5621_v18 = vld [vmem:[%s7172_s1 + $0x88] sm:$0xff]  ;;  %v7276_v60 = vunpack.c.l.bf16 %v5399_v63 }
 0x361   :  { %2225 = vmatprep.mubr.bf16.mxu0 %v4623_v40  ;;  %2999 = vmatprep.mubr.bf16.mxu1 %v4623_v40  ;;  %v5455_v22 = vld [vmem:[%s7172_s1 + $0x30] sm:$0xff]  ;;  %7243 = vst [vmem:[#allocation28_spill] sm:$0xff] %v5595_v21  ;;  %7249 = vst [vmem:[#allocation30_spill] sm:$0xff] %v5621_v18  ;;  %v7262_v18 = vunpack.c.h.bf16 %v5385_v54 }
 0x362   :  { %v1822_v25 = vadd.f32 %v4266_v24, %v5248_v43  ;;  %v1861_v26 = vmax.f32 %v1819_v23, 0.0  ;;  %v5581_v23 = vld [vmem:[%s7172_s1 + $0x78] sm:$0xff]  ;;  %vm5720_vm11 = vcmp.ne.f32.partialorder %v7276_v60, 0.0 }
 0x363   :  { %7241 = vst [vmem:[#allocation26_spill] sm:$0xff] %v5581_v23  ;;  %vm5678_vm9 = vcmp.ne.f32.partialorder %v7262_v18, 0.0  ;;  %v7268_v23 = vunpack.c.h.bf16 %v5368_v47 }
 0x364   :  { %v1862_v27 = vmax.f32 %v1822_v25, 0.0  ;;  %v4267_v28 = vpop.f32.mrb[124].mxu1  ;;  %v5463_v25 = vld [vmem:[%s7171_s0 + $0x38] sm:$0xff] }
 0x365   :  { %v4268_v29 = vpop.f32.mrb[125].mxu1 }
 0x366   :  { %v1879_v30 = vpack.c.bf16 %v1862_v27, %v1861_v26  ;;  %v4269_v31 = vadd.f32 %v4268_v29, %v4267_v28  ;;  %v4270_v32 = vpop.f32.mrb[126].mxu1  ;;  %v5469_v27 = vld [vmem:[%s7172_s1 + $0x38] sm:$0xff]  ;;  %v5553_v29 = vld [vmem:[%s7172_s1 + $0x68] sm:$0xff]  ;;  %v5567_v26 = vld [vmem:[%s7172_s1 + $0x70] sm:$0xff] }
 0x367   :  { %v4271_v33 = vpop.f32.mrb[127].mxu1  ;;  %7237 = vst [vmem:[#allocation22_spill] sm:$0xff] %v5553_v29  ;;  %7239 = vst [vmem:[#allocation24_spill] sm:$0xff] %v5567_v26  ;;  %v5589_v28 = vld [vmem:[%s7171_s0 + $0x80] sm:$0xff] }
 0x368   :  { %v1827_v34 = vadd.f32 %v4269_v31, %v5248_v43  ;;  %v4272_v35 = vadd.f32 %v4271_v33, %v4270_v32  ;;  %3911 = vmatmul.mubr.msk.bf16.gmra.mrb[184].mxu0 %vm1199_vm0, %v1879_v30  ;;  %3935 = vmatmul.mubr.msk.bf16.gmra.mrb[184].mxu1 %vm1199_vm0, %v1879_v30  ;;  %v5477_v31 = vld [vmem:[%s7171_s0 + $0x40] sm:$0xff]  ;;  %v5575_v30 = vld [vmem:[%s7171_s0 + $0x78] sm:$0xff]  ;;  %7242 = vst [vmem:[#allocation27_spill] sm:$0xff] %v5589_v28 }
 0x369   :  { %2235 = vmatprep.mubr.bf16.mxu0 %v4623_v40  ;;  %3009 = vmatprep.mubr.bf16.mxu1 %v4623_v40  ;;  %v5353_v40 = vld [vmem:[%s7171_s0] sm:$0xff]  ;;  %7240 = vst [vmem:[#allocation25_spill] sm:$0xff] %v5575_v30 }
 0x36a   :  { %v1830_v36 = vadd.f32 %v4272_v35, %v5248_v43  ;;  %v1863_v37 = vmax.f32 %v1827_v34, 0.0  ;;  %v7191_v43 = vunpack.c.l.bf16 %v5353_v40  ;;  %v7188_v49 = vunpack.c.h.bf16 %v5353_v40  ;;  %v5483_v33 = vld [vmem:[%s7172_s1 + $0x40] sm:$0xff]  ;;  %v5525_v35 = vld [vmem:[%s7172_s1 + $0x58] sm:$0xff]  ;;  %v5561_v34 = vld [vmem:[%s7171_s0 + $0x70] sm:$0xff] }
 0x36b   :  { %7233 = vst [vmem:[#allocation18_spill] sm:$0xff] %v5525_v35  ;;  %v5539_v32 = vld [vmem:[%s7172_s1 + $0x60] sm:$0xff]  ;;  %7238 = vst [vmem:[#allocation23_spill] sm:$0xff] %v5561_v34  ;;  %v7267_v28 = vunpack.c.h.bf16 %v5353_v40  ;;  %v7303_v35 = vunpack.c.h.bf16 %v5407_v3 }
 0x36c   :  { %v1864_v38 = vmax.f32 %v1830_v36, 0.0  ;;  %v5505_v36 = vld [vmem:[%s7171_s0 + $0x50] sm:$0xff]  ;;  %7235 = vst [vmem:[#allocation20_spill] sm:$0xff] %v5539_v32  ;;  %vm5602_vm2 = vcmp.ne.f32.partialorder %v7191_v43, 0.0  ;;  %vm5630_vm4 = vcmp.ne.f32.partialorder %v7188_v49, 0.0 }
 0x36d   :  { %7230 = vst [vmem:[#allocation15_spill] sm:$0xff] %v5505_v36 }
 0x36e   :  { %v1880_v39 = vpack.c.bf16 %v1864_v38, %v1863_v37  ;;  %v5491_v37 = vld [vmem:[%s7171_s0 + $0x48] sm:$0xff]  ;;  %v5511_v38 = vld [vmem:[%s7172_s1 + $0x50] sm:$0xff] }
 0x36f   :  { %7231 = vst [vmem:[#allocation16_spill] sm:$0xff] %v5511_v38 }
 0x370   :  { %3912 = vmatmul.mubr.msk.bf16.gmra.mrb[188].mxu0 %vm1199_vm0, %v1880_v39  ;;  %3936 = vmatmul.mubr.msk.bf16.gmra.mrb[188].mxu1 %vm1199_vm0, %v1880_v39  ;;  %v5497_v39 = vld [vmem:[%s7172_s1 + $0x48] sm:$0xff] }
 0x3cb   :  { %v2087_v16 = vpop.f32.mrb[128].mxu0  ;;  %v2861_v14 = vpop.f32.mrb[128].mxu1 }
 0x3cc   :  { %v2088_v8 = vadd.f32 %v2087_v16, %v5357_v44  ;;  %v2862_v7 = vadd.f32 %v2861_v14, %v5360_v45  ;;  %v2089_v6 = vpop.f32.mrb[129].mxu0  ;;  %v2863_v4 = vpop.f32.mrb[129].mxu1  ;;  %v5643_v16 = vld [vmem:[%s7171_s0 + $0x90] sm:$0xff] }
 0x3cd   :  { %7254 = vst [vmem:[#allocation31_spill] sm:$0xff] %v5643_v16  ;;  %v2090_v2 = vadd.f32 %v2089_v6, %v5363_v46  ;;  %v2864_v1 = vadd.f32 %v2863_v4, %v5374_v50  ;;  %v2091_v0 = vpop.f32.mrb[130].mxu0  ;;  %v2865_v55 = vpop.f32.mrb[130].mxu1  ;;  %v7265_v6 = vunpack.c.l.bf16 %v5353_v40  ;;  %v7272_v40 = vunpack.c.h.bf16 %v5385_v54 }
 0x3ce   :  { %v2246_v49 = vmax.f32 %v2088_v8, 0.0  ;;  %v3020_v4 = vmax.f32 %v2862_v7, 0.0  ;;  %v2092_v48 = vadd.f32 %v2091_v0, %v5357_v44  ;;  %v2866_v53 = vadd.f32 %v2865_v55, %v5360_v45  ;;  %v2093_v43 = vpop.f32.mrb[131].mxu0  ;;  %v2867_v56 = vpop.f32.mrb[131].mxu1 }
 0x3cf   :  { %v2247_v8 = vmax.f32 %v2090_v2, 0.0  ;;  %v3021_v7 = vmax.f32 %v2864_v1, 0.0  ;;  %v2094_v0 = vadd.f32 %v2093_v43, %v5363_v46  ;;  %v2868_v55 = vadd.f32 %v2867_v56, %v5374_v50 }
 0x3d0   :  { %v2310_v10 = vsub.f32 %v7265_v6, %v2246_v49  ;;  %v3084_v16 = vsub.f32 %v7266_v52, %v3020_v4  ;;  %v2248_v20 = vmax.f32 %v2092_v48, 0.0  ;;  %v3022_v21 = vmax.f32 %v2866_v53, 0.0 }
 0x3d1   :  { %v2311_v18 = vsub.f32 %v7267_v28, %v2247_v8  ;;  %v3085_v30 = vsub.f32 %v7268_v23, %v3021_v7  ;;  %v2249_v2 = vmax.f32 %v2094_v0, 0.0  ;;  %v3023_v1 = vmax.f32 %v2868_v55, 0.0 }
 0x3d2   :  { %v2374_v26 = vmul.f32 %v2310_v10, %v2310_v10  ;;  %v3148_v43 = vmul.f32 %v3084_v16, %v3084_v16  ;;  %v7269_v56 = vunpack.c.l.bf16 %v5379_v57  ;;  %v7270_v49 = vunpack.c.l.bf16 %v5385_v54 }
 0x3d3   :  { %v2375_v29 = vmul.f32 %v2311_v18, %v2311_v18  ;;  %v3149_v52 = vmul.f32 %v3085_v30, %v3085_v30  ;;  %v7271_v48 = vunpack.c.h.bf16 %v5379_v57  ;;  %v3087_v28 = vsub.f32 %v7272_v40, %v3023_v1  ;;  %v2097_v47 = vpop.f32.mrb[132].mxu0  ;;  %v2871_v23 = vpop.f32.mrb[132].mxu1 }
 0x3d4   :  { %v2312_v34 = vsub.f32 %v7269_v56, %v2248_v20  ;;  %v3086_v6 = vsub.f32 %v7270_v49, %v3022_v21  ;;  %v2502_v4 = vmul.f32 25.0, %v2374_v26  ;;  %v3276_v8 = vmul.f32 25.0, %v3148_v43  ;;  %v2099_v7 = vpop.f32.mrb[133].mxu0  ;;  %v2873_v0 = vpop.f32.mrb[133].mxu1 }
 0x3d5   :  { %v2313_v53 = vsub.f32 %v7271_v48, %v2249_v2  ;;  %v2503_v20 = vmul.f32 25.0, %v2375_v29  ;;  %v3277_v55 = vmul.f32 25.0, %v3149_v52  ;;  %v3151_v21 = vmul.f32 %v3087_v28, %v3087_v28  ;;  %v2101_v18 = vpop.f32.mrb[134].mxu0  ;;  %v2875_v30 = vpop.f32.mrb[134].mxu1 }
 0x3d6   :  { %v2376_v10 = vmul.f32 %v2312_v34, %v2312_v34  ;;  %v3150_v16 = vmul.f32 %v3086_v6, %v3086_v6  ;;  %v2566_v57 = vsel %vm5602_vm2, %v2502_v4, %v2374_v26  ;;  %v3340_v54 = vsel %vm5608_vm3, %v3276_v8, %v3148_v43  ;;  %v2103_v49 = vpop.f32.mrb[135].mxu0  ;;  %v2877_v48 = vpop.f32.mrb[135].mxu1 }
 0x3d7   :  { %v2377_v56 = vmul.f32 %v2313_v53, %v2313_v53  ;;  %v2567_v34 = vsel %vm5630_vm4, %v2503_v20, %v2375_v29  ;;  %v3341_v6 = vsel %vm5636_vm5, %v3277_v55, %v3149_v52  ;;  %v3279_v40 = vmul.f32 25.0, %v3151_v21 }
 0x3d8   :  { %v2504_v2 = vmul.f32 25.0, %v2376_v10  ;;  %v3278_v1 = vmul.f32 25.0, %v3150_v16  ;;  %v2630_v28 = vadd.f32 %v2567_v34, %v2566_v57  ;;  %v3404_v41 = vadd.f32 %v3341_v6, %v3340_v54 }
 0x3d9   :  { %v2505_v53 = vmul.f32 25.0, %v2377_v56  ;;  %v7273_v26 = vunpack.c.l.bf16 %v5393_v58  ;;  %v3343_v62 = vsel %vm5678_vm9, %v3279_v40, %v3151_v21  ;;  %v2098_v14 = vadd.f32 %v2097_v47, %v5357_v44 }
 0x3da   :  { %v2568_v24 = vsel %vm5656_vm6, %v2504_v2, %v2376_v10  ;;  %v3342_v19 = vsel %vm5662_vm7, %v3278_v1, %v3150_v16  ;;  %v2872_v52 = vadd.f32 %v2871_v23, %v5360_v45  ;;  %v7279_v4 = vunpack.c.h.bf16 %v5393_v58 }
 0x3db   :  { %vm5714_vm10 = vcmp.ne.f32.partialorder %v7273_v26, 0.0  ;;  %v2569_v29 = vsel %vm5672_vm8, %v2505_v53, %v2377_v56  ;;  %v7282_v10 = vunpack.c.h.bf16 %v5399_v63  ;;  %v2631_v61 = vadd.f32 %v2630_v28, %v2568_v24  ;;  %v2107_v2 = vpop.f32.mrb[136].mxu0 }
 0x3dc   :  { %vm5732_vm12 = vcmp.ne.f32.partialorder %v7279_v4, 0.0  ;;  %v3405_v20 = vadd.f32 %v3404_v41, %v3342_v19  ;;  %v2100_v12 = vadd.f32 %v2099_v7, %v5363_v46  ;;  %v2874_v47 = vadd.f32 %v2873_v0, %v5374_v50  ;;  %v2881_v0 = vpop.f32.mrb[136].mxu1  ;;  %v2109_v40 = vpop.f32.mrb[137].mxu0 }
 0x3dd   :  { %vm5738_vm13 = vcmp.ne.f32.partialorder %v7282_v10, 0.0  ;;  %v7285_v23 = vunpack.c.l.bf16 %v5407_v3  ;;  %v7288_v56 = vunpack.c.l.bf16 %v5413_v5  ;;  %v2250_v57 = vmax.f32 %v2098_v14, 0.0  ;;  %v2883_v28 = vpop.f32.mrb[137].mxu1  ;;  %v5762_v4 = vpop.f32.mrb[138].mxu0 }
 0x3de   :  { %v3024_v54 = vmax.f32 %v2872_v52, 0.0  ;;  %v2102_v41 = vadd.f32 %v2101_v18, %v5357_v44  ;;  %v2876_v7 = vadd.f32 %v2875_v30, %v5360_v45  ;;  %v2632_v1 = vadd.f32 %v2631_v61, %v2569_v29  ;;  %v5764_v18 = vpop.f32.mrb[138].mxu1 }
 0x3df   :  { %vm5746_vm14 = vcmp.ne.f32.partialorder %v7285_v23, 0.0  ;;  %vm5752_vm15 = vcmp.ne.f32.partialorder %v7288_v56, 0.0  ;;  %v3406_v34 = vadd.f32 %v3405_v20, %v3343_v62  ;;  %v2251_v6 = vmax.f32 %v2100_v12, 0.0  ;;  %v5786_v63 = vpop.f32.mrb[139].mxu1 }
 0x3e0   :  { %v3025_v53 = vmax.f32 %v2874_v47, 0.0  ;;  %v7291_v24 = vmov %v7273_v26  ;;  %v7292_v26 = vmov %v7276_v60  ;;  %v2252_v14 = vmax.f32 %v2102_v41, 0.0 }
 0x3e1   :  { %v2314_v19 = vsub.f32 %v7291_v24, %v2250_v57  ;;  %v3088_v60 = vsub.f32 %v7292_v26, %v3024_v54  ;;  %v3026_v52 = vmax.f32 %v2876_v7, 0.0  ;;  %v7293_v30 = vunpack.c.h.bf16 %v5393_v58  ;;  %v5784_v58 = vpop.f32.mrb[139].mxu0 }
 0x3e2   :  { %v7294_v62 = vmov %v7282_v10  ;;  %v2104_v61 = vadd.f32 %v2103_v49, %v5363_v46  ;;  %v7295_v20 = vunpack.c.h.bf16 %v5407_v3  ;;  %v2878_v47 = vadd.f32 %v2877_v48, %v5374_v50 }
 0x3e3   :  { %v2315_v29 = vsub.f32 %v7293_v30, %v2251_v6  ;;  %v3089_v10 = vsub.f32 %v7294_v62, %v3025_v53  ;;  %v7298_v23 = vunpack.c.h.bf16 %v5413_v5  ;;  %v2378_v57 = vmul.f32 %v2314_v19, %v2314_v19 }
 0x3e4   :  { %vm5773_vm0 = vcmp.ne.f32.partialorder %v7295_v20, 0.0  ;;  %v3152_v49 = vmul.f32 %v3088_v60, %v3088_v60  ;;  %v7301_v54 = vunpack.c.l.bf16 %v5407_v3  ;;  %v7302_v7 = vunpack.c.l.bf16 %v5413_v5 }
 0x3e5   :  { %vm5780_vm1 = vcmp.ne.f32.partialorder %v7298_v23, 0.0  ;;  %v2379_v53 = vmul.f32 %v2315_v29, %v2315_v29  ;;  %v3153_v48 = vmul.f32 %v3089_v10, %v3089_v10  ;;  %v2253_v24 = vmax.f32 %v2104_v61, 0.0  ;;  %v5800_v61 = vpop.f32.mrb[140].mxu0 }
 0x3e6   :  { %v2316_v41 = vsub.f32 %v7301_v54, %v2252_v14  ;;  %v3090_v6 = vsub.f32 %v7302_v7, %v3026_v52  ;;  %v3027_v26 = vmax.f32 %v2878_v47, 0.0  ;;  %v2506_v30 = vmul.f32 25.0, %v2378_v57  ;;  %v5802_v47 = vpop.f32.mrb[140].mxu1 }
 0x3e7   :  { %v3280_v62 = vmul.f32 25.0, %v3152_v49  ;;  %v2507_v32 = vmul.f32 25.0, %v2379_v53  ;;  %v3281_v42 = vmul.f32 25.0, %v3153_v48  ;;  %v2317_v19 = vsub.f32 %v7303_v35, %v2253_v24  ;;  %v5808_v35 = vpop.f32.mrb[141].mxu0  ;;  %v5810_v43 = vpop.f32.mrb[141].mxu1 }
 0x3e8   :  { %v2380_v20 = vmul.f32 %v2316_v41, %v2316_v41  ;;  %v3154_v23 = vmul.f32 %v3090_v6, %v3090_v6  ;;  %v7304_v60 = vunpack.c.h.bf16 %v5413_v5  ;;  %v2570_v14 = vsel %vm5714_vm10, %v2506_v30, %v2378_v57  ;;  %v5828_v16 = vpop.f32.mrb[142].mxu0  ;;  %v5830_v55 = vpop.f32.mrb[142].mxu1 }
 0x3e9   :  { %v3344_v52 = vsel %vm5720_vm11, %v3280_v62, %v3152_v49  ;;  %v2633_v54 = vadd.f32 %v2632_v1, %v2570_v14  ;;  %v2571_v3 = vsel %vm5732_vm12, %v2507_v32, %v2379_v53  ;;  %v3345_v5 = vsel %vm5738_vm13, %v3281_v42, %v3153_v48  ;;  %v5846_v30 = vpop.f32.mrb[143].mxu0  ;;  %v5848_v62 = vpop.f32.mrb[143].mxu1 }
 0x3ea   :  { %v3091_v51 = vsub.f32 %v7304_v60, %v3027_v26  ;;  %v2508_v29 = vmul.f32 25.0, %v2380_v20  ;;  %v3282_v10 = vmul.f32 25.0, %v3154_v23  ;;  %v3407_v41 = vadd.f32 %v3406_v34, %v3344_v52 }
 0x3eb   :  { %v2381_v49 = vmul.f32 %v2317_v19, %v2317_v19  ;;  %v7305_v1 = vunpack.c.l.bf16 %v5421_v9  ;;  %v7308_v32 = vunpack.c.l.bf16 %v5427_v11  ;;  %v2634_v21 = vadd.f32 %v2633_v54, %v2571_v3 }
 0x3ec   :  { %v2572_v13 = vsel %vm5746_vm14, %v2508_v29, %v2380_v20  ;;  %v3346_v57 = vsel %vm5752_vm15, %v3282_v10, %v3154_v23  ;;  %v3155_v7 = vmul.f32 %v3091_v51, %v3091_v51  ;;  %v3408_v34 = vadd.f32 %v3407_v41, %v3345_v5 }
 0x3ed   :  { %vm5818_vm2 = vcmp.ne.f32.partialorder %v7305_v1, 0.0  ;;  %vm5824_vm3 = vcmp.ne.f32.partialorder %v7308_v32, 0.0  ;;  %v2108_v51 = vadd.f32 %v2107_v2, %v5357_v44  ;;  %v2882_v6 = vadd.f32 %v2881_v0, %v5360_v45 }
 0x3ee   :  { %v7311_v53 = vunpack.c.h.bf16 %v5421_v9  ;;  %v7314_v24 = vunpack.c.h.bf16 %v5427_v11  ;;  %v2509_v20 = vmul.f32 25.0, %v2381_v49  ;;  %v3283_v2 = vmul.f32 25.0, %v3155_v7 }
 0x3ef   :  { %v2110_v0 = vadd.f32 %v2109_v40, %v5363_v46  ;;  %v2884_v23 = vadd.f32 %v2883_v28, %v5374_v50  ;;  %v2635_v19 = vadd.f32 %v2634_v21, %v2572_v13  ;;  %v3409_v60 = vadd.f32 %v3408_v34, %v3346_v57 }
 0x3f0   :  { %vm5836_vm4 = vcmp.ne.f32.partialorder %v7311_v53, 0.0  ;;  %vm5842_vm5 = vcmp.ne.f32.partialorder %v7314_v24, 0.0  ;;  %v2254_v14 = vmax.f32 %v2108_v51, 0.0  ;;  %v3028_v52 = vmax.f32 %v2882_v6, 0.0 }
 0x3f1   :  { %v2573_v29 = vsel %vm5773_vm0, %v2509_v20, %v2381_v49  ;;  %v3347_v10 = vsel %vm5780_vm1, %v3283_v2, %v3155_v7  ;;  %v2255_v54 = vmax.f32 %v2110_v0, 0.0  ;;  %v3029_v41 = vmax.f32 %v2884_v23, 0.0 }
 0x3f2   :  { %v2636_v3 = vadd.f32 %v2635_v19, %v2573_v29  ;;  %v3410_v5 = vadd.f32 %v3409_v60, %v3347_v10  ;;  %v2318_v32 = vsub.f32 %v7305_v1, %v2254_v14  ;;  %v7317_v40 = vunpack.c.l.bf16 %v5427_v11 }
 0x3f3   :  { %v7318_v13 = vmov %v7311_v53  ;;  %v7319_v21 = vmov %v7314_v24  ;;  %v2112_v56 = vadd.f32 %v5762_v4, %v5357_v44  ;;  %v7320_v49 = vunpack.c.l.bf16 %v5435_v15  ;;  %v5892_v24 = vpop.f32.mrb[144].mxu0 }
 0x3f4   :  { %v3092_v28 = vsub.f32 %v7317_v40, %v3028_v52  ;;  %v2319_v57 = vsub.f32 %v7318_v13, %v2255_v54  ;;  %v3093_v12 = vsub.f32 %v7319_v21, %v3029_v41  ;;  %v2886_v34 = vadd.f32 %v5764_v18, %v5360_v45  ;;  %v5894_v18 = vpop.f32.mrb[144].mxu1  ;;  %v5900_v19 = vpop.f32.mrb[145].mxu0 }
 0x3f5   :  { %vm5868_vm6 = vcmp.ne.f32.partialorder %v7320_v49, 0.0  ;;  %v7323_v51 = vunpack.c.l.bf16 %v5441_v17  ;;  %v7326_v11 = vunpack.c.h.bf16 %v5435_v15  ;;  %v7329_v4 = vunpack.c.h.bf16 %v5441_v17  ;;  %v5902_v60 = vpop.f32.mrb[145].mxu1  ;;  %v5904_v54 = vpop.f32.mrb[146].mxu0 }
 0x3f6   :  { %v2382_v20 = vmul.f32 %v2318_v32, %v2318_v32  ;;  %v3156_v2 = vmul.f32 %v3092_v28, %v3092_v28  ;;  %v2114_v0 = vadd.f32 %v5784_v58, %v5363_v46  ;;  %v2888_v23 = vadd.f32 %v5786_v63, %v5374_v50  ;;  %v5906_v41 = vpop.f32.mrb[146].mxu1  ;;  %v5908_v58 = vpop.f32.mrb[147].mxu0 }
 0x3f7   :  { %vm5876_vm7 = vcmp.ne.f32.partialorder %v7323_v51, 0.0  ;;  %vm5882_vm8 = vcmp.ne.f32.partialorder %v7326_v11, 0.0  ;;  %vm5888_vm9 = vcmp.ne.f32.partialorder %v7329_v4, 0.0  ;;  %v2383_v14 = vmul.f32 %v2319_v57, %v2319_v57  ;;  %v5910_v13 = vpop.f32.mrb[147].mxu1 }
 0x3f8   :  { %v3157_v52 = vmul.f32 %v3093_v12, %v3093_v12  ;;  %v2256_v29 = vmax.f32 %v2112_v56, 0.0  ;;  %v3030_v10 = vmax.f32 %v2886_v34, 0.0  ;;  %v2510_v1 = vmul.f32 25.0, %v2382_v20 }
 0x3f9   :  { %v3284_v32 = vmul.f32 25.0, %v3156_v2  ;;  %v2257_v40 = vmax.f32 %v2114_v0, 0.0  ;;  %v3031_v28 = vmax.f32 %v2888_v23, 0.0  ;;  %v2511_v63 = vmul.f32 25.0, %v2383_v14 }
 0x3fa   :  { %v3285_v21 = vmul.f32 25.0, %v3157_v52  ;;  %v2320_v57 = vsub.f32 %v7320_v49, %v2256_v29  ;;  %v7332_v12 = vmov %v7323_v51  ;;  %v2574_v34 = vsel %vm5818_vm2, %v2510_v1, %v2382_v20 }
 0x3fb   :  { %v3094_v56 = vsub.f32 %v7332_v12, %v3030_v10  ;;  %v3348_v51 = vsel %vm5824_vm3, %v3284_v32, %v3156_v2  ;;  %v2321_v4 = vsub.f32 %v7326_v11, %v2257_v40  ;;  %v7333_v0 = vunpack.c.h.bf16 %v5441_v17 }
 0x3fc   :  { %v2637_v38 = vadd.f32 %v2636_v3, %v2574_v34  ;;  %v3411_v36 = vadd.f32 %v3410_v5, %v3348_v51  ;;  %v2575_v29 = vsel %vm5836_vm4, %v2511_v63, %v2383_v14  ;;  %v3349_v10 = vsel %vm5842_vm5, %v3285_v21, %v3157_v52  ;;  %v5944_v14 = vpop.f32.mrb[148].mxu0  ;;  %v5946_v52 = vpop.f32.mrb[148].mxu1 }
 0x3fd   :  { %v3095_v23 = vsub.f32 %v7333_v0, %v3031_v28  ;;  %v2384_v49 = vmul.f32 %v2320_v57, %v2320_v57  ;;  %v3158_v8 = vmul.f32 %v3094_v56, %v3094_v56  ;;  %v2385_v20 = vmul.f32 %v2321_v4, %v2321_v4  ;;  %v5948_v21 = vpop.f32.mrb[149].mxu0  ;;  %v5950_v57 = vpop.f32.mrb[149].mxu1 }
 0x3fe   :  { %v7334_v42 = vunpack.c.l.bf16 %v5449_v59  ;;  %v7337_v17 = vunpack.c.l.bf16 %v5455_v22  ;;  %v2638_v48 = vadd.f32 %v2637_v38, %v2575_v29  ;;  %v3412_v5 = vadd.f32 %v3411_v36, %v3349_v10  ;;  %v5968_v11 = vpop.f32.mrb[150].mxu0  ;;  %v5970_v4 = vpop.f32.mrb[150].mxu1 }
 0x3ff   :  { %v3159_v1 = vmul.f32 %v3095_v23, %v3095_v23  ;;  %v2118_v26 = vadd.f32 %v5800_v61, %v5357_v44  ;;  %v2892_v2 = vadd.f32 %v5802_v47, %v5360_v45  ;;  %v2512_v32 = vmul.f32 25.0, %v2384_v49  ;;  %v5980_v29 = vpop.f32.mrb[151].mxu0  ;;  %v5982_v10 = vpop.f32.mrb[151].mxu1 }
 0x400   :  { %vm5930_vm10 = vcmp.ne.f32.partialorder %v7334_v42, 0.0  ;;  %vm5936_vm11 = vcmp.ne.f32.partialorder %v7337_v17, 0.0  ;;  %v3286_v40 = vmul.f32 25.0, %v3158_v8  ;;  %v2513_v28 = vmul.f32 25.0, %v2385_v20 }
 0x401   :  { %v3287_v63 = vmul.f32 25.0, %v3159_v1  ;;  %v2258_v38 = vmax.f32 %v2118_v26, 0.0  ;;  %v3032_v36 = vmax.f32 %v2892_v2, 0.0  ;;  %v2120_v61 = vadd.f32 %v5808_v35, %v5363_v46 }
 0x402   :  { %v7340_v12 = vunpack.c.h.bf16 %v5449_v59  ;;  %v2894_v56 = vadd.f32 %v5810_v43, %v5374_v50  ;;  %v7343_v34 = vunpack.c.h.bf16 %v5455_v22  ;;  %v2576_v35 = vsel %vm5868_vm6, %v2512_v32, %v2384_v49 }
 0x403   :  { %v3350_v0 = vsel %vm5876_vm7, %v3286_v40, %v3158_v8  ;;  %v2577_v23 = vsel %vm5882_vm8, %v2513_v28, %v2385_v20  ;;  %v3351_v43 = vsel %vm5888_vm9, %v3287_v63, %v3159_v1  ;;  %v2639_v42 = vadd.f32 %v2638_v48, %v2576_v35 }
 0x404   :  { %vm5956_vm12 = vcmp.ne.f32.partialorder %v7340_v12, 0.0  ;;  %vm5964_vm13 = vcmp.ne.f32.partialorder %v7343_v34, 0.0  ;;  %v3413_v17 = vadd.f32 %v3412_v5, %v3350_v0  ;;  %v7346_v26 = vunpack.c.l.bf16 %v5449_v59 }
 0x405   :  { %v7347_v7 = vunpack.c.l.bf16 %v5455_v22  ;;  %v2259_v9 = vmax.f32 %v2120_v61, 0.0  ;;  %v3033_v8 = vmax.f32 %v2894_v56, 0.0  ;;  %v2122_v6 = vadd.f32 %v5828_v16, %v5357_v44 }
 0x406   :  { %v2322_v2 = vsub.f32 %v7346_v26, %v2258_v38  ;;  %v7348_v53 = vunpack.c.l.bf16 %v5463_v25  ;;  %v2896_v1 = vadd.f32 %v5830_v55, %v5360_v45  ;;  %v7351_v48 = vunpack.c.l.bf16 %v5469_v27 }
 0x407   :  { %v3096_v49 = vsub.f32 %v7347_v7, %v3032_v36  ;;  %v2640_v32 = vadd.f32 %v2639_v42, %v2577_v23  ;;  %v3414_v40 = vadd.f32 %v3413_v17, %v3351_v43  ;;  %v7354_v16 = vmov %v7340_v12  ;;  %v6024_v42 = vpop.f32.mrb[152].mxu0  ;;  %v6026_v17 = vpop.f32.mrb[152].mxu1 }
 0x408   :  { %vm5992_vm14 = vcmp.ne.f32.partialorder %v7348_v53, 0.0  ;;  %vm6000_vm15 = vcmp.ne.f32.partialorder %v7351_v48, 0.0  ;;  %v2386_v28 = vmul.f32 %v2322_v2, %v2322_v2  ;;  %v2323_v38 = vsub.f32 %v7354_v16, %v2259_v9 }
 0x409   :  { %v3160_v63 = vmul.f32 %v3096_v49, %v3096_v49  ;;  %v7355_v36 = vmov %v7343_v34  ;;  %v2260_v12 = vmax.f32 %v2122_v6, 0.0  ;;  %v3034_v56 = vmax.f32 %v2896_v1, 0.0 }
 0x40a   :  { %v3097_v61 = vsub.f32 %v7355_v36, %v3033_v8  ;;  %v2514_v34 = vmul.f32 25.0, %v2386_v28  ;;  %v2124_v35 = vadd.f32 %v5846_v30, %v5363_v46  ;;  %v7356_v0 = vunpack.c.h.bf16 %v5463_v25  ;;  %v6032_v8 = vpop.f32.mrb[153].mxu0 }
 0x40b   :  { %v3288_v55 = vmul.f32 25.0, %v3160_v63  ;;  %v2898_v59 = vadd.f32 %v5848_v62, %v5374_v50  ;;  %v7359_v43 = vunpack.c.h.bf16 %v5469_v27  ;;  %v2387_v30 = vmul.f32 %v2323_v38, %v2323_v38  ;;  %v6034_v62 = vpop.f32.mrb[153].mxu1  ;;  %v6040_v16 = vpop.f32.mrb[154].mxu0 }
 0x40c   :  { %vm6012_vm0 = vcmp.ne.f32.partialorder %v7356_v0, 0.0  ;;  %v3161_v26 = vmul.f32 %v3097_v61, %v3097_v61  ;;  %v7362_v2 = vmov %v7348_v53  ;;  %v7363_v49 = vmov %v7351_v48  ;;  %v6042_v38 = vpop.f32.mrb[154].mxu1  ;;  %v6044_v0 = vpop.f32.mrb[155].mxu0 }
 0x40d   :  { %vm6020_vm1 = vcmp.ne.f32.partialorder %v7359_v43, 0.0  ;;  %v2324_v7 = vsub.f32 %v7362_v2, %v2260_v12  ;;  %v3098_v9 = vsub.f32 %v7363_v49, %v3034_v56  ;;  %v2578_v6 = vsel %vm5930_vm10, %v2514_v34, %v2386_v28  ;;  %v6046_v43 = vpop.f32.mrb[155].mxu1  ;;  %v6092_v5 = vpop.f32.mrb[156].mxu0 }
 0x40e   :  { %v3352_v53 = vsel %vm5936_vm11, %v3288_v55, %v3160_v63  ;;  %v2261_v1 = vmax.f32 %v2124_v35, 0.0  ;;  %v3035_v48 = vmax.f32 %v2898_v59, 0.0  ;;  %v2641_v36 = vadd.f32 %v2640_v32, %v2578_v6 }
 0x40f   :  { %v3415_v61 = vadd.f32 %v3414_v40, %v3352_v53  ;;  %v2515_v12 = vmul.f32 25.0, %v2387_v30  ;;  %v3289_v56 = vmul.f32 25.0, %v3161_v26  ;;  %v2388_v2 = vmul.f32 %v2324_v7, %v2324_v7 }
 0x410   :  { %v3162_v15 = vmul.f32 %v3098_v9, %v3098_v9  ;;  %v7364_v28 = vunpack.c.h.bf16 %v5463_v25  ;;  %v7365_v63 = vunpack.c.h.bf16 %v5469_v27  ;;  %v2128_v40 = vadd.f32 %v5892_v24, %v5357_v44 }
 0x411   :  { %v2579_v55 = vsel %vm5956_vm12, %v2515_v12, %v2387_v30  ;;  %v3353_v32 = vsel %vm5964_vm13, %v3289_v56, %v3161_v26  ;;  %v7366_v35 = vunpack.c.l.bf16 %v5477_v31  ;;  %v2902_v25 = vadd.f32 %v5894_v18, %v5360_v45  ;;  %v6094_v56 = vpop.f32.mrb[156].mxu1 }
 0x412   :  { %v2325_v3 = vsub.f32 %v7364_v28, %v2261_v1  ;;  %v3099_v34 = vsub.f32 %v7365_v63, %v3035_v48  ;;  %v7369_v27 = vunpack.c.l.bf16 %v5483_v33  ;;  %v2642_v51 = vadd.f32 %v2641_v36, %v2579_v55  ;;  %v6098_v63 = vpop.f32.mrb[157].mxu1 }
 0x413   :  { %vm6060_vm2 = vcmp.ne.f32.partialorder %v7366_v35, 0.0  ;;  %v3416_v30 = vadd.f32 %v3415_v61, %v3353_v32  ;;  %v2516_v26 = vmul.f32 25.0, %v2388_v2  ;;  %v3290_v7 = vmul.f32 25.0, %v3162_v15 }
 0x414   :  { %vm6068_vm3 = vcmp.ne.f32.partialorder %v7369_v27, 0.0  ;;  %v2389_v24 = vmul.f32 %v2325_v3, %v2325_v3  ;;  %v3163_v49 = vmul.f32 %v3099_v34, %v3099_v34  ;;  %v2262_v9 = vmax.f32 %v2128_v40, 0.0  ;;  %v6096_v3 = vpop.f32.mrb[157].mxu0 }
 0x415   :  { %v3036_v6 = vmax.f32 %v2902_v25, 0.0  ;;  %v2580_v53 = vsel %vm5992_vm14, %v2516_v26, %v2388_v2  ;;  %v3354_v18 = vsel %vm6000_vm15, %v3290_v7, %v3162_v15  ;;  %v2130_v1 = vadd.f32 %v5900_v19, %v5363_v46  ;;  %v6104_v25 = vpop.f32.mrb[158].mxu0 }
 0x416   :  { %v7372_v48 = vunpack.c.h.bf16 %v5477_v31  ;;  %v2904_v61 = vadd.f32 %v5902_v60, %v5374_v50  ;;  %v7375_v12 = vunpack.c.h.bf16 %v5483_v33  ;;  %v2643_v19 = vadd.f32 %v2642_v51, %v2580_v53  ;;  %v6128_v22 = vpop.f32.mrb[159].mxu0 }
 0x417   :  { %v3417_v2 = vadd.f32 %v3416_v30, %v3354_v18  ;;  %v2517_v15 = vmul.f32 25.0, %v2389_v24  ;;  %v3291_v28 = vmul.f32 25.0, %v3163_v49  ;;  %v7378_v60 = vmov %v7366_v35 }
 0x418   :  { %vm6080_vm4 = vcmp.ne.f32.partialorder %v7372_v48, 0.0  ;;  %vm6088_vm5 = vcmp.ne.f32.partialorder %v7375_v12, 0.0  ;;  %v2326_v34 = vsub.f32 %v7378_v60, %v2262_v9  ;;  %v7379_v55 = vmov %v7369_v27  ;;  %v6106_v27 = vpop.f32.mrb[158].mxu1 }
 0x419   :  { %v3100_v32 = vsub.f32 %v7379_v55, %v3036_v6  ;;  %v2263_v40 = vmax.f32 %v2130_v1, 0.0  ;;  %v3037_v35 = vmax.f32 %v2904_v61, 0.0  ;;  %v2581_v51 = vsel %vm6012_vm0, %v2517_v15, %v2389_v24  ;;  %v6130_v24 = vpop.f32.mrb[159].mxu1 }
 0x41a   :  { %v3355_v30 = vsel %vm6020_vm1, %v3291_v28, %v3163_v49  ;;  %v2132_v26 = vadd.f32 %v5904_v54, %v5357_v44  ;;  %v7380_v7 = vunpack.c.l.bf16 %v5491_v37  ;;  %v2906_v6 = vadd.f32 %v5906_v41, %v5360_v45 }
 0x41b   :  { %v7383_v53 = vunpack.c.l.bf16 %v5497_v39  ;;  %v2644_v54 = vadd.f32 %v2643_v19, %v2581_v51  ;;  %v3418_v49 = vadd.f32 %v3417_v2, %v3355_v30  ;;  %v2390_v18 = vmul.f32 %v2326_v34, %v2326_v34 }
 0x41c   :  { %vm6116_vm6 = vcmp.ne.f32.partialorder %v7380_v7, 0.0  ;;  %v3164_v1 = vmul.f32 %v3100_v32, %v3100_v32  ;;  %v2327_v61 = vsub.f32 %v7372_v48, %v2263_v40  ;;  %v3101_v41 = vsub.f32 %v7375_v12, %v3037_v35  ;;  %v6160_v48 = vpop.f32.mrb[160].mxu0  ;;  %v6162_v12 = vpop.f32.mrb[160].mxu1 }
 0x41d   :  { %vm6124_vm7 = vcmp.ne.f32.partialorder %v7383_v53, 0.0  ;;  %v2264_v15 = vmax.f32 %v2132_v26, 0.0  ;;  %v3038_v28 = vmax.f32 %v2906_v6, 0.0  ;;  %v2518_v60 = vmul.f32 25.0, %v2390_v18 }
 0x41e   :  { %v3292_v55 = vmul.f32 25.0, %v3164_v1  ;;  %v2134_v7 = vadd.f32 %v5908_v58, %v5363_v46  ;;  %v7386_v53 = vunpack.c.h.bf16 %v5491_v37  ;;  %v2908_v31 = vadd.f32 %v5910_v13, %v5374_v50 }
 0x41f   :  { %v7389_v2 = vunpack.c.h.bf16 %v5497_v39  ;;  %v2391_v34 = vmul.f32 %v2327_v61, %v2327_v61  ;;  %v3165_v32 = vmul.f32 %v3101_v41, %v3101_v41  ;;  %v7392_v40 = vunpack.c.l.bf16 %v5491_v37 }
 0x420   :  { %vm6140_vm8 = vcmp.ne.f32.partialorder %v7386_v53, 0.0  ;;  %v7393_v35 = vunpack.c.l.bf16 %v5497_v39  ;;  %v2582_v30 = vsel %vm6060_vm2, %v2518_v60, %v2390_v18  ;;  %v3356_v13 = vsel %vm6068_vm3, %v3292_v55, %v3164_v1 }
 0x421   :  { %vm6148_vm9 = vcmp.ne.f32.partialorder %v7389_v2, 0.0  ;;  %v2328_v58 = vsub.f32 %v7392_v40, %v2264_v15  ;;  %v2265_v26 = vmax.f32 %v2134_v7, 0.0  ;;  %v3039_v6 = vmax.f32 %v2908_v31, 0.0  ;;  %v6164_v15 = vpop.f32.mrb[161].mxu0  ;;  %v6166_v40 = vpop.f32.mrb[161].mxu1 }
 0x422   :  { %v3102_v51 = vsub.f32 %v7393_v35, %v3038_v28  ;;  %v2645_v61 = vadd.f32 %v2644_v54, %v2582_v30  ;;  %v3419_v41 = vadd.f32 %v3418_v49, %v3356_v13  ;;  %v2519_v53 = vmul.f32 25.0, %v2391_v34  ;;  %v6172_v55 = vpop.f32.mrb[162].mxu0  ;;  %v6174_v7 = vpop.f32.mrb[162].mxu1 }
 0x423   :  { %v3293_v2 = vmul.f32 25.0, %v3165_v32  ;;  %v2392_v28 = vmul.f32 %v2328_v58, %v2328_v58  ;;  %v7394_v18 = vunpack.c.h.bf16 %v5491_v37  ;;  %v7395_v1 = vunpack.c.h.bf16 %v5497_v39  ;;  %v7396_v58 = vld [vmem:[#allocation15_spill] sm:$0xff]  ;;  %v6196_v20 = vpop.f32.mrb[163].mxu0 }
 0x424   :  { %v3166_v59 = vmul.f32 %v3102_v51, %v3102_v51  ;;  %v2583_v54 = vsel %vm6080_vm4, %v2519_v53, %v2391_v34  ;;  %v2138_v31 = vadd.f32 %v5944_v14, %v5357_v44  ;;  %v7397_v35 = vunpack.c.l.bf16 %v7396_v58  ;;  %v7400_v51 = vld [vmem:[#allocation16_spill] sm:$0xff]  ;;  %v6198_v34 = vpop.f32.mrb[163].mxu1 }
 0x425   :  { %v2329_v47 = vsub.f32 %v7394_v18, %v2265_v26  ;;  %v3103_v60 = vsub.f32 %v7395_v1, %v3039_v6  ;;  %v3357_v49 = vsel %vm6088_vm5, %v3293_v2, %v3165_v32  ;;  %v2912_v39 = vadd.f32 %v5946_v52, %v5360_v45  ;;  %7404 = vst [vmem:[#allocation15_spill] sm:$0xff] %v6198_v34 }
 0x426   :  { %vm6184_vm10 = vcmp.ne.f32.partialorder %v7397_v35, 0.0  ;;  %v7401_v30 = vunpack.c.l.bf16 %v7400_v51  ;;  %v2646_v14 = vadd.f32 %v2645_v61, %v2583_v54  ;;  %v3420_v32 = vadd.f32 %v3419_v41, %v3357_v49 }
 0x427   :  { %v2520_v13 = vmul.f32 25.0, %v2392_v28  ;;  %v3294_v26 = vmul.f32 25.0, %v3166_v59  ;;  %v2393_v6 = vmul.f32 %v2329_v47, %v2329_v47  ;;  %v3167_v53 = vmul.f32 %v3103_v60, %v3103_v60 }
 0x428   :  { %vm6192_vm11 = vcmp.ne.f32.partialorder %v7401_v30, 0.0  ;;  %v2266_v2 = vmax.f32 %v2138_v31, 0.0  ;;  %v3040_v18 = vmax.f32 %v2912_v39, 0.0  ;;  %v2140_v35 = vadd.f32 %v5948_v21, %v5363_v46 }
 0x429   :  { %v2584_v52 = vsel %vm6116_vm6, %v2520_v13, %v2392_v28  ;;  %v3358_v1 = vsel %vm6124_vm7, %v3294_v26, %v3166_v59  ;;  %v7405_v30 = vunpack.c.h.bf16 %v7396_v58  ;;  %v2914_v41 = vadd.f32 %v5950_v57, %v5374_v50  ;;  %v6224_v26 = vpop.f32.mrb[164].mxu0  ;;  %v6226_v57 = vpop.f32.mrb[164].mxu1 }
 0x42a   :  { %v7408_v47 = vunpack.c.h.bf16 %v7400_v51  ;;  %v2647_v23 = vadd.f32 %v2646_v14, %v2584_v52  ;;  %v3421_v28 = vadd.f32 %v3420_v32, %v3358_v1  ;;  %v2521_v59 = vmul.f32 25.0, %v2393_v6  ;;  %7413 = vst [vmem:[#allocation16_spill] sm:$0xff] %v6224_v26  ;;  %7414 = vst [vmem:[#allocation33_spill] sm:$0xff] %v6226_v57  ;;  %v7415_v52 = vld [vmem:[#allocation17_spill] sm:$0xff]  ;;  %v6248_v33 = vpop.f32.mrb[165].mxu0 }
 0x42b   :  { %vm6208_vm12 = vcmp.ne.f32.partialorder %v7405_v30, 0.0  ;;  %v3295_v60 = vmul.f32 25.0, %v3167_v53  ;;  %v7411_v21 = vunpack.c.l.bf16 %v7396_v58  ;;  %v7412_v49 = vunpack.c.l.bf16 %v7400_v51  ;;  %7423 = vst [vmem:[#allocation17_spill] sm:$0xff] %v6248_v33 }
 0x42c   :  { %vm6216_vm13 = vcmp.ne.f32.partialorder %v7408_v47, 0.0  ;;  %v2267_v39 = vmax.f32 %v2140_v35, 0.0  ;;  %v3041_v13 = vmax.f32 %v2914_v41, 0.0  ;;  %v2585_v30 = vsel %vm6140_vm8, %v2521_v59, %v2393_v6  ;;  %v7419_v35 = vld [vmem:[#allocation18_spill] sm:$0xff]  ;;  %v6250_v6 = vpop.f32.mrb[165].mxu1 }
 0x42d   :  { %v2330_v54 = vsub.f32 %v7411_v21, %v2266_v2  ;;  %v3104_v31 = vsub.f32 %v7412_v49, %v3040_v18  ;;  %v3359_v14 = vsel %vm6148_vm9, %v3295_v60, %v3167_v53  ;;  %v2142_v32 = vadd.f32 %v5968_v11, %v5357_v44  ;;  %7424 = vst [vmem:[#allocation18_spill] sm:$0xff] %v6250_v6  ;;  %v6252_v60 = vpop.f32.mrb[166].mxu0  ;;  %v6254_v21 = vpop.f32.mrb[166].mxu1 }
 0x42e   :  { %v7416_v2 = vunpack.c.l.bf16 %v7415_v52  ;;  %v2916_v18 = vadd.f32 %v5970_v4, %v5360_v45  ;;  %v7420_v41 = vunpack.c.l.bf16 %v7419_v35  ;;  %v2648_v11 = vadd.f32 %v2647_v23, %v2585_v30  ;;  %7425 = vst [vmem:[#allocation34_spill] sm:$0xff] %v6252_v60  ;;  %7426 = vst [vmem:[#allocation35_spill] sm:$0xff] %v6254_v21  ;;  %v6260_v34 = vpop.f32.mrb[167].mxu0  ;;  %v6262_v33 = vpop.f32.mrb[167].mxu1 }
 0x42f   :  { %v3422_v53 = vadd.f32 %v3421_v28, %v3359_v14  ;;  %v2394_v47 = vmul.f32 %v2330_v54, %v2330_v54  ;;  %v3168_v59 = vmul.f32 %v3104_v31, %v3104_v31  ;;  %v7427_v4 = vunpack.c.h.bf16 %v7396_v58  ;;  %7429 = vst [vmem:[#allocation36_spill] sm:$0xff] %v6260_v34  ;;  %7430 = vst [vmem:[#allocation37_spill] sm:$0xff] %v6262_v33  ;;  %v6294_v37 = vpop.f32.mrb[168].mxu1 }
 0x430   :  { %vm6236_vm14 = vcmp.ne.f32.partialorder %v7416_v2, 0.0  ;;  %vm6244_vm15 = vcmp.ne.f32.partialorder %v7420_v41, 0.0  ;;  %v7428_v2 = vunpack.c.h.bf16 %v7400_v51  ;;  %v2268_v57 = vmax.f32 %v2142_v32, 0.0 }
 0x431   :  { %v2331_v49 = vsub.f32 %v7427_v4, %v2267_v39  ;;  %v3042_v26 = vmax.f32 %v2916_v18, 0.0  ;;  %v2522_v23 = vmul.f32 25.0, %v2394_v47  ;;  %v3296_v28 = vmul.f32 25.0, %v3168_v59 }
 0x432   :  { %v3105_v41 = vsub.f32 %v7428_v2, %v3041_v13  ;;  %v2144_v54 = vadd.f32 %v5980_v29, %v5363_v46  ;;  %v7431_v31 = vunpack.c.h.bf16 %v7415_v52  ;;  %v2918_v58 = vadd.f32 %v5982_v10, %v5374_v50 }
 0x433   :  { %v7434_v51 = vunpack.c.h.bf16 %v7419_v35  ;;  %v2395_v13 = vmul.f32 %v2331_v49, %v2331_v49  ;;  %v7437_v32 = vunpack.c.l.bf16 %v7415_v52  ;;  %v7438_v18 = vunpack.c.l.bf16 %v7419_v35 }
 0x434   :  { %vm6268_vm0 = vcmp.ne.f32.partialorder %v7431_v31, 0.0  ;;  %v3169_v14 = vmul.f32 %v3105_v41, %v3105_v41  ;;  %v2586_v2 = vsel %vm6184_vm10, %v2522_v23, %v2394_v47  ;;  %v3360_v10 = vsel %vm6192_vm11, %v3296_v28, %v3168_v59  ;;  %v7441_v47 = vld [vmem:[#allocation19_spill] sm:$0xff] }
 0x435   :  { %vm6276_vm1 = vcmp.ne.f32.partialorder %v7434_v51, 0.0  ;;  %v2332_v29 = vsub.f32 %v7437_v32, %v2268_v57  ;;  %v3106_v4 = vsub.f32 %v7438_v18, %v3042_v26  ;;  %v2269_v31 = vmax.f32 %v2144_v54, 0.0  ;;  %v6292_v18 = vpop.f32.mrb[168].mxu0 }
 0x436   :  { %v3043_v33 = vmax.f32 %v2918_v58, 0.0  ;;  %v2649_v51 = vadd.f32 %v2648_v11, %v2586_v2  ;;  %v3423_v34 = vadd.f32 %v3422_v53, %v3360_v10  ;;  %v2523_v21 = vmul.f32 25.0, %v2395_v13  ;;  %v6316_v9 = vpop.f32.mrb[169].mxu0 }
 0x437   :  { %v3297_v60 = vmul.f32 25.0, %v3169_v14  ;;  %v2396_v49 = vmul.f32 %v2332_v29, %v2332_v29  ;;  %v3170_v41 = vmul.f32 %v3106_v4, %v3106_v4  ;;  %v7439_v6 = vunpack.c.h.bf16 %v7415_v52  ;;  %v6320_v54 = vpop.f32.mrb[170].mxu0 }
 0x438   :  { %v7440_v32 = vunpack.c.h.bf16 %v7419_v35  ;;  %v2587_v36 = vsel %vm6208_vm12, %v2523_v21, %v2395_v13  ;;  %v2148_v53 = vadd.f32 %v6024_v42, %v5357_v44  ;;  %v7442_v59 = vunpack.c.l.bf16 %v7441_v47  ;;  %v6324_v4 = vpop.f32.mrb[171].mxu0 }
 0x439   :  { %v2333_v57 = vsub.f32 %v7439_v6, %v2269_v31  ;;  %v3361_v11 = vsel %vm6216_vm13, %v3297_v60, %v3169_v14  ;;  %v2922_v35 = vadd.f32 %v6026_v17, %v5360_v45  ;;  %v6318_v60 = vpop.f32.mrb[169].mxu1  ;;  %v2650_v42 = vadd.f32 %v2649_v51, %v2587_v36 }
 0x43a   :  { %v3107_v26 = vsub.f32 %v7440_v32, %v3043_v33  ;;  %vm6304_vm2 = vcmp.ne.f32.partialorder %v7442_v59, 0.0  ;;  %v7445_v33 = vld [vmem:[#allocation20_spill] sm:$0xff]  ;;  %v3424_v21 = vadd.f32 %v3423_v34, %v3361_v11  ;;  %v2524_v23 = vmul.f32 25.0, %v2396_v49  ;;  %v6322_v58 = vpop.f32.mrb[170].mxu1 }
 0x43b   :  { %v7446_v6 = vunpack.c.l.bf16 %v7445_v33  ;;  %v3298_v28 = vmul.f32 25.0, %v3170_v41  ;;  %v2397_v13 = vmul.f32 %v2333_v57, %v2333_v57  ;;  %v2270_v14 = vmax.f32 %v2148_v53, 0.0  ;;  %v6326_v2 = vpop.f32.mrb[171].mxu1 }
 0x43c   :  { %v3171_v17 = vmul.f32 %v3107_v26, %v3107_v26  ;;  %v3044_v29 = vmax.f32 %v2922_v35, 0.0  ;;  %v2588_v10 = vsel %vm6236_vm14, %v2524_v23, %v2396_v49  ;;  %v2150_v31 = vadd.f32 %v6032_v8, %v5363_v46 }
 0x43d   :  { %vm6312_vm3 = vcmp.ne.f32.partialorder %v7446_v6, 0.0  ;;  %v3362_v34 = vsel %vm6244_vm15, %v3298_v28, %v3170_v41  ;;  %v7449_v51 = vunpack.c.h.bf16 %v7441_v47  ;;  %v2924_v32 = vadd.f32 %v6034_v62, %v5374_v50 }
 0x43e   :  { %v7452_v26 = vunpack.c.h.bf16 %v7445_v33  ;;  %v2651_v19 = vadd.f32 %v2650_v42, %v2588_v10  ;;  %v3425_v49 = vadd.f32 %v3424_v21, %v3362_v34  ;;  %v2525_v41 = vmul.f32 25.0, %v2397_v13  ;;  %v7457_v21 = vld [vmem:[#allocation21_spill] sm:$0xff] }
 0x43f   :  { %vm6336_vm4 = vcmp.ne.f32.partialorder %v7449_v51, 0.0  ;;  %v3299_v36 = vmul.f32 25.0, %v3171_v17  ;;  %v7455_v8 = vmov %v7442_v59  ;;  %v7456_v53 = vmov %v7446_v6  ;;  %v6374_v51 = vpop.f32.mrb[172].mxu1 }
 0x440   :  { %vm6344_vm5 = vcmp.ne.f32.partialorder %v7452_v26, 0.0  ;;  %v2334_v11 = vsub.f32 %v7455_v8, %v2270_v14  ;;  %v3108_v59 = vsub.f32 %v7456_v53, %v3044_v29  ;;  %v2271_v35 = vmax.f32 %v2150_v31, 0.0  ;;  %v7461_v29 = vld [vmem:[#allocation22_spill] sm:$0xff]  ;;  %7465 = vst [vmem:[#allocation19_spill] sm:$0xff] %v6374_v51 }
 0x441   :  { %v3045_v6 = vmax.f32 %v2924_v32, 0.0  ;;  %v2589_v62 = vsel %vm6268_vm0, %v2525_v41, %v2397_v13  ;;  %v3363_v23 = vsel %vm6276_vm1, %v3299_v36, %v3171_v17  ;;  %v2152_v42 = vadd.f32 %v6040_v16, %v5357_v44  ;;  %v6372_v16 = vpop.f32.mrb[172].mxu0 }
 0x442   :  { %v7458_v28 = vunpack.c.l.bf16 %v7457_v21  ;;  %v2926_v14 = vadd.f32 %v6042_v38, %v5360_v45  ;;  %v7462_v34 = vunpack.c.l.bf16 %v7461_v29  ;;  %v2652_v39 = vadd.f32 %v2651_v19, %v2589_v62  ;;  %v6380_v53 = vpop.f32.mrb[173].mxu0 }
 0x443   :  { %v3426_v13 = vadd.f32 %v3425_v49, %v3363_v23  ;;  %v2398_v17 = vmul.f32 %v2334_v11, %v2334_v11  ;;  %v3172_v31 = vmul.f32 %v3108_v59, %v3108_v59  ;;  %v7466_v32 = vunpack.c.h.bf16 %v7441_v47  ;;  %7468 = vst [vmem:[#allocation20_spill] sm:$0xff] %v6380_v53 }
 0x444   :  { %vm6360_vm6 = vcmp.ne.f32.partialorder %v7458_v28, 0.0  ;;  %vm6368_vm7 = vcmp.ne.f32.partialorder %v7462_v34, 0.0  ;;  %v7467_v41 = vunpack.c.h.bf16 %v7445_v33  ;;  %v2272_v36 = vmax.f32 %v2152_v42, 0.0  ;;  %v6382_v28 = vpop.f32.mrb[173].mxu1 }
 0x445   :  { %v2335_v26 = vsub.f32 %v7466_v32, %v2271_v35  ;;  %v3046_v8 = vmax.f32 %v2926_v14, 0.0  ;;  %7469 = vst [vmem:[#allocation21_spill] sm:$0xff] %v6382_v28  ;;  %v2526_v19 = vmul.f32 25.0, %v2398_v17  ;;  %v3300_v49 = vmul.f32 25.0, %v3172_v31  ;;  %v6402_v23 = vpop.f32.mrb[174].mxu1 }
 0x446   :  { %v3109_v38 = vsub.f32 %v7467_v41, %v3045_v6  ;;  %v2154_v11 = vadd.f32 %v6044_v0, %v5363_v46  ;;  %v7470_v59 = vunpack.c.h.bf16 %v7457_v21  ;;  %v2928_v47 = vadd.f32 %v6046_v43, %v5374_v50  ;;  %v6400_v6 = vpop.f32.mrb[174].mxu0  ;;  %7477 = vst [vmem:[#allocation38_spill] sm:$0xff] %v6402_v23  ;;  %v6410_v43 = vpop.f32.mrb[175].mxu1 }
 0x447   :  { %v7473_v33 = vunpack.c.h.bf16 %v7461_v29  ;;  %7476 = vst [vmem:[#allocation22_spill] sm:$0xff] %v6400_v6  ;;  %v2399_v0 = vmul.f32 %v2335_v26, %v2335_v26  ;;  %v7478_v14 = vunpack.c.l.bf16 %v7457_v21  ;;  %v7479_v32 = vunpack.c.l.bf16 %v7461_v29  ;;  %7481 = vst [vmem:[#allocation40_spill] sm:$0xff] %v6410_v43 }
 0x448   :  { %vm6388_vm8 = vcmp.ne.f32.partialorder %v7470_v59, 0.0  ;;  %v3173_v42 = vmul.f32 %v3109_v38, %v3109_v38  ;;  %v6408_v59 = vpop.f32.mrb[175].mxu0  ;;  %v3364_v6 = vsel %vm6312_vm3, %v3300_v49, %v3172_v31  ;;  %v2273_v28 = vmax.f32 %v2154_v11, 0.0  ;;  %v6442_v49 = vpop.f32.mrb[176].mxu1 }
 0x449   :  { %vm6396_vm9 = vcmp.ne.f32.partialorder %v7473_v33, 0.0  ;;  %v2336_v34 = vsub.f32 %v7478_v14, %v2272_v36  ;;  %v3110_v41 = vsub.f32 %v7479_v32, %v3046_v8  ;;  %7480 = vst [vmem:[#allocation39_spill] sm:$0xff] %v6408_v59  ;;  %v2590_v33 = vsel %vm6304_vm2, %v2526_v19, %v2398_v17 }
 0x44a   :  { %v3047_v23 = vmax.f32 %v2928_v47, 0.0  ;;  %v2653_v26 = vadd.f32 %v2652_v39, %v2590_v33  ;;  %v3427_v38 = vadd.f32 %v3426_v13, %v3364_v6  ;;  %v2527_v53 = vmul.f32 25.0, %v2399_v0  ;;  %v7484_v13 = vld [vmem:[#allocation23_spill] sm:$0xff] }
 0x44b   :  { %v3301_v51 = vmul.f32 25.0, %v3173_v42  ;;  %v2400_v36 = vmul.f32 %v2336_v34, %v2336_v34  ;;  %v3174_v14 = vmul.f32 %v3110_v41, %v3110_v41  ;;  %v7482_v8 = vunpack.c.h.bf16 %v7457_v21 }
 0x44c   :  { %v7483_v59 = vunpack.c.h.bf16 %v7461_v29  ;;  %v2591_v52 = vsel %vm6336_vm4, %v2527_v53, %v2399_v0  ;;  %v2158_v39 = vadd.f32 %v6092_v5, %v5357_v44  ;;  %v7485_v17 = vunpack.c.l.bf16 %v7484_v13  ;;  %v7488_v29 = vld [vmem:[#allocation24_spill] sm:$0xff]  ;;  %v6440_v5 = vpop.f32.mrb[176].mxu0 }
 0x44d   :  { %v2337_v32 = vsub.f32 %v7482_v8, %v2273_v28  ;;  %v3365_v61 = vsel %vm6344_vm5, %v3301_v51, %v3173_v42  ;;  %v2932_v21 = vadd.f32 %v6094_v56, %v5360_v45  ;;  %v7489_v28 = vunpack.c.l.bf16 %v7488_v29  ;;  %v6444_v0 = vpop.f32.mrb[177].mxu0  ;;  %v6446_v56 = vpop.f32.mrb[177].mxu1 }
 0x44e   :  { %v3111_v43 = vsub.f32 %v7483_v59, %v3047_v23  ;;  %vm6428_vm10 = vcmp.ne.f32.partialorder %v7485_v17, 0.0  ;;  %v2654_v1 = vadd.f32 %v2653_v26, %v2591_v52  ;;  %v3428_v51 = vadd.f32 %v3427_v38, %v3365_v61  ;;  %v6468_v30 = vpop.f32.mrb[178].mxu0  ;;  %v6470_v38 = vpop.f32.mrb[178].mxu1 }
 0x44f   :  { %vm6436_vm11 = vcmp.ne.f32.partialorder %v7489_v28, 0.0  ;;  %v2528_v53 = vmul.f32 25.0, %v2400_v36  ;;  %v3302_v19 = vmul.f32 25.0, %v3174_v14  ;;  %v2401_v11 = vmul.f32 %v2337_v32, %v2337_v32  ;;  %v6472_v32 = vpop.f32.mrb[179].mxu0  ;;  %v6474_v52 = vpop.f32.mrb[179].mxu1 }
 0x450   :  { %v3175_v47 = vmul.f32 %v3111_v43, %v3111_v43  ;;  %v2274_v6 = vmax.f32 %v2158_v39, 0.0  ;;  %v3048_v23 = vmax.f32 %v2932_v21, 0.0  ;;  %v2160_v41 = vadd.f32 %v6096_v3, %v5363_v46 }
 0x451   :  { %v2592_v42 = vsel %vm6360_vm6, %v2528_v53, %v2400_v36  ;;  %v3366_v34 = vsel %vm6368_vm7, %v3302_v19, %v3174_v14  ;;  %v7492_v59 = vunpack.c.h.bf16 %v7484_v13  ;;  %v2934_v43 = vadd.f32 %v6098_v63, %v5374_v50  ;;  %v7500_v19 = vld [vmem:[#allocation25_spill] sm:$0xff] }
 0x452   :  { %v7495_v26 = vunpack.c.h.bf16 %v7488_v29  ;;  %v2655_v3 = vadd.f32 %v2654_v1, %v2592_v42  ;;  %v3429_v36 = vadd.f32 %v3428_v51, %v3366_v34  ;;  %v2529_v14 = vmul.f32 25.0, %v2401_v11 }
 0x453   :  { %vm6456_vm12 = vcmp.ne.f32.partialorder %v7492_v59, 0.0  ;;  %v3303_v8 = vmul.f32 25.0, %v3175_v47  ;;  %v7498_v63 = vmov %v7485_v17  ;;  %v7499_v39 = vmov %v7489_v28 }
 0x454   :  { %vm6464_vm13 = vcmp.ne.f32.partialorder %v7495_v26, 0.0  ;;  %v2338_v61 = vsub.f32 %v7498_v63, %v2274_v6  ;;  %v3112_v17 = vsub.f32 %v7499_v39, %v3048_v23  ;;  %v2275_v21 = vmax.f32 %v2160_v41, 0.0  ;;  %v7504_v23 = vld [vmem:[#allocation26_spill] sm:$0xff] }
 0x455   :  { %v3049_v28 = vmax.f32 %v2934_v43, 0.0  ;;  %v2593_v53 = vsel %vm6388_vm8, %v2529_v14, %v2401_v11  ;;  %v3367_v1 = vsel %vm6396_vm9, %v3303_v8, %v3175_v47  ;;  %v2162_v51 = vadd.f32 %v6104_v25, %v5357_v44 }
 0x456   :  { %v7501_v42 = vunpack.c.l.bf16 %v7500_v19  ;;  %v2936_v6 = vadd.f32 %v6106_v27, %v5360_v45  ;;  %v7505_v41 = vunpack.c.l.bf16 %v7504_v23  ;;  %v2656_v35 = vadd.f32 %v2655_v3, %v2593_v53 }
 0x457   :  { %v3430_v11 = vadd.f32 %v3429_v36, %v3367_v1  ;;  %v2402_v47 = vmul.f32 %v2338_v61, %v2338_v61  ;;  %v3176_v59 = vmul.f32 %v3112_v17, %v3112_v17  ;;  %v7508_v25 = vunpack.c.h.bf16 %v7484_v13  ;;  %v6520_v61 = vpop.f32.mrb[180].mxu0  ;;  %v6522_v17 = vpop.f32.mrb[180].mxu1 }
 0x458   :  { %vm6488_vm14 = vcmp.ne.f32.partialorder %v7501_v42, 0.0  ;;  %vm6496_vm15 = vcmp.ne.f32.partialorder %v7505_v41, 0.0  ;;  %v3113_v14 = vsub.f32 %v7495_v26, %v3049_v28  ;;  %v2276_v8 = vmax.f32 %v2162_v51, 0.0  ;;  %7515 = vst [vmem:[#allocation23_spill] sm:$0xff] %v6522_v17 }
 0x459   :  { %v2339_v43 = vsub.f32 %v7508_v25, %v2275_v21  ;;  %v3050_v63 = vmax.f32 %v2936_v6, 0.0  ;;  %v2530_v39 = vmul.f32 25.0, %v2402_v47  ;;  %v3304_v27 = vmul.f32 25.0, %v3176_v59  ;;  %v6528_v6 = vpop.f32.mrb[181].mxu0 }
 0x45a   :  { %v2164_v42 = vadd.f32 %v6128_v22, %v5363_v46  ;;  %v7509_v41 = vunpack.c.h.bf16 %v7500_v19  ;;  %v2938_v13 = vadd.f32 %v6130_v24, %v5374_v50  ;;  %v7512_v36 = vunpack.c.h.bf16 %v7504_v23  ;;  %7518 = vst [vmem:[#allocation24_spill] sm:$0xff] %v6528_v6  ;;  %v6530_v24 = vpop.f32.mrb[181].mxu1 }
 0x45b   :  { %v2403_v22 = vmul.f32 %v2339_v43, %v2339_v43  ;;  %v3177_v21 = vmul.f32 %v3113_v14, %v3113_v14  ;;  %v7516_v28 = vunpack.c.l.bf16 %v7500_v19  ;;  %v7517_v1 = vunpack.c.l.bf16 %v7504_v23  ;;  %7519 = vst [vmem:[#allocation25_spill] sm:$0xff] %v6530_v24  ;;  %v6536_v43 = vpop.f32.mrb[182].mxu0  ;;  %v6538_v14 = vpop.f32.mrb[182].mxu1 }
 0x45c   :  { %vm6508_vm0 = vcmp.ne.f32.partialorder %v7509_v41, 0.0  ;;  %vm6516_vm1 = vcmp.ne.f32.partialorder %v7512_v36, 0.0  ;;  %v2594_v25 = vsel %vm6428_vm10, %v2530_v39, %v2402_v47  ;;  %v3368_v26 = vsel %vm6436_vm11, %v3304_v27, %v3176_v59  ;;  %v6542_v6 = vpop.f32.mrb[183].mxu1 }
 0x45d   :  { %v2340_v53 = vsub.f32 %v7516_v28, %v2276_v8  ;;  %v3114_v51 = vsub.f32 %v7517_v1, %v3050_v63  ;;  %v2277_v41 = vmax.f32 %v2164_v42, 0.0  ;;  %v3051_v36 = vmax.f32 %v2938_v13, 0.0  ;;  %v6540_v1 = vpop.f32.mrb[183].mxu0  ;;  %v7522_v42 = vld [vmem:[#allocation27_spill] sm:$0xff] }
 0x45e   :  { %v2657_v8 = vadd.f32 %v2656_v35, %v2594_v25  ;;  %v3431_v28 = vadd.f32 %v3430_v11, %v3368_v26  ;;  %v2531_v17 = vmul.f32 25.0, %v2403_v22  ;;  %v3305_v63 = vmul.f32 25.0, %v3177_v21  ;;  %v6588_v62 = vpop.f32.mrb[184].mxu0 }
 0x45f   :  { %v2404_v24 = vmul.f32 %v2340_v53, %v2340_v53  ;;  %v3178_v31 = vmul.f32 %v3114_v51, %v3114_v51  ;;  %v7520_v47 = vunpack.c.h.bf16 %v7500_v19  ;;  %v7521_v59 = vunpack.c.h.bf16 %v7504_v23  ;;  %v7526_v23 = vld [vmem:[#allocation28_spill] sm:$0xff] }
 0x460   :  { %v2595_v27 = vsel %vm6456_vm12, %v2531_v17, %v2403_v22  ;;  %v3369_v35 = vsel %vm6464_vm13, %v3305_v63, %v3177_v21  ;;  %v2168_v11 = vadd.f32 %v6160_v48, %v5357_v44  ;;  %v7523_v13 = vunpack.c.l.bf16 %v7522_v42 }
 0x461   :  { %v2341_v57 = vsub.f32 %v7520_v47, %v2277_v41  ;;  %v3115_v39 = vsub.f32 %v7521_v59, %v3051_v36  ;;  %v2942_v19 = vadd.f32 %v6162_v12, %v5360_v45  ;;  %v7527_v51 = vunpack.c.l.bf16 %v7526_v23 }
 0x462   :  { %vm6556_vm2 = vcmp.ne.f32.partialorder %v7523_v13, 0.0  ;;  %v2658_v10 = vadd.f32 %v2657_v8, %v2595_v27  ;;  %v3432_v17 = vadd.f32 %v3431_v28, %v3369_v35  ;;  %v2532_v22 = vmul.f32 25.0, %v2404_v24  ;;  %v6592_v27 = vpop.f32.mrb[185].mxu0 }
 0x463   :  { %vm6564_vm3 = vcmp.ne.f32.partialorder %v7527_v51, 0.0  ;;  %v3306_v21 = vmul.f32 25.0, %v3178_v31  ;;  %v2405_v48 = vmul.f32 %v2341_v57, %v2341_v57  ;;  %v3179_v25 = vmul.f32 %v3115_v39, %v3115_v39  ;;  %7536 = vst [vmem:[#allocation26_spill] sm:$0xff] %v6592_v27 }
 0x464   :  { %v2278_v26 = vmax.f32 %v2168_v11, 0.0  ;;  %v3052_v41 = vmax.f32 %v2942_v19, 0.0  ;;  %v2596_v36 = vsel %vm6488_vm14, %v2532_v22, %v2404_v24  ;;  %v2170_v63 = vadd.f32 %v6164_v15, %v5363_v46  ;;  %v6590_v24 = vpop.f32.mrb[184].mxu1 }
 0x465   :  { %v3370_v12 = vsel %vm6496_vm15, %v3306_v21, %v3178_v31  ;;  %v7530_v47 = vunpack.c.h.bf16 %v7522_v42  ;;  %v2944_v28 = vadd.f32 %v6166_v40, %v5374_v50  ;;  %v7533_v57 = vunpack.c.h.bf16 %v7526_v23  ;;  %v6594_v35 = vpop.f32.mrb[185].mxu1  ;;  %v6600_v21 = vpop.f32.mrb[186].mxu0 }
 0x466   :  { %v2659_v15 = vadd.f32 %v2658_v10, %v2596_v36  ;;  %v3433_v31 = vadd.f32 %v3432_v17, %v3370_v12  ;;  %v2533_v59 = vmul.f32 25.0, %v2405_v48  ;;  %v3307_v39 = vmul.f32 25.0, %v3179_v25  ;;  %7537 = vst [vmem:[#allocation27_spill] sm:$0xff] %v6594_v35  ;;  %7540 = vst [vmem:[#allocation28_spill] sm:$0xff] %v6600_v21  ;;  %v7542_v12 = vld [vmem:[#allocation29_spill] sm:$0xff]  ;;  %v6624_v29 = vpop.f32.mrb[187].mxu0 }
 0x467   :  { %vm6576_vm4 = vcmp.ne.f32.partialorder %v7530_v47, 0.0  ;;  %vm6584_vm5 = vcmp.ne.f32.partialorder %v7533_v57, 0.0  ;;  %v7538_v40 = vmov %v7523_v13  ;;  %v7539_v13 = vmov %v7527_v51  ;;  %v6602_v47 = vpop.f32.mrb[186].mxu1  ;;  %7550 = vst [vmem:[#allocation29_spill] sm:$0xff] %v6624_v29 }
 0x468   :  { %v2342_v11 = vsub.f32 %v7538_v40, %v2278_v26  ;;  %v3116_v19 = vsub.f32 %v7539_v13, %v3052_v41  ;;  %v2279_v51 = vmax.f32 %v2170_v63, 0.0  ;;  %v3053_v22 = vmax.f32 %v2944_v28, 0.0  ;;  %7541 = vst [vmem:[#allocation41_spill] sm:$0xff] %v6602_v47  ;;  %v7546_v63 = vld [vmem:[#allocation30_spill] sm:$0xff] }
 0x469   :  { %v2597_v10 = vsel %vm6508_vm0, %v2533_v59, %v2405_v48  ;;  %v3371_v17 = vsel %vm6516_vm1, %v3307_v39, %v3179_v25  ;;  %v2172_v36 = vadd.f32 %v6172_v55, %v5357_v44  ;;  %v7543_v26 = vunpack.c.l.bf16 %v7542_v12  ;;  %v6626_v48 = vpop.f32.mrb[187].mxu1 }
 0x46a   :  { %v2946_v41 = vadd.f32 %v6174_v7, %v5360_v45  ;;  %v7547_v28 = vunpack.c.l.bf16 %v7546_v63  ;;  %7551 = vst [vmem:[#allocation30_spill] sm:$0xff] %v6626_v48  ;;  %v2660_v55 = vadd.f32 %v2659_v15, %v2597_v10  ;;  %v3434_v25 = vadd.f32 %v3433_v31, %v3371_v17  ;;  %v7557_v31 = vld [vmem:[#allocation15_spill] sm:$0xff] }
 0x46b   :  { %vm6612_vm6 = vcmp.ne.f32.partialorder %v7543_v26, 0.0  ;;  %v2406_v59 = vmul.f32 %v2342_v11, %v2342_v11  ;;  %v3180_v39 = vmul.f32 %v3116_v19, %v3116_v19  ;;  %v7552_v40 = vunpack.c.h.bf16 %v7522_v42 }
 0x46c   :  { %vm6620_vm7 = vcmp.ne.f32.partialorder %v7547_v28, 0.0  ;;  %v7553_v26 = vunpack.c.h.bf16 %v7526_v23  ;;  %v2280_v47 = vmax.f32 %v2172_v36, 0.0  ;;  %v3054_v21 = vmax.f32 %v2946_v41, 0.0  ;;  %v4474_v23 = vld [vmem:[%s7171_s0 + $0x98] sm:$0xff] }
 0x46d   :  { %v2343_v13 = vsub.f32 %v7552_v40, %v2279_v51  ;;  %v2534_v28 = vmul.f32 25.0, %v2406_v59  ;;  %v3308_v35 = vmul.f32 25.0, %v3180_v39  ;;  %v2174_v27 = vadd.f32 %v6196_v20, %v5363_v46 }
 0x46e   :  { %v3117_v7 = vsub.f32 %v7553_v26, %v3053_v22  ;;  %v7554_v29 = vunpack.c.h.bf16 %v7542_v12  ;;  %v2948_v42 = vadd.f32 %v7557_v31, %v5374_v50  ;;  %v7558_v11 = vunpack.c.h.bf16 %v7546_v63  ;;  %v6656_v26 = vpop.f32.mrb[188].mxu0  ;;  %v6658_v31 = vpop.f32.mrb[188].mxu1 }
 0x46f   :  { %v2407_v19 = vmul.f32 %v2343_v13, %v2343_v13  ;;  %v7561_v22 = vunpack.c.l.bf16 %v7542_v12  ;;  %v7562_v10 = vunpack.c.l.bf16 %v7546_v63  ;;  %v2598_v36 = vsel %vm6556_vm2, %v2534_v28, %v2406_v59 }
 0x470   :  { %vm6636_vm8 = vcmp.ne.f32.partialorder %v7554_v29, 0.0  ;;  %vm6644_vm9 = vcmp.ne.f32.partialorder %v7558_v11, 0.0  ;;  %v3181_v51 = vmul.f32 %v3117_v7, %v3117_v7  ;;  %v3372_v41 = vsel %vm6564_vm3, %v3308_v35, %v3180_v39 }
 0x471   :  { %v2344_v20 = vsub.f32 %v7561_v22, %v2280_v47  ;;  %v3118_v17 = vsub.f32 %v7562_v10, %v3054_v21  ;;  %v2281_v29 = vmax.f32 %v2174_v27, 0.0  ;;  %v3055_v40 = vmax.f32 %v2948_v42, 0.0  ;;  %v6660_v47 = vpop.f32.mrb[189].mxu0  ;;  %v6662_v22 = vpop.f32.mrb[189].mxu1  ;;  %v7566_v42 = vld [vmem:[#allocation16_spill] sm:$0xff]  ;;  %v7567_v10 = vld [vmem:[#allocation33_spill] sm:$0xff] }
 0x472   :  { %v2661_v13 = vadd.f32 %v2660_v55, %v2598_v36  ;;  %v3435_v7 = vadd.f32 %v3434_v25, %v3372_v41  ;;  %v2535_v11 = vmul.f32 25.0, %v2407_v19  ;;  %v3309_v48 = vmul.f32 25.0, %v3181_v51  ;;  %v6668_v39 = vpop.f32.mrb[190].mxu0  ;;  %v6670_v28 = vpop.f32.mrb[190].mxu1 }
 0x473   :  { %v2408_v21 = vmul.f32 %v2344_v20, %v2344_v20  ;;  %v3182_v53 = vmul.f32 %v3118_v17, %v3118_v17  ;;  %v7563_v59 = vunpack.c.h.bf16 %v7542_v12  ;;  %v7564_v27 = vunpack.c.h.bf16 %v7546_v63  ;;  %7565 = vst [vmem:[#allocation15_spill] sm:$0xff] %v6670_v28  ;;  %v6680_v17 = vpop.f32.mrb[191].mxu0  ;;  %v6682_v63 = vpop.f32.mrb[191].mxu1 }
 0x474   :  { %v2599_v55 = vsel %vm6576_vm4, %v2535_v11, %v2407_v19  ;;  %v3373_v25 = vsel %vm6584_vm5, %v3309_v48, %v3181_v51  ;;  %v2178_v20 = vadd.f32 %v7566_v42, %v5357_v44  ;;  %v2952_v12 = vadd.f32 %v7567_v10, %v5360_v45  ;;  %7568 = vst [vmem:[#allocation16_spill] sm:$0xff] %v6680_v17  ;;  %v7570_v51 = vld [vmem:[#allocation31_spill] sm:$0xff] }
 0x475   :  { %v2345_v33 = vsub.f32 %v7563_v59, %v2281_v29  ;;  %v3119_v35 = vsub.f32 %v7564_v27, %v3055_v40  ;;  %7569 = vst [vmem:[#allocation33_spill] sm:$0xff] %v6682_v63  ;;  %v2662_v36 = vadd.f32 %v2661_v13, %v2599_v55  ;;  %v3436_v41 = vadd.f32 %v3435_v7, %v3373_v25  ;;  %v7574_v13 = vld [vmem:[#allocation17_spill] sm:$0xff] }
 0x476   :  { %v2536_v29 = vmul.f32 25.0, %v2408_v21  ;;  %v3310_v40 = vmul.f32 25.0, %v3182_v53  ;;  %v2282_v19 = vmax.f32 %v2178_v20, 0.0  ;;  %v3056_v11 = vmax.f32 %v2952_v12, 0.0 }
 0x477   :  { %v2409_v59 = vmul.f32 %v2345_v33, %v2345_v33  ;;  %v3183_v8 = vmul.f32 %v3119_v35, %v3119_v35  ;;  %v7571_v27 = vunpack.c.l.bf16 %v7570_v51  ;;  %v2180_v7 = vadd.f32 %v7574_v13, %v5363_v46 }
 0x478   :  { %v2600_v34 = vsel %vm6612_vm6, %v2536_v29, %v2408_v21  ;;  %v3374_v48 = vsel %vm6620_vm7, %v3310_v40, %v3182_v53  ;;  %v7576_v21 = vld [vmem:[#allocation32_spill] sm:$0xff]  ;;  %v1920_v17 = vunpack.c.h.bf16 %v4474_v23 }
 0x479   :  { %vm6690_vm10 = vcmp.ne.f32.partialorder %v7571_v27, 0.0  ;;  %v2663_v55 = vadd.f32 %v2662_v36, %v2600_v34  ;;  %v3437_v33 = vadd.f32 %v3436_v41, %v3374_v48  ;;  %v2537_v35 = vmul.f32 25.0, %v2409_v59 }
 0x47a   :  { %v3311_v25 = vmul.f32 25.0, %v3183_v8  ;;  %v7575_v20 = vmov %v7571_v27  ;;  %v7577_v10 = vunpack.c.l.bf16 %v7576_v21  ;;  %v2283_v29 = vmax.f32 %v2180_v7, 0.0 }
 0x47b   :  { %v2346_v57 = vsub.f32 %v7575_v20, %v2282_v19  ;;  %v2601_v40 = vsel %vm6636_vm8, %v2537_v35, %v2409_v59  ;;  %v7581_v41 = vunpack.c.h.bf16 %v7570_v51  ;;  %v7586_v35 = vld [vmem:[#allocation34_spill] sm:$0xff]  ;;  %vm6758_vm0 = vcmp.ne.f32.partialorder %v1920_v17, 0.0 }
 0x47c   :  { %v3120_v3 = vsub.f32 %v7577_v10, %v3056_v11  ;;  %v7578_v53 = vmov %v7577_v10  ;;  %v3375_v36 = vsel %vm6644_vm9, %v3311_v25, %v3183_v8  ;;  %v7584_v11 = vld [vmem:[#allocation18_spill] sm:$0xff]  ;;  %v2664_v48 = vadd.f32 %v2663_v55, %v2601_v40 }
 0x47d   :  { %vm6702_vm11 = vcmp.ne.f32.partialorder %v7578_v53, 0.0  ;;  %vm6712_vm12 = vcmp.ne.f32.partialorder %v7581_v41, 0.0  ;;  %v2954_v34 = vadd.f32 %v7584_v11, %v5374_v50  ;;  %v3438_v27 = vadd.f32 %v3437_v33, %v3375_v36  ;;  %v4475_v55 = vld [vmem:[%s7172_s1 + $0x98] sm:$0xff] }
 0x47e   :  { %v2410_v13 = vmul.f32 %v2346_v57, %v2346_v57  ;;  %v3184_v20 = vmul.f32 %v3120_v3, %v3120_v3  ;;  %v7585_v7 = vmov %v7581_v41  ;;  %v1919_v8 = vunpack.c.l.bf16 %v4474_v23  ;;  %v7587_v57 = vld [vmem:[#allocation35_spill] sm:$0xff] }
 0x47f   :  { %v2347_v15 = vsub.f32 %v7585_v7, %v2283_v29  ;;  %v3057_v59 = vmax.f32 %v2954_v34, 0.0  ;;  %v2182_v25 = vadd.f32 %v7586_v35, %v5357_v44  ;;  %v2741_v33 = vunpack.c.l.bf16 %v4475_v55  ;;  %v4477_v41 = vld [vmem:[%s7172_s1 + $0xa0] sm:$0xff] }
 0x480   :  { %v2538_v10 = vmul.f32 25.0, %v2410_v13  ;;  %v3312_v53 = vmul.f32 25.0, %v3184_v20  ;;  %v2956_v51 = vadd.f32 %v7587_v57, %v5360_v45  ;;  %v7588_v29 = vunpack.c.h.bf16 %v7576_v21 }
 0x481   :  { %v2411_v3 = vmul.f32 %v2347_v15, %v2347_v15  ;;  %v2284_v11 = vmax.f32 %v2182_v25, 0.0  ;;  %vm6742_vm14 = vcmp.ne.f32.partialorder %v1919_v8, 0.0  ;;  %v7594_v25 = vld [vmem:[#allocation36_spill] sm:$0xff]  ;;  %vm6754_vm15 = vcmp.ne.f32.partialorder %v2741_v33, 0.0 }
 0x482   :  { %v3121_v40 = vsub.f32 %v7588_v29, %v3057_v59  ;;  %v7589_v36 = vmov %v7588_v29  ;;  %v2602_v34 = vsel %vm6690_vm10, %v2538_v10, %v2410_v13  ;;  %v3376_v7 = vsel %vm6702_vm11, %v3312_v53, %v3184_v20  ;;  %v7595_v20 = vld [vmem:[#allocation37_spill] sm:$0xff] }
 0x483   :  { %vm6734_vm13 = vcmp.ne.f32.partialorder %v7589_v36, 0.0  ;;  %v3058_v15 = vmax.f32 %v2956_v51, 0.0  ;;  %v2665_v57 = vadd.f32 %v2664_v48, %v2602_v34  ;;  %v3439_v59 = vadd.f32 %v3438_v27, %v3376_v7 }
 0x484   :  { %v2539_v29 = vmul.f32 25.0, %v2411_v3  ;;  %v3185_v21 = vmul.f32 %v3121_v40, %v3121_v40  ;;  %v2348_v36 = vsub.f32 %v1919_v8, %v2284_v11  ;;  %v2184_v28 = vadd.f32 %v7594_v25, %v5363_v46 }
 0x485   :  { %v3122_v63 = vsub.f32 %v2741_v33, %v3058_v15  ;;  %v2742_v13 = vunpack.c.h.bf16 %v4475_v55  ;;  %v2958_v10 = vadd.f32 %v7595_v20, %v5374_v50  ;;  %v2188_v33 = vadd.f32 %v6292_v18, %v5357_v44 }
 0x486   :  { %v2603_v42 = vsel %vm6712_vm12, %v2539_v29, %v2411_v3  ;;  %v3313_v12 = vmul.f32 25.0, %v3185_v21  ;;  %v2412_v51 = vmul.f32 %v2348_v36, %v2348_v36  ;;  %v2285_v27 = vmax.f32 %v2184_v28, 0.0  ;;  %v4476_v28 = vld [vmem:[%s7171_s0 + $0xa0] sm:$0xff] }
 0x487   :  { %v2666_v53 = vadd.f32 %v2665_v57, %v2603_v42  ;;  %v3186_v48 = vmul.f32 %v3122_v63, %v3122_v63  ;;  %v3059_v19 = vmax.f32 %v2958_v10, 0.0  ;;  %v1921_v63 = vunpack.c.l.bf16 %v4476_v28 }
 0x488   :  { %v3377_v8 = vsel %vm6734_vm13, %v3313_v12, %v3185_v21  ;;  %v2540_v3 = vmul.f32 25.0, %v2412_v51  ;;  %v2349_v34 = vsub.f32 %v1920_v17, %v2285_v27  ;;  %v2743_v15 = vunpack.c.l.bf16 %v4477_v41 }
 0x489   :  { %v3440_v55 = vadd.f32 %v3439_v59, %v3377_v8  ;;  %v3314_v11 = vmul.f32 25.0, %v3186_v48  ;;  %v3123_v7 = vsub.f32 %v2742_v13, %v3059_v19  ;;  %v2962_v29 = vadd.f32 %v6294_v37, %v5360_v45 }
 0x48a   :  { %v2604_v57 = vsel %vm6742_vm14, %v2540_v3, %v2412_v51  ;;  %v2413_v59 = vmul.f32 %v2349_v34, %v2349_v34  ;;  %v2286_v42 = vmax.f32 %v2188_v33, 0.0  ;;  %vm3251_vm1 = vcmp.ne.f32.partialorder %v2742_v13, 0.0 }
 0x48b   :  { %v3378_v17 = vsel %vm6754_vm15, %v3314_v11, %v3186_v48  ;;  %v2667_v21 = vadd.f32 %v2666_v53, %v2604_v57  ;;  %v3187_v25 = vmul.f32 %v3123_v7, %v3123_v7  ;;  %v3060_v12 = vmax.f32 %v2962_v29, 0.0 }
 0x48c   :  { %v3441_v36 = vadd.f32 %v3440_v55, %v3378_v17  ;;  %v2541_v18 = vmul.f32 25.0, %v2413_v59  ;;  %v2350_v10 = vsub.f32 %v1921_v63, %v2286_v42  ;;  %v1922_v27 = vunpack.c.h.bf16 %v4476_v28 }
 0x48d   :  { %v3315_v20 = vmul.f32 25.0, %v3187_v25  ;;  %v2190_v35 = vadd.f32 %v6316_v9, %v5363_v46  ;;  %v3124_v48 = vsub.f32 %v2743_v15, %v3060_v12  ;;  %v2744_v8 = vunpack.c.h.bf16 %v4477_v41 }
 0x48e   :  { %v2605_v51 = vsel %vm6758_vm0, %v2541_v18, %v2413_v59  ;;  %v2964_v37 = vadd.f32 %v6318_v60, %v5374_v50  ;;  %v2414_v19 = vmul.f32 %v2350_v10, %v2350_v10  ;;  %vm6782_vm2 = vcmp.ne.f32.partialorder %v1921_v63, 0.0  ;;  %v4478_v63 = vld [vmem:[%s7171_s0 + $0xa8] sm:$0xff] }
 0x48f   :  { %v2668_v53 = vadd.f32 %v2667_v21, %v2605_v51  ;;  %v3379_v23 = vsel %vm3251_vm1, %v3315_v20, %v3187_v25  ;;  %v2287_v55 = vmax.f32 %v2190_v35, 0.0  ;;  %v3188_v11 = vmul.f32 %v3124_v48, %v3124_v48  ;;  %v4479_v59 = vld [vmem:[%s7172_s1 + $0xa8] sm:$0xff] }
 0x490   :  { %v3442_v13 = vadd.f32 %v3441_v36, %v3379_v23  ;;  %v3061_v34 = vmax.f32 %v2964_v37, 0.0  ;;  %v2542_v9 = vmul.f32 25.0, %v2414_v19  ;;  %vm6786_vm3 = vcmp.ne.f32.partialorder %v2743_v15, 0.0 }
 0x491   :  { %v2351_v7 = vsub.f32 %v1922_v27, %v2287_v55  ;;  %vm6790_vm4 = vcmp.ne.f32.partialorder %v1922_v27, 0.0  ;;  %v3316_v60 = vmul.f32 25.0, %v3188_v11  ;;  %v1923_v41 = vunpack.c.l.bf16 %v4478_v63 }
 0x492   :  { %v3125_v33 = vsub.f32 %v2744_v8, %v3061_v34  ;;  %v2192_v57 = vadd.f32 %v6320_v54, %v5357_v44  ;;  %v2606_v15 = vsel %vm6782_vm2, %v2542_v9, %v2414_v19  ;;  %v2745_v29 = vunpack.c.l.bf16 %v4479_v59 }
 0x493   :  { %v2415_v17 = vmul.f32 %v2351_v7, %v2351_v7  ;;  %v2966_v21 = vadd.f32 %v6322_v58, %v5360_v45  ;;  %v2669_v36 = vadd.f32 %v2668_v53, %v2606_v15  ;;  %v3380_v25 = vsel %vm6786_vm3, %v3316_v60, %v3188_v11  ;;  %v4480_v60 = vld [vmem:[%s7171_s0 + $0xb0] sm:$0xff] }
 0x494   :  { %v3189_v42 = vmul.f32 %v3125_v33, %v3125_v33  ;;  %v2288_v18 = vmax.f32 %v2192_v57, 0.0  ;;  %v3443_v12 = vadd.f32 %v3442_v13, %v3380_v25  ;;  %vm3253_vm5 = vcmp.ne.f32.partialorder %v2744_v8, 0.0  ;;  %v4481_v15 = vld [vmem:[%s7172_s1 + $0xb0] sm:$0xff] }
 0x495   :  { %v2543_v54 = vmul.f32 25.0, %v2415_v17  ;;  %v3062_v20 = vmax.f32 %v2966_v21, 0.0  ;;  %v1924_v35 = vunpack.c.h.bf16 %v4478_v63  ;;  %v2194_v51 = vadd.f32 %v6324_v4, %v5363_v46 }
 0x496   :  { %v3317_v10 = vmul.f32 25.0, %v3189_v42  ;;  %v2352_v27 = vsub.f32 %v1923_v41, %v2288_v18  ;;  %v2746_v37 = vunpack.c.h.bf16 %v4479_v59  ;;  %v2968_v53 = vadd.f32 %v6326_v2, %v5374_v50  ;;  %v7612_v59 = vld [vmem:[#allocation19_spill] sm:$0xff] }
 0x497   :  { %v2607_v48 = vsel %vm6790_vm4, %v2543_v54, %v2415_v17  ;;  %v3126_v58 = vsub.f32 %v2745_v29, %v3062_v20  ;;  %v2289_v13 = vmax.f32 %v2194_v51, 0.0  ;;  %vm6814_vm6 = vcmp.ne.f32.partialorder %v1923_v41, 0.0 }
 0x498   :  { %v2670_v23 = vadd.f32 %v2669_v36, %v2607_v48  ;;  %v3381_v19 = vsel %vm3253_vm5, %v3317_v10, %v3189_v42  ;;  %v2416_v55 = vmul.f32 %v2352_v27, %v2352_v27  ;;  %v3063_v34 = vmax.f32 %v2968_v53, 0.0  ;;  %v7613_v27 = vld [vmem:[#allocation20_spill] sm:$0xff]  ;;  %v7614_v53 = vld [vmem:[#allocation21_spill] sm:$0xff] }
 0x499   :  { %v3444_v8 = vadd.f32 %v3443_v12, %v3381_v19  ;;  %v3190_v11 = vmul.f32 %v3126_v58, %v3126_v58  ;;  %vm6818_vm7 = vcmp.ne.f32.partialorder %v2745_v29, 0.0  ;;  %v2353_v40 = vsub.f32 %v1924_v35, %v2289_v13 }
 0x49a   :  { %v2544_v4 = vmul.f32 25.0, %v2416_v55  ;;  %vm6822_vm8 = vcmp.ne.f32.partialorder %v1924_v35, 0.0  ;;  %v3127_v28 = vsub.f32 %v2746_v37, %v3063_v34  ;;  %v1925_v33 = vunpack.c.l.bf16 %v4480_v60 }
 0x49b   :  { %v3318_v2 = vmul.f32 25.0, %v3190_v11  ;;  %v2198_v63 = vadd.f32 %v6372_v16, %v5357_v44  ;;  %v2417_v57 = vmul.f32 %v2353_v40, %v2353_v40  ;;  %v2747_v17 = vunpack.c.l.bf16 %v4481_v15 }
 0x49c   :  { %v2608_v41 = vsel %vm6814_vm6, %v2544_v4, %v2416_v55  ;;  %v2972_v29 = vadd.f32 %v7612_v59, %v5360_v45  ;;  %v3191_v25 = vmul.f32 %v3127_v28, %v3127_v28  ;;  %vm3255_vm9 = vcmp.ne.f32.partialorder %v2746_v37, 0.0 }
 0x49d   :  { %v2671_v21 = vadd.f32 %v2670_v23, %v2608_v41  ;;  %v3382_v36 = vsel %vm6818_vm7, %v3318_v2, %v3190_v11  ;;  %v2290_v42 = vmax.f32 %v2198_v63, 0.0  ;;  %v2545_v16 = vmul.f32 25.0, %v2417_v57  ;;  %v7621_v63 = vld [vmem:[#allocation22_spill] sm:$0xff] }
 0x49e   :  { %v3445_v18 = vadd.f32 %v3444_v8, %v3382_v36  ;;  %v3064_v12 = vmax.f32 %v2972_v29, 0.0  ;;  %v3319_v54 = vmul.f32 25.0, %v3191_v25  ;;  %v1926_v10 = vunpack.c.h.bf16 %v4480_v60  ;;  %v4482_v60 = vld [vmem:[%s7171_s0 + $0xb8] sm:$0xff] }
 0x49f   :  { %v2354_v20 = vsub.f32 %v1925_v33, %v2290_v42  ;;  %v2200_v35 = vadd.f32 %v7613_v27, %v5363_v46  ;;  %v2609_v51 = vsel %vm6822_vm8, %v2545_v16, %v2417_v57  ;;  %v2748_v58 = vunpack.c.h.bf16 %v4481_v15  ;;  %v7622_v29 = vld [vmem:[#allocation38_spill] sm:$0xff] }
 0x4a0   :  { %v3128_v48 = vsub.f32 %v2747_v17, %v3064_v12  ;;  %v2974_v23 = vadd.f32 %v7614_v53, %v5374_v50  ;;  %v2672_v19 = vadd.f32 %v2671_v21, %v2609_v51  ;;  %v3383_v55 = vsel %vm3255_vm9, %v3319_v54, %v3191_v25 }
 0x4a1   :  { %v2418_v13 = vmul.f32 %v2354_v20, %v2354_v20  ;;  %v2291_v8 = vmax.f32 %v2200_v35, 0.0  ;;  %v3446_v37 = vadd.f32 %v3445_v18, %v3383_v55  ;;  %vm6846_vm10 = vcmp.ne.f32.partialorder %v1925_v33, 0.0  ;;  %v7623_v35 = vld [vmem:[#allocation39_spill] sm:$0xff] }
 0x4a2   :  { %v3192_v11 = vmul.f32 %v3128_v48, %v3128_v48  ;;  %v3065_v34 = vmax.f32 %v2974_v23, 0.0  ;;  %vm6850_vm11 = vcmp.ne.f32.partialorder %v2747_v17, 0.0  ;;  %vm6854_vm12 = vcmp.ne.f32.partialorder %v1926_v10, 0.0  ;;  %v4483_v17 = vld [vmem:[%s7172_s1 + $0xb8] sm:$0xff] }
 0x4a3   :  { %v2546_v4 = vmul.f32 25.0, %v2418_v13  ;;  %v2355_v40 = vsub.f32 %v1926_v10, %v2291_v8  ;;  %v1927_v33 = vunpack.c.l.bf16 %v4482_v60  ;;  %v2202_v41 = vadd.f32 %v7621_v63, %v5357_v44 }
 0x4a4   :  { %v3320_v2 = vmul.f32 25.0, %v3192_v11  ;;  %v3129_v28 = vsub.f32 %v2748_v58, %v3065_v34  ;;  %v2749_v59 = vunpack.c.l.bf16 %v4483_v17  ;;  %v2976_v21 = vadd.f32 %v7622_v29, %v5360_v45 }
 0x4a5   :  { %v2610_v57 = vsel %vm6846_vm10, %v2546_v4, %v2418_v13  ;;  %v2419_v15 = vmul.f32 %v2355_v40, %v2355_v40  ;;  %v2292_v18 = vmax.f32 %v2202_v41, 0.0  ;;  %vm3257_vm13 = vcmp.ne.f32.partialorder %v2748_v58, 0.0 }
 0x4a6   :  { %v2673_v36 = vadd.f32 %v2672_v19, %v2610_v57  ;;  %v3384_v25 = vsel %vm6850_vm11, %v3320_v2, %v3192_v11  ;;  %v3193_v42 = vmul.f32 %v3129_v28, %v3129_v28  ;;  %v3066_v54 = vmax.f32 %v2976_v21, 0.0  ;;  %v7624_v19 = vld [vmem:[#allocation40_spill] sm:$0xff] }
 0x4a7   :  { %v3447_v16 = vadd.f32 %v3446_v37, %v3384_v25  ;;  %v2547_v12 = vmul.f32 25.0, %v2419_v15  ;;  %v2356_v10 = vsub.f32 %v1927_v33, %v2292_v18  ;;  %v1928_v27 = vunpack.c.h.bf16 %v4482_v60 }
 0x4a8   :  { %v3321_v20 = vmul.f32 25.0, %v3193_v42  ;;  %v2204_v51 = vadd.f32 %v7623_v35, %v5363_v46  ;;  %v3130_v53 = vsub.f32 %v2749_v59, %v3066_v54  ;;  %v2750_v23 = vunpack.c.h.bf16 %v4483_v17  ;;  %v4485_v17 = vld [vmem:[%s7172_s1 + $0xc0] sm:$0xff] }
 0x4a9   :  { %v2611_v48 = vsel %vm6854_vm12, %v2547_v12, %v2419_v15  ;;  %v2978_v55 = vadd.f32 %v7624_v19, %v5374_v50  ;;  %v2420_v37 = vmul.f32 %v2356_v10, %v2356_v10  ;;  %vm6878_vm14 = vcmp.ne.f32.partialorder %v1927_v33, 0.0  ;;  %v4484_v33 = vld [vmem:[%s7171_s0 + $0xc0] sm:$0xff] }
 0x4aa   :  { %v2674_v13 = vadd.f32 %v2673_v36, %v2611_v48  ;;  %v3385_v8 = vsel %vm3257_vm13, %v3321_v20, %v3193_v42  ;;  %v2293_v3 = vmax.f32 %v2204_v51, 0.0  ;;  %v3194_v34 = vmul.f32 %v3130_v53, %v3130_v53 }
 0x4ab   :  { %v3448_v58 = vadd.f32 %v3447_v16, %v3385_v8  ;;  %v3067_v4 = vmax.f32 %v2978_v55, 0.0  ;;  %v2548_v9 = vmul.f32 25.0, %v2420_v37  ;;  %vm6882_vm15 = vcmp.ne.f32.partialorder %v2749_v59, 0.0 }
 0x4ac   :  { %v2357_v7 = vsub.f32 %v1928_v27, %v2293_v3  ;;  %vm6886_vm0 = vcmp.ne.f32.partialorder %v1928_v27, 0.0  ;;  %v3322_v28 = vmul.f32 25.0, %v3194_v34  ;;  %v1929_v63 = vunpack.c.l.bf16 %v4484_v33 }
 0x4ad   :  { %v3131_v60 = vsub.f32 %v2750_v23, %v3067_v4  ;;  %v2208_v41 = vadd.f32 %v6440_v5, %v5357_v44  ;;  %v2612_v57 = vsel %vm6878_vm14, %v2548_v9, %v2420_v37  ;;  %v2751_v59 = vunpack.c.l.bf16 %v4485_v17  ;;  %v4486_v4 = vld [vmem:[%s7171_s0 + $0xc8] sm:$0xff] }
 0x4ae   :  { %v2421_v15 = vmul.f32 %v2357_v7, %v2357_v7  ;;  %v2982_v29 = vadd.f32 %v6442_v49, %v5360_v45  ;;  %v2675_v21 = vadd.f32 %v2674_v13, %v2612_v57  ;;  %v3386_v36 = vsel %vm6882_vm15, %v3322_v28, %v3194_v34  ;;  %v4487_v28 = vld [vmem:[%s7172_s1 + $0xc8] sm:$0xff] }
 0x4af   :  { %v3195_v25 = vmul.f32 %v3131_v60, %v3131_v60  ;;  %v2294_v42 = vmax.f32 %v2208_v41, 0.0  ;;  %v3449_v18 = vadd.f32 %v3448_v58, %v3386_v36  ;;  %vm3259_vm1 = vcmp.ne.f32.partialorder %v2750_v23, 0.0 }
 0x4b0   :  { %v2549_v5 = vmul.f32 25.0, %v2421_v15  ;;  %v3068_v16 = vmax.f32 %v2982_v29, 0.0  ;;  %v1930_v20 = vunpack.c.h.bf16 %v4484_v33  ;;  %v2210_v10 = vadd.f32 %v6444_v0, %v5363_v46 }
 0x4b1   :  { %v3323_v12 = vmul.f32 25.0, %v3195_v25  ;;  %v2358_v54 = vsub.f32 %v1929_v63, %v2294_v42  ;;  %v2752_v35 = vunpack.c.h.bf16 %v4485_v17  ;;  %v2984_v51 = vadd.f32 %v6446_v56, %v5374_v50 }
 0x4b2   :  { %v2613_v27 = vsel %vm6886_vm0, %v2549_v5, %v2421_v15  ;;  %v3132_v49 = vsub.f32 %v2751_v59, %v3068_v16  ;;  %v2295_v55 = vmax.f32 %v2210_v10, 0.0  ;;  %vm6910_vm2 = vcmp.ne.f32.partialorder %v1929_v63, 0.0 }
 0x4b3   :  { %v2676_v48 = vadd.f32 %v2675_v21, %v2613_v27  ;;  %v3387_v53 = vsel %vm3259_vm1, %v3323_v12, %v3195_v25  ;;  %v2422_v19 = vmul.f32 %v2358_v54, %v2358_v54  ;;  %v3069_v37 = vmax.f32 %v2984_v51, 0.0  ;;  %v4490_v27 = vld [vmem:[%s7171_s0 + $0xd8] sm:$0xff] }
 0x4b4   :  { %v3450_v23 = vadd.f32 %v3449_v18, %v3387_v53  ;;  %v3196_v8 = vmul.f32 %v3132_v49, %v3132_v49  ;;  %vm6914_vm3 = vcmp.ne.f32.partialorder %v2751_v59, 0.0  ;;  %v2359_v58 = vsub.f32 %v1930_v20, %v2295_v55  ;;  %v4488_v55 = vld [vmem:[%s7171_s0 + $0xd0] sm:$0xff] }
 0x4b5   :  { %v2550_v0 = vmul.f32 25.0, %v2422_v19  ;;  %vm6918_vm4 = vcmp.ne.f32.partialorder %v1930_v20, 0.0  ;;  %v3133_v34 = vsub.f32 %v2752_v35, %v3069_v37  ;;  %v1931_v9 = vunpack.c.l.bf16 %v4486_v4 }
 0x4b6   :  { %v3324_v56 = vmul.f32 25.0, %v3196_v8  ;;  %v2212_v40 = vadd.f32 %v6468_v30, %v5357_v44  ;;  %v2423_v2 = vmul.f32 %v2359_v58, %v2359_v58  ;;  %v2753_v60 = vunpack.c.l.bf16 %v4487_v28  ;;  %v7643_v58 = vld [vmem:[#allocation23_spill] sm:$0xff] }
 0x4b7   :  { %v2614_v7 = vsel %vm6910_vm2, %v2550_v0, %v2422_v19  ;;  %v2986_v33 = vadd.f32 %v6470_v38, %v5360_v45  ;;  %v3197_v57 = vmul.f32 %v3133_v34, %v3133_v34  ;;  %vm3261_vm5 = vcmp.ne.f32.partialorder %v2752_v35, 0.0  ;;  %v4489_v0 = vld [vmem:[%s7172_s1 + $0xd0] sm:$0xff] }
 0x4b8   :  { %v2677_v63 = vadd.f32 %v2676_v48, %v2614_v7  ;;  %v3388_v41 = vsel %vm6914_vm3, %v3324_v56, %v3196_v8  ;;  %v2296_v15 = vmax.f32 %v2212_v40, 0.0  ;;  %v2551_v30 = vmul.f32 25.0, %v2423_v2 }
 0x4b9   :  { %v3451_v17 = vadd.f32 %v3450_v23, %v3388_v41  ;;  %v3070_v59 = vmax.f32 %v2986_v33, 0.0  ;;  %v3325_v29 = vmul.f32 25.0, %v3197_v57  ;;  %v1932_v36 = vunpack.c.h.bf16 %v4486_v4  ;;  %v7644_v33 = vld [vmem:[#allocation24_spill] sm:$0xff] }
 0x4ba   :  { %v2360_v21 = vsub.f32 %v1931_v9, %v2296_v15  ;;  %v2214_v25 = vadd.f32 %v6472_v32, %v5363_v46  ;;  %v2615_v42 = vsel %vm6918_vm4, %v2551_v30, %v2423_v2  ;;  %v2754_v18 = vunpack.c.h.bf16 %v4487_v28 }
 0x4bb   :  { %v3134_v38 = vsub.f32 %v2753_v60, %v3070_v59  ;;  %v2988_v5 = vadd.f32 %v6474_v52, %v5374_v50  ;;  %v2678_v16 = vadd.f32 %v2677_v63, %v2615_v42  ;;  %v3389_v12 = vsel %vm3261_vm5, %v3325_v29, %v3197_v57 }
 0x4bc   :  { %v2424_v54 = vmul.f32 %v2360_v21, %v2360_v21  ;;  %v2297_v20 = vmax.f32 %v2214_v25, 0.0  ;;  %v3452_v10 = vadd.f32 %v3451_v17, %v3389_v12  ;;  %vm6942_vm6 = vcmp.ne.f32.partialorder %v1931_v9, 0.0  ;;  %v7645_v17 = vld [vmem:[#allocation25_spill] sm:$0xff] }
 0x4bd   :  { %v3198_v49 = vmul.f32 %v3134_v38, %v3134_v38  ;;  %v3071_v35 = vmax.f32 %v2988_v5, 0.0  ;;  %vm6946_vm7 = vcmp.ne.f32.partialorder %v2753_v60, 0.0  ;;  %vm6950_vm8 = vcmp.ne.f32.partialorder %v1932_v36, 0.0 }
 0x4be   :  { %v2552_v32 = vmul.f32 25.0, %v2424_v54  ;;  %v2361_v48 = vsub.f32 %v1932_v36, %v2297_v20  ;;  %v1933_v23 = vunpack.c.l.bf16 %v4488_v55  ;;  %v2218_v13 = vadd.f32 %v6520_v61, %v5357_v44 }
 0x4bf   :  { %v3326_v52 = vmul.f32 25.0, %v3198_v49  ;;  %v3135_v19 = vsub.f32 %v2754_v18, %v3071_v35  ;;  %v2755_v3 = vunpack.c.l.bf16 %v4489_v0  ;;  %v2992_v11 = vadd.f32 %v7643_v58, %v5360_v45 }
 0x4c0   :  { %v2616_v8 = vsel %vm6942_vm6, %v2552_v32, %v2424_v54  ;;  %v2425_v37 = vmul.f32 %v2361_v48, %v2361_v48  ;;  %v2298_v9 = vmax.f32 %v2218_v13, 0.0  ;;  %vm3263_vm9 = vcmp.ne.f32.partialorder %v2754_v18, 0.0  ;;  %v4491_v48 = vld [vmem:[%s7172_s1 + $0xd8] sm:$0xff] }
 0x4c1   :  { %v2679_v56 = vadd.f32 %v2678_v16, %v2616_v8  ;;  %v3390_v34 = vsel %vm6946_vm7, %v3326_v52, %v3198_v49  ;;  %v3199_v4 = vmul.f32 %v3135_v19, %v3135_v19  ;;  %v3072_v7 = vmax.f32 %v2992_v11, 0.0 }
 0x4c2   :  { %v3453_v40 = vadd.f32 %v3452_v10, %v3390_v34  ;;  %v2553_v61 = vmul.f32 25.0, %v2425_v37  ;;  %v2362_v28 = vsub.f32 %v1933_v23, %v2298_v9  ;;  %v1934_v60 = vunpack.c.h.bf16 %v4488_v55 }
 0x4c3   :  { %v3327_v2 = vmul.f32 25.0, %v3199_v4  ;;  %v2220_v63 = vadd.f32 %v7644_v33, %v5363_v46  ;;  %v3136_v57 = vsub.f32 %v2755_v3, %v3072_v7  ;;  %v2756_v15 = vunpack.c.h.bf16 %v4489_v0 }
 0x4c4   :  { %v2617_v41 = vsel %vm6950_vm8, %v2553_v61, %v2425_v37  ;;  %v2994_v30 = vadd.f32 %v7645_v17, %v5374_v50  ;;  %v2426_v21 = vmul.f32 %v2362_v28, %v2362_v28  ;;  %vm6974_vm10 = vcmp.ne.f32.partialorder %v1933_v23, 0.0  ;;  %v4492_v17 = vld [vmem:[%s7171_s0 + $0xe0] sm:$0xff] }
 0x4c5   :  { %v2680_v59 = vadd.f32 %v2679_v56, %v2617_v41  ;;  %v3391_v29 = vsel %vm3263_vm9, %v3327_v2, %v3199_v4  ;;  %v2299_v36 = vmax.f32 %v2220_v63, 0.0  ;;  %v3200_v38 = vmul.f32 %v3136_v57, %v3136_v57 }
 0x4c6   :  { %v3454_v25 = vadd.f32 %v3453_v40, %v3391_v29  ;;  %v3073_v18 = vmax.f32 %v2994_v30, 0.0  ;;  %v2554_v5 = vmul.f32 25.0, %v2426_v21  ;;  %vm6978_vm11 = vcmp.ne.f32.partialorder %v2755_v3, 0.0 }
 0x4c7   :  { %v2363_v12 = vsub.f32 %v1934_v60, %v2299_v36  ;;  %vm6982_vm12 = vcmp.ne.f32.partialorder %v1934_v60, 0.0  ;;  %v3328_v20 = vmul.f32 25.0, %v3200_v38  ;;  %v1935_v49 = vunpack.c.l.bf16 %v4490_v27  ;;  %v4493_v36 = vld [vmem:[%s7172_s1 + $0xe0] sm:$0xff] }
 0x4c8   :  { %v3137_v10 = vsub.f32 %v2756_v15, %v3073_v18  ;;  %v2222_v35 = vadd.f32 %v6536_v43, %v5357_v44  ;;  %v2618_v32 = vsel %vm6974_vm10, %v2554_v5, %v2426_v21  ;;  %v2757_v53 = vunpack.c.l.bf16 %v4491_v48 }
 0x4c9   :  { %v2427_v51 = vmul.f32 %v2363_v12, %v2363_v12  ;;  %v2996_v52 = vadd.f32 %v6538_v14, %v5360_v45  ;;  %v2681_v19 = vadd.f32 %v2680_v59, %v2618_v32  ;;  %v3392_v55 = vsel %vm6978_vm11, %v3328_v20, %v3200_v38 }
 0x4ca   :  { %v3201_v23 = vmul.f32 %v3137_v10, %v3137_v10  ;;  %v2300_v13 = vmax.f32 %v2222_v35, 0.0  ;;  %v3455_v8 = vadd.f32 %v3454_v25, %v3392_v55  ;;  %vm3265_vm13 = vcmp.ne.f32.partialorder %v2756_v15, 0.0 }
 0x4cb   :  { %v2555_v43 = vmul.f32 25.0, %v2427_v51  ;;  %v3074_v37 = vmax.f32 %v2996_v52, 0.0  ;;  %v1936_v58 = vunpack.c.h.bf16 %v4490_v27  ;;  %v2224_v11 = vadd.f32 %v6540_v1, %v5363_v46 }
 0x4cc   :  { %v3329_v0 = vmul.f32 25.0, %v3201_v23  ;;  %v2364_v3 = vsub.f32 %v1935_v49, %v2300_v13  ;;  %v2758_v34 = vunpack.c.h.bf16 %v4491_v48  ;;  %v2998_v4 = vadd.f32 %v6542_v6, %v5374_v50  ;;  %v7659_v48 = vld [vmem:[#allocation27_spill] sm:$0xff] }
 0x4cd   :  { %v2619_v56 = vsel %vm6982_vm12, %v2555_v43, %v2427_v51  ;;  %v3138_v14 = vsub.f32 %v2757_v53, %v3074_v37  ;;  %v2301_v7 = vmax.f32 %v2224_v11, 0.0  ;;  %vm7006_vm14 = vcmp.ne.f32.partialorder %v1935_v49, 0.0  ;;  %v7658_v49 = vld [vmem:[#allocation26_spill] sm:$0xff] }
 0x4ce   :  { %v2682_v9 = vadd.f32 %v2681_v19, %v2619_v56  ;;  %v3393_v40 = vsel %vm3265_vm13, %v3329_v0, %v3201_v23  ;;  %v2428_v61 = vmul.f32 %v2364_v3, %v2364_v3  ;;  %v3075_v33 = vmax.f32 %v2998_v4, 0.0 }
 0x4cf   :  { %v3456_v2 = vadd.f32 %v3455_v8, %v3393_v40  ;;  %v3202_v60 = vmul.f32 %v3138_v14, %v3138_v14  ;;  %vm7010_vm15 = vcmp.ne.f32.partialorder %v2757_v53, 0.0  ;;  %v2365_v41 = vsub.f32 %v1936_v58, %v2301_v7  ;;  %v4497_v8 = vld [vmem:[%s7172_s1 + $0xf0] sm:$0xff] }
 0x4d0   :  { %v2556_v1 = vmul.f32 25.0, %v2428_v61  ;;  %vm7014_vm0 = vcmp.ne.f32.partialorder %v1936_v58, 0.0  ;;  %v3139_v15 = vsub.f32 %v2758_v34, %v3075_v33  ;;  %v1937_v30 = vunpack.c.l.bf16 %v4492_v17 }
 0x4d1   :  { %v3330_v6 = vmul.f32 25.0, %v3202_v60  ;;  %v2228_v59 = vadd.f32 %v6588_v62, %v5357_v44  ;;  %v2429_v21 = vmul.f32 %v2365_v41, %v2365_v41  ;;  %v2759_v25 = vunpack.c.l.bf16 %v4493_v36 }
 0x4d2   :  { %v2620_v29 = vsel %vm7006_vm14, %v2556_v1, %v2428_v61  ;;  %v3002_v42 = vadd.f32 %v6590_v24, %v5360_v45  ;;  %v3203_v5 = vmul.f32 %v3139_v15, %v3139_v15  ;;  %vm3267_vm1 = vcmp.ne.f32.partialorder %v2758_v34, 0.0  ;;  %v4494_v34 = vld [vmem:[%s7171_s0 + $0xe8] sm:$0xff] }
 0x4d3   :  { %v2683_v38 = vadd.f32 %v2682_v9, %v2620_v29  ;;  %v3394_v18 = vsel %vm7010_vm15, %v3330_v6, %v3202_v60  ;;  %v2302_v16 = vmax.f32 %v2228_v59, 0.0  ;;  %v2557_v62 = vmul.f32 25.0, %v2429_v21  ;;  %v7666_v9 = vld [vmem:[#allocation28_spill] sm:$0xff]  ;;  %v7667_v60 = vld [vmem:[#allocation41_spill] sm:$0xff] }
 0x4d4   :  { %v3457_v12 = vadd.f32 %v3456_v2, %v3394_v18  ;;  %v3076_v54 = vmax.f32 %v3002_v42, 0.0  ;;  %v3331_v20 = vmul.f32 25.0, %v3203_v5  ;;  %v1938_v27 = vunpack.c.h.bf16 %v4492_v17  ;;  %v4495_v2 = vld [vmem:[%s7172_s1 + $0xe8] sm:$0xff]  ;;  %v7669_v18 = vld [vmem:[#allocation30_spill] sm:$0xff] }
 0x4d5   :  { %v2366_v10 = vsub.f32 %v1937_v30, %v2302_v16  ;;  %v2230_v35 = vadd.f32 %v7658_v49, %v5363_v46  ;;  %v2621_v32 = vsel %vm7014_vm0, %v2557_v62, %v2429_v21  ;;  %v2760_v51 = vunpack.c.h.bf16 %v4493_v36  ;;  %v7668_v21 = vld [vmem:[#allocation29_spill] sm:$0xff] }
 0x4d6   :  { %v3140_v24 = vsub.f32 %v2759_v25, %v3076_v54  ;;  %v3004_v53 = vadd.f32 %v7659_v48, %v5374_v50  ;;  %v2684_v52 = vadd.f32 %v2683_v38, %v2621_v32  ;;  %v3395_v19 = vsel %vm3267_vm1, %v3331_v20, %v3203_v5 }
 0x4d7   :  { %v2430_v55 = vmul.f32 %v2366_v10, %v2366_v10  ;;  %v2303_v23 = vmax.f32 %v2230_v35, 0.0  ;;  %v3458_v13 = vadd.f32 %v3457_v12, %v3395_v19  ;;  %vm7038_vm2 = vcmp.ne.f32.partialorder %v1937_v30, 0.0 }
 0x4d8   :  { %v3204_v43 = vmul.f32 %v3140_v24, %v3140_v24  ;;  %v3077_v37 = vmax.f32 %v3004_v53, 0.0  ;;  %vm7042_vm3 = vcmp.ne.f32.partialorder %v2759_v25, 0.0  ;;  %vm7046_vm4 = vcmp.ne.f32.partialorder %v1938_v27, 0.0 }
 0x4d9   :  { %v2558_v0 = vmul.f32 25.0, %v2430_v55  ;;  %v2367_v58 = vsub.f32 %v1938_v27, %v2303_v23  ;;  %v1939_v4 = vunpack.c.l.bf16 %v4494_v34  ;;  %v2232_v40 = vadd.f32 %v7666_v9, %v5357_v44 }
 0x4da   :  { %v3332_v56 = vmul.f32 25.0, %v3204_v43  ;;  %v3141_v14 = vsub.f32 %v2760_v51, %v3077_v37  ;;  %v2761_v28 = vunpack.c.l.bf16 %v4495_v2  ;;  %v3006_v33 = vadd.f32 %v7667_v60, %v5360_v45 }
 0x4db   :  { %v2622_v61 = vsel %vm7038_vm2, %v2558_v0, %v2430_v55  ;;  %v2431_v7 = vmul.f32 %v2367_v58, %v2367_v58  ;;  %v2304_v57 = vmax.f32 %v2232_v40, 0.0  ;;  %vm3269_vm5 = vcmp.ne.f32.partialorder %v2760_v51, 0.0 }
 0x4dc   :  { %v2685_v1 = vadd.f32 %v2684_v52, %v2622_v61  ;;  %v3396_v63 = vsel %vm7042_vm3, %v3332_v56, %v3204_v43  ;;  %v3205_v41 = vmul.f32 %v3141_v14, %v3141_v14  ;;  %v3078_v17 = vmax.f32 %v3006_v33, 0.0  ;;  %v4496_v52 = vld [vmem:[%s7171_s0 + $0xf0] sm:$0xff] }
 0x4dd   :  { %v3459_v6 = vadd.f32 %v3458_v13, %v3396_v63  ;;  %v2559_v15 = vmul.f32 25.0, %v2431_v7  ;;  %v2368_v59 = vsub.f32 %v1939_v4, %v2304_v57  ;;  %v1940_v29 = vunpack.c.h.bf16 %v4494_v34 }
 0x4de   :  { %v3333_v30 = vmul.f32 25.0, %v3205_v41  ;;  %v2234_v36 = vadd.f32 %v7668_v21, %v5363_v46  ;;  %v3142_v42 = vsub.f32 %v2761_v28, %v3078_v17  ;;  %v2762_v38 = vunpack.c.h.bf16 %v4495_v2  ;;  %v4498_v17 = vld [vmem:[%s7171_s0 + $0xf8] sm:$0xff]  ;;  %s4625_s0 = smov [#allocation8]  }
 0x4df   :  { %v2623_v25 = vsel %vm7046_vm4, %v2559_v15, %v2431_v7  ;;  %v3008_v5 = vadd.f32 %v7669_v18, %v5374_v50  ;;  %v2432_v62 = vmul.f32 %v2368_v59, %v2368_v59  ;;  %vm7070_vm6 = vcmp.ne.f32.partialorder %v1939_v4, 0.0  ;;  %v4499_v21 = vld [vmem:[%s7172_s1 + $0xf8] sm:$0xff]  ;;  %s3727_s1 = sshll.u32 %s4625_s0, 4  ;;  %s3728_s1 = int_to_ptr.vmem [resolvable:$true] %s3727_s1 }
 0x4e0   :  { %v2686_v16 = vadd.f32 %v2685_v1, %v2623_v25  ;;  %v3397_v12 = vsel %vm3269_vm5, %v3333_v30, %v3205_v41  ;;  %v2305_v54 = vmax.f32 %v2234_v36, 0.0  ;;  %v3206_v27 = vmul.f32 %v3142_v42, %v3142_v42  ;;  %v7680_v25 = vld [vmem:[#allocation15_spill] sm:$0xff]  ;;  %s4566_s4 = scalar_lea.vmem %s3728_s1, 32  ;;  %p4571_p11 = scmp.lt.s32.totalorder %s3728_s1, %s3728_s1 }
 0x4e1   :  { %v3460_v20 = vadd.f32 %v3459_v6, %v3397_v12  ;;  %v3079_v49 = vmax.f32 %v3008_v5, 0.0  ;;  %v2560_v35 = vmul.f32 25.0, %v2432_v62  ;;  %vm7074_vm7 = vcmp.ne.f32.partialorder %v2761_v28, 0.0  ;;  %p4567_p10 = scmp.ne.s32.totalorder %s3728_s1, %s4566_s4  ;;  %p4572_p12 = scmp.lt.s32.totalorder %s4566_s4, %s4566_s4 }
 0x4e2   :  { %v2369_v24 = vsub.f32 %v1940_v29, %v2305_v54  ;;  %vm7078_vm8 = vcmp.ne.f32.partialorder %v1940_v29, 0.0  ;;  %v3334_v48 = vmul.f32 25.0, %v3206_v27  ;;  %v1941_v19 = vunpack.c.l.bf16 %v4496_v52 }
 0x4e3   :  { %v3143_v53 = vsub.f32 %v2762_v38, %v3079_v49  ;;  %v2238_v55 = vadd.f32 %v6656_v26, %v5357_v44  ;;  %v2624_v23 = vsel %vm7070_vm6, %v2560_v35, %v2432_v62  ;;  %v2763_v43 = vunpack.c.l.bf16 %v4497_v8  ;;  %v7684_v49 = vld [vmem:[#allocation33_spill] sm:$0xff]  ;;  %p4573_p13 = por %p4572_p12, %p4571_p11 }
 0x4e4   :  { %v2433_v13 = vmul.f32 %v2369_v24, %v2369_v24  ;;  %v3012_v37 = vadd.f32 %v6658_v31, %v5360_v45  ;;  %v2687_v0 = vadd.f32 %v2686_v16, %v2624_v23  ;;  %v3398_v3 = vsel %vm7074_vm7, %v3334_v48, %v3206_v27  ;;  %v7681_v16 = vld [vmem:[#allocation16_spill] sm:$0xff] }
 0x4e5   :  { %v3207_v58 = vmul.f32 %v3143_v53, %v3143_v53  ;;  %v2306_v11 = vmax.f32 %v2238_v55, 0.0  ;;  %v3461_v56 = vadd.f32 %v3460_v20, %v3398_v3  ;;  %vm3271_vm9 = vcmp.ne.f32.partialorder %v2762_v38, 0.0  ;;  %p4574_p0 = pnand %p4573_p13, %p4567_p10 }
 0x4e6   :  { %v2561_v26 = vmul.f32 25.0, %v2433_v13  ;;  %v3080_v14 = vmax.f32 %v3012_v37, 0.0  ;;  %v1942_v9 = vunpack.c.h.bf16 %v4496_v52  ;;  %v2240_v40 = vadd.f32 %v6660_v47, %v5363_v46 }
 0x4e7   :  { %v3335_v34 = vmul.f32 25.0, %v3207_v58  ;;  %v2370_v4 = vsub.f32 %v1941_v19, %v2306_v11  ;;  %vm7098_vm10 = vcmp.ne.f32.partialorder %v1941_v19, 0.0  ;;  %v2764_v7 = vunpack.c.h.bf16 %v4497_v8 }
 0x4e8   :  { %v3144_v31 = vsub.f32 %v2763_v43, %v3080_v14  ;;  %v3014_v2 = vadd.f32 %v6662_v22, %v5374_v50  ;;  %vm7104_vm11 = vcmp.ne.f32.partialorder %v2763_v43, 0.0  ;;  %v2307_v1 = vmax.f32 %v2240_v40, 0.0 }
 0x4e9   :  { %v3399_v28 = vsel %vm3271_vm9, %v3335_v34, %v3207_v58  ;;  %v2434_v60 = vmul.f32 %v2370_v4, %v2370_v4  ;;  %v2625_v63 = vsel %vm7078_vm8, %v2561_v26, %v2433_v13  ;;  %v1943_v22 = vunpack.c.l.bf16 %v4498_v17 }
 0x4ea   :  { %v3462_v47 = vadd.f32 %v3461_v56, %v3399_v28  ;;  %v3208_v41 = vmul.f32 %v3144_v31, %v3144_v31  ;;  %v3081_v57 = vmax.f32 %v3014_v2, 0.0  ;;  %v2371_v15 = vsub.f32 %v1942_v9, %v2307_v1 }
 0x4eb   :  { %v2562_v6 = vmul.f32 25.0, %v2434_v60  ;;  %v2242_v30 = vadd.f32 %v6668_v39, %v5357_v44  ;;  %v2765_v36 = vunpack.c.l.bf16 %v4499_v21  ;;  %v3016_v42 = vadd.f32 %v7680_v25, %v5360_v45 }
 0x4ec   :  { %v3336_v59 = vmul.f32 25.0, %v3208_v41  ;;  %v3145_v29 = vsub.f32 %v2764_v7, %v3081_v57  ;;  %v2435_v38 = vmul.f32 %v2371_v15, %v2371_v15  ;;  %v1944_v5 = vunpack.c.h.bf16 %v4498_v17 }
 0x4ed   :  { %v2308_v18 = vmax.f32 %v2242_v30, 0.0  ;;  %v2244_v12 = vadd.f32 %v7681_v16, %v5363_v46  ;;  %vm7122_vm12 = vcmp.ne.f32.partialorder %v1942_v9, 0.0  ;;  %v3082_v39 = vmax.f32 %v3016_v42, 0.0 }
 0x4ee   :  { %v3209_v44 = vmul.f32 %v3145_v29, %v3145_v29  ;;  %v2766_v54 = vunpack.c.h.bf16 %v4499_v21  ;;  %v2563_v20 = vmul.f32 25.0, %v2435_v38  ;;  %v3018_v35 = vadd.f32 %v7684_v49, %v5374_v50 }
 0x4ef   :  { %v2372_v10 = vsub.f32 %v1943_v22, %v2308_v18  ;;  %v2309_v27 = vmax.f32 %v2244_v12, 0.0  ;;  %v3400_v45 = vsel %vm7104_vm11, %v3336_v59, %v3208_v41  ;;  %vm7130_vm13 = vcmp.ne.f32.partialorder %v2764_v7, 0.0 }
 0x4f0   :  { %v3337_v46 = vmul.f32 25.0, %v3209_v44  ;;  %v3146_v24 = vsub.f32 %v2765_v36, %v3082_v39  ;;  %v3083_v53 = vmax.f32 %v3018_v35, 0.0  ;;  %v2626_v52 = vsel %vm7098_vm10, %v2562_v6, %v2434_v60 }
 0x4f1   :  { %v2436_v51 = vmul.f32 %v2372_v10, %v2372_v10  ;;  %v2373_v48 = vsub.f32 %v1944_v5, %v2309_v27  ;;  %vm7136_vm14 = vcmp.ne.f32.partialorder %v1943_v22, 0.0  ;;  %v2627_v50 = vsel %vm7122_vm12, %v2563_v20, %v2435_v38 }
 0x4f2   :  { %v3210_v19 = vmul.f32 %v3146_v24, %v3146_v24  ;;  %v2688_v23 = vadd.f32 %v2687_v0, %v2625_v63  ;;  %v3147_v43 = vsub.f32 %v2766_v54, %v3083_v53  ;;  %vm3274_vm15 = vcmp.ne.f32.partialorder %v2765_v36, 0.0 }
 0x4f3   :  { %v2564_v13 = vmul.f32 25.0, %v2436_v51  ;;  %v2437_v8 = vmul.f32 %v2373_v48, %v2373_v48  ;;  %v3401_v58 = vsel %vm7130_vm13, %v3337_v46, %v3209_v44  ;;  %v3463_v11 = vadd.f32 %v3462_v47, %v3400_v45 }
 0x4f4   :  { %v3338_v37 = vmul.f32 25.0, %v3210_v19  ;;  %v2689_v3 = vadd.f32 %v2688_v23, %v2626_v52  ;;  %v3211_v56 = vmul.f32 %v3147_v43, %v3147_v43  ;;  %vm2501_vm0 = vcmp.ne.f32.partialorder %v1944_v5, 0.0 }
 0x4f5   :  { %v2565_v26 = vmul.f32 25.0, %v2437_v8  ;;  %vm3275_vm1 = vcmp.ne.f32.partialorder %v2766_v54, 0.0  ;;  %v3464_v34 = vadd.f32 %v3463_v11, %v3401_v58  ;;  %v2628_v0 = vsel %vm7136_vm14, %v2564_v13, %v2436_v51 }
 0x4f6   :  { %v2690_v14 = vadd.f32 %v2689_v3, %v2627_v50  ;;  %v3339_v4 = vmul.f32 25.0, %v3211_v56  ;;  %v3402_v9 = vsel %vm3274_vm15, %v3338_v37, %v3210_v19 }
 0x4f7   :  { %v3465_v61 = vadd.f32 %v3464_v34, %v3402_v9  ;;  %v2629_v31 = vsel %vm2501_vm0, %v2565_v26, %v2437_v8 }
 0x4f8   :  { %v2691_v40 = vadd.f32 %v2690_v14, %v2628_v0  ;;  %v3403_v7 = vsel %vm3275_vm1, %v3339_v4, %v3211_v56 }
 0x4f9   :  { %v3466_v28 = vadd.f32 %v3465_v61, %v3403_v7 }
 0x4fa   :  { %v2692_v2 = vadd.f32 %v2691_v40, %v2629_v31 }
 0x4fc   :  { %2693 = vadd.xlane.f32.xlu0 %v2692_v2 }
 0x500   :  { %3467 = vadd.xlane.f32.xlu0 %v3466_v28 }
 0x501   :  { %4577 = shalt.err (!%p4574_p0)
}
 0x502   :  { %s4578_s8 = scalar_lea.hbm %s7184_s13, 32 }
 0x503   :  { %p4579_p1 = scmp.ne.s32.totalorder %s7184_s13, %s4578_s8  ;;  %p4582_p2 = scmp.lt.u32.totalorder %s4578_s8, %s7184_s13 }
 0x505   :  { %p4584_p3 = pnand %p4582_p2, %p4579_p1 }
 0x507   :  { %4587 = shalt.err (!%p4584_p3)
}
 0x508   :  { %3730 = dma.vmem_to_hbm [thread:$0]  %s3728_s1, 32, %s7184_s13, [#allocation4]   ;;  %v3606_v60 = vpop.xlane.xlu1 %3605  ;;  %v7689_v16 = vlaneseq }
 0x509   :  { %v3607_v33 = vrot.slane %v3606_v60, 4  ;;  %s4626_s25 = smov [#allocation9]  }
 0x50a   :  { %v3712_v12 = vand.u32 127, %v7689_v16  ;;  %s3737_s26 = sshll.u32 %s4626_s25, 4  ;;  %s3738_s26 = int_to_ptr.vmem [resolvable:$true] %s3737_s26 }
 0x50b   :  { %v3608_v1 = vadd.f32 %v3607_v33, %v3606_v60  ;;  %s4588_s24 = scalar_lea.vmem %s3738_s26, 16  ;;  %s4592_s29 = scalar_lea.vmem %s3738_s26, 32 }
 0x50c   :  { %vm3713_vm2 = vcmp.eq.s32.totalorder %v3712_v12, 0  ;;  %vm3716_vm3 = vcmp.eq.s32.totalorder %v3712_v12, 1  ;;  %p4589_p4 = scmp.ne.s32.totalorder %s3738_s26, %s4588_s24  ;;  %p4593_p5 = scmp.lt.s32.totalorder %s3738_s26, %s3738_s26 }
 0x50d   :  { %v3609_v57 = vrot.slane %v3608_v1, 2  ;;  %p4594_p6 = scmp.lt.s32.totalorder %s4592_s29, %s4588_s24 }
 0x50f   :  { %v3610_v59 = vadd.f32 %v3609_v57, %v3608_v1  ;;  %p4595_p7 = por %p4594_p6, %p4593_p5 }
 0x511   :  { %v3611_v42 = vrot.slane %v3610_v59, 1  ;;  %p4596_p8 = pnand %p4595_p7, %p4589_p4 }
 0x513   :  { %v3612_v5 = vadd.f32 %v3611_v42, %v3610_v59 }
 0x589   :  { %v2694_v63 = vpop.xlane.xlu0 %2693 }
 0x58a   :  { %v2695_v47 = vrot.slane %v2694_v63, 4 }
 0x58c   :  { %v2696_v41 = vadd.f32 %v2695_v47, %v2694_v63 }
 0x58d   :  { %v3468_v6 = vpop.xlane.xlu0 %3467 }
 0x58e   :  { %v2697_v15 = vrot.slane %v2696_v41, 2  ;;  %v3469_v17 = vrot.slane %v3468_v6, 4 }
 0x590   :  { %v3470_v22 = vadd.f32 %v3469_v17, %v3468_v6  ;;  %v2698_v30 = vadd.f32 %v2697_v15, %v2696_v41 }
 0x592   :  { %v3471_v29 = vrot.slane %v3470_v22, 2  ;;  %v2699_v21 = vrot.slane %v2698_v30, 1 }
 0x594   :  { %v3472_v36 = vadd.f32 %v3471_v29, %v3470_v22  ;;  %v2700_v25 = vadd.f32 %v2699_v21, %v2698_v30 }
 0x596   :  { %4273 = vpush %v2700_v25  ;;  %v3473_v38 = vrot.slane %v3472_v36, 1 }
 0x598   :  { %v3474_v18 = vadd.f32 %v3473_v38, %v3472_v36 }
 0x59a   :  { %4275 = vpush %v3474_v18 }
 0x59b   :  { %4277 = vpush %v3612_v5 }
 0x5c7   :  { %s4274_s13 = spop %4273 }
 0x5cb   :  { %s4276_s28 = spop %4275 }
 0x5cc   :  { %s3477_s12 = sadd.f32 %s4276_s28, %s4274_s13  ;;  %s4278_s10 = spop %4277 }
 0x5cd   :  { %v3717_v62 = vstv %s4278_s10 }
 0x5ce   :  { %v3714_v44 = vstv %s3477_s12  ;;  %v3718_v54 = vsel %vm3716_vm3, %v3717_v62, 0.0 }
 0x5cf   :  { %v3715_v39 = vsel %vm3713_vm2, %v3714_v44, 0.0 }
 0x5d0   :  { %v3719_v20 = vadd.f32 %v3718_v54, %v3715_v39 }
 0x5d2   :  { %3720 = vst [vmem:[#allocation9] sm:$0x1] %v3719_v20 }
 0x5d3   :  { %4599 = shalt.err (!%p4596_p8)
}
 0x5d4   :  { %s4600_s17 = scalar_lea.hbm %s7185_s14, 16 }
 0x5d5   :  { %p4601_p9 = scmp.ne.s32.totalorder %s7185_s14, %s4600_s17  ;;  %p4604_p10 = scmp.lt.u32.totalorder %s4600_s17, %s7185_s14 }
 0x5d7   :  { %p4606_p11 = pnand %p4604_p10, %p4601_p9 }
 0x5d9   :  { %4609 = shalt.err (!%p4606_p11)
}
 0x5da   :  { %3740 = dma.vmem_to_hbm [thread:$0]  %s3738_s26, 16, %s7185_s14, [#allocation10]  }
 0x5db   :  { %4614 = dma.done.wait [#allocation4], 32  }
 0x5dc   :  { %4615 = vsyncadd [#allocation4], 4294967264 }
 0x5dd   :  { %4616 = dma.done.wait [#allocation10], 16  }
 0x5de   :  { %4617 = vsyncadd [#allocation10], 4294967280 }
 0x5df   :  { %3747 = vsyncpa [#allocation3], 1 }
 0x5e0   :  { %3748 = vsyncpa [#allocation6], 1 }
 0x5e1   :  { %3749 = vsyncpa [#allocation4], 1 }
 0x5e2   :  { %3750 = vsyncpa [#allocation10], 1 }

// kernel: tpu_custom_call.1
= control target key start
LH: loop header
LB: loop body
LE: loop exit
PB: predicated region body
PF: predicated region fallthrough
CT: control target
= control target key end

     0   :  { %20 = vsyncpa [#allocation3], 0  ;;  %s7171_s0 = inlined_call_operand.vmem [shape: bf16[256,256], index: 0, kind: input, shape index: {}]   ;;  %s7172_s1 = inlined_call_operand.vmem [shape: bf16[256,256], index: 1, kind: input, shape index: {}]   ;;  %s7173_s2 = inlined_call_operand.vmem [shape: bf16[256,64], index: 2, kind: input, shape index: {}]   ;;  %s7174_s3 = inlined_call_operand.vmem [shape: bf16[256,64], index: 3, kind: input, shape index: {}]   ;;  %s7175_s4 = inlined_call_operand.vmem [shape: f32[1,64], index: 4, kind: input, shape index: {}]   ;;  %s7176_s5 = inlined_call_operand.hbm [shape: bf16[64,256], index: 5, kind: input, shape index: {}]   ;;  %s7177_s6 = inlined_call_operand.vmem [shape: f32[1,256], index: 6, kind: input, shape index: {}]   ;;  %s7178_s7 = inlined_call_operand.vmem [shape: bf16[256,64], index: 7, kind: input, shape index: {}]   ;;  %s7179_s8 = inlined_call_operand.vmem [shape: f32[1,64], index: 8, kind: input, shape index: {}]   ;;  %s7180_s9 = inlined_call_operand.hbm [shape: bf16[64,256], index: 9, kind: input, shape index: {}]   ;;  %s7181_s10 = inlined_call_operand.hbm [shape: bf16[64,256], index: 10, kind: input, shape index: {}]   ;;  %s7182_s11 = inlined_call_operand.vmem [shape: f32[1,256], index: 11, kind: input, shape index: {}]   ;;  %s7183_s12 = inlined_call_operand.vmem [shape: f32[1,256], index: 12, kind: input, shape index: {}]   ;;  %s7184_s13 = inlined_call_operand.hbm [shape: f32[1,1,256], index: 13, kind: output, shape index: {0}]   ;;  %s7185_s14 = inlined_call_operand.hbm [shape: f32[1,1,128], index: 14, kind: output, shape index: {1}]  }
   0x1   :  { %21 = vsyncpa [#allocation6], 0 }
   0x2   :  { %22 = vsyncpa [#allocation4], 0 }
   0x3   :  { %23 = vsyncpa [#allocation10], 0  ;;  %s4618_s29 = smov [#allocation5]   ;;  %s4619_s15 = smov [#allocation2]  }
   0x4   :  { %s57_s30 = sshll.u32 %s4618_s29, 4  ;;  %s39_s16 = sshll.u32 %s4619_s15, 4  ;;  %s58_s30 = int_to_ptr.vmem [resolvable:$true] %s57_s30  ;;  %s4702_s16 = int_to_ptr.vmem [resolvable:$true] %s39_s16 }
   0x5   :  { %s4500_s19 = scalar_lea.hbm %s7180_s9, 1024 }
   0x6   :  { %p4501_p0 = scmp.ne.s32.totalorder %s7180_s9, %s4500_s19  ;;  %p4504_p1 = scmp.lt.u32.totalorder %s4500_s19, %s7180_s9 }
   0x8   :  { %p4506_p2 = pnand %p4504_p1, %p4501_p0 }
   0xa   :  { %4509 = shalt.err (!%p4506_p2)
}
   0xb   :  { %s4510_s24 = scalar_lea.vmem %s58_s30, 1024  ;;  %p4515_p4 = scmp.lt.s32.totalorder %s58_s30, %s58_s30 }
   0xc   :  { %p4511_p3 = scmp.ne.s32.totalorder %s58_s30, %s4510_s24  ;;  %p4516_p5 = scmp.lt.s32.totalorder %s4510_s24, %s4510_s24 }
   0xe   :  { %p4517_p6 = por %p4516_p5, %p4515_p4 }
  0x10   :  { %p4518_p7 = pnand %p4517_p6, %p4511_p3 }
  0x12   :  { %4521 = shalt.err (!%p4518_p7)
}
  0x13   :  { %s4620_s25 = smov 128   ;;  %s4621_s26 = smov 8  }
  0x14   :  { %63 = dma.hbm_to_vmem [thread:$0]  %s7180_s9, 1024, %s58_s30, [#allocation6], %s4620_s25, %s4620_s25, %s4621_s26  }
  0x15   :  { %s4522_s17 = scalar_lea.hbm %s7176_s5, 1024 }
  0x16   :  { %p4523_p8 = scmp.ne.s32.totalorder %s7176_s5, %s4522_s17  ;;  %p4526_p9 = scmp.lt.u32.totalorder %s4522_s17, %s7176_s5 }
  0x18   :  { %p4528_p10 = pnand %p4526_p9, %p4523_p8 }
  0x1a   :  { %4531 = shalt.err (!%p4528_p10)
}
  0x1b   :  { %s4532_s22 = scalar_lea.vmem %s4702_s16, 1024  ;;  %p4537_p12 = scmp.lt.s32.totalorder %s4702_s16, %s4702_s16 }
  0x1c   :  { %p4533_p11 = scmp.ne.s32.totalorder %s4702_s16, %s4532_s22  ;;  %p4538_p13 = scmp.lt.s32.totalorder %s4532_s22, %s4532_s22 }
  0x1e   :  { %p4539_p0 = por %p4538_p13, %p4537_p12 }
  0x20   :  { %p4540_p1 = pnand %p4539_p0, %p4533_p11 }
  0x22   :  { %4543 = shalt.err (!%p4540_p1)
}
  0x23   :  { %45 = dma.hbm_to_vmem [thread:$0]  %s7176_s5, 1024, %s4702_s16, [#allocation3], %s4620_s25, %s4620_s25, %s4621_s26  }
  0x24   :  { %s4622_s23 = smov [#allocation7]   ;;  %s4544_s29 = scalar_lea.hbm %s7181_s10, 1024 }
  0x25   :  { %s69_s24 = sshll.u32 %s4622_s23, 4  ;;  %p4545_p2 = scmp.ne.s32.totalorder %s7181_s10, %s4544_s29  ;;  %s70_s24 = int_to_ptr.vmem [resolvable:$true] %s69_s24 }
  0x26   :  { %p4548_p3 = scmp.lt.u32.totalorder %s4544_s29, %s7181_s10 }
  0x28   :  { %p4550_p4 = pnand %p4548_p3, %p4545_p2 }
  0x2a   :  { %4553 = shalt.err (!%p4550_p4)
}
  0x2b   :  { %s4554_s20 = scalar_lea.vmem %s70_s24, 1024  ;;  %p4559_p6 = scmp.lt.s32.totalorder %s70_s24, %s70_s24 }
  0x2c   :  { %p4555_p5 = scmp.ne.s32.totalorder %s70_s24, %s4554_s20  ;;  %p4560_p7 = scmp.lt.s32.totalorder %s4554_s20, %s4554_s20 }
  0x2e   :  { %p4561_p8 = por %p4560_p7, %p4559_p6 }
  0x30   :  { %p4562_p9 = pnand %p4561_p8, %p4555_p5 }
  0x32   :  { %4565 = shalt.err (!%p4562_p9)
}
  0x33   :  { %75 = dma.hbm_to_vmem [thread:$0]  %s7181_s10, 1024, %s70_s24, [#allocation6], %s4620_s25, %s4620_s25, %s4621_s26  }
  0x34   :  { %4610 = dma.done.wait [#allocation3], 1024  }
  0x35   :  { %4611 = vsyncadd [#allocation3], 4294966272 }
  0x36   :  { %4612 = dma.done.wait [#allocation6], 2048  }
  0x37   :  { %4613 = vsyncadd [#allocation6], 4294965248  ;;  %v4288_v0 = vld [vmem:[%s7174_s3 + $0x40] sm:$0xff]   ;;  %v4292_v4 = vld [vmem:[%s7174_s3 + $0x48] sm:$0xff]   ;;  %vm1199_vm0 = vcmask 523264  }
  0x38   :  { %v4289_v1 = vld [vmem:[%s7173_s2 + $0x40] sm:$0xff]   ;;  %3937 = vmatprep.subr.bf16.mxu0 %v4288_v0  ;;  %v4293_v5 = vld [vmem:[%s7173_s2 + $0x48] sm:$0xff]   ;;  %v4296_v8 = vld [vmem:[%s7174_s3 + $0x50] sm:$0xff]  }
  0x39   :  { %v4290_v2 = vld [vmem:[%s7174_s3] sm:$0xff]   ;;  %4049 = vmatprep.subr.bf16.mxu1 %v4289_v1  ;;  %v4294_v6 = vld [vmem:[%s7174_s3 + $0x8] sm:$0xff]   ;;  %v4297_v9 = vld [vmem:[%s7173_s2 + $0x50] sm:$0xff]  }
  0x3a   :  { %v4291_v3 = vld [vmem:[%s7173_s2] sm:$0xff]   ;;  %3938 = vmatpush3.bf16.msra.mxu0 %v4290_v2  ;;  %v4295_v7 = vld [vmem:[%s7173_s2 + $0x8] sm:$0xff]   ;;  %v4298_v10 = vld [vmem:[%s7174_s3 + $0x10] sm:$0xff]  }
  0x3b   :  { %4050 = vmatpush3.bf16.msra.mxu1 %v4291_v3  ;;  %3939 = vmatprep.subr.bf16.mxu0 %v4292_v4  ;;  %v4299_v11 = vld [vmem:[%s7173_s2 + $0x10] sm:$0xff]   ;;  %v4300_v12 = vld [vmem:[%s7174_s3 + $0x58] sm:$0xff]   ;;  %v4304_v16 = vld [vmem:[%s7174_s3 + $0x60] sm:$0xff]  }
  0x3c   :  { %4051 = vmatprep.subr.bf16.mxu1 %v4293_v5  ;;  %v4301_v13 = vld [vmem:[%s7173_s2 + $0x58] sm:$0xff]   ;;  %v4305_v17 = vld [vmem:[%s7173_s2 + $0x60] sm:$0xff]   ;;  %v4308_v20 = vld [vmem:[%s7174_s3 + $0x68] sm:$0xff]  }
  0x3d   :  { %v4302_v14 = vld [vmem:[%s7174_s3 + $0x18] sm:$0xff]   ;;  %v4306_v18 = vld [vmem:[%s7174_s3 + $0x20] sm:$0xff]   ;;  %v4309_v21 = vld [vmem:[%s7173_s2 + $0x68] sm:$0xff]  }
  0x3e   :  { %3940 = vmatpush3.bf16.msra.mxu0 %v4294_v6  ;;  %v4303_v15 = vld [vmem:[%s7173_s2 + $0x18] sm:$0xff]   ;;  %v4307_v19 = vld [vmem:[%s7173_s2 + $0x20] sm:$0xff]   ;;  %v4310_v22 = vld [vmem:[%s7174_s3 + $0x28] sm:$0xff]  }
  0x3f   :  { %4052 = vmatpush3.bf16.msra.mxu1 %v4295_v7  ;;  %3941 = vmatprep.subr.bf16.mxu0 %v4296_v8  ;;  %v4311_v23 = vld [vmem:[%s7173_s2 + $0x28] sm:$0xff]   ;;  %v4312_v24 = vld [vmem:[%s7174_s3 + $0x70] sm:$0xff]   ;;  %v4316_v28 = vld [vmem:[%s7174_s3 + $0x78] sm:$0xff]  }
  0x40   :  { %4053 = vmatprep.subr.bf16.mxu1 %v4297_v9  ;;  %v4313_v25 = vld [vmem:[%s7173_s2 + $0x70] sm:$0xff]   ;;  %v4317_v29 = vld [vmem:[%s7173_s2 + $0x78] sm:$0xff]   ;;  %v122_v32 = vld [vmem:[%s7172_s1] sm:$0xff] }
  0x41   :  { %v4314_v26 = vld [vmem:[%s7174_s3 + $0x30] sm:$0xff]   ;;  %v4318_v30 = vld [vmem:[%s7174_s3 + $0x38] sm:$0xff]   ;;  %v123_v33 = vld [vmem:[%s7172_s1 + $0x8] sm:$0xff] }
  0x42   :  { %3942 = vmatpush3.bf16.msra.mxu0 %v4298_v10  ;;  %v4315_v27 = vld [vmem:[%s7173_s2 + $0x30] sm:$0xff]   ;;  %v4319_v31 = vld [vmem:[%s7173_s2 + $0x38] sm:$0xff]   ;;  %v90_v34 = vld [vmem:[%s7171_s0] sm:$0xff]  ;;  %v3752_v35 = vcombine.high %v122_v32, %v123_v33  ;;  %v3751_v37 = vcombine.low %v122_v32, %v123_v33 }
  0x43   :  { %4054 = vmatpush3.bf16.msra.mxu1 %v4299_v11  ;;  %3943 = vmatprep.subr.bf16.mxu0 %v4300_v12  ;;  %v91_v36 = vld [vmem:[%s7171_s0 + $0x8] sm:$0xff]  ;;  %v124_v38 = vld [vmem:[%s7172_s1 + $0x10] sm:$0xff]  ;;  %v125_v39 = vld [vmem:[%s7172_s1 + $0x18] sm:$0xff] }
  0x44   :  { %4055 = vmatprep.subr.bf16.mxu1 %v4301_v13  ;;  %v3800_v40 = vcombine.high %v90_v34, %v91_v36  ;;  %v3799_v41 = vcombine.low %v90_v34, %v91_v36  ;;  %v3754_v42 = vcombine.high %v124_v38, %v125_v39  ;;  %v92_v43 = vld [vmem:[%s7171_s0 + $0x10] sm:$0xff]  ;;  %v93_v44 = vld [vmem:[%s7171_s0 + $0x18] sm:$0xff]  ;;  %506 = vmatprep.mubr.bf16.mxu0 %v3752_v35  ;;  %v126_v46 = vld [vmem:[%s7172_s1 + $0x20] sm:$0xff] }
  0x45   :  { %v3802_v45 = vcombine.high %v92_v43, %v93_v44  ;;  %v127_v47 = vld [vmem:[%s7172_s1 + $0x28] sm:$0xff]  ;;  %v94_v48 = vld [vmem:[%s7171_s0 + $0x20] sm:$0xff]  ;;  %v3753_v50 = vcombine.low %v124_v38, %v125_v39  ;;  %v3801_v51 = vcombine.low %v92_v43, %v93_v44  ;;  %v128_v54 = vld [vmem:[%s7172_s1 + $0x30] sm:$0xff] }
  0x46   :  { %3944 = vmatpush3.bf16.msra.mxu0 %v4302_v14  ;;  %923 = vmatprep.mubr.bf16.mxu1 %v3800_v40  ;;  %v95_v49 = vld [vmem:[%s7171_s0 + $0x28] sm:$0xff]  ;;  %v3756_v52 = vcombine.high %v126_v46, %v127_v47  ;;  %v129_v55 = vld [vmem:[%s7172_s1 + $0x38] sm:$0xff]  ;;  %v96_v56 = vld [vmem:[%s7171_s0 + $0x30] sm:$0xff]  ;;  %v3755_v58 = vcombine.low %v126_v46, %v127_v47 }
  0x47   :  { %4056 = vmatpush3.bf16.msra.mxu1 %v4303_v15  ;;  %3945 = vmatprep.subr.bf16.mxu0 %v4304_v16  ;;  %v3804_v53 = vcombine.high %v94_v48, %v95_v49  ;;  %v97_v57 = vld [vmem:[%s7171_s0 + $0x38] sm:$0xff]  ;;  %v3803_v59 = vcombine.low %v94_v48, %v95_v49  ;;  %v3758_v60 = vcombine.high %v128_v54, %v129_v55  ;;  %v4372_v62 = vld [vmem:[#allocation2] ss:$8 sps:$4 sm:$0xff]   ;;  %v4374_v63 = vld [vmem:[#allocation2 + $0x4] ss:$8 sps:$4 sm:$0xff]  }
  0x48   :  { %4057 = vmatprep.subr.bf16.mxu1 %v4305_v17  ;;  %v3806_v61 = vcombine.high %v96_v56, %v97_v57  ;;  %v130_v0 = vld [vmem:[%s7172_s1 + $0x40] sm:$0xff]  ;;  %v131_v1 = vld [vmem:[%s7172_s1 + $0x48] sm:$0xff]  ;;  %v4387_v4 = vld [vmem:[#allocation2 + $0x10] ss:$8 sps:$4 sm:$0xff]   ;;  %v3757_v6 = vcombine.low %v128_v54, %v129_v55  ;;  %v3805_v7 = vcombine.low %v96_v56, %v97_v57 }
  0x49   :  { %v98_v2 = vld [vmem:[%s7171_s0 + $0x40] sm:$0xff]  ;;  %v99_v3 = vld [vmem:[%s7171_s0 + $0x48] sm:$0xff]  ;;  %v4389_v5 = vld [vmem:[#allocation2 + $0x14] ss:$8 sps:$4 sm:$0xff]   ;;  %v3760_v8 = vcombine.high %v130_v0, %v131_v1 }
  0x4a   :  { %3946 = vmatpush3.bf16.msra.mxu0 %v4306_v18  ;;  %v4392_v9 = vld [vmem:[#allocation2 + $0x24] ss:$8 sps:$4 sm:$0xff]   ;;  %v3808_v10 = vcombine.high %v98_v2, %v99_v3  ;;  %v4390_v11 = vld [vmem:[#allocation2 + $0x20] ss:$8 sps:$4 sm:$0xff]   ;;  %v4395_v12 = vld [vmem:[#allocation2 + $0x34] ss:$8 sps:$4 sm:$0xff]   ;;  %v3759_v18 = vcombine.low %v130_v0, %v131_v1 }
  0x4b   :  { %4058 = vmatpush3.bf16.msra.mxu1 %v4307_v19  ;;  %3947 = vmatprep.subr.bf16.mxu0 %v4308_v20  ;;  %v132_v13 = vld [vmem:[%s7172_s1 + $0x50] sm:$0xff]  ;;  %v133_v14 = vld [vmem:[%s7172_s1 + $0x58] sm:$0xff]  ;;  %v3807_v19 = vcombine.low %v98_v2, %v99_v3  ;;  %v138_v38 = vld [vmem:[%s7172_s1 + $0x80] sm:$0xff] }
  0x4c   :  { %4059 = vmatprep.subr.bf16.mxu1 %v4309_v21  ;;  %v4393_v15 = vld [vmem:[#allocation2 + $0x30] ss:$8 sps:$4 sm:$0xff]   ;;  %v3762_v20 = vcombine.high %v132_v13, %v133_v14  ;;  %v139_v39 = vld [vmem:[%s7172_s1 + $0x88] sm:$0xff]  ;;  %v106_v40 = vld [vmem:[%s7171_s0 + $0x80] sm:$0xff] }
  0x4d   :  { %v100_v16 = vld [vmem:[%s7171_s0 + $0x50] sm:$0xff]  ;;  %v101_v17 = vld [vmem:[%s7171_s0 + $0x58] sm:$0xff]  ;;  %v3768_v44 = vcombine.high %v138_v38, %v139_v39  ;;  %v142_v54 = vld [vmem:[%s7172_s1 + $0xa0] sm:$0xff] }
  0x4e   :  { %3948 = vmatpush3.bf16.msra.mxu0 %v4310_v22  ;;  %v3810_v21 = vcombine.high %v100_v16, %v101_v17  ;;  %v134_v22 = vld [vmem:[%s7172_s1 + $0x60] sm:$0xff]  ;;  %v104_v32 = vld [vmem:[%s7171_s0 + $0x70] sm:$0xff]  ;;  %v105_v33 = vld [vmem:[%s7171_s0 + $0x78] sm:$0xff] }
  0x4f   :  { %4060 = vmatpush3.bf16.msra.mxu1 %v4311_v23  ;;  %3949 = vmatprep.subr.bf16.mxu0 %v4312_v24  ;;  %v135_v23 = vld [vmem:[%s7172_s1 + $0x68] sm:$0xff]  ;;  %v102_v24 = vld [vmem:[%s7171_s0 + $0x60] sm:$0xff]  ;;  %v3813_v43 = vcombine.low %v104_v32, %v105_v33  ;;  %v140_v46 = vld [vmem:[%s7172_s1 + $0x90] sm:$0xff] }
  0x50   :  { %4061 = vmatprep.subr.bf16.mxu1 %v4313_v25  ;;  %v103_v25 = vld [vmem:[%s7171_s0 + $0x68] sm:$0xff]  ;;  %v3763_v34 = vcombine.low %v134_v22, %v135_v23  ;;  %v141_v47 = vld [vmem:[%s7172_s1 + $0x98] sm:$0xff]  ;;  %v108_v48 = vld [vmem:[%s7171_s0 + $0x90] sm:$0xff] }
  0x51   :  { %v3811_v35 = vcombine.low %v102_v24, %v103_v25  ;;  %v109_v49 = vld [vmem:[%s7171_s0 + $0x98] sm:$0xff]  ;;  %v143_v55 = vld [vmem:[%s7172_s1 + $0xa8] sm:$0xff]  ;;  %v110_v56 = vld [vmem:[%s7171_s0 + $0xa0] sm:$0xff] }
  0x52   :  { %3950 = vmatpush3.bf16.msra.mxu0 %v4314_v26  ;;  %v3761_v26 = vcombine.low %v132_v13, %v133_v14  ;;  %v111_v57 = vld [vmem:[%s7171_s0 + $0xa8] sm:$0xff]  ;;  %v112_v0 = vld [vmem:[%s7171_s0 + $0xb0] sm:$0xff]  ;;  %v113_v1 = vld [vmem:[%s7171_s0 + $0xb8] sm:$0xff]  ;;  %v3771_v2 = vcombine.low %v142_v54, %v143_v55 }
  0x53   :  { %4062 = vmatpush3.bf16.msra.mxu1 %v4315_v27  ;;  %3951 = vmatprep.subr.bf16.mxu0 %v4316_v28  ;;  %v3809_v27 = vcombine.low %v100_v16, %v101_v17  ;;  %v3764_v28 = vcombine.high %v134_v22, %v135_v23  ;;  %v3819_v3 = vcombine.low %v110_v56, %v111_v57  ;;  %v148_v14 = vld [vmem:[%s7172_s1 + $0xd0] sm:$0xff]  ;;  %v117_v17 = vld [vmem:[%s7171_s0 + $0xd8] sm:$0xff]  ;;  %v150_v22 = vld [vmem:[%s7172_s1 + $0xe0] sm:$0xff] }
  0x54   :  { %4063 = vmatprep.subr.bf16.mxu1 %v4317_v29  ;;  %v3812_v29 = vcombine.high %v102_v24, %v103_v25  ;;  %v116_v16 = vld [vmem:[%s7171_s0 + $0xd0] sm:$0xff]  ;;  %v151_v23 = vld [vmem:[%s7172_s1 + $0xe8] sm:$0xff]  ;;  %v118_v24 = vld [vmem:[%s7171_s0 + $0xe0] sm:$0xff] }
  0x55   :  { %v119_v25 = vld [vmem:[%s7171_s0 + $0xe8] sm:$0xff] }
  0x56   :  { %3952 = vmatpush3.bf16.msra.mxu0 %v4318_v30  ;;  %v136_v30 = vld [vmem:[%s7172_s1 + $0x70] sm:$0xff] }
  0x57   :  { %4064 = vmatpush3.bf16.msra.mxu1 %v4319_v31  ;;  %1248 = vmatprep.subr.bf16.mxu0 %v4374_v63  ;;  %v137_v31 = vld [vmem:[%s7172_s1 + $0x78] sm:$0xff] }
  0x58   :  { %v3766_v36 = vcombine.high %v136_v30, %v137_v31  ;;  %v145_v63 = vld [vmem:[%s7172_s1 + $0xb8] sm:$0xff] }
  0x59   :  { %507 = vmatmul.mubr.bf16.vlgmr.msra.gmra.mrb[0].mxu0 %v3751_v37  ;;  %v3814_v37 = vcombine.high %v104_v32, %v105_v33  ;;  %v120_v32 = vld [vmem:[%s7171_s0 + $0xf0] sm:$0xff]  ;;  %v121_v33 = vld [vmem:[%s7171_s0 + $0xf8] sm:$0xff] }
  0x5a   :  { %924 = vmatmul.mubr.bf16.vlgmr.msra.gmra.mrb[0].mxu1 %v3799_v41  ;;  %514 = vmatprep.mubr.bf16.mxu0 %v3754_v42  ;;  %v107_v41 = vld [vmem:[%s7171_s0 + $0x88] sm:$0xff]  ;;  %v3765_v42 = vcombine.low %v136_v30, %v137_v31  ;;  %v152_v30 = vld [vmem:[%s7172_s1 + $0xf0] sm:$0xff]  ;;  %v153_v31 = vld [vmem:[%s7172_s1 + $0xf8] sm:$0xff] }
  0x5b   :  { %931 = vmatprep.mubr.bf16.mxu1 %v3802_v45  ;;  %1249 = vmatpush1.bf16.msra.mxu0 %v4372_v62  ;;  %v3816_v45 = vcombine.high %v106_v40, %v107_v41  ;;  %v144_v62 = vld [vmem:[%s7172_s1 + $0xb0] sm:$0xff] }
  0x5c   :  { %1250 = vmatprep.subr.bf16.mxu0 %v4389_v5  ;;  %v3822_v5 = vcombine.high %v112_v0, %v113_v1 }
  0x5f   :  { %1251 = vmatpush1.bf16.msra.mxu0 %v4387_v4  ;;  %v3774_v4 = vcombine.high %v144_v62, %v145_v63 }
  0x60   :  { %1252 = vmatprep.subr.bf16.mxu0 %v4392_v9  ;;  %v115_v9 = vld [vmem:[%s7171_s0 + $0xc8] sm:$0xff] }
  0x61   :  { %515 = vmatmul.mubr.bf16.gmra.mrb[4].mxu0 %v3753_v50  ;;  %v3767_v50 = vcombine.low %v138_v38, %v139_v39  ;;  %v3781_v38 = vcombine.low %v152_v30, %v153_v31  ;;  %v3829_v39 = vcombine.low %v120_v32, %v121_v33 }
  0x62   :  { %932 = vmatmul.mubr.bf16.gmra.mrb[4].mxu1 %v3801_v51  ;;  %522 = vmatprep.mubr.bf16.mxu0 %v3756_v52  ;;  %v3815_v51 = vcombine.low %v106_v40, %v107_v41  ;;  %v3770_v52 = vcombine.high %v140_v46, %v141_v47  ;;  %v4623_v40 = vmov 0   ;;  %v4396_v41 = vld [vmem:[%s7178_s7 + $0x40] sm:$0xff]  }
  0x63   :  { %939 = vmatprep.mubr.bf16.mxu1 %v3804_v53  ;;  %1253 = vmatpush1.bf16.msra.mxu0 %v4390_v11  ;;  %v3818_v53 = vcombine.high %v108_v48, %v109_v49  ;;  %v3821_v11 = vcombine.low %v112_v0, %v113_v1 }
  0x64   :  { %1254 = vmatprep.subr.bf16.mxu0 %v4395_v12  ;;  %4161 = vmatprep.subr.bf16.mxu1 %v4396_v41 }
  0x67   :  { %1255 = vmatpush1.bf16.msra.mxu0 %v4393_v15  ;;  %v149_v15 = vld [vmem:[%s7172_s1 + $0xd8] sm:$0xff] }
  0x69   :  { %523 = vmatmul.mubr.bf16.gmra.mrb[8].mxu0 %v3755_v58  ;;  %v3769_v58 = vcombine.low %v140_v46, %v141_v47 }
  0x6a   :  { %940 = vmatmul.mubr.bf16.gmra.mrb[8].mxu1 %v3803_v59  ;;  %530 = vmatprep.mubr.bf16.mxu0 %v3758_v60  ;;  %v3817_v59 = vcombine.low %v108_v48, %v109_v49  ;;  %v3772_v60 = vcombine.high %v142_v54, %v143_v55 }
  0x6b   :  { %947 = vmatprep.mubr.bf16.mxu1 %v3806_v61  ;;  %v3820_v61 = vcombine.high %v110_v56, %v111_v57  ;;  %v4398_v57 = vld [vmem:[%s7178_s7 + $0x48] sm:$0xff]  }
  0x71   :  { %531 = vmatmul.mubr.bf16.gmra.mrb[12].mxu0 %v3757_v6  ;;  %v146_v6 = vld [vmem:[%s7172_s1 + $0xc0] sm:$0xff] }
  0x72   :  { %948 = vmatmul.mubr.bf16.gmra.mrb[12].mxu1 %v3805_v7  ;;  %538 = vmatprep.mubr.bf16.mxu0 %v3760_v8  ;;  %v147_v7 = vld [vmem:[%s7172_s1 + $0xc8] sm:$0xff]  ;;  %v114_v8 = vld [vmem:[%s7171_s0 + $0xc0] sm:$0xff] }
  0x73   :  { %955 = vmatprep.mubr.bf16.mxu1 %v3808_v10  ;;  %v3773_v10 = vcombine.low %v144_v62, %v145_v63  ;;  %v3776_v12 = vcombine.high %v146_v6, %v147_v7  ;;  %v3824_v13 = vcombine.high %v114_v8, %v115_v9  ;;  %v4401_v63 = vld [vmem:[%s7178_s7 + $0x10] sm:$0xff]  }
  0x79   :  { %539 = vmatmul.mubr.bf16.gmra.mrb[16].mxu0 %v3759_v18  ;;  %v3775_v18 = vcombine.low %v146_v6, %v147_v7 }
  0x7a   :  { %956 = vmatmul.mubr.bf16.gmra.mrb[16].mxu1 %v3807_v19  ;;  %546 = vmatprep.mubr.bf16.mxu0 %v3762_v20  ;;  %v3823_v19 = vcombine.low %v114_v8, %v115_v9  ;;  %v3778_v20 = vcombine.high %v148_v14, %v149_v15 }
  0x7b   :  { %963 = vmatprep.mubr.bf16.mxu1 %v3810_v21  ;;  %v3826_v21 = vcombine.high %v116_v16, %v117_v17 }
  0x81   :  { %547 = vmatmul.mubr.bf16.gmra.mrb[20].mxu0 %v3761_v26  ;;  %v3777_v26 = vcombine.low %v148_v14, %v149_v15  ;;  %v4403_v14 = vld [vmem:[%s7178_s7 + $0x18] sm:$0xff]  }
  0x82   :  { %964 = vmatmul.mubr.bf16.gmra.mrb[20].mxu1 %v3809_v27  ;;  %554 = vmatprep.mubr.bf16.mxu0 %v3764_v28  ;;  %v3825_v27 = vcombine.low %v116_v16, %v117_v17  ;;  %v3780_v28 = vcombine.high %v150_v22, %v151_v23 }
  0x83   :  { %971 = vmatprep.mubr.bf16.mxu1 %v3812_v29  ;;  %v3828_v29 = vcombine.high %v118_v24, %v119_v25 }
  0x89   :  { %555 = vmatmul.mubr.bf16.gmra.mrb[24].mxu0 %v3763_v34  ;;  %v3779_v34 = vcombine.low %v150_v22, %v151_v23  ;;  %v4405_v22 = vld [vmem:[%s7178_s7 + $0x20] sm:$0xff]  }
  0x8a   :  { %972 = vmatmul.mubr.bf16.gmra.mrb[24].mxu1 %v3811_v35  ;;  %562 = vmatprep.mubr.bf16.mxu0 %v3766_v36  ;;  %v3827_v35 = vcombine.low %v118_v24, %v119_v25  ;;  %v3782_v36 = vcombine.high %v152_v30, %v153_v31 }
  0x8b   :  { %979 = vmatprep.mubr.bf16.mxu1 %v3814_v37  ;;  %v3830_v37 = vcombine.high %v120_v32, %v121_v33 }
  0x91   :  { %563 = vmatmul.mubr.bf16.gmra.mrb[28].mxu0 %v3765_v42  ;;  %v4397_v42 = vld [vmem:[%s7178_s7] sm:$0xff]  }
  0x92   :  { %980 = vmatmul.mubr.bf16.gmra.mrb[28].mxu1 %v3813_v43  ;;  %570 = vmatprep.mubr.bf16.mxu0 %v3768_v44 }
  0x93   :  { %987 = vmatprep.mubr.bf16.mxu1 %v3816_v45  ;;  %4162 = vmatpush3.bf16.msra.mxu1 %v4397_v42  ;;  %v4408_v42 = vld [vmem:[%s7178_s7 + $0x70] sm:$0xff]  }
  0x94   :  { %4163 = vmatprep.subr.bf16.mxu1 %v4398_v57 }
  0x99   :  { %571 = vmatmul.mubr.bf16.gmra.mrb[32].mxu0 %v3767_v50 }
  0x9a   :  { %988 = vmatmul.mubr.bf16.gmra.mrb[32].mxu1 %v3815_v51  ;;  %578 = vmatprep.mubr.bf16.mxu0 %v3770_v52  ;;  %v5052_v52 = vld [vmem:[%s7175_s4] ss:$0 sm:$0xff] }
  0x9b   :  { %995 = vmatprep.mubr.bf16.mxu1 %v3818_v53 }
  0xa1   :  { %579 = vmatmul.mubr.bf16.gmra.mrb[36].mxu0 %v3769_v58  ;;  %v4399_v58 = vld [vmem:[%s7178_s7 + $0x8] sm:$0xff]  }
  0xa2   :  { %996 = vmatmul.mubr.bf16.gmra.mrb[36].mxu1 %v3817_v59  ;;  %586 = vmatprep.mubr.bf16.mxu0 %v3772_v60 }
  0xa3   :  { %1003 = vmatprep.mubr.bf16.mxu1 %v3820_v61  ;;  %v4400_v61 = vld [vmem:[%s7178_s7 + $0x50] sm:$0xff]   ;;  %4164 = vmatpush3.bf16.msra.mxu1 %v4399_v58 }
  0xa4   :  { %4165 = vmatprep.subr.bf16.mxu1 %v4400_v61 }
  0xa7   :  { %4166 = vmatpush3.bf16.msra.mxu1 %v4401_v63 }
  0xa9   :  { %587 = vmatmul.mubr.bf16.gmra.mrb[40].mxu0 %v3771_v2 }
  0xaa   :  { %1004 = vmatmul.mubr.bf16.gmra.mrb[40].mxu1 %v3819_v3  ;;  %594 = vmatprep.mubr.bf16.mxu0 %v3774_v4  ;;  %v4402_v3 = vld [vmem:[%s7178_s7 + $0x58] sm:$0xff]  }
  0xab   :  { %1011 = vmatprep.mubr.bf16.mxu1 %v3822_v5  ;;  %4167 = vmatprep.subr.bf16.mxu1 %v4402_v3 }
  0xac   :  { %4168 = vmatpush3.bf16.msra.mxu1 %v4403_v14 }
  0xb1   :  { %595 = vmatmul.mubr.bf16.gmra.mrb[44].mxu0 %v3773_v10 }
  0xb2   :  { %1012 = vmatmul.mubr.bf16.gmra.mrb[44].mxu1 %v3821_v11  ;;  %602 = vmatprep.mubr.bf16.mxu0 %v3776_v12 }
  0xb3   :  { %1019 = vmatprep.mubr.bf16.mxu1 %v3824_v13 }
  0xb9   :  { %603 = vmatmul.mubr.bf16.gmra.mrb[48].mxu0 %v3775_v18  ;;  %v4404_v18 = vld [vmem:[%s7178_s7 + $0x60] sm:$0xff]  }
  0xba   :  { %1020 = vmatmul.mubr.bf16.gmra.mrb[48].mxu1 %v3823_v19  ;;  %610 = vmatprep.mubr.bf16.mxu0 %v3778_v20 }
  0xbb   :  { %1027 = vmatprep.mubr.bf16.mxu1 %v3826_v21  ;;  %4169 = vmatprep.subr.bf16.mxu1 %v4404_v18 }
  0xbc   :  { %4170 = vmatpush3.bf16.msra.mxu1 %v4405_v22 }
  0xc1   :  { %611 = vmatmul.mubr.bf16.gmra.mrb[52].mxu0 %v3777_v26  ;;  %v4406_v26 = vld [vmem:[%s7178_s7 + $0x68] sm:$0xff]  }
  0xc2   :  { %1028 = vmatmul.mubr.bf16.gmra.mrb[52].mxu1 %v3825_v27  ;;  %618 = vmatprep.mubr.bf16.mxu0 %v3780_v28 }
  0xc3   :  { %1035 = vmatprep.mubr.bf16.mxu1 %v3828_v29  ;;  %4171 = vmatprep.subr.bf16.mxu1 %v4406_v26 }
  0xc9   :  { %619 = vmatmul.mubr.bf16.gmra.mrb[56].mxu0 %v3779_v34 }
  0xca   :  { %1036 = vmatmul.mubr.bf16.gmra.mrb[56].mxu1 %v3827_v35  ;;  %626 = vmatprep.mubr.bf16.mxu0 %v3782_v36 }
  0xcb   :  { %1043 = vmatprep.mubr.bf16.mxu1 %v3830_v37  ;;  %v4407_v37 = vld [vmem:[%s7178_s7 + $0x28] sm:$0xff]  }
  0xcc   :  { %4172 = vmatpush3.bf16.msra.mxu1 %v4407_v37 }
  0xcd   :  { %4173 = vmatprep.subr.bf16.mxu1 %v4408_v42 }
  0xd1   :  { %627 = vmatmul.mubr.bf16.gmra.mrb[60].mxu0 %v3781_v38 }
  0xd2   :  { %1044 = vmatmul.mubr.bf16.gmra.mrb[60].mxu1 %v3829_v39  ;;  %1280 = vmatprep.mubr.bf16.mxu0 %v4623_v40 }
 0x12c   :  { %v3953_v43 = vpop.f32.mrb[0].mxu0 }
 0x12d   :  { %v4065_v44 = vpop.f32.mrb[0].mxu1  ;;  %v3954_v45 = vpop.f32.mrb[1].mxu0 }
 0x12e   :  { %v3955_v46 = vadd.f32 %v3954_v45, %v3953_v43  ;;  %v4066_v47 = vpop.f32.mrb[1].mxu1  ;;  %v3956_v48 = vpop.f32.mrb[2].mxu0 }
 0x12f   :  { %v4067_v49 = vadd.f32 %v4066_v47, %v4065_v44  ;;  %v4068_v50 = vpop.f32.mrb[2].mxu1  ;;  %v3957_v51 = vpop.f32.mrb[3].mxu0 }
 0x130   :  { %v3958_v53 = vadd.f32 %v3957_v51, %v3956_v48  ;;  %v4069_v54 = vpop.f32.mrb[3].mxu1 }
 0x131   :  { %v926_v55 = vadd.f32 %v4067_v49, %v3955_v46  ;;  %v4070_v56 = vadd.f32 %v4069_v54, %v4068_v50  ;;  %v4409_v46 = vld [vmem:[%s7178_s7 + $0x30] sm:$0xff]   ;;  %v4410_v50 = vld [vmem:[%s7178_s7 + $0x78] sm:$0xff]  }
 0x132   :  { %4174 = vmatpush3.bf16.msra.mxu1 %v4409_v46 }
 0x133   :  { %v1059_v59 = vadd.f32 %v5052_v52, %v926_v55  ;;  %v929_v60 = vadd.f32 %v4070_v56, %v3958_v53  ;;  %4175 = vmatprep.subr.bf16.mxu1 %v4410_v50 }
 0x134   :  { %v3959_v62 = vpop.f32.mrb[4].mxu0 }
 0x135   :  { %v1060_v0 = vadd.f32 %v5052_v52, %v929_v60  ;;  %v4071_v1 = vpop.f32.mrb[4].mxu1  ;;  %v3960_v2 = vpop.f32.mrb[5].mxu0  ;;  %v1091_v7 = vmax.f32 %v1059_v59, 0.0 }
 0x136   :  { %v3961_v4 = vadd.f32 %v3960_v2, %v3959_v62  ;;  %v4072_v5 = vpop.f32.mrb[5].mxu1  ;;  %v3962_v6 = vpop.f32.mrb[6].mxu0  ;;  %v4411_v62 = vld [vmem:[%s7178_s7 + $0x38] sm:$0xff]  }
 0x137   :  { %v1092_v8 = vmax.f32 %v1060_v0, 0.0  ;;  %v4073_v9 = vadd.f32 %v4072_v5, %v4071_v1  ;;  %v4074_v10 = vpop.f32.mrb[6].mxu1  ;;  %v3963_v11 = vpop.f32.mrb[7].mxu0  ;;  %4176 = vmatpush3.bf16.msra.mxu1 %v4411_v62 }
 0x138   :  { %v3964_v12 = vadd.f32 %v3963_v11, %v3962_v6  ;;  %v4075_v13 = vpop.f32.mrb[7].mxu1 }
 0x139   :  { %v1123_v15 = vpack.c.bf16 %v1092_v8, %v1091_v7  ;;  %v934_v16 = vadd.f32 %v4073_v9, %v3961_v4  ;;  %v4076_v17 = vadd.f32 %v4075_v13, %v4074_v10 }
 0x13b   :  { %v1061_v19 = vadd.f32 %v5052_v52, %v934_v16  ;;  %v937_v20 = vadd.f32 %v4076_v17, %v3964_v12  ;;  %3856 = vmatmul.mubr.msk.bf16.vlgmr.msra.gmra.mrb[64].mxu0 %vm1199_vm0, %v1123_v15 }
 0x13c   :  { %v3965_v21 = vpop.f32.mrb[8].mxu0  ;;  %1290 = vmatprep.mubr.bf16.mxu0 %v4623_v40 }
 0x13d   :  { %v1062_v23 = vadd.f32 %v5052_v52, %v937_v20  ;;  %v4077_v24 = vpop.f32.mrb[8].mxu1  ;;  %v3966_v25 = vpop.f32.mrb[9].mxu0  ;;  %v1093_v30 = vmax.f32 %v1061_v19, 0.0 }
 0x13e   :  { %v3967_v27 = vadd.f32 %v3966_v25, %v3965_v21  ;;  %v4078_v28 = vpop.f32.mrb[9].mxu1  ;;  %v3968_v29 = vpop.f32.mrb[10].mxu0 }
 0x13f   :  { %v1094_v31 = vmax.f32 %v1062_v23, 0.0  ;;  %v4079_v32 = vadd.f32 %v4078_v28, %v4077_v24  ;;  %v4080_v33 = vpop.f32.mrb[10].mxu1  ;;  %v3969_v34 = vpop.f32.mrb[11].mxu0 }
 0x140   :  { %v3970_v35 = vadd.f32 %v3969_v34, %v3968_v29  ;;  %v4081_v36 = vpop.f32.mrb[11].mxu1 }
 0x141   :  { %v1124_v38 = vpack.c.bf16 %v1094_v31, %v1093_v30  ;;  %v942_v39 = vadd.f32 %v4079_v32, %v3967_v27  ;;  %v4082_v41 = vadd.f32 %v4081_v36, %v4080_v33 }
 0x143   :  { %v1063_v43 = vadd.f32 %v5052_v52, %v942_v39  ;;  %v945_v44 = vadd.f32 %v4082_v41, %v3970_v35  ;;  %3857 = vmatmul.mubr.msk.bf16.gmra.mrb[68].mxu0 %vm1199_vm0, %v1124_v38 }
 0x144   :  { %v3971_v45 = vpop.f32.mrb[12].mxu0  ;;  %1300 = vmatprep.mubr.bf16.mxu0 %v4623_v40 }
 0x145   :  { %v1064_v47 = vadd.f32 %v5052_v52, %v945_v44  ;;  %v4083_v48 = vpop.f32.mrb[12].mxu1  ;;  %v3972_v49 = vpop.f32.mrb[13].mxu0  ;;  %v1095_v55 = vmax.f32 %v1063_v43, 0.0 }
 0x146   :  { %v3973_v51 = vadd.f32 %v3972_v49, %v3971_v45  ;;  %v4084_v53 = vpop.f32.mrb[13].mxu1  ;;  %v3974_v54 = vpop.f32.mrb[14].mxu0 }
 0x147   :  { %v1096_v56 = vmax.f32 %v1064_v47, 0.0  ;;  %v4085_v57 = vadd.f32 %v4084_v53, %v4083_v48  ;;  %v4086_v58 = vpop.f32.mrb[14].mxu1  ;;  %v3975_v59 = vpop.f32.mrb[15].mxu0 }
 0x148   :  { %v3976_v60 = vadd.f32 %v3975_v59, %v3974_v54  ;;  %v4087_v61 = vpop.f32.mrb[15].mxu1 }
 0x149   :  { %v1125_v63 = vpack.c.bf16 %v1096_v56, %v1095_v55  ;;  %v950_v0 = vadd.f32 %v4085_v57, %v3973_v51  ;;  %v4088_v1 = vadd.f32 %v4087_v61, %v4086_v58 }
 0x14b   :  { %v1065_v2 = vadd.f32 %v5052_v52, %v950_v0  ;;  %v953_v3 = vadd.f32 %v4088_v1, %v3976_v60  ;;  %3858 = vmatmul.mubr.msk.bf16.gmra.mrb[72].mxu0 %vm1199_vm0, %v1125_v63 }
 0x14c   :  { %v3977_v4 = vpop.f32.mrb[16].mxu0  ;;  %1310 = vmatprep.mubr.bf16.mxu0 %v4623_v40 }
 0x14d   :  { %v1066_v5 = vadd.f32 %v5052_v52, %v953_v3  ;;  %v4089_v6 = vpop.f32.mrb[16].mxu1  ;;  %v3978_v7 = vpop.f32.mrb[17].mxu0  ;;  %v1097_v11 = vmax.f32 %v1065_v2, 0.0 }
 0x14e   :  { %v3979_v8 = vadd.f32 %v3978_v7, %v3977_v4  ;;  %v4090_v9 = vpop.f32.mrb[17].mxu1  ;;  %v3980_v10 = vpop.f32.mrb[18].mxu0 }
 0x14f   :  { %v1098_v12 = vmax.f32 %v1066_v5, 0.0  ;;  %v4091_v13 = vadd.f32 %v4090_v9, %v4089_v6  ;;  %v4092_v14 = vpop.f32.mrb[18].mxu1  ;;  %v3981_v15 = vpop.f32.mrb[19].mxu0 }
 0x150   :  { %v3982_v16 = vadd.f32 %v3981_v15, %v3980_v10  ;;  %v4093_v17 = vpop.f32.mrb[19].mxu1 }
 0x151   :  { %v1126_v18 = vpack.c.bf16 %v1098_v12, %v1097_v11  ;;  %v958_v19 = vadd.f32 %v4091_v13, %v3979_v8  ;;  %v4094_v20 = vadd.f32 %v4093_v17, %v4092_v14 }
 0x153   :  { %v1067_v21 = vadd.f32 %v5052_v52, %v958_v19  ;;  %v961_v22 = vadd.f32 %v4094_v20, %v3982_v16  ;;  %3859 = vmatmul.mubr.msk.bf16.gmra.mrb[76].mxu0 %vm1199_vm0, %v1126_v18 }
 0x154   :  { %v3983_v23 = vpop.f32.mrb[20].mxu0  ;;  %1320 = vmatprep.mubr.bf16.mxu0 %v4623_v40 }
 0x155   :  { %v1068_v24 = vadd.f32 %v5052_v52, %v961_v22  ;;  %v4095_v25 = vpop.f32.mrb[20].mxu1  ;;  %v3984_v26 = vpop.f32.mrb[21].mxu0  ;;  %v1099_v30 = vmax.f32 %v1067_v21, 0.0 }
 0x156   :  { %v3985_v27 = vadd.f32 %v3984_v26, %v3983_v23  ;;  %v4096_v28 = vpop.f32.mrb[21].mxu1  ;;  %v3986_v29 = vpop.f32.mrb[22].mxu0 }
 0x157   :  { %v1100_v31 = vmax.f32 %v1068_v24, 0.0  ;;  %v4097_v32 = vadd.f32 %v4096_v28, %v4095_v25  ;;  %v4098_v33 = vpop.f32.mrb[22].mxu1  ;;  %v3987_v34 = vpop.f32.mrb[23].mxu0 }
 0x158   :  { %v3988_v35 = vadd.f32 %v3987_v34, %v3986_v29  ;;  %v4099_v36 = vpop.f32.mrb[23].mxu1 }
 0x159   :  { %v1127_v37 = vpack.c.bf16 %v1100_v31, %v1099_v30  ;;  %v966_v38 = vadd.f32 %v4097_v32, %v3985_v27  ;;  %v4100_v39 = vadd.f32 %v4099_v36, %v4098_v33 }
 0x15b   :  { %v1069_v41 = vadd.f32 %v5052_v52, %v966_v38  ;;  %v969_v42 = vadd.f32 %v4100_v39, %v3988_v35  ;;  %3860 = vmatmul.mubr.msk.bf16.gmra.mrb[80].mxu0 %vm1199_vm0, %v1127_v37 }
 0x15c   :  { %v3989_v43 = vpop.f32.mrb[24].mxu0  ;;  %1330 = vmatprep.mubr.bf16.mxu0 %v4623_v40 }
 0x15d   :  { %v1070_v44 = vadd.f32 %v5052_v52, %v969_v42  ;;  %v4101_v45 = vpop.f32.mrb[24].mxu1  ;;  %v3990_v46 = vpop.f32.mrb[25].mxu0  ;;  %v1101_v50 = vmax.f32 %v1069_v41, 0.0 }
 0x15e   :  { %v3991_v47 = vadd.f32 %v3990_v46, %v3989_v43  ;;  %v4102_v48 = vpop.f32.mrb[25].mxu1  ;;  %v3992_v49 = vpop.f32.mrb[26].mxu0 }
 0x15f   :  { %v1102_v51 = vmax.f32 %v1070_v44, 0.0  ;;  %v4103_v53 = vadd.f32 %v4102_v48, %v4101_v45  ;;  %v4104_v54 = vpop.f32.mrb[26].mxu1  ;;  %v3993_v55 = vpop.f32.mrb[27].mxu0 }
 0x160   :  { %v3994_v56 = vadd.f32 %v3993_v55, %v3992_v49  ;;  %v4105_v57 = vpop.f32.mrb[27].mxu1 }
 0x161   :  { %v1128_v58 = vpack.c.bf16 %v1102_v51, %v1101_v50  ;;  %v974_v59 = vadd.f32 %v4103_v53, %v3991_v47  ;;  %v4106_v60 = vadd.f32 %v4105_v57, %v4104_v54 }
 0x163   :  { %v1071_v61 = vadd.f32 %v5052_v52, %v974_v59  ;;  %v977_v62 = vadd.f32 %v4106_v60, %v3994_v56  ;;  %3861 = vmatmul.mubr.msk.bf16.gmra.mrb[84].mxu0 %vm1199_vm0, %v1128_v58 }
 0x164   :  { %v3995_v63 = vpop.f32.mrb[28].mxu0  ;;  %1340 = vmatprep.mubr.bf16.mxu0 %v4623_v40 }
 0x165   :  { %v1072_v0 = vadd.f32 %v5052_v52, %v977_v62  ;;  %v4107_v1 = vpop.f32.mrb[28].mxu1  ;;  %v3996_v2 = vpop.f32.mrb[29].mxu0  ;;  %v1103_v6 = vmax.f32 %v1071_v61, 0.0 }
 0x166   :  { %v3997_v3 = vadd.f32 %v3996_v2, %v3995_v63  ;;  %v4108_v4 = vpop.f32.mrb[29].mxu1  ;;  %v3998_v5 = vpop.f32.mrb[30].mxu0 }
 0x167   :  { %v1104_v7 = vmax.f32 %v1072_v0, 0.0  ;;  %v4109_v8 = vadd.f32 %v4108_v4, %v4107_v1  ;;  %v4110_v9 = vpop.f32.mrb[30].mxu1  ;;  %v3999_v10 = vpop.f32.mrb[31].mxu0 }
 0x168   :  { %v4000_v11 = vadd.f32 %v3999_v10, %v3998_v5  ;;  %v4111_v12 = vpop.f32.mrb[31].mxu1 }
 0x169   :  { %v1129_v13 = vpack.c.bf16 %v1104_v7, %v1103_v6  ;;  %v982_v14 = vadd.f32 %v4109_v8, %v3997_v3  ;;  %v4112_v15 = vadd.f32 %v4111_v12, %v4110_v9 }
 0x16b   :  { %v1073_v16 = vadd.f32 %v5052_v52, %v982_v14  ;;  %v985_v17 = vadd.f32 %v4112_v15, %v4000_v11  ;;  %3862 = vmatmul.mubr.msk.bf16.gmra.mrb[88].mxu0 %vm1199_vm0, %v1129_v13 }
 0x16c   :  { %v4001_v18 = vpop.f32.mrb[32].mxu0  ;;  %1350 = vmatprep.mubr.bf16.mxu0 %v4623_v40 }
 0x16d   :  { %v1074_v19 = vadd.f32 %v5052_v52, %v985_v17  ;;  %v4113_v20 = vpop.f32.mrb[32].mxu1  ;;  %v4002_v21 = vpop.f32.mrb[33].mxu0  ;;  %v1105_v25 = vmax.f32 %v1073_v16, 0.0 }
 0x16e   :  { %v4003_v22 = vadd.f32 %v4002_v21, %v4001_v18  ;;  %v4114_v23 = vpop.f32.mrb[33].mxu1  ;;  %v4004_v24 = vpop.f32.mrb[34].mxu0 }
 0x16f   :  { %v1106_v26 = vmax.f32 %v1074_v19, 0.0  ;;  %v4115_v27 = vadd.f32 %v4114_v23, %v4113_v20  ;;  %v4116_v28 = vpop.f32.mrb[34].mxu1  ;;  %v4005_v29 = vpop.f32.mrb[35].mxu0 }
 0x170   :  { %v4006_v30 = vadd.f32 %v4005_v29, %v4004_v24  ;;  %v4117_v31 = vpop.f32.mrb[35].mxu1 }
 0x171   :  { %v1130_v32 = vpack.c.bf16 %v1106_v26, %v1105_v25  ;;  %v990_v33 = vadd.f32 %v4115_v27, %v4003_v22  ;;  %v4118_v34 = vadd.f32 %v4117_v31, %v4116_v28 }
 0x173   :  { %v1075_v35 = vadd.f32 %v5052_v52, %v990_v33  ;;  %v993_v36 = vadd.f32 %v4118_v34, %v4006_v30  ;;  %3863 = vmatmul.mubr.msk.bf16.gmra.mrb[92].mxu0 %vm1199_vm0, %v1130_v32 }
 0x174   :  { %v4007_v37 = vpop.f32.mrb[36].mxu0  ;;  %1360 = vmatprep.mubr.bf16.mxu0 %v4623_v40 }
 0x175   :  { %v1076_v38 = vadd.f32 %v5052_v52, %v993_v36  ;;  %v4119_v39 = vpop.f32.mrb[36].mxu1  ;;  %v4008_v41 = vpop.f32.mrb[37].mxu0  ;;  %v1107_v45 = vmax.f32 %v1075_v35, 0.0 }
 0x176   :  { %v4009_v42 = vadd.f32 %v4008_v41, %v4007_v37  ;;  %v4120_v43 = vpop.f32.mrb[37].mxu1  ;;  %v4010_v44 = vpop.f32.mrb[38].mxu0 }
 0x177   :  { %v1108_v46 = vmax.f32 %v1076_v38, 0.0  ;;  %v4121_v47 = vadd.f32 %v4120_v43, %v4119_v39  ;;  %v4122_v48 = vpop.f32.mrb[38].mxu1  ;;  %v4011_v49 = vpop.f32.mrb[39].mxu0 }
 0x178   :  { %v4012_v50 = vadd.f32 %v4011_v49, %v4010_v44  ;;  %v4123_v51 = vpop.f32.mrb[39].mxu1 }
 0x179   :  { %v1131_v53 = vpack.c.bf16 %v1108_v46, %v1107_v45  ;;  %v998_v54 = vadd.f32 %v4121_v47, %v4009_v42  ;;  %v4124_v55 = vadd.f32 %v4123_v51, %v4122_v48 }
 0x17b   :  { %v1077_v56 = vadd.f32 %v5052_v52, %v998_v54  ;;  %v1001_v57 = vadd.f32 %v4124_v55, %v4012_v50  ;;  %3864 = vmatmul.mubr.msk.bf16.gmra.mrb[96].mxu0 %vm1199_vm0, %v1131_v53 }
 0x17c   :  { %v4013_v58 = vpop.f32.mrb[40].mxu0  ;;  %1370 = vmatprep.mubr.bf16.mxu0 %v4623_v40 }
 0x17d   :  { %v1078_v59 = vadd.f32 %v5052_v52, %v1001_v57  ;;  %v4125_v60 = vpop.f32.mrb[40].mxu1  ;;  %v4014_v61 = vpop.f32.mrb[41].mxu0  ;;  %v1109_v1 = vmax.f32 %v1077_v56, 0.0 }
 0x17e   :  { %v4015_v62 = vadd.f32 %v4014_v61, %v4013_v58  ;;  %v4126_v63 = vpop.f32.mrb[41].mxu1  ;;  %v4016_v0 = vpop.f32.mrb[42].mxu0 }
 0x17f   :  { %v1110_v2 = vmax.f32 %v1078_v59, 0.0  ;;  %v4127_v3 = vadd.f32 %v4126_v63, %v4125_v60  ;;  %v4128_v4 = vpop.f32.mrb[42].mxu1  ;;  %v4017_v5 = vpop.f32.mrb[43].mxu0 }
 0x180   :  { %v4018_v6 = vadd.f32 %v4017_v5, %v4016_v0  ;;  %v4129_v7 = vpop.f32.mrb[43].mxu1 }
 0x181   :  { %v1132_v8 = vpack.c.bf16 %v1110_v2, %v1109_v1  ;;  %v1006_v9 = vadd.f32 %v4127_v3, %v4015_v62  ;;  %v4130_v10 = vadd.f32 %v4129_v7, %v4128_v4 }
 0x183   :  { %v1079_v11 = vadd.f32 %v5052_v52, %v1006_v9  ;;  %v1009_v12 = vadd.f32 %v4130_v10, %v4018_v6  ;;  %3865 = vmatmul.mubr.msk.bf16.gmra.mrb[100].mxu0 %vm1199_vm0, %v1132_v8 }
 0x184   :  { %v4019_v13 = vpop.f32.mrb[44].mxu0  ;;  %1380 = vmatprep.mubr.bf16.mxu0 %v4623_v40 }
 0x185   :  { %v1080_v14 = vadd.f32 %v5052_v52, %v1009_v12  ;;  %v4131_v15 = vpop.f32.mrb[44].mxu1  ;;  %v4020_v16 = vpop.f32.mrb[45].mxu0  ;;  %v1111_v20 = vmax.f32 %v1079_v11, 0.0 }
 0x186   :  { %v4021_v17 = vadd.f32 %v4020_v16, %v4019_v13  ;;  %v4132_v18 = vpop.f32.mrb[45].mxu1  ;;  %v4022_v19 = vpop.f32.mrb[46].mxu0 }
 0x187   :  { %v1112_v21 = vmax.f32 %v1080_v14, 0.0  ;;  %v4133_v22 = vadd.f32 %v4132_v18, %v4131_v15  ;;  %v4134_v23 = vpop.f32.mrb[46].mxu1  ;;  %v4023_v24 = vpop.f32.mrb[47].mxu0 }
 0x188   :  { %v4024_v25 = vadd.f32 %v4023_v24, %v4022_v19  ;;  %v4135_v26 = vpop.f32.mrb[47].mxu1 }
 0x189   :  { %v1133_v27 = vpack.c.bf16 %v1112_v21, %v1111_v20  ;;  %v1014_v28 = vadd.f32 %v4133_v22, %v4021_v17  ;;  %v4136_v29 = vadd.f32 %v4135_v26, %v4134_v23 }
 0x18b   :  { %v1081_v30 = vadd.f32 %v5052_v52, %v1014_v28  ;;  %v1017_v31 = vadd.f32 %v4136_v29, %v4024_v25  ;;  %3866 = vmatmul.mubr.msk.bf16.gmra.mrb[104].mxu0 %vm1199_vm0, %v1133_v27 }
 0x18c   :  { %v4025_v32 = vpop.f32.mrb[48].mxu0  ;;  %1390 = vmatprep.mubr.bf16.mxu0 %v4623_v40 }
 0x18d   :  { %v1082_v33 = vadd.f32 %v5052_v52, %v1017_v31  ;;  %v4137_v34 = vpop.f32.mrb[48].mxu1  ;;  %v4026_v35 = vpop.f32.mrb[49].mxu0  ;;  %v1113_v39 = vmax.f32 %v1081_v30, 0.0 }
 0x18e   :  { %v4027_v36 = vadd.f32 %v4026_v35, %v4025_v32  ;;  %v4138_v37 = vpop.f32.mrb[49].mxu1  ;;  %v4028_v38 = vpop.f32.mrb[50].mxu0 }
 0x18f   :  { %v1114_v41 = vmax.f32 %v1082_v33, 0.0  ;;  %v4139_v42 = vadd.f32 %v4138_v37, %v4137_v34  ;;  %v4140_v43 = vpop.f32.mrb[50].mxu1  ;;  %v4029_v44 = vpop.f32.mrb[51].mxu0 }
 0x190   :  { %v4030_v45 = vadd.f32 %v4029_v44, %v4028_v38  ;;  %v4141_v46 = vpop.f32.mrb[51].mxu1 }
 0x191   :  { %v1134_v47 = vpack.c.bf16 %v1114_v41, %v1113_v39  ;;  %v1022_v48 = vadd.f32 %v4139_v42, %v4027_v36  ;;  %v4142_v49 = vadd.f32 %v4141_v46, %v4140_v43 }
 0x193   :  { %v1083_v50 = vadd.f32 %v5052_v52, %v1022_v48  ;;  %v1025_v51 = vadd.f32 %v4142_v49, %v4030_v45  ;;  %3867 = vmatmul.mubr.msk.bf16.gmra.mrb[108].mxu0 %vm1199_vm0, %v1134_v47 }
 0x194   :  { %v4031_v53 = vpop.f32.mrb[52].mxu0  ;;  %1400 = vmatprep.mubr.bf16.mxu0 %v4623_v40 }
 0x195   :  { %v1084_v54 = vadd.f32 %v5052_v52, %v1025_v51  ;;  %v4143_v55 = vpop.f32.mrb[52].mxu1  ;;  %v4032_v56 = vpop.f32.mrb[53].mxu0  ;;  %v1115_v60 = vmax.f32 %v1083_v50, 0.0  ;;  %v7186_v51 = vlaneseq }
 0x196   :  { %v4033_v57 = vadd.f32 %v4032_v56, %v4031_v53  ;;  %v4144_v58 = vpop.f32.mrb[53].mxu1  ;;  %v4034_v59 = vpop.f32.mrb[54].mxu0  ;;  %v4412_v53 = vld [vmem:[#allocation5] ss:$8 sps:$4 sm:$0xff]   ;;  %v4417_v56 = vld [vmem:[#allocation7 + $0x4] ss:$8 sps:$4 sm:$0xff]  }
 0x197   :  { %v1116_v61 = vmax.f32 %v1084_v54, 0.0  ;;  %v4145_v62 = vadd.f32 %v4144_v58, %v4143_v55  ;;  %v4146_v63 = vpop.f32.mrb[54].mxu1  ;;  %v4035_v0 = vpop.f32.mrb[55].mxu0  ;;  %v4414_v54 = vld [vmem:[#allocation5 + $0x4] ss:$8 sps:$4 sm:$0xff]   ;;  %v5161_v55 = vshrl.u32 %v7186_v51, 7  ;;  %2827 = vmatprep.subr.bf16.mxu1 %v4417_v56 }
 0x198   :  { %v4036_v1 = vadd.f32 %v4035_v0, %v4034_v59  ;;  %v4147_v2 = vpop.f32.mrb[55].mxu1  ;;  %2053 = vmatprep.subr.bf16.mxu0 %v4414_v54  ;;  %vm3708_vm1 = vcmp.lt.s32.totalorder %v7186_v51, 256  ;;  %v5519_v51 = vld [vmem:[%s7171_s0 + $0x58] sm:$0xff] }
 0x199   :  { %v1135_v3 = vpack.c.bf16 %v1116_v61, %v1115_v60  ;;  %v1030_v4 = vadd.f32 %v4145_v62, %v4033_v57  ;;  %v4148_v5 = vadd.f32 %v4147_v2, %v4146_v63  ;;  %2054 = vmatpush1.bf16.msra.mxu0 %v4412_v53  ;;  %v5164_v57 = vsub.s32 0, %v5161_v55  ;;  %v4432_v53 = vld [vmem:[#allocation5 + $0x34] ss:$8 sps:$4 sm:$0xff]   ;;  %7232 = vst [vmem:[#allocation17_spill] sm:$0xff] %v5519_v51 }
 0x19a   :  { %v5170_v58 = vsub.s32 1, %v5161_v55 }
 0x19b   :  { %v1085_v6 = vadd.f32 %v5052_v52, %v1030_v4  ;;  %v1033_v7 = vadd.f32 %v4148_v5, %v4036_v1  ;;  %3868 = vmatmul.mubr.msk.bf16.gmra.mrb[112].mxu0 %vm1199_vm0, %v1135_v3 }
 0x19c   :  { %v4037_v8 = vpop.f32.mrb[56].mxu0  ;;  %1410 = vmatprep.mubr.bf16.mxu0 %v4623_v40 }
 0x19d   :  { %v1086_v9 = vadd.f32 %v5052_v52, %v1033_v7  ;;  %v4149_v10 = vpop.f32.mrb[56].mxu1  ;;  %v4038_v11 = vpop.f32.mrb[57].mxu0  ;;  %v1117_v15 = vmax.f32 %v1085_v6, 0.0 }
 0x19e   :  { %v4039_v12 = vadd.f32 %v4038_v11, %v4037_v8  ;;  %v4150_v13 = vpop.f32.mrb[57].mxu1  ;;  %v4040_v14 = vpop.f32.mrb[58].mxu0 }
 0x19f   :  { %v1118_v16 = vmax.f32 %v1086_v9, 0.0  ;;  %v4151_v17 = vadd.f32 %v4150_v13, %v4149_v10  ;;  %v4152_v18 = vpop.f32.mrb[58].mxu1  ;;  %v4041_v19 = vpop.f32.mrb[59].mxu0 }
 0x1a0   :  { %v4042_v20 = vadd.f32 %v4041_v19, %v4040_v14  ;;  %v4153_v21 = vpop.f32.mrb[59].mxu1 }
 0x1a1   :  { %v1136_v22 = vpack.c.bf16 %v1118_v16, %v1117_v15  ;;  %v1038_v23 = vadd.f32 %v4151_v17, %v4039_v12  ;;  %v4154_v24 = vadd.f32 %v4153_v21, %v4152_v18  ;;  %v4415_v18 = vld [vmem:[#allocation7] ss:$8 sps:$4 sm:$0xff]  }
 0x1a3   :  { %v1087_v25 = vadd.f32 %v5052_v52, %v1038_v23  ;;  %v1041_v26 = vadd.f32 %v4154_v24, %v4042_v20  ;;  %3869 = vmatmul.mubr.msk.bf16.gmra.mrb[116].mxu0 %vm1199_vm0, %v1136_v22 }
 0x1a4   :  { %v4043_v27 = vpop.f32.mrb[60].mxu0  ;;  %1420 = vmatprep.mubr.bf16.mxu0 %v4623_v40 }
 0x1a5   :  { %v1088_v28 = vadd.f32 %v5052_v52, %v1041_v26  ;;  %v4155_v29 = vpop.f32.mrb[60].mxu1  ;;  %v4044_v30 = vpop.f32.mrb[61].mxu0  ;;  %v1119_v34 = vmax.f32 %v1087_v25, 0.0 }
 0x1a6   :  { %v4045_v31 = vadd.f32 %v4044_v30, %v4043_v27  ;;  %v4156_v32 = vpop.f32.mrb[61].mxu1  ;;  %v4046_v33 = vpop.f32.mrb[62].mxu0 }
 0x1a7   :  { %v1120_v35 = vmax.f32 %v1088_v28, 0.0  ;;  %v4157_v36 = vadd.f32 %v4156_v32, %v4155_v29  ;;  %v4158_v37 = vpop.f32.mrb[62].mxu1  ;;  %v4047_v38 = vpop.f32.mrb[63].mxu0  ;;  %v4420_v32 = vld [vmem:[#allocation5 + $0x14] ss:$8 sps:$4 sm:$0xff]  }
 0x1a8   :  { %v4048_v39 = vadd.f32 %v4047_v38, %v4046_v33  ;;  %v4159_v41 = vpop.f32.mrb[63].mxu1  ;;  %2055 = vmatprep.subr.bf16.mxu0 %v4420_v32 }
 0x1a9   :  { %v1137_v42 = vpack.c.bf16 %v1120_v35, %v1119_v34  ;;  %v1046_v43 = vadd.f32 %v4157_v36, %v4045_v31  ;;  %v4160_v44 = vadd.f32 %v4159_v41, %v4158_v37  ;;  %v4418_v31 = vld [vmem:[#allocation5 + $0x10] ss:$8 sps:$4 sm:$0xff]   ;;  %v4423_v37 = vld [vmem:[#allocation7 + $0x14] ss:$8 sps:$4 sm:$0xff]  }
 0x1aa   :  { %v4421_v36 = vld [vmem:[#allocation7 + $0x10] ss:$8 sps:$4 sm:$0xff]   ;;  %2056 = vmatpush1.bf16.msra.mxu0 %v4418_v31 }
 0x1ab   :  { %v1089_v45 = vadd.f32 %v5052_v52, %v1046_v43  ;;  %v1049_v46 = vadd.f32 %v4160_v44, %v4048_v39  ;;  %3870 = vmatmul.mubr.msk.bf16.gmra.mrb[120].mxu0 %vm1199_vm0, %v1137_v42  ;;  %v4426_v42 = vld [vmem:[#allocation5 + $0x24] ss:$8 sps:$4 sm:$0xff]  }
 0x1ac   :  { %1430 = vmatprep.mubr.bf16.mxu0 %v4623_v40  ;;  %2057 = vmatprep.subr.bf16.mxu0 %v4426_v42 }
 0x1ad   :  { %v1090_v47 = vadd.f32 %v5052_v52, %v1049_v46  ;;  %v1121_v48 = vmax.f32 %v1089_v45, 0.0  ;;  %v1147_v52 = vld [vmem:[%s7177_s6] sm:$0x3] }
 0x1ae   :  { %v5173_v59 = vrot.slane %v1147_v52, %v5164_v57  ;;  %v5176_v60 = vrot.slane %v1147_v52, %v5170_v58  ;;  %v4424_v46 = vld [vmem:[#allocation5 + $0x20] ss:$8 sps:$4 sm:$0xff]  }
 0x1af   :  { %v1122_v49 = vmax.f32 %v1090_v47, 0.0  ;;  %v4429_v47 = vld [vmem:[#allocation7 + $0x24] ss:$8 sps:$4 sm:$0xff]   ;;  %2058 = vmatpush1.bf16.msra.mxu0 %v4424_v46 }
 0x1b0   :  { %2059 = vmatprep.subr.bf16.mxu0 %v4432_v53 }
 0x1b1   :  { %v1138_v50 = vpack.c.bf16 %v1122_v49, %v1121_v48 }
 0x1b3   :  { %3871 = vmatmul.mubr.msk.bf16.gmra.mrb[124].mxu0 %vm1199_vm0, %v1138_v50 }
 0x1b4   :  { %2085 = vmatprep.mubr.bf16.mxu0 %v4623_v40 }
 0x20e   :  { %v1282_v61 = vpop.f32.mrb[64].mxu0 }
 0x20f   :  { %v1283_v62 = vadd.f32 %v1282_v61, %v5173_v59  ;;  %v1284_v63 = vpop.f32.mrb[65].mxu0 }
 0x210   :  { %v1285_v0 = vadd.f32 %v1284_v63, %v5176_v60  ;;  %v1286_v1 = vpop.f32.mrb[66].mxu0 }
 0x211   :  { %v1441_v2 = vmax.f32 %v1283_v62, 0.0  ;;  %v1287_v3 = vadd.f32 %v1286_v1, %v5173_v59  ;;  %v1288_v4 = vpop.f32.mrb[67].mxu0  ;;  %v4427_v62 = vld [vmem:[#allocation7 + $0x20] ss:$8 sps:$4 sm:$0xff]   ;;  %v4435_v1 = vld [vmem:[#allocation7 + $0x34] ss:$8 sps:$4 sm:$0xff]  }
 0x212   :  { %v1442_v5 = vmax.f32 %v1285_v0, 0.0  ;;  %v1289_v6 = vadd.f32 %v1288_v4, %v5176_v60 }
 0x213   :  { %v3478_v7 = vmul.f32 %v1441_v2, %v1441_v2  ;;  %v1443_v8 = vmax.f32 %v1287_v3, 0.0 }
 0x214   :  { %v3479_v9 = vmul.f32 %v1442_v5, %v1442_v5  ;;  %v1444_v10 = vmax.f32 %v1289_v6, 0.0 }
 0x215   :  { %v1505_v11 = vpack.c.bf16 %v1443_v8, %v1441_v2  ;;  %v3480_v12 = vmul.f32 %v1443_v8, %v1443_v8  ;;  %v3614_v13 = vadd.f32 %v1443_v8, %v1441_v2 }
 0x216   :  { %v3542_v14 = vadd.f32 %v3479_v9, %v3478_v7  ;;  %v3651_v15 = vadd.f32 %v1444_v10, %v1442_v5  ;;  %v1292_v16 = vpop.f32.mrb[68].mxu0  ;;  %v1506_v17 = vpack.c.bf16 %v1444_v10, %v1442_v5  ;;  %v3481_v22 = vmul.f32 %v1444_v10, %v1444_v10  ;;  %v4430_v7 = vld [vmem:[#allocation5 + $0x30] ss:$8 sps:$4 sm:$0xff]  }
 0x217   :  { %v1293_v19 = vadd.f32 %v1292_v16, %v5173_v59  ;;  %v1294_v20 = vpop.f32.mrb[69].mxu0  ;;  %2060 = vmatpush1.bf16.msra.mxu0 %v4430_v7 }
 0x218   :  { %v3543_v21 = vadd.f32 %v3542_v14, %v3480_v12  ;;  %v1295_v23 = vadd.f32 %v1294_v20, %v5176_v60  ;;  %v1296_v24 = vpop.f32.mrb[70].mxu0  ;;  %1704 = vmatprep.mubr.bf16.mxu1 %v1506_v17  ;;  %v4433_v14 = vld [vmem:[#allocation7 + $0x30] ss:$8 sps:$4 sm:$0xff]  }
 0x219   :  { %v1445_v25 = vmax.f32 %v1293_v19, 0.0  ;;  %v1297_v26 = vadd.f32 %v1296_v24, %v5173_v59  ;;  %v1298_v27 = vpop.f32.mrb[71].mxu0  ;;  %1705 = vmatmul.mubr.bf16.vlgmr.msra.gmra.mrb[64].mxu1 %v1505_v11 }
 0x21a   :  { %v3544_v28 = vadd.f32 %v3543_v21, %v3481_v22  ;;  %v1446_v29 = vmax.f32 %v1295_v23, 0.0  ;;  %v1299_v30 = vadd.f32 %v1298_v27, %v5176_v60  ;;  %2828 = vmatpush1.bf16.msra.mxu1 %v4415_v18 }
 0x21b   :  { %v3482_v33 = vmul.f32 %v1445_v25, %v1445_v25  ;;  %v3615_v34 = vadd.f32 %v3614_v13, %v1445_v25  ;;  %v1447_v35 = vmax.f32 %v1297_v26, 0.0  ;;  %2829 = vmatprep.subr.bf16.mxu1 %v4423_v37 }
 0x21c   :  { %v3483_v38 = vmul.f32 %v1446_v29, %v1446_v29  ;;  %v3652_v39 = vadd.f32 %v3651_v15, %v1446_v29  ;;  %v1448_v41 = vmax.f32 %v1299_v30, 0.0 }
 0x21d   :  { %v3545_v43 = vadd.f32 %v3544_v28, %v3482_v33  ;;  %v3616_v44 = vadd.f32 %v3615_v34, %v1447_v35  ;;  %v1507_v45 = vpack.c.bf16 %v1447_v35, %v1445_v25  ;;  %v3484_v56 = vmul.f32 %v1447_v35, %v1447_v35 }
 0x21e   :  { %v3653_v48 = vadd.f32 %v3652_v39, %v1448_v41  ;;  %v1302_v49 = vpop.f32.mrb[72].mxu0  ;;  %v1508_v50 = vpack.c.bf16 %v1448_v41, %v1446_v29  ;;  %2830 = vmatpush1.bf16.msra.mxu1 %v4421_v36  ;;  %v3485_v3 = vmul.f32 %v1448_v41, %v1448_v41 }
 0x21f   :  { %v3546_v54 = vadd.f32 %v3545_v43, %v3483_v38  ;;  %v1303_v52 = vadd.f32 %v1302_v49, %v5173_v59  ;;  %v1304_v61 = vpop.f32.mrb[73].mxu0  ;;  %2831 = vmatprep.subr.bf16.mxu1 %v4429_v47 }
 0x220   :  { %v1305_v63 = vadd.f32 %v1304_v61, %v5176_v60  ;;  %v1306_v0 = vpop.f32.mrb[74].mxu0  ;;  %1712 = vmatprep.mubr.bf16.mxu1 %v1508_v50 }
 0x221   :  { %v3547_v2 = vadd.f32 %v3546_v54, %v3484_v56  ;;  %v1449_v4 = vmax.f32 %v1303_v52, 0.0  ;;  %v1307_v5 = vadd.f32 %v1306_v0, %v5173_v59  ;;  %v1308_v6 = vpop.f32.mrb[75].mxu0  ;;  %1713 = vmatmul.mubr.bf16.gmra.mrb[68].mxu1 %v1507_v45 }
 0x222   :  { %v1450_v8 = vmax.f32 %v1305_v63, 0.0  ;;  %v1309_v9 = vadd.f32 %v1308_v6, %v5176_v60  ;;  %2832 = vmatpush1.bf16.msra.mxu1 %v4427_v62 }
 0x223   :  { %v3548_v10 = vadd.f32 %v3547_v2, %v3485_v3  ;;  %v3486_v11 = vmul.f32 %v1449_v4, %v1449_v4  ;;  %v3617_v12 = vadd.f32 %v3616_v44, %v1449_v4  ;;  %v1451_v13 = vmax.f32 %v1307_v5, 0.0  ;;  %2833 = vmatprep.subr.bf16.mxu1 %v4435_v1 }
 0x224   :  { %v3487_v15 = vmul.f32 %v1450_v8, %v1450_v8  ;;  %v3654_v16 = vadd.f32 %v3653_v48, %v1450_v8  ;;  %v1452_v17 = vmax.f32 %v1309_v9, 0.0 }
 0x225   :  { %v3549_v18 = vadd.f32 %v3548_v10, %v3486_v11  ;;  %v3618_v19 = vadd.f32 %v3617_v12, %v1451_v13  ;;  %v1509_v20 = vpack.c.bf16 %v1451_v13, %v1449_v4  ;;  %v3488_v25 = vmul.f32 %v1451_v13, %v1451_v13 }
 0x226   :  { %v3655_v21 = vadd.f32 %v3654_v16, %v1452_v17  ;;  %v1312_v22 = vpop.f32.mrb[76].mxu0  ;;  %v1510_v23 = vpack.c.bf16 %v1452_v17, %v1450_v8  ;;  %2834 = vmatpush1.bf16.msra.mxu1 %v4433_v14  ;;  %v3489_v31 = vmul.f32 %v1452_v17, %v1452_v17 }
 0x227   :  { %v3550_v24 = vadd.f32 %v3549_v18, %v3487_v15  ;;  %v1313_v26 = vadd.f32 %v1312_v22, %v5173_v59  ;;  %v1314_v27 = vpop.f32.mrb[77].mxu0 }
 0x228   :  { %v1315_v28 = vadd.f32 %v1314_v27, %v5176_v60  ;;  %v1316_v29 = vpop.f32.mrb[78].mxu0  ;;  %1720 = vmatprep.mubr.bf16.mxu1 %v1510_v23 }
 0x229   :  { %v3551_v30 = vadd.f32 %v3550_v24, %v3488_v25  ;;  %v1453_v32 = vmax.f32 %v1313_v26, 0.0  ;;  %v1317_v33 = vadd.f32 %v1316_v29, %v5173_v59  ;;  %v1318_v34 = vpop.f32.mrb[79].mxu0  ;;  %1721 = vmatmul.mubr.bf16.gmra.mrb[72].mxu1 %v1509_v20 }
 0x22a   :  { %v1454_v35 = vmax.f32 %v1315_v28, 0.0  ;;  %v1319_v36 = vadd.f32 %v1318_v34, %v5176_v60 }
 0x22b   :  { %v3552_v37 = vadd.f32 %v3551_v30, %v3489_v31  ;;  %v3490_v38 = vmul.f32 %v1453_v32, %v1453_v32  ;;  %v3619_v39 = vadd.f32 %v3618_v19, %v1453_v32  ;;  %v1455_v41 = vmax.f32 %v1317_v33, 0.0 }
 0x22c   :  { %v3491_v42 = vmul.f32 %v1454_v35, %v1454_v35  ;;  %v3656_v43 = vadd.f32 %v3655_v21, %v1454_v35  ;;  %v1456_v44 = vmax.f32 %v1319_v36, 0.0 }
 0x22d   :  { %v3553_v45 = vadd.f32 %v3552_v37, %v3490_v38  ;;  %v3620_v46 = vadd.f32 %v3619_v39, %v1455_v41  ;;  %v1511_v47 = vpack.c.bf16 %v1455_v41, %v1453_v32  ;;  %v3492_v54 = vmul.f32 %v1455_v41, %v1455_v41 }
 0x22e   :  { %v3657_v48 = vadd.f32 %v3656_v43, %v1456_v44  ;;  %v1322_v49 = vpop.f32.mrb[80].mxu0  ;;  %v1512_v50 = vpack.c.bf16 %v1456_v44, %v1454_v35  ;;  %v3493_v0 = vmul.f32 %v1456_v44, %v1456_v44 }
 0x22f   :  { %v3554_v53 = vadd.f32 %v3553_v45, %v3491_v42  ;;  %v1323_v56 = vadd.f32 %v1322_v49, %v5173_v59  ;;  %v1324_v52 = vpop.f32.mrb[81].mxu0 }
 0x230   :  { %v1325_v61 = vadd.f32 %v1324_v52, %v5176_v60  ;;  %v1326_v62 = vpop.f32.mrb[82].mxu0  ;;  %1728 = vmatprep.mubr.bf16.mxu1 %v1512_v50 }
 0x231   :  { %v3555_v63 = vadd.f32 %v3554_v53, %v3492_v54  ;;  %v1457_v1 = vmax.f32 %v1323_v56, 0.0  ;;  %v1327_v2 = vadd.f32 %v1326_v62, %v5173_v59  ;;  %v1328_v3 = vpop.f32.mrb[83].mxu0  ;;  %1729 = vmatmul.mubr.bf16.gmra.mrb[76].mxu1 %v1511_v47 }
 0x232   :  { %v1458_v4 = vmax.f32 %v1325_v61, 0.0  ;;  %v1329_v5 = vadd.f32 %v1328_v3, %v5176_v60 }
 0x233   :  { %v3556_v6 = vadd.f32 %v3555_v63, %v3493_v0  ;;  %v3494_v7 = vmul.f32 %v1457_v1, %v1457_v1  ;;  %v3621_v8 = vadd.f32 %v3620_v46, %v1457_v1  ;;  %v1459_v9 = vmax.f32 %v1327_v2, 0.0 }
 0x234   :  { %v3495_v10 = vmul.f32 %v1458_v4, %v1458_v4  ;;  %v3658_v11 = vadd.f32 %v3657_v48, %v1458_v4  ;;  %v1460_v12 = vmax.f32 %v1329_v5, 0.0 }
 0x235   :  { %v3557_v13 = vadd.f32 %v3556_v6, %v3494_v7  ;;  %v3622_v14 = vadd.f32 %v3621_v8, %v1459_v9  ;;  %v1513_v15 = vpack.c.bf16 %v1459_v9, %v1457_v1  ;;  %v3496_v20 = vmul.f32 %v1459_v9, %v1459_v9 }
 0x236   :  { %v3659_v16 = vadd.f32 %v3658_v11, %v1460_v12  ;;  %v1332_v17 = vpop.f32.mrb[84].mxu0  ;;  %v1514_v18 = vpack.c.bf16 %v1460_v12, %v1458_v4  ;;  %v3497_v26 = vmul.f32 %v1460_v12, %v1460_v12 }
 0x237   :  { %v3558_v19 = vadd.f32 %v3557_v13, %v3495_v10  ;;  %v1333_v21 = vadd.f32 %v1332_v17, %v5173_v59  ;;  %v1334_v22 = vpop.f32.mrb[85].mxu0 }
 0x238   :  { %v1335_v23 = vadd.f32 %v1334_v22, %v5176_v60  ;;  %v1336_v24 = vpop.f32.mrb[86].mxu0  ;;  %1736 = vmatprep.mubr.bf16.mxu1 %v1514_v18 }
 0x239   :  { %v3559_v25 = vadd.f32 %v3558_v19, %v3496_v20  ;;  %v1461_v27 = vmax.f32 %v1333_v21, 0.0  ;;  %v1337_v28 = vadd.f32 %v1336_v24, %v5173_v59  ;;  %v1338_v29 = vpop.f32.mrb[87].mxu0  ;;  %1737 = vmatmul.mubr.bf16.gmra.mrb[80].mxu1 %v1513_v15 }
 0x23a   :  { %v1462_v30 = vmax.f32 %v1335_v23, 0.0  ;;  %v1339_v31 = vadd.f32 %v1338_v29, %v5176_v60 }
 0x23b   :  { %v3560_v32 = vadd.f32 %v3559_v25, %v3497_v26  ;;  %v3498_v33 = vmul.f32 %v1461_v27, %v1461_v27  ;;  %v3623_v34 = vadd.f32 %v3622_v14, %v1461_v27  ;;  %v1463_v35 = vmax.f32 %v1337_v28, 0.0 }
 0x23c   :  { %v3499_v36 = vmul.f32 %v1462_v30, %v1462_v30  ;;  %v3660_v37 = vadd.f32 %v3659_v16, %v1462_v30  ;;  %v1464_v38 = vmax.f32 %v1339_v31, 0.0 }
 0x23d   :  { %v3561_v39 = vadd.f32 %v3560_v32, %v3498_v33  ;;  %v3624_v41 = vadd.f32 %v3623_v34, %v1463_v35  ;;  %v1515_v42 = vpack.c.bf16 %v1463_v35, %v1461_v27  ;;  %v3500_v47 = vmul.f32 %v1463_v35, %v1463_v35 }
 0x23e   :  { %v3661_v43 = vadd.f32 %v3660_v37, %v1464_v38  ;;  %v1342_v44 = vpop.f32.mrb[88].mxu0  ;;  %v1516_v45 = vpack.c.bf16 %v1464_v38, %v1462_v30  ;;  %v3501_v56 = vmul.f32 %v1464_v38, %v1464_v38 }
 0x23f   :  { %v3562_v46 = vadd.f32 %v3561_v39, %v3499_v36  ;;  %v1343_v48 = vadd.f32 %v1342_v44, %v5173_v59  ;;  %v1344_v49 = vpop.f32.mrb[89].mxu0 }
 0x240   :  { %v1345_v50 = vadd.f32 %v1344_v49, %v5176_v60  ;;  %v1346_v53 = vpop.f32.mrb[90].mxu0  ;;  %1744 = vmatprep.mubr.bf16.mxu1 %v1516_v45 }
 0x241   :  { %v3563_v54 = vadd.f32 %v3562_v46, %v3500_v47  ;;  %v1465_v52 = vmax.f32 %v1343_v48, 0.0  ;;  %v1347_v61 = vadd.f32 %v1346_v53, %v5173_v59  ;;  %v1348_v62 = vpop.f32.mrb[91].mxu0  ;;  %1745 = vmatmul.mubr.bf16.gmra.mrb[84].mxu1 %v1515_v42 }
 0x242   :  { %v1466_v63 = vmax.f32 %v1345_v50, 0.0  ;;  %v1349_v0 = vadd.f32 %v1348_v62, %v5176_v60 }
 0x243   :  { %v3564_v1 = vadd.f32 %v3563_v54, %v3501_v56  ;;  %v3502_v2 = vmul.f32 %v1465_v52, %v1465_v52  ;;  %v3625_v3 = vadd.f32 %v3624_v41, %v1465_v52  ;;  %v1467_v4 = vmax.f32 %v1347_v61, 0.0 }
 0x244   :  { %v3503_v5 = vmul.f32 %v1466_v63, %v1466_v63  ;;  %v3662_v6 = vadd.f32 %v3661_v43, %v1466_v63  ;;  %v1468_v7 = vmax.f32 %v1349_v0, 0.0 }
 0x245   :  { %v3565_v8 = vadd.f32 %v3564_v1, %v3502_v2  ;;  %v3626_v9 = vadd.f32 %v3625_v3, %v1467_v4  ;;  %v1517_v10 = vpack.c.bf16 %v1467_v4, %v1465_v52  ;;  %v3504_v15 = vmul.f32 %v1467_v4, %v1467_v4 }
 0x246   :  { %v3663_v11 = vadd.f32 %v3662_v6, %v1468_v7  ;;  %v1352_v12 = vpop.f32.mrb[92].mxu0  ;;  %v1518_v13 = vpack.c.bf16 %v1468_v7, %v1466_v63  ;;  %v3505_v21 = vmul.f32 %v1468_v7, %v1468_v7 }
 0x247   :  { %v3566_v14 = vadd.f32 %v3565_v8, %v3503_v5  ;;  %v1353_v16 = vadd.f32 %v1352_v12, %v5173_v59  ;;  %v1354_v17 = vpop.f32.mrb[93].mxu0 }
 0x248   :  { %v1355_v18 = vadd.f32 %v1354_v17, %v5176_v60  ;;  %v1356_v19 = vpop.f32.mrb[94].mxu0  ;;  %1752 = vmatprep.mubr.bf16.mxu1 %v1518_v13 }
 0x249   :  { %v3567_v20 = vadd.f32 %v3566_v14, %v3504_v15  ;;  %v1469_v22 = vmax.f32 %v1353_v16, 0.0  ;;  %v1357_v23 = vadd.f32 %v1356_v19, %v5173_v59  ;;  %v1358_v24 = vpop.f32.mrb[95].mxu0  ;;  %1753 = vmatmul.mubr.bf16.gmra.mrb[88].mxu1 %v1517_v10 }
 0x24a   :  { %v1470_v25 = vmax.f32 %v1355_v18, 0.0  ;;  %v1359_v26 = vadd.f32 %v1358_v24, %v5176_v60 }
 0x24b   :  { %v3568_v27 = vadd.f32 %v3567_v20, %v3505_v21  ;;  %v3506_v28 = vmul.f32 %v1469_v22, %v1469_v22  ;;  %v3627_v29 = vadd.f32 %v3626_v9, %v1469_v22  ;;  %v1471_v30 = vmax.f32 %v1357_v23, 0.0 }
 0x24c   :  { %v3507_v31 = vmul.f32 %v1470_v25, %v1470_v25  ;;  %v3664_v32 = vadd.f32 %v3663_v11, %v1470_v25  ;;  %v1472_v33 = vmax.f32 %v1359_v26, 0.0 }
 0x24d   :  { %v3569_v34 = vadd.f32 %v3568_v27, %v3506_v28  ;;  %v3628_v35 = vadd.f32 %v3627_v29, %v1471_v30  ;;  %v1519_v36 = vpack.c.bf16 %v1471_v30, %v1469_v22  ;;  %v3508_v42 = vmul.f32 %v1471_v30, %v1471_v30 }
 0x24e   :  { %v3665_v37 = vadd.f32 %v3664_v32, %v1472_v33  ;;  %v1362_v38 = vpop.f32.mrb[96].mxu0  ;;  %v1520_v39 = vpack.c.bf16 %v1472_v33, %v1470_v25  ;;  %v3509_v48 = vmul.f32 %v1472_v33, %v1472_v33 }
 0x24f   :  { %v3570_v41 = vadd.f32 %v3569_v34, %v3507_v31  ;;  %v1363_v43 = vadd.f32 %v1362_v38, %v5173_v59  ;;  %v1364_v44 = vpop.f32.mrb[97].mxu0 }
 0x250   :  { %v1365_v45 = vadd.f32 %v1364_v44, %v5176_v60  ;;  %v1366_v46 = vpop.f32.mrb[98].mxu0  ;;  %1760 = vmatprep.mubr.bf16.mxu1 %v1520_v39 }
 0x251   :  { %v3571_v47 = vadd.f32 %v3570_v41, %v3508_v42  ;;  %v1473_v49 = vmax.f32 %v1363_v43, 0.0  ;;  %v1367_v50 = vadd.f32 %v1366_v46, %v5173_v59  ;;  %v1368_v53 = vpop.f32.mrb[99].mxu0  ;;  %1761 = vmatmul.mubr.bf16.gmra.mrb[92].mxu1 %v1519_v36 }
 0x252   :  { %v1474_v54 = vmax.f32 %v1365_v45, 0.0  ;;  %v1369_v56 = vadd.f32 %v1368_v53, %v5176_v60 }
 0x253   :  { %v3572_v52 = vadd.f32 %v3571_v47, %v3509_v48  ;;  %v3510_v61 = vmul.f32 %v1473_v49, %v1473_v49  ;;  %v3629_v62 = vadd.f32 %v3628_v35, %v1473_v49  ;;  %v1475_v63 = vmax.f32 %v1367_v50, 0.0 }
 0x254   :  { %v3511_v0 = vmul.f32 %v1474_v54, %v1474_v54  ;;  %v3666_v1 = vadd.f32 %v3665_v37, %v1474_v54  ;;  %v1476_v2 = vmax.f32 %v1369_v56, 0.0 }
 0x255   :  { %v3573_v3 = vadd.f32 %v3572_v52, %v3510_v61  ;;  %v3630_v4 = vadd.f32 %v3629_v62, %v1475_v63  ;;  %v1521_v5 = vpack.c.bf16 %v1475_v63, %v1473_v49  ;;  %v3512_v10 = vmul.f32 %v1475_v63, %v1475_v63 }
 0x256   :  { %v3667_v6 = vadd.f32 %v3666_v1, %v1476_v2  ;;  %v1372_v7 = vpop.f32.mrb[100].mxu0  ;;  %v1522_v8 = vpack.c.bf16 %v1476_v2, %v1474_v54  ;;  %v3513_v16 = vmul.f32 %v1476_v2, %v1476_v2 }
 0x257   :  { %v3574_v9 = vadd.f32 %v3573_v3, %v3511_v0  ;;  %v1373_v11 = vadd.f32 %v1372_v7, %v5173_v59  ;;  %v1374_v12 = vpop.f32.mrb[101].mxu0 }
 0x258   :  { %v1375_v13 = vadd.f32 %v1374_v12, %v5176_v60  ;;  %v1376_v14 = vpop.f32.mrb[102].mxu0  ;;  %1768 = vmatprep.mubr.bf16.mxu1 %v1522_v8 }
 0x259   :  { %v3575_v15 = vadd.f32 %v3574_v9, %v3512_v10  ;;  %v1477_v17 = vmax.f32 %v1373_v11, 0.0  ;;  %v1377_v18 = vadd.f32 %v1376_v14, %v5173_v59  ;;  %v1378_v19 = vpop.f32.mrb[103].mxu0  ;;  %1769 = vmatmul.mubr.bf16.gmra.mrb[96].mxu1 %v1521_v5 }
 0x25a   :  { %v1478_v20 = vmax.f32 %v1375_v13, 0.0  ;;  %v1379_v21 = vadd.f32 %v1378_v19, %v5176_v60 }
 0x25b   :  { %v3576_v22 = vadd.f32 %v3575_v15, %v3513_v16  ;;  %v3514_v23 = vmul.f32 %v1477_v17, %v1477_v17  ;;  %v3631_v24 = vadd.f32 %v3630_v4, %v1477_v17  ;;  %v1479_v25 = vmax.f32 %v1377_v18, 0.0 }
 0x25c   :  { %v3515_v26 = vmul.f32 %v1478_v20, %v1478_v20  ;;  %v3668_v27 = vadd.f32 %v3667_v6, %v1478_v20  ;;  %v1480_v28 = vmax.f32 %v1379_v21, 0.0 }
 0x25d   :  { %v3577_v29 = vadd.f32 %v3576_v22, %v3514_v23  ;;  %v3632_v30 = vadd.f32 %v3631_v24, %v1479_v25  ;;  %v1523_v31 = vpack.c.bf16 %v1479_v25, %v1477_v17  ;;  %v3516_v36 = vmul.f32 %v1479_v25, %v1479_v25 }
 0x25e   :  { %v3669_v32 = vadd.f32 %v3668_v27, %v1480_v28  ;;  %v1382_v33 = vpop.f32.mrb[104].mxu0  ;;  %v1524_v34 = vpack.c.bf16 %v1480_v28, %v1478_v20  ;;  %v3517_v43 = vmul.f32 %v1480_v28, %v1480_v28 }
 0x25f   :  { %v3578_v35 = vadd.f32 %v3577_v29, %v3515_v26  ;;  %v1383_v37 = vadd.f32 %v1382_v33, %v5173_v59  ;;  %v1384_v38 = vpop.f32.mrb[105].mxu0 }
 0x260   :  { %v1385_v39 = vadd.f32 %v1384_v38, %v5176_v60  ;;  %v1386_v41 = vpop.f32.mrb[106].mxu0  ;;  %1776 = vmatprep.mubr.bf16.mxu1 %v1524_v34 }
 0x261   :  { %v3579_v42 = vadd.f32 %v3578_v35, %v3516_v36  ;;  %v1481_v44 = vmax.f32 %v1383_v37, 0.0  ;;  %v1387_v45 = vadd.f32 %v1386_v41, %v5173_v59  ;;  %v1388_v46 = vpop.f32.mrb[107].mxu0  ;;  %1777 = vmatmul.mubr.bf16.gmra.mrb[100].mxu1 %v1523_v31 }
 0x262   :  { %v1482_v47 = vmax.f32 %v1385_v39, 0.0  ;;  %v1389_v48 = vadd.f32 %v1388_v46, %v5176_v60 }
 0x263   :  { %v3580_v49 = vadd.f32 %v3579_v42, %v3517_v43  ;;  %v3518_v50 = vmul.f32 %v1481_v44, %v1481_v44  ;;  %v3633_v53 = vadd.f32 %v3632_v30, %v1481_v44  ;;  %v1483_v54 = vmax.f32 %v1387_v45, 0.0 }
 0x264   :  { %v3519_v56 = vmul.f32 %v1482_v47, %v1482_v47  ;;  %v3670_v52 = vadd.f32 %v3669_v32, %v1482_v47  ;;  %v1484_v61 = vmax.f32 %v1389_v48, 0.0 }
 0x265   :  { %v3581_v62 = vadd.f32 %v3580_v49, %v3518_v50  ;;  %v3634_v63 = vadd.f32 %v3633_v53, %v1483_v54  ;;  %v1525_v0 = vpack.c.bf16 %v1483_v54, %v1481_v44  ;;  %v3520_v5 = vmul.f32 %v1483_v54, %v1483_v54 }
 0x266   :  { %v3671_v1 = vadd.f32 %v3670_v52, %v1484_v61  ;;  %v1392_v2 = vpop.f32.mrb[108].mxu0  ;;  %v1526_v3 = vpack.c.bf16 %v1484_v61, %v1482_v47  ;;  %v3521_v11 = vmul.f32 %v1484_v61, %v1484_v61 }
 0x267   :  { %v3582_v4 = vadd.f32 %v3581_v62, %v3519_v56  ;;  %v1393_v6 = vadd.f32 %v1392_v2, %v5173_v59  ;;  %v1394_v7 = vpop.f32.mrb[109].mxu0 }
 0x268   :  { %v1395_v8 = vadd.f32 %v1394_v7, %v5176_v60  ;;  %v1396_v9 = vpop.f32.mrb[110].mxu0  ;;  %1784 = vmatprep.mubr.bf16.mxu1 %v1526_v3 }
 0x269   :  { %v3583_v10 = vadd.f32 %v3582_v4, %v3520_v5  ;;  %v1485_v12 = vmax.f32 %v1393_v6, 0.0  ;;  %v1397_v13 = vadd.f32 %v1396_v9, %v5173_v59  ;;  %v1398_v14 = vpop.f32.mrb[111].mxu0  ;;  %1785 = vmatmul.mubr.bf16.gmra.mrb[104].mxu1 %v1525_v0 }
 0x26a   :  { %v1486_v15 = vmax.f32 %v1395_v8, 0.0  ;;  %v1399_v16 = vadd.f32 %v1398_v14, %v5176_v60 }
 0x26b   :  { %v3584_v17 = vadd.f32 %v3583_v10, %v3521_v11  ;;  %v3522_v18 = vmul.f32 %v1485_v12, %v1485_v12  ;;  %v3635_v19 = vadd.f32 %v3634_v63, %v1485_v12  ;;  %v1487_v20 = vmax.f32 %v1397_v13, 0.0 }
 0x26c   :  { %v3523_v21 = vmul.f32 %v1486_v15, %v1486_v15  ;;  %v3672_v22 = vadd.f32 %v3671_v1, %v1486_v15  ;;  %v1488_v23 = vmax.f32 %v1399_v16, 0.0 }
 0x26d   :  { %v3585_v24 = vadd.f32 %v3584_v17, %v3522_v18  ;;  %v3636_v25 = vadd.f32 %v3635_v19, %v1487_v20  ;;  %v1527_v26 = vpack.c.bf16 %v1487_v20, %v1485_v12  ;;  %v3524_v31 = vmul.f32 %v1487_v20, %v1487_v20 }
 0x26e   :  { %v3673_v27 = vadd.f32 %v3672_v22, %v1488_v23  ;;  %v1402_v28 = vpop.f32.mrb[112].mxu0  ;;  %v1528_v29 = vpack.c.bf16 %v1488_v23, %v1486_v15  ;;  %v3525_v37 = vmul.f32 %v1488_v23, %v1488_v23 }
 0x26f   :  { %v3586_v30 = vadd.f32 %v3585_v24, %v3523_v21  ;;  %v1403_v32 = vadd.f32 %v1402_v28, %v5173_v59  ;;  %v1404_v33 = vpop.f32.mrb[113].mxu0 }
 0x270   :  { %v1405_v34 = vadd.f32 %v1404_v33, %v5176_v60  ;;  %v1406_v35 = vpop.f32.mrb[114].mxu0  ;;  %1792 = vmatprep.mubr.bf16.mxu1 %v1528_v29 }
 0x271   :  { %v3587_v36 = vadd.f32 %v3586_v30, %v3524_v31  ;;  %v1489_v38 = vmax.f32 %v1403_v32, 0.0  ;;  %v1407_v39 = vadd.f32 %v1406_v35, %v5173_v59  ;;  %v1408_v41 = vpop.f32.mrb[115].mxu0  ;;  %1793 = vmatmul.mubr.bf16.gmra.mrb[108].mxu1 %v1527_v26 }
 0x272   :  { %v1490_v42 = vmax.f32 %v1405_v34, 0.0  ;;  %v1409_v43 = vadd.f32 %v1408_v41, %v5176_v60 }
 0x273   :  { %v3588_v44 = vadd.f32 %v3587_v36, %v3525_v37  ;;  %v3526_v45 = vmul.f32 %v1489_v38, %v1489_v38  ;;  %v3637_v46 = vadd.f32 %v3636_v25, %v1489_v38  ;;  %v1491_v47 = vmax.f32 %v1407_v39, 0.0 }
 0x274   :  { %v3527_v48 = vmul.f32 %v1490_v42, %v1490_v42  ;;  %v3674_v49 = vadd.f32 %v3673_v27, %v1490_v42  ;;  %v1492_v50 = vmax.f32 %v1409_v43, 0.0 }
 0x275   :  { %v3589_v53 = vadd.f32 %v3588_v44, %v3526_v45  ;;  %v3638_v54 = vadd.f32 %v3637_v46, %v1491_v47  ;;  %v1529_v56 = vpack.c.bf16 %v1491_v47, %v1489_v38  ;;  %v3528_v0 = vmul.f32 %v1491_v47, %v1491_v47 }
 0x276   :  { %v3675_v52 = vadd.f32 %v3674_v49, %v1492_v50  ;;  %v1412_v61 = vpop.f32.mrb[116].mxu0  ;;  %v1530_v62 = vpack.c.bf16 %v1492_v50, %v1490_v42  ;;  %v3529_v6 = vmul.f32 %v1492_v50, %v1492_v50 }
 0x277   :  { %v3590_v63 = vadd.f32 %v3589_v53, %v3527_v48  ;;  %v1413_v1 = vadd.f32 %v1412_v61, %v5173_v59  ;;  %v1414_v2 = vpop.f32.mrb[117].mxu0 }
 0x278   :  { %v1415_v3 = vadd.f32 %v1414_v2, %v5176_v60  ;;  %v1416_v4 = vpop.f32.mrb[118].mxu0  ;;  %1800 = vmatprep.mubr.bf16.mxu1 %v1530_v62 }
 0x279   :  { %v3591_v5 = vadd.f32 %v3590_v63, %v3528_v0  ;;  %v1493_v7 = vmax.f32 %v1413_v1, 0.0  ;;  %v1417_v8 = vadd.f32 %v1416_v4, %v5173_v59  ;;  %v1418_v9 = vpop.f32.mrb[119].mxu0  ;;  %1801 = vmatmul.mubr.bf16.gmra.mrb[112].mxu1 %v1529_v56 }
 0x27a   :  { %v1494_v10 = vmax.f32 %v1415_v3, 0.0  ;;  %v1419_v11 = vadd.f32 %v1418_v9, %v5176_v60 }
 0x27b   :  { %v3592_v12 = vadd.f32 %v3591_v5, %v3529_v6  ;;  %v3530_v13 = vmul.f32 %v1493_v7, %v1493_v7  ;;  %v3639_v14 = vadd.f32 %v3638_v54, %v1493_v7  ;;  %v1495_v15 = vmax.f32 %v1417_v8, 0.0 }
 0x27c   :  { %v3531_v16 = vmul.f32 %v1494_v10, %v1494_v10  ;;  %v3676_v17 = vadd.f32 %v3675_v52, %v1494_v10  ;;  %v1496_v18 = vmax.f32 %v1419_v11, 0.0 }
 0x27d   :  { %v3593_v19 = vadd.f32 %v3592_v12, %v3530_v13  ;;  %v3640_v20 = vadd.f32 %v3639_v14, %v1495_v15  ;;  %v1531_v21 = vpack.c.bf16 %v1495_v15, %v1493_v7  ;;  %v3532_v26 = vmul.f32 %v1495_v15, %v1495_v15 }
 0x27e   :  { %v3677_v22 = vadd.f32 %v3676_v17, %v1496_v18  ;;  %v1422_v23 = vpop.f32.mrb[120].mxu0  ;;  %v1532_v24 = vpack.c.bf16 %v1496_v18, %v1494_v10  ;;  %v3533_v32 = vmul.f32 %v1496_v18, %v1496_v18 }
 0x27f   :  { %v3594_v25 = vadd.f32 %v3593_v19, %v3531_v16  ;;  %v1423_v27 = vadd.f32 %v1422_v23, %v5173_v59  ;;  %v1424_v28 = vpop.f32.mrb[121].mxu0 }
 0x280   :  { %v1425_v29 = vadd.f32 %v1424_v28, %v5176_v60  ;;  %v1426_v30 = vpop.f32.mrb[122].mxu0  ;;  %1808 = vmatprep.mubr.bf16.mxu1 %v1532_v24 }
 0x281   :  { %v3595_v31 = vadd.f32 %v3594_v25, %v3532_v26  ;;  %v1497_v33 = vmax.f32 %v1423_v27, 0.0  ;;  %v1427_v34 = vadd.f32 %v1426_v30, %v5173_v59  ;;  %v1428_v35 = vpop.f32.mrb[123].mxu0  ;;  %1809 = vmatmul.mubr.bf16.gmra.mrb[116].mxu1 %v1531_v21  ;;  %v4624_v25 = vmov 1966171168  }
 0x282   :  { %v1498_v36 = vmax.f32 %v1425_v29, 0.0  ;;  %v1429_v37 = vadd.f32 %v1428_v35, %v5176_v60  ;;  %v3692_v26 = vunpack.c.l.s4 %v4624_v25 }
 0x283   :  { %v3596_v38 = vadd.f32 %v3595_v31, %v3533_v32  ;;  %v3534_v39 = vmul.f32 %v1497_v33, %v1497_v33  ;;  %v3641_v41 = vadd.f32 %v3640_v20, %v1497_v33  ;;  %v1499_v42 = vmax.f32 %v1427_v34, 0.0 }
 0x284   :  { %v3535_v43 = vmul.f32 %v1498_v36, %v1498_v36  ;;  %v3678_v44 = vadd.f32 %v3677_v22, %v1498_v36  ;;  %v1500_v45 = vmax.f32 %v1429_v37, 0.0  ;;  %v3693_v32 = vunpack.c.0.s8 %v3692_v26 }
 0x285   :  { %v3597_v46 = vadd.f32 %v3596_v38, %v3534_v39  ;;  %v3642_v47 = vadd.f32 %v3641_v41, %v1499_v42  ;;  %v1533_v48 = vpack.c.bf16 %v1499_v42, %v1497_v33  ;;  %v3536_v56 = vmul.f32 %v1499_v42, %v1499_v42 }
 0x286   :  { %v3679_v49 = vadd.f32 %v3678_v44, %v1500_v45  ;;  %v1432_v50 = vpop.f32.mrb[124].mxu0  ;;  %v1534_v53 = vpack.c.bf16 %v1500_v45, %v1498_v36  ;;  %v3537_v1 = vmul.f32 %v1500_v45, %v1500_v45  ;;  %v3696_v37 = vsub.s32 %v3693_v32, %v5161_v55 }
 0x287   :  { %v3598_v54 = vadd.f32 %v3597_v46, %v3535_v43  ;;  %v1433_v52 = vadd.f32 %v1432_v50, %v5173_v59  ;;  %v1434_v61 = vpop.f32.mrb[125].mxu0  ;;  %v5248_v43 = vld [vmem:[%s7179_s8] ss:$0 sm:$0xff] }
 0x288   :  { %v1435_v62 = vadd.f32 %v1434_v61, %v5176_v60  ;;  %v1436_v63 = vpop.f32.mrb[126].mxu0  ;;  %1816 = vmatprep.mubr.bf16.mxu1 %v1534_v53 }
 0x289   :  { %v3599_v0 = vadd.f32 %v3598_v54, %v3536_v56  ;;  %v1501_v2 = vmax.f32 %v1433_v52, 0.0  ;;  %v1437_v3 = vadd.f32 %v1436_v63, %v5173_v59  ;;  %v1438_v4 = vpop.f32.mrb[127].mxu0  ;;  %1817 = vmatmul.mubr.bf16.gmra.mrb[120].mxu1 %v1533_v48 }
 0x28a   :  { %v1502_v5 = vmax.f32 %v1435_v62, 0.0  ;;  %v1439_v6 = vadd.f32 %v1438_v4, %v5176_v60 }
 0x28b   :  { %v3600_v7 = vadd.f32 %v3599_v0, %v3537_v1  ;;  %v3538_v8 = vmul.f32 %v1501_v2, %v1501_v2  ;;  %v3643_v9 = vadd.f32 %v3642_v47, %v1501_v2  ;;  %v1503_v10 = vmax.f32 %v1437_v3, 0.0 }
 0x28c   :  { %v3539_v11 = vmul.f32 %v1502_v5, %v1502_v5  ;;  %v3680_v12 = vadd.f32 %v3679_v49, %v1502_v5  ;;  %v1504_v13 = vmax.f32 %v1439_v6, 0.0 }
 0x28d   :  { %v3644_v14 = vadd.f32 %v3643_v9, %v1503_v10  ;;  %v1535_v15 = vpack.c.bf16 %v1503_v10, %v1501_v2  ;;  %v3601_v16 = vadd.f32 %v3600_v7, %v3538_v8  ;;  %v3540_v20 = vmul.f32 %v1503_v10, %v1503_v10 }
 0x28e   :  { %v3681_v17 = vadd.f32 %v3680_v12, %v1504_v13  ;;  %v1536_v18 = vpack.c.bf16 %v1504_v13, %v1502_v5  ;;  %v3541_v60 = vmul.f32 %v1504_v13, %v1504_v13 }
 0x28f   :  { %v3645_v19 = vrot.slane %v3644_v14, 4  ;;  %v3602_v59 = vadd.f32 %v3601_v16, %v3539_v11 }
 0x290   :  { %v3682_v21 = vrot.slane %v3681_v17, 4  ;;  %1824 = vmatprep.mubr.bf16.mxu1 %v1536_v18 }
 0x291   :  { %v3646_v22 = vadd.f32 %v3645_v19, %v3644_v14  ;;  %1825 = vmatmul.mubr.bf16.gmra.mrb[124].mxu1 %v1535_v15  ;;  %v3603_v23 = vadd.f32 %v3602_v59, %v3540_v20 }
 0x292   :  { %v3683_v24 = vadd.f32 %v3682_v21, %v3681_v17  ;;  %2859 = vmatprep.mubr.bf16.mxu1 %v4623_v40 }
 0x293   :  { %v3647_v27 = vrot.slane %v3646_v22, 2  ;;  %v3604_v28 = vadd.f32 %v3603_v23, %v3541_v60 }
 0x294   :  { %v3684_v29 = vrot.slane %v3683_v24, 2 }
 0x295   :  { %v3648_v30 = vadd.f32 %v3647_v27, %v3646_v22  ;;  %3605 = vadd.xlane.f32.xlu1 %v3604_v28 }
 0x296   :  { %v3685_v31 = vadd.f32 %v3684_v29, %v3683_v24 }
 0x297   :  { %v3649_v33 = vrot.slane %v3648_v30, 1 }
 0x298   :  { %v3686_v34 = vrot.slane %v3685_v31, 1 }
 0x299   :  { %v3650_v35 = vadd.f32 %v3649_v33, %v3648_v30 }
 0x29a   :  { %v3687_v36 = vadd.f32 %v3686_v34, %v3685_v31 }
 0x29c   :  { %v3690_v38 = vcombine.low %v3650_v35, %v3687_v36 }
 0x29e   :  { %v3697_v39 = vrot.slane %v3690_v38, %v3696_v37 }
 0x2a0   :  { %v3704_v41 = vrot.slane %v3697_v39, %v3696_v37 }
 0x2a2   :  { %3710 = vst.msk [vmem:[#allocation8] sm:$0x3] %vm3708_vm1, %v3704_v41 }
 0x2ec   :  { %v4177_v42 = vpop.f32.mrb[64].mxu1 }
 0x2ed   :  { %v4178_v44 = vpop.f32.mrb[65].mxu1 }
 0x2ee   :  { %v4179_v45 = vadd.f32 %v4178_v44, %v4177_v42  ;;  %v4180_v46 = vpop.f32.mrb[66].mxu1 }
 0x2ef   :  { %v4181_v47 = vpop.f32.mrb[67].mxu1 }
 0x2f0   :  { %v1707_v48 = vadd.f32 %v4179_v45, %v5248_v43  ;;  %v4182_v49 = vadd.f32 %v4181_v47, %v4180_v46 }
 0x2f2   :  { %v1710_v55 = vadd.f32 %v4182_v49, %v5248_v43  ;;  %v1833_v50 = vmax.f32 %v1707_v48, 0.0 }
 0x2f4   :  { %v1834_v53 = vmax.f32 %v1710_v55, 0.0  ;;  %v4183_v54 = vpop.f32.mrb[68].mxu1 }
 0x2f5   :  { %v4184_v56 = vpop.f32.mrb[69].mxu1 }
 0x2f6   :  { %v1865_v52 = vpack.c.bf16 %v1834_v53, %v1833_v50  ;;  %v4185_v61 = vadd.f32 %v4184_v56, %v4183_v54  ;;  %v4186_v62 = vpop.f32.mrb[70].mxu1 }
 0x2f7   :  { %v4187_v63 = vpop.f32.mrb[71].mxu1 }
 0x2f8   :  { %v1715_v0 = vadd.f32 %v4185_v61, %v5248_v43  ;;  %v4188_v1 = vadd.f32 %v4187_v63, %v4186_v62  ;;  %3897 = vmatmul.mubr.msk.bf16.vlgmr.msra.gmra.mrb[128].mxu0 %vm1199_vm0, %v1865_v52  ;;  %3921 = vmatmul.mubr.msk.bf16.vlgmr.msra.gmra.mrb[128].mxu1 %vm1199_vm0, %v1865_v52 }
 0x2f9   :  { %2095 = vmatprep.mubr.bf16.mxu0 %v4623_v40  ;;  %2869 = vmatprep.mubr.bf16.mxu1 %v4623_v40 }
 0x2fa   :  { %v1718_v2 = vadd.f32 %v4188_v1, %v5248_v43  ;;  %v1835_v3 = vmax.f32 %v1715_v0, 0.0 }
 0x2fc   :  { %v1836_v4 = vmax.f32 %v1718_v2, 0.0  ;;  %v4189_v5 = vpop.f32.mrb[72].mxu1 }
 0x2fd   :  { %v4190_v6 = vpop.f32.mrb[73].mxu1 }
 0x2fe   :  { %v1866_v7 = vpack.c.bf16 %v1836_v4, %v1835_v3  ;;  %v4191_v8 = vadd.f32 %v4190_v6, %v4189_v5  ;;  %v4192_v9 = vpop.f32.mrb[74].mxu1 }
 0x2ff   :  { %v4193_v10 = vpop.f32.mrb[75].mxu1 }
 0x300   :  { %v1723_v11 = vadd.f32 %v4191_v8, %v5248_v43  ;;  %v4194_v12 = vadd.f32 %v4193_v10, %v4192_v9  ;;  %3898 = vmatmul.mubr.msk.bf16.gmra.mrb[132].mxu0 %vm1199_vm0, %v1866_v7  ;;  %3922 = vmatmul.mubr.msk.bf16.gmra.mrb[132].mxu1 %vm1199_vm0, %v1866_v7 }
 0x301   :  { %2105 = vmatprep.mubr.bf16.mxu0 %v4623_v40  ;;  %2879 = vmatprep.mubr.bf16.mxu1 %v4623_v40 }
 0x302   :  { %v1726_v13 = vadd.f32 %v4194_v12, %v5248_v43  ;;  %v1837_v14 = vmax.f32 %v1723_v11, 0.0 }
 0x304   :  { %v1838_v15 = vmax.f32 %v1726_v13, 0.0  ;;  %v4195_v16 = vpop.f32.mrb[76].mxu1 }
 0x305   :  { %v4196_v17 = vpop.f32.mrb[77].mxu1 }
 0x306   :  { %v1867_v18 = vpack.c.bf16 %v1838_v15, %v1837_v14  ;;  %v4197_v19 = vadd.f32 %v4196_v17, %v4195_v16  ;;  %v4198_v20 = vpop.f32.mrb[78].mxu1 }
 0x307   :  { %v4199_v59 = vpop.f32.mrb[79].mxu1 }
 0x308   :  { %v1731_v21 = vadd.f32 %v4197_v19, %v5248_v43  ;;  %v4200_v22 = vadd.f32 %v4199_v59, %v4198_v20  ;;  %3899 = vmatmul.mubr.msk.bf16.gmra.mrb[136].mxu0 %vm1199_vm0, %v1867_v18  ;;  %3923 = vmatmul.mubr.msk.bf16.gmra.mrb[136].mxu1 %vm1199_vm0, %v1867_v18 }
 0x309   :  { %2115 = vmatprep.mubr.bf16.mxu0 %v4623_v40  ;;  %2889 = vmatprep.mubr.bf16.mxu1 %v4623_v40 }
 0x30a   :  { %v1734_v60 = vadd.f32 %v4200_v22, %v5248_v43  ;;  %v1839_v23 = vmax.f32 %v1731_v21, 0.0 }
 0x30c   :  { %v1840_v24 = vmax.f32 %v1734_v60, 0.0  ;;  %v4201_v25 = vpop.f32.mrb[80].mxu1 }
 0x30d   :  { %v4202_v26 = vpop.f32.mrb[81].mxu1 }
 0x30e   :  { %v1868_v27 = vpack.c.bf16 %v1840_v24, %v1839_v23  ;;  %v4203_v28 = vadd.f32 %v4202_v26, %v4201_v25  ;;  %v4204_v29 = vpop.f32.mrb[82].mxu1 }
 0x30f   :  { %v4205_v30 = vpop.f32.mrb[83].mxu1 }
 0x310   :  { %v1739_v31 = vadd.f32 %v4203_v28, %v5248_v43  ;;  %v4206_v32 = vadd.f32 %v4205_v30, %v4204_v29  ;;  %3900 = vmatmul.mubr.msk.bf16.gmra.mrb[140].mxu0 %vm1199_vm0, %v1868_v27  ;;  %3924 = vmatmul.mubr.msk.bf16.gmra.mrb[140].mxu1 %vm1199_vm0, %v1868_v27 }
 0x311   :  { %2125 = vmatprep.mubr.bf16.mxu0 %v4623_v40  ;;  %2899 = vmatprep.mubr.bf16.mxu1 %v4623_v40 }
 0x312   :  { %v1742_v33 = vadd.f32 %v4206_v32, %v5248_v43  ;;  %v1841_v34 = vmax.f32 %v1739_v31, 0.0 }
 0x314   :  { %v1842_v35 = vmax.f32 %v1742_v33, 0.0  ;;  %v4207_v36 = vpop.f32.mrb[84].mxu1 }
 0x315   :  { %v4208_v37 = vpop.f32.mrb[85].mxu1 }
 0x316   :  { %v1869_v38 = vpack.c.bf16 %v1842_v35, %v1841_v34  ;;  %v4209_v39 = vadd.f32 %v4208_v37, %v4207_v36  ;;  %v4210_v41 = vpop.f32.mrb[86].mxu1 }
 0x317   :  { %v4211_v42 = vpop.f32.mrb[87].mxu1 }
 0x318   :  { %v1747_v44 = vadd.f32 %v4209_v39, %v5248_v43  ;;  %v4212_v45 = vadd.f32 %v4211_v42, %v4210_v41  ;;  %3901 = vmatmul.mubr.msk.bf16.gmra.mrb[144].mxu0 %vm1199_vm0, %v1869_v38  ;;  %3925 = vmatmul.mubr.msk.bf16.gmra.mrb[144].mxu1 %vm1199_vm0, %v1869_v38 }
 0x319   :  { %2135 = vmatprep.mubr.bf16.mxu0 %v4623_v40  ;;  %2909 = vmatprep.mubr.bf16.mxu1 %v4623_v40 }
 0x31a   :  { %v1750_v46 = vadd.f32 %v4212_v45, %v5248_v43  ;;  %v1843_v47 = vmax.f32 %v1747_v44, 0.0 }
 0x31c   :  { %v1844_v48 = vmax.f32 %v1750_v46, 0.0  ;;  %v4213_v49 = vpop.f32.mrb[88].mxu1 }
 0x31d   :  { %v4214_v55 = vpop.f32.mrb[89].mxu1 }
 0x31e   :  { %v1870_v50 = vpack.c.bf16 %v1844_v48, %v1843_v47  ;;  %v4215_v53 = vadd.f32 %v4214_v55, %v4213_v49  ;;  %v4216_v54 = vpop.f32.mrb[90].mxu1 }
 0x31f   :  { %v4217_v56 = vpop.f32.mrb[91].mxu1 }
 0x320   :  { %v1755_v52 = vadd.f32 %v4215_v53, %v5248_v43  ;;  %v4218_v61 = vadd.f32 %v4217_v56, %v4216_v54  ;;  %3902 = vmatmul.mubr.msk.bf16.gmra.mrb[148].mxu0 %vm1199_vm0, %v1870_v50  ;;  %3926 = vmatmul.mubr.msk.bf16.gmra.mrb[148].mxu1 %vm1199_vm0, %v1870_v50 }
 0x321   :  { %2145 = vmatprep.mubr.bf16.mxu0 %v4623_v40  ;;  %2919 = vmatprep.mubr.bf16.mxu1 %v4623_v40 }
 0x322   :  { %v1758_v62 = vadd.f32 %v4218_v61, %v5248_v43  ;;  %v1845_v63 = vmax.f32 %v1755_v52, 0.0 }
 0x324   :  { %v1846_v0 = vmax.f32 %v1758_v62, 0.0  ;;  %v4219_v1 = vpop.f32.mrb[92].mxu1 }
 0x325   :  { %v4220_v2 = vpop.f32.mrb[93].mxu1 }
 0x326   :  { %v1871_v3 = vpack.c.bf16 %v1846_v0, %v1845_v63  ;;  %v4221_v4 = vadd.f32 %v4220_v2, %v4219_v1  ;;  %v4222_v5 = vpop.f32.mrb[94].mxu1 }
 0x327   :  { %v4223_v6 = vpop.f32.mrb[95].mxu1 }
 0x328   :  { %v1763_v7 = vadd.f32 %v4221_v4, %v5248_v43  ;;  %v4224_v8 = vadd.f32 %v4223_v6, %v4222_v5  ;;  %3903 = vmatmul.mubr.msk.bf16.gmra.mrb[152].mxu0 %vm1199_vm0, %v1871_v3  ;;  %3927 = vmatmul.mubr.msk.bf16.gmra.mrb[152].mxu1 %vm1199_vm0, %v1871_v3 }
 0x329   :  { %2155 = vmatprep.mubr.bf16.mxu0 %v4623_v40  ;;  %2929 = vmatprep.mubr.bf16.mxu1 %v4623_v40 }
 0x32a   :  { %v1766_v9 = vadd.f32 %v4224_v8, %v5248_v43  ;;  %v1847_v10 = vmax.f32 %v1763_v7, 0.0 }
 0x32c   :  { %v1848_v11 = vmax.f32 %v1766_v9, 0.0  ;;  %v4225_v12 = vpop.f32.mrb[96].mxu1 }
 0x32d   :  { %v4226_v13 = vpop.f32.mrb[97].mxu1 }
 0x32e   :  { %v1872_v14 = vpack.c.bf16 %v1848_v11, %v1847_v10  ;;  %v4227_v15 = vadd.f32 %v4226_v13, %v4225_v12  ;;  %v4228_v16 = vpop.f32.mrb[98].mxu1 }
 0x32f   :  { %v4229_v17 = vpop.f32.mrb[99].mxu1 }
 0x330   :  { %v1771_v18 = vadd.f32 %v4227_v15, %v5248_v43  ;;  %v4230_v19 = vadd.f32 %v4229_v17, %v4228_v16  ;;  %3904 = vmatmul.mubr.msk.bf16.gmra.mrb[156].mxu0 %vm1199_vm0, %v1872_v14  ;;  %3928 = vmatmul.mubr.msk.bf16.gmra.mrb[156].mxu1 %vm1199_vm0, %v1872_v14 }
 0x331   :  { %2165 = vmatprep.mubr.bf16.mxu0 %v4623_v40  ;;  %2939 = vmatprep.mubr.bf16.mxu1 %v4623_v40 }
 0x332   :  { %v1774_v20 = vadd.f32 %v4230_v19, %v5248_v43  ;;  %v1849_v59 = vmax.f32 %v1771_v18, 0.0 }
 0x334   :  { %v1850_v21 = vmax.f32 %v1774_v20, 0.0  ;;  %v4231_v22 = vpop.f32.mrb[100].mxu1 }
 0x335   :  { %v4232_v60 = vpop.f32.mrb[101].mxu1 }
 0x336   :  { %v1873_v23 = vpack.c.bf16 %v1850_v21, %v1849_v59  ;;  %v4233_v24 = vadd.f32 %v4232_v60, %v4231_v22  ;;  %v4234_v25 = vpop.f32.mrb[102].mxu1 }
 0x337   :  { %v4235_v26 = vpop.f32.mrb[103].mxu1 }
 0x338   :  { %v1779_v27 = vadd.f32 %v4233_v24, %v5248_v43  ;;  %v4236_v28 = vadd.f32 %v4235_v26, %v4234_v25  ;;  %3905 = vmatmul.mubr.msk.bf16.gmra.mrb[160].mxu0 %vm1199_vm0, %v1873_v23  ;;  %3929 = vmatmul.mubr.msk.bf16.gmra.mrb[160].mxu1 %vm1199_vm0, %v1873_v23 }
 0x339   :  { %2175 = vmatprep.mubr.bf16.mxu0 %v4623_v40  ;;  %2949 = vmatprep.mubr.bf16.mxu1 %v4623_v40 }
 0x33a   :  { %v1782_v29 = vadd.f32 %v4236_v28, %v5248_v43  ;;  %v1851_v30 = vmax.f32 %v1779_v27, 0.0 }
 0x33c   :  { %v1852_v31 = vmax.f32 %v1782_v29, 0.0  ;;  %v4237_v32 = vpop.f32.mrb[104].mxu1 }
 0x33d   :  { %v4238_v33 = vpop.f32.mrb[105].mxu1 }
 0x33e   :  { %v1874_v34 = vpack.c.bf16 %v1852_v31, %v1851_v30  ;;  %v4239_v35 = vadd.f32 %v4238_v33, %v4237_v32  ;;  %v4240_v36 = vpop.f32.mrb[106].mxu1 }
 0x33f   :  { %v4241_v37 = vpop.f32.mrb[107].mxu1 }
 0x340   :  { %v1787_v38 = vadd.f32 %v4239_v35, %v5248_v43  ;;  %v4242_v39 = vadd.f32 %v4241_v37, %v4240_v36  ;;  %3906 = vmatmul.mubr.msk.bf16.gmra.mrb[164].mxu0 %vm1199_vm0, %v1874_v34  ;;  %3930 = vmatmul.mubr.msk.bf16.gmra.mrb[164].mxu1 %vm1199_vm0, %v1874_v34 }
 0x341   :  { %2185 = vmatprep.mubr.bf16.mxu0 %v4623_v40  ;;  %2959 = vmatprep.mubr.bf16.mxu1 %v4623_v40 }
 0x342   :  { %v1790_v41 = vadd.f32 %v4242_v39, %v5248_v43  ;;  %v1853_v42 = vmax.f32 %v1787_v38, 0.0 }
 0x344   :  { %v1854_v44 = vmax.f32 %v1790_v41, 0.0  ;;  %v4243_v45 = vpop.f32.mrb[108].mxu1  ;;  %v1953_v41 = vld [vmem:[%s7182_s11] sm:$0x3] }
 0x345   :  { %v4244_v46 = vpop.f32.mrb[109].mxu1 }
 0x346   :  { %v1875_v47 = vpack.c.bf16 %v1854_v44, %v1853_v42  ;;  %v4245_v48 = vadd.f32 %v4244_v46, %v4243_v45  ;;  %v4246_v49 = vpop.f32.mrb[110].mxu1  ;;  %v2775_v42 = vld [vmem:[%s7183_s12] sm:$0x3]  ;;  %v5357_v44 = vrot.slane %v1953_v41, %v5164_v57  ;;  %v5363_v46 = vrot.slane %v1953_v41, %v5170_v58  ;;  %v5547_v41 = vld [vmem:[%s7171_s0 + $0x68] sm:$0xff] }
 0x347   :  { %v4247_v55 = vpop.f32.mrb[111].mxu1  ;;  %v5360_v45 = vrot.slane %v2775_v42, %v5164_v57  ;;  %v5379_v57 = vld [vmem:[%s7171_s0 + $0x8] sm:$0xff]  ;;  %7236 = vst [vmem:[#allocation21_spill] sm:$0xff] %v5547_v41 }
 0x348   :  { %v1795_v50 = vadd.f32 %v4245_v48, %v5248_v43  ;;  %v4248_v53 = vadd.f32 %v4247_v55, %v4246_v49  ;;  %3907 = vmatmul.mubr.msk.bf16.gmra.mrb[168].mxu0 %vm1199_vm0, %v1875_v47  ;;  %3931 = vmatmul.mubr.msk.bf16.gmra.mrb[168].mxu1 %vm1199_vm0, %v1875_v47  ;;  %v5368_v47 = vld [vmem:[%s7172_s1] sm:$0xff] }
 0x349   :  { %2195 = vmatprep.mubr.bf16.mxu0 %v4623_v40  ;;  %2969 = vmatprep.mubr.bf16.mxu1 %v4623_v40  ;;  %v7189_v48 = vunpack.c.l.bf16 %v5368_v47  ;;  %v7187_v55 = vunpack.c.h.bf16 %v5368_v47 }
 0x34a   :  { %v1798_v54 = vadd.f32 %v4248_v53, %v5248_v43  ;;  %v1855_v56 = vmax.f32 %v1795_v50, 0.0  ;;  %v5374_v50 = vrot.slane %v2775_v42, %v5170_v58  ;;  %v7190_v53 = vunpack.c.l.bf16 %v5379_v57  ;;  %v5393_v58 = vld [vmem:[%s7171_s0 + $0x10] sm:$0xff]  ;;  %v5533_v42 = vld [vmem:[%s7171_s0 + $0x60] sm:$0xff] }
 0x34b   :  { %7234 = vst [vmem:[#allocation19_spill] sm:$0xff] %v5533_v42  ;;  %vm5608_vm3 = vcmp.ne.f32.partialorder %v7189_v48, 0.0  ;;  %vm5636_vm5 = vcmp.ne.f32.partialorder %v7187_v55, 0.0 }
 0x34c   :  { %v1856_v52 = vmax.f32 %v1798_v54, 0.0  ;;  %v4249_v61 = vpop.f32.mrb[112].mxu1  ;;  %v5385_v54 = vld [vmem:[%s7172_s1 + $0x8] sm:$0xff]  ;;  %vm5656_vm6 = vcmp.ne.f32.partialorder %v7190_v53, 0.0 }
 0x34d   :  { %v4250_v62 = vpop.f32.mrb[113].mxu1 }
 0x34e   :  { %v1876_v63 = vpack.c.bf16 %v1856_v52, %v1855_v56  ;;  %v4251_v0 = vadd.f32 %v4250_v62, %v4249_v61  ;;  %v4252_v1 = vpop.f32.mrb[114].mxu1  ;;  %v7192_v56 = vunpack.c.l.bf16 %v5385_v54  ;;  %v7197_v52 = vunpack.c.h.bf16 %v5379_v57 }
 0x34f   :  { %v4253_v2 = vpop.f32.mrb[115].mxu1 }
 0x350   :  { %v1803_v3 = vadd.f32 %v4251_v0, %v5248_v43  ;;  %v4254_v4 = vadd.f32 %v4253_v2, %v4252_v1  ;;  %3908 = vmatmul.mubr.msk.bf16.gmra.mrb[172].mxu0 %vm1199_vm0, %v1876_v63  ;;  %3932 = vmatmul.mubr.msk.bf16.gmra.mrb[172].mxu1 %vm1199_vm0, %v1876_v63  ;;  %v5399_v63 = vld [vmem:[%s7172_s1 + $0x10] sm:$0xff]  ;;  %vm5662_vm7 = vcmp.ne.f32.partialorder %v7192_v56, 0.0  ;;  %vm5672_vm8 = vcmp.ne.f32.partialorder %v7197_v52, 0.0 }
 0x351   :  { %2205 = vmatprep.mubr.bf16.mxu0 %v4623_v40  ;;  %2979 = vmatprep.mubr.bf16.mxu1 %v4623_v40  ;;  %v7266_v52 = vunpack.c.l.bf16 %v5368_v47 }
 0x352   :  { %v1806_v5 = vadd.f32 %v4254_v4, %v5248_v43  ;;  %v1857_v6 = vmax.f32 %v1803_v3, 0.0  ;;  %v5407_v3 = vld [vmem:[%s7171_s0 + $0x18] sm:$0xff] }
 0x354   :  { %v1858_v7 = vmax.f32 %v1806_v5, 0.0  ;;  %v4255_v8 = vpop.f32.mrb[116].mxu1  ;;  %v5413_v5 = vld [vmem:[%s7172_s1 + $0x18] sm:$0xff] }
 0x355   :  { %v4256_v9 = vpop.f32.mrb[117].mxu1 }
 0x356   :  { %v1877_v10 = vpack.c.bf16 %v1858_v7, %v1857_v6  ;;  %v4257_v11 = vadd.f32 %v4256_v9, %v4255_v8  ;;  %v4258_v12 = vpop.f32.mrb[118].mxu1  ;;  %v5421_v9 = vld [vmem:[%s7171_s0 + $0x20] sm:$0xff] }
 0x357   :  { %v4259_v13 = vpop.f32.mrb[119].mxu1 }
 0x358   :  { %v1811_v14 = vadd.f32 %v4257_v11, %v5248_v43  ;;  %v4260_v15 = vadd.f32 %v4259_v13, %v4258_v12  ;;  %3909 = vmatmul.mubr.msk.bf16.gmra.mrb[176].mxu0 %vm1199_vm0, %v1877_v10  ;;  %3933 = vmatmul.mubr.msk.bf16.gmra.mrb[176].mxu1 %vm1199_vm0, %v1877_v10  ;;  %v5427_v11 = vld [vmem:[%s7172_s1 + $0x20] sm:$0xff]  ;;  %v5649_v10 = vld [vmem:[%s7172_s1 + $0x90] sm:$0xff] }
 0x359   :  { %2215 = vmatprep.mubr.bf16.mxu0 %v4623_v40  ;;  %2989 = vmatprep.mubr.bf16.mxu1 %v4623_v40  ;;  %7255 = vst [vmem:[#allocation32_spill] sm:$0xff] %v5649_v10 }
 0x35a   :  { %v1814_v16 = vadd.f32 %v4260_v15, %v5248_v43  ;;  %v1859_v17 = vmax.f32 %v1811_v14, 0.0  ;;  %v5435_v15 = vld [vmem:[%s7171_s0 + $0x28] sm:$0xff] }
 0x35c   :  { %v1860_v18 = vmax.f32 %v1814_v16, 0.0  ;;  %v4261_v19 = vpop.f32.mrb[120].mxu1 }
 0x35d   :  { %v4262_v20 = vpop.f32.mrb[121].mxu1 }
 0x35e   :  { %v1878_v59 = vpack.c.bf16 %v1860_v18, %v1859_v17  ;;  %v4263_v21 = vadd.f32 %v4262_v20, %v4261_v19  ;;  %v4264_v22 = vpop.f32.mrb[122].mxu1  ;;  %v5441_v17 = vld [vmem:[%s7172_s1 + $0x28] sm:$0xff] }
 0x35f   :  { %v4265_v60 = vpop.f32.mrb[123].mxu1  ;;  %v5615_v20 = vld [vmem:[%s7171_s0 + $0x88] sm:$0xff] }
 0x360   :  { %v1819_v23 = vadd.f32 %v4263_v21, %v5248_v43  ;;  %v4266_v24 = vadd.f32 %v4265_v60, %v4264_v22  ;;  %3910 = vmatmul.mubr.msk.bf16.gmra.mrb[180].mxu0 %vm1199_vm0, %v1878_v59  ;;  %3934 = vmatmul.mubr.msk.bf16.gmra.mrb[180].mxu1 %vm1199_vm0, %v1878_v59  ;;  %v5449_v59 = vld [vmem:[%s7171_s0 + $0x30] sm:$0xff]  ;;  %v5595_v21 = vld [vmem:[%s7172_s1 + $0x80] sm:$0xff]  ;;  %7248 = vst [vmem:[#allocation29_spill] sm:$0xff] %v5615_v20  ;;  %v5621_v18 = vld [vmem:[%s7172_s1 + $0x88] sm:$0xff]  ;;  %v7276_v60 = vunpack.c.l.bf16 %v5399_v63 }
 0x361   :  { %2225 = vmatprep.mubr.bf16.mxu0 %v4623_v40  ;;  %2999 = vmatprep.mubr.bf16.mxu1 %v4623_v40  ;;  %v5455_v22 = vld [vmem:[%s7172_s1 + $0x30] sm:$0xff]  ;;  %7243 = vst [vmem:[#allocation28_spill] sm:$0xff] %v5595_v21  ;;  %7249 = vst [vmem:[#allocation30_spill] sm:$0xff] %v5621_v18  ;;  %v7262_v18 = vunpack.c.h.bf16 %v5385_v54 }
 0x362   :  { %v1822_v25 = vadd.f32 %v4266_v24, %v5248_v43  ;;  %v1861_v26 = vmax.f32 %v1819_v23, 0.0  ;;  %v5581_v23 = vld [vmem:[%s7172_s1 + $0x78] sm:$0xff]  ;;  %vm5720_vm11 = vcmp.ne.f32.partialorder %v7276_v60, 0.0 }
 0x363   :  { %7241 = vst [vmem:[#allocation26_spill] sm:$0xff] %v5581_v23  ;;  %vm5678_vm9 = vcmp.ne.f32.partialorder %v7262_v18, 0.0  ;;  %v7268_v23 = vunpack.c.h.bf16 %v5368_v47 }
 0x364   :  { %v1862_v27 = vmax.f32 %v1822_v25, 0.0  ;;  %v4267_v28 = vpop.f32.mrb[124].mxu1  ;;  %v5463_v25 = vld [vmem:[%s7171_s0 + $0x38] sm:$0xff] }
 0x365   :  { %v4268_v29 = vpop.f32.mrb[125].mxu1 }
 0x366   :  { %v1879_v30 = vpack.c.bf16 %v1862_v27, %v1861_v26  ;;  %v4269_v31 = vadd.f32 %v4268_v29, %v4267_v28  ;;  %v4270_v32 = vpop.f32.mrb[126].mxu1  ;;  %v5469_v27 = vld [vmem:[%s7172_s1 + $0x38] sm:$0xff]  ;;  %v5553_v29 = vld [vmem:[%s7172_s1 + $0x68] sm:$0xff]  ;;  %v5567_v26 = vld [vmem:[%s7172_s1 + $0x70] sm:$0xff] }
 0x367   :  { %v4271_v33 = vpop.f32.mrb[127].mxu1  ;;  %7237 = vst [vmem:[#allocation22_spill] sm:$0xff] %v5553_v29  ;;  %7239 = vst [vmem:[#allocation24_spill] sm:$0xff] %v5567_v26  ;;  %v5589_v28 = vld [vmem:[%s7171_s0 + $0x80] sm:$0xff] }
 0x368   :  { %v1827_v34 = vadd.f32 %v4269_v31, %v5248_v43  ;;  %v4272_v35 = vadd.f32 %v4271_v33, %v4270_v32  ;;  %3911 = vmatmul.mubr.msk.bf16.gmra.mrb[184].mxu0 %vm1199_vm0, %v1879_v30  ;;  %3935 = vmatmul.mubr.msk.bf16.gmra.mrb[184].mxu1 %vm1199_vm0, %v1879_v30  ;;  %v5477_v31 = vld [vmem:[%s7171_s0 + $0x40] sm:$0xff]  ;;  %v5575_v30 = vld [vmem:[%s7171_s0 + $0x78] sm:$0xff]  ;;  %7242 = vst [vmem:[#allocation27_spill] sm:$0xff] %v5589_v28 }
 0x369   :  { %2235 = vmatprep.mubr.bf16.mxu0 %v4623_v40  ;;  %3009 = vmatprep.mubr.bf16.mxu1 %v4623_v40  ;;  %v5353_v40 = vld [vmem:[%s7171_s0] sm:$0xff]  ;;  %7240 = vst [vmem:[#allocation25_spill] sm:$0xff] %v5575_v30 }
 0x36a   :  { %v1830_v36 = vadd.f32 %v4272_v35, %v5248_v43  ;;  %v1863_v37 = vmax.f32 %v1827_v34, 0.0  ;;  %v7191_v43 = vunpack.c.l.bf16 %v5353_v40  ;;  %v7188_v49 = vunpack.c.h.bf16 %v5353_v40  ;;  %v5483_v33 = vld [vmem:[%s7172_s1 + $0x40] sm:$0xff]  ;;  %v5525_v35 = vld [vmem:[%s7172_s1 + $0x58] sm:$0xff]  ;;  %v5561_v34 = vld [vmem:[%s7171_s0 + $0x70] sm:$0xff] }
 0x36b   :  { %7233 = vst [vmem:[#allocation18_spill] sm:$0xff] %v5525_v35  ;;  %v5539_v32 = vld [vmem:[%s7172_s1 + $0x60] sm:$0xff]  ;;  %7238 = vst [vmem:[#allocation23_spill] sm:$0xff] %v5561_v34  ;;  %v7267_v28 = vunpack.c.h.bf16 %v5353_v40  ;;  %v7303_v35 = vunpack.c.h.bf16 %v5407_v3 }
 0x36c   :  { %v1864_v38 = vmax.f32 %v1830_v36, 0.0  ;;  %v5505_v36 = vld [vmem:[%s7171_s0 + $0x50] sm:$0xff]  ;;  %7235 = vst [vmem:[#allocation20_spill] sm:$0xff] %v5539_v32  ;;  %vm5602_vm2 = vcmp.ne.f32.partialorder %v7191_v43, 0.0  ;;  %vm5630_vm4 = vcmp.ne.f32.partialorder %v7188_v49, 0.0 }
 0x36d   :  { %7230 = vst [vmem:[#allocation15_spill] sm:$0xff] %v5505_v36 }
 0x36e   :  { %v1880_v39 = vpack.c.bf16 %v1864_v38, %v1863_v37  ;;  %v5491_v37 = vld [vmem:[%s7171_s0 + $0x48] sm:$0xff]  ;;  %v5511_v38 = vld [vmem:[%s7172_s1 + $0x50] sm:$0xff] }
 0x36f   :  { %7231 = vst [vmem:[#allocation16_spill] sm:$0xff] %v5511_v38 }
 0x370   :  { %3912 = vmatmul.mubr.msk.bf16.gmra.mrb[188].mxu0 %vm1199_vm0, %v1880_v39  ;;  %3936 = vmatmul.mubr.msk.bf16.gmra.mrb[188].mxu1 %vm1199_vm0, %v1880_v39  ;;  %v5497_v39 = vld [vmem:[%s7172_s1 + $0x48] sm:$0xff] }
 0x3cb   :  { %v2087_v16 = vpop.f32.mrb[128].mxu0  ;;  %v2861_v14 = vpop.f32.mrb[128].mxu1 }
 0x3cc   :  { %v2088_v8 = vadd.f32 %v2087_v16, %v5357_v44  ;;  %v2862_v7 = vadd.f32 %v2861_v14, %v5360_v45  ;;  %v2089_v6 = vpop.f32.mrb[129].mxu0  ;;  %v2863_v4 = vpop.f32.mrb[129].mxu1  ;;  %v5643_v16 = vld [vmem:[%s7171_s0 + $0x90] sm:$0xff] }
 0x3cd   :  { %7254 = vst [vmem:[#allocation31_spill] sm:$0xff] %v5643_v16  ;;  %v2090_v2 = vadd.f32 %v2089_v6, %v5363_v46  ;;  %v2864_v1 = vadd.f32 %v2863_v4, %v5374_v50  ;;  %v2091_v0 = vpop.f32.mrb[130].mxu0  ;;  %v2865_v55 = vpop.f32.mrb[130].mxu1  ;;  %v7265_v6 = vunpack.c.l.bf16 %v5353_v40  ;;  %v7272_v40 = vunpack.c.h.bf16 %v5385_v54 }
 0x3ce   :  { %v2246_v49 = vmax.f32 %v2088_v8, 0.0  ;;  %v3020_v4 = vmax.f32 %v2862_v7, 0.0  ;;  %v2092_v48 = vadd.f32 %v2091_v0, %v5357_v44  ;;  %v2866_v53 = vadd.f32 %v2865_v55, %v5360_v45  ;;  %v2093_v43 = vpop.f32.mrb[131].mxu0  ;;  %v2867_v56 = vpop.f32.mrb[131].mxu1 }
 0x3cf   :  { %v2247_v8 = vmax.f32 %v2090_v2, 0.0  ;;  %v3021_v7 = vmax.f32 %v2864_v1, 0.0  ;;  %v2094_v0 = vadd.f32 %v2093_v43, %v5363_v46  ;;  %v2868_v55 = vadd.f32 %v2867_v56, %v5374_v50 }
 0x3d0   :  { %v2310_v10 = vsub.f32 %v7265_v6, %v2246_v49  ;;  %v3084_v16 = vsub.f32 %v7266_v52, %v3020_v4  ;;  %v2248_v20 = vmax.f32 %v2092_v48, 0.0  ;;  %v3022_v21 = vmax.f32 %v2866_v53, 0.0 }
 0x3d1   :  { %v2311_v18 = vsub.f32 %v7267_v28, %v2247_v8  ;;  %v3085_v30 = vsub.f32 %v7268_v23, %v3021_v7  ;;  %v2249_v2 = vmax.f32 %v2094_v0, 0.0  ;;  %v3023_v1 = vmax.f32 %v2868_v55, 0.0 }
 0x3d2   :  { %v2374_v26 = vmul.f32 %v2310_v10, %v2310_v10  ;;  %v3148_v43 = vmul.f32 %v3084_v16, %v3084_v16  ;;  %v7269_v56 = vunpack.c.l.bf16 %v5379_v57  ;;  %v7270_v49 = vunpack.c.l.bf16 %v5385_v54 }
 0x3d3   :  { %v2375_v29 = vmul.f32 %v2311_v18, %v2311_v18  ;;  %v3149_v52 = vmul.f32 %v3085_v30, %v3085_v30  ;;  %v7271_v48 = vunpack.c.h.bf16 %v5379_v57  ;;  %v3087_v28 = vsub.f32 %v7272_v40, %v3023_v1  ;;  %v2097_v47 = vpop.f32.mrb[132].mxu0  ;;  %v2871_v23 = vpop.f32.mrb[132].mxu1 }
 0x3d4   :  { %v2312_v34 = vsub.f32 %v7269_v56, %v2248_v20  ;;  %v3086_v6 = vsub.f32 %v7270_v49, %v3022_v21  ;;  %v2502_v4 = vmul.f32 25.0, %v2374_v26  ;;  %v3276_v8 = vmul.f32 25.0, %v3148_v43  ;;  %v2099_v7 = vpop.f32.mrb[133].mxu0  ;;  %v2873_v0 = vpop.f32.mrb[133].mxu1 }
 0x3d5   :  { %v2313_v53 = vsub.f32 %v7271_v48, %v2249_v2  ;;  %v2503_v20 = vmul.f32 25.0, %v2375_v29  ;;  %v3277_v55 = vmul.f32 25.0, %v3149_v52  ;;  %v3151_v21 = vmul.f32 %v3087_v28, %v3087_v28  ;;  %v2101_v18 = vpop.f32.mrb[134].mxu0  ;;  %v2875_v30 = vpop.f32.mrb[134].mxu1 }
 0x3d6   :  { %v2376_v10 = vmul.f32 %v2312_v34, %v2312_v34  ;;  %v3150_v16 = vmul.f32 %v3086_v6, %v3086_v6  ;;  %v2566_v57 = vsel %vm5602_vm2, %v2502_v4, %v2374_v26  ;;  %v3340_v54 = vsel %vm5608_vm3, %v3276_v8, %v3148_v43  ;;  %v2103_v49 = vpop.f32.mrb[135].mxu0  ;;  %v2877_v48 = vpop.f32.mrb[135].mxu1 }
 0x3d7   :  { %v2377_v56 = vmul.f32 %v2313_v53, %v2313_v53  ;;  %v2567_v34 = vsel %vm5630_vm4, %v2503_v20, %v2375_v29  ;;  %v3341_v6 = vsel %vm5636_vm5, %v3277_v55, %v3149_v52  ;;  %v3279_v40 = vmul.f32 25.0, %v3151_v21 }
 0x3d8   :  { %v2504_v2 = vmul.f32 25.0, %v2376_v10  ;;  %v3278_v1 = vmul.f32 25.0, %v3150_v16  ;;  %v2630_v28 = vadd.f32 %v2567_v34, %v2566_v57  ;;  %v3404_v41 = vadd.f32 %v3341_v6, %v3340_v54 }
 0x3d9   :  { %v2505_v53 = vmul.f32 25.0, %v2377_v56  ;;  %v7273_v26 = vunpack.c.l.bf16 %v5393_v58  ;;  %v3343_v62 = vsel %vm5678_vm9, %v3279_v40, %v3151_v21  ;;  %v2098_v14 = vadd.f32 %v2097_v47, %v5357_v44 }
 0x3da   :  { %v2568_v24 = vsel %vm5656_vm6, %v2504_v2, %v2376_v10  ;;  %v3342_v19 = vsel %vm5662_vm7, %v3278_v1, %v3150_v16  ;;  %v2872_v52 = vadd.f32 %v2871_v23, %v5360_v45  ;;  %v7279_v4 = vunpack.c.h.bf16 %v5393_v58 }
 0x3db   :  { %vm5714_vm10 = vcmp.ne.f32.partialorder %v7273_v26, 0.0  ;;  %v2569_v29 = vsel %vm5672_vm8, %v2505_v53, %v2377_v56  ;;  %v7282_v10 = vunpack.c.h.bf16 %v5399_v63  ;;  %v2631_v61 = vadd.f32 %v2630_v28, %v2568_v24  ;;  %v2107_v2 = vpop.f32.mrb[136].mxu0 }
 0x3dc   :  { %vm5732_vm12 = vcmp.ne.f32.partialorder %v7279_v4, 0.0  ;;  %v3405_v20 = vadd.f32 %v3404_v41, %v3342_v19  ;;  %v2100_v12 = vadd.f32 %v2099_v7, %v5363_v46  ;;  %v2874_v47 = vadd.f32 %v2873_v0, %v5374_v50  ;;  %v2881_v0 = vpop.f32.mrb[136].mxu1  ;;  %v2109_v40 = vpop.f32.mrb[137].mxu0 }
 0x3dd   :  { %vm5738_vm13 = vcmp.ne.f32.partialorder %v7282_v10, 0.0  ;;  %v7285_v23 = vunpack.c.l.bf16 %v5407_v3  ;;  %v7288_v56 = vunpack.c.l.bf16 %v5413_v5  ;;  %v2250_v57 = vmax.f32 %v2098_v14, 0.0  ;;  %v2883_v28 = vpop.f32.mrb[137].mxu1  ;;  %v5762_v4 = vpop.f32.mrb[138].mxu0 }
 0x3de   :  { %v3024_v54 = vmax.f32 %v2872_v52, 0.0  ;;  %v2102_v41 = vadd.f32 %v2101_v18, %v5357_v44  ;;  %v2876_v7 = vadd.f32 %v2875_v30, %v5360_v45  ;;  %v2632_v1 = vadd.f32 %v2631_v61, %v2569_v29  ;;  %v5764_v18 = vpop.f32.mrb[138].mxu1 }
 0x3df   :  { %vm5746_vm14 = vcmp.ne.f32.partialorder %v7285_v23, 0.0  ;;  %vm5752_vm15 = vcmp.ne.f32.partialorder %v7288_v56, 0.0  ;;  %v3406_v34 = vadd.f32 %v3405_v20, %v3343_v62  ;;  %v2251_v6 = vmax.f32 %v2100_v12, 0.0  ;;  %v5786_v63 = vpop.f32.mrb[139].mxu1 }
 0x3e0   :  { %v3025_v53 = vmax.f32 %v2874_v47, 0.0  ;;  %v7291_v24 = vmov %v7273_v26  ;;  %v7292_v26 = vmov %v7276_v60  ;;  %v2252_v14 = vmax.f32 %v2102_v41, 0.0 }
 0x3e1   :  { %v2314_v19 = vsub.f32 %v7291_v24, %v2250_v57  ;;  %v3088_v60 = vsub.f32 %v7292_v26, %v3024_v54  ;;  %v3026_v52 = vmax.f32 %v2876_v7, 0.0  ;;  %v7293_v30 = vunpack.c.h.bf16 %v5393_v58  ;;  %v5784_v58 = vpop.f32.mrb[139].mxu0 }
 0x3e2   :  { %v7294_v62 = vmov %v7282_v10  ;;  %v2104_v61 = vadd.f32 %v2103_v49, %v5363_v46  ;;  %v7295_v20 = vunpack.c.h.bf16 %v5407_v3  ;;  %v2878_v47 = vadd.f32 %v2877_v48, %v5374_v50 }
 0x3e3   :  { %v2315_v29 = vsub.f32 %v7293_v30, %v2251_v6  ;;  %v3089_v10 = vsub.f32 %v7294_v62, %v3025_v53  ;;  %v7298_v23 = vunpack.c.h.bf16 %v5413_v5  ;;  %v2378_v57 = vmul.f32 %v2314_v19, %v2314_v19 }
 0x3e4   :  { %vm5773_vm0 = vcmp.ne.f32.partialorder %v7295_v20, 0.0  ;;  %v3152_v49 = vmul.f32 %v3088_v60, %v3088_v60  ;;  %v7301_v54 = vunpack.c.l.bf16 %v5407_v3  ;;  %v7302_v7 = vunpack.c.l.bf16 %v5413_v5 }
 0x3e5   :  { %vm5780_vm1 = vcmp.ne.f32.partialorder %v7298_v23, 0.0  ;;  %v2379_v53 = vmul.f32 %v2315_v29, %v2315_v29  ;;  %v3153_v48 = vmul.f32 %v3089_v10, %v3089_v10  ;;  %v2253_v24 = vmax.f32 %v2104_v61, 0.0  ;;  %v5800_v61 = vpop.f32.mrb[140].mxu0 }
 0x3e6   :  { %v2316_v41 = vsub.f32 %v7301_v54, %v2252_v14  ;;  %v3090_v6 = vsub.f32 %v7302_v7, %v3026_v52  ;;  %v3027_v26 = vmax.f32 %v2878_v47, 0.0  ;;  %v2506_v30 = vmul.f32 25.0, %v2378_v57  ;;  %v5802_v47 = vpop.f32.mrb[140].mxu1 }
 0x3e7   :  { %v3280_v62 = vmul.f32 25.0, %v3152_v49  ;;  %v2507_v32 = vmul.f32 25.0, %v2379_v53  ;;  %v3281_v42 = vmul.f32 25.0, %v3153_v48  ;;  %v2317_v19 = vsub.f32 %v7303_v35, %v2253_v24  ;;  %v5808_v35 = vpop.f32.mrb[141].mxu0  ;;  %v5810_v43 = vpop.f32.mrb[141].mxu1 }
 0x3e8   :  { %v2380_v20 = vmul.f32 %v2316_v41, %v2316_v41  ;;  %v3154_v23 = vmul.f32 %v3090_v6, %v3090_v6  ;;  %v7304_v60 = vunpack.c.h.bf16 %v5413_v5  ;;  %v2570_v14 = vsel %vm5714_vm10, %v2506_v30, %v2378_v57  ;;  %v5828_v16 = vpop.f32.mrb[142].mxu0  ;;  %v5830_v55 = vpop.f32.mrb[142].mxu1 }
 0x3e9   :  { %v3344_v52 = vsel %vm5720_vm11, %v3280_v62, %v3152_v49  ;;  %v2633_v54 = vadd.f32 %v2632_v1, %v2570_v14  ;;  %v2571_v3 = vsel %vm5732_vm12, %v2507_v32, %v2379_v53  ;;  %v3345_v5 = vsel %vm5738_vm13, %v3281_v42, %v3153_v48  ;;  %v5846_v30 = vpop.f32.mrb[143].mxu0  ;;  %v5848_v62 = vpop.f32.mrb[143].mxu1 }
 0x3ea   :  { %v3091_v51 = vsub.f32 %v7304_v60, %v3027_v26  ;;  %v2508_v29 = vmul.f32 25.0, %v2380_v20  ;;  %v3282_v10 = vmul.f32 25.0, %v3154_v23  ;;  %v3407_v41 = vadd.f32 %v3406_v34, %v3344_v52 }
 0x3eb   :  { %v2381_v49 = vmul.f32 %v2317_v19, %v2317_v19  ;;  %v7305_v1 = vunpack.c.l.bf16 %v5421_v9  ;;  %v7308_v32 = vunpack.c.l.bf16 %v5427_v11  ;;  %v2634_v21 = vadd.f32 %v2633_v54, %v2571_v3 }
 0x3ec   :  { %v2572_v13 = vsel %vm5746_vm14, %v2508_v29, %v2380_v20  ;;  %v3346_v57 = vsel %vm5752_vm15, %v3282_v10, %v3154_v23  ;;  %v3155_v7 = vmul.f32 %v3091_v51, %v3091_v51  ;;  %v3408_v34 = vadd.f32 %v3407_v41, %v3345_v5 }
 0x3ed   :  { %vm5818_vm2 = vcmp.ne.f32.partialorder %v7305_v1, 0.0  ;;  %vm5824_vm3 = vcmp.ne.f32.partialorder %v7308_v32, 0.0  ;;  %v2108_v51 = vadd.f32 %v2107_v2, %v5357_v44  ;;  %v2882_v6 = vadd.f32 %v2881_v0, %v5360_v45 }
 0x3ee   :  { %v7311_v53 = vunpack.c.h.bf16 %v5421_v9  ;;  %v7314_v24 = vunpack.c.h.bf16 %v5427_v11  ;;  %v2509_v20 = vmul.f32 25.0, %v2381_v49  ;;  %v3283_v2 = vmul.f32 25.0, %v3155_v7 }
 0x3ef   :  { %v2110_v0 = vadd.f32 %v2109_v40, %v5363_v46  ;;  %v2884_v23 = vadd.f32 %v2883_v28, %v5374_v50  ;;  %v2635_v19 = vadd.f32 %v2634_v21, %v2572_v13  ;;  %v3409_v60 = vadd.f32 %v3408_v34, %v3346_v57 }
 0x3f0   :  { %vm5836_vm4 = vcmp.ne.f32.partialorder %v7311_v53, 0.0  ;;  %vm5842_vm5 = vcmp.ne.f32.partialorder %v7314_v24, 0.0  ;;  %v2254_v14 = vmax.f32 %v2108_v51, 0.0  ;;  %v3028_v52 = vmax.f32 %v2882_v6, 0.0 }
 0x3f1   :  { %v2573_v29 = vsel %vm5773_vm0, %v2509_v20, %v2381_v49  ;;  %v3347_v10 = vsel %vm5780_vm1, %v3283_v2, %v3155_v7  ;;  %v2255_v54 = vmax.f32 %v2110_v0, 0.0  ;;  %v3029_v41 = vmax.f32 %v2884_v23, 0.0 }
 0x3f2   :  { %v2636_v3 = vadd.f32 %v2635_v19, %v2573_v29  ;;  %v3410_v5 = vadd.f32 %v3409_v60, %v3347_v10  ;;  %v2318_v32 = vsub.f32 %v7305_v1, %v2254_v14  ;;  %v7317_v40 = vunpack.c.l.bf16 %v5427_v11 }
 0x3f3   :  { %v7318_v13 = vmov %v7311_v53  ;;  %v7319_v21 = vmov %v7314_v24  ;;  %v2112_v56 = vadd.f32 %v5762_v4, %v5357_v44  ;;  %v7320_v49 = vunpack.c.l.bf16 %v5435_v15  ;;  %v5892_v24 = vpop.f32.mrb[144].mxu0 }
 0x3f4   :  { %v3092_v28 = vsub.f32 %v7317_v40, %v3028_v52  ;;  %v2319_v57 = vsub.f32 %v7318_v13, %v2255_v54  ;;  %v3093_v12 = vsub.f32 %v7319_v21, %v3029_v41  ;;  %v2886_v34 = vadd.f32 %v5764_v18, %v5360_v45  ;;  %v5894_v18 = vpop.f32.mrb[144].mxu1  ;;  %v5900_v19 = vpop.f32.mrb[145].mxu0 }
 0x3f5   :  { %vm5868_vm6 = vcmp.ne.f32.partialorder %v7320_v49, 0.0  ;;  %v7323_v51 = vunpack.c.l.bf16 %v5441_v17  ;;  %v7326_v11 = vunpack.c.h.bf16 %v5435_v15  ;;  %v7329_v4 = vunpack.c.h.bf16 %v5441_v17  ;;  %v5902_v60 = vpop.f32.mrb[145].mxu1  ;;  %v5904_v54 = vpop.f32.mrb[146].mxu0 }
 0x3f6   :  { %v2382_v20 = vmul.f32 %v2318_v32, %v2318_v32  ;;  %v3156_v2 = vmul.f32 %v3092_v28, %v3092_v28  ;;  %v2114_v0 = vadd.f32 %v5784_v58, %v5363_v46  ;;  %v2888_v23 = vadd.f32 %v5786_v63, %v5374_v50  ;;  %v5906_v41 = vpop.f32.mrb[146].mxu1  ;;  %v5908_v58 = vpop.f32.mrb[147].mxu0 }
 0x3f7   :  { %vm5876_vm7 = vcmp.ne.f32.partialorder %v7323_v51, 0.0  ;;  %vm5882_vm8 = vcmp.ne.f32.partialorder %v7326_v11, 0.0  ;;  %vm5888_vm9 = vcmp.ne.f32.partialorder %v7329_v4, 0.0  ;;  %v2383_v14 = vmul.f32 %v2319_v57, %v2319_v57  ;;  %v5910_v13 = vpop.f32.mrb[147].mxu1 }
 0x3f8   :  { %v3157_v52 = vmul.f32 %v3093_v12, %v3093_v12  ;;  %v2256_v29 = vmax.f32 %v2112_v56, 0.0  ;;  %v3030_v10 = vmax.f32 %v2886_v34, 0.0  ;;  %v2510_v1 = vmul.f32 25.0, %v2382_v20 }
 0x3f9   :  { %v3284_v32 = vmul.f32 25.0, %v3156_v2  ;;  %v2257_v40 = vmax.f32 %v2114_v0, 0.0  ;;  %v3031_v28 = vmax.f32 %v2888_v23, 0.0  ;;  %v2511_v63 = vmul.f32 25.0, %v2383_v14 }
 0x3fa   :  { %v3285_v21 = vmul.f32 25.0, %v3157_v52  ;;  %v2320_v57 = vsub.f32 %v7320_v49, %v2256_v29  ;;  %v7332_v12 = vmov %v7323_v51  ;;  %v2574_v34 = vsel %vm5818_vm2, %v2510_v1, %v2382_v20 }
 0x3fb   :  { %v3094_v56 = vsub.f32 %v7332_v12, %v3030_v10  ;;  %v3348_v51 = vsel %vm5824_vm3, %v3284_v32, %v3156_v2  ;;  %v2321_v4 = vsub.f32 %v7326_v11, %v2257_v40  ;;  %v7333_v0 = vunpack.c.h.bf16 %v5441_v17 }
 0x3fc   :  { %v2637_v38 = vadd.f32 %v2636_v3, %v2574_v34  ;;  %v3411_v36 = vadd.f32 %v3410_v5, %v3348_v51  ;;  %v2575_v29 = vsel %vm5836_vm4, %v2511_v63, %v2383_v14  ;;  %v3349_v10 = vsel %vm5842_vm5, %v3285_v21, %v3157_v52  ;;  %v5944_v14 = vpop.f32.mrb[148].mxu0  ;;  %v5946_v52 = vpop.f32.mrb[148].mxu1 }
 0x3fd   :  { %v3095_v23 = vsub.f32 %v7333_v0, %v3031_v28  ;;  %v2384_v49 = vmul.f32 %v2320_v57, %v2320_v57  ;;  %v3158_v8 = vmul.f32 %v3094_v56, %v3094_v56  ;;  %v2385_v20 = vmul.f32 %v2321_v4, %v2321_v4  ;;  %v5948_v21 = vpop.f32.mrb[149].mxu0  ;;  %v5950_v57 = vpop.f32.mrb[149].mxu1 }
 0x3fe   :  { %v7334_v42 = vunpack.c.l.bf16 %v5449_v59  ;;  %v7337_v17 = vunpack.c.l.bf16 %v5455_v22  ;;  %v2638_v48 = vadd.f32 %v2637_v38, %v2575_v29  ;;  %v3412_v5 = vadd.f32 %v3411_v36, %v3349_v10  ;;  %v5968_v11 = vpop.f32.mrb[150].mxu0  ;;  %v5970_v4 = vpop.f32.mrb[150].mxu1 }
 0x3ff   :  { %v3159_v1 = vmul.f32 %v3095_v23, %v3095_v23  ;;  %v2118_v26 = vadd.f32 %v5800_v61, %v5357_v44  ;;  %v2892_v2 = vadd.f32 %v5802_v47, %v5360_v45  ;;  %v2512_v32 = vmul.f32 25.0, %v2384_v49  ;;  %v5980_v29 = vpop.f32.mrb[151].mxu0  ;;  %v5982_v10 = vpop.f32.mrb[151].mxu1 }
 0x400   :  { %vm5930_vm10 = vcmp.ne.f32.partialorder %v7334_v42, 0.0  ;;  %vm5936_vm11 = vcmp.ne.f32.partialorder %v7337_v17, 0.0  ;;  %v3286_v40 = vmul.f32 25.0, %v3158_v8  ;;  %v2513_v28 = vmul.f32 25.0, %v2385_v20 }
 0x401   :  { %v3287_v63 = vmul.f32 25.0, %v3159_v1  ;;  %v2258_v38 = vmax.f32 %v2118_v26, 0.0  ;;  %v3032_v36 = vmax.f32 %v2892_v2, 0.0  ;;  %v2120_v61 = vadd.f32 %v5808_v35, %v5363_v46 }
 0x402   :  { %v7340_v12 = vunpack.c.h.bf16 %v5449_v59  ;;  %v2894_v56 = vadd.f32 %v5810_v43, %v5374_v50  ;;  %v7343_v34 = vunpack.c.h.bf16 %v5455_v22  ;;  %v2576_v35 = vsel %vm5868_vm6, %v2512_v32, %v2384_v49 }
 0x403   :  { %v3350_v0 = vsel %vm5876_vm7, %v3286_v40, %v3158_v8  ;;  %v2577_v23 = vsel %vm5882_vm8, %v2513_v28, %v2385_v20  ;;  %v3351_v43 = vsel %vm5888_vm9, %v3287_v63, %v3159_v1  ;;  %v2639_v42 = vadd.f32 %v2638_v48, %v2576_v35 }
 0x404   :  { %vm5956_vm12 = vcmp.ne.f32.partialorder %v7340_v12, 0.0  ;;  %vm5964_vm13 = vcmp.ne.f32.partialorder %v7343_v34, 0.0  ;;  %v3413_v17 = vadd.f32 %v3412_v5, %v3350_v0  ;;  %v7346_v26 = vunpack.c.l.bf16 %v5449_v59 }
 0x405   :  { %v7347_v7 = vunpack.c.l.bf16 %v5455_v22  ;;  %v2259_v9 = vmax.f32 %v2120_v61, 0.0  ;;  %v3033_v8 = vmax.f32 %v2894_v56, 0.0  ;;  %v2122_v6 = vadd.f32 %v5828_v16, %v5357_v44 }
 0x406   :  { %v2322_v2 = vsub.f32 %v7346_v26, %v2258_v38  ;;  %v7348_v53 = vunpack.c.l.bf16 %v5463_v25  ;;  %v2896_v1 = vadd.f32 %v5830_v55, %v5360_v45  ;;  %v7351_v48 = vunpack.c.l.bf16 %v5469_v27 }
 0x407   :  { %v3096_v49 = vsub.f32 %v7347_v7, %v3032_v36  ;;  %v2640_v32 = vadd.f32 %v2639_v42, %v2577_v23  ;;  %v3414_v40 = vadd.f32 %v3413_v17, %v3351_v43  ;;  %v7354_v16 = vmov %v7340_v12  ;;  %v6024_v42 = vpop.f32.mrb[152].mxu0  ;;  %v6026_v17 = vpop.f32.mrb[152].mxu1 }
 0x408   :  { %vm5992_vm14 = vcmp.ne.f32.partialorder %v7348_v53, 0.0  ;;  %vm6000_vm15 = vcmp.ne.f32.partialorder %v7351_v48, 0.0  ;;  %v2386_v28 = vmul.f32 %v2322_v2, %v2322_v2  ;;  %v2323_v38 = vsub.f32 %v7354_v16, %v2259_v9 }
 0x409   :  { %v3160_v63 = vmul.f32 %v3096_v49, %v3096_v49  ;;  %v7355_v36 = vmov %v7343_v34  ;;  %v2260_v12 = vmax.f32 %v2122_v6, 0.0  ;;  %v3034_v56 = vmax.f32 %v2896_v1, 0.0 }
 0x40a   :  { %v3097_v61 = vsub.f32 %v7355_v36, %v3033_v8  ;;  %v2514_v34 = vmul.f32 25.0, %v2386_v28  ;;  %v2124_v35 = vadd.f32 %v5846_v30, %v5363_v46  ;;  %v7356_v0 = vunpack.c.h.bf16 %v5463_v25  ;;  %v6032_v8 = vpop.f32.mrb[153].mxu0 }
 0x40b   :  { %v3288_v55 = vmul.f32 25.0, %v3160_v63  ;;  %v2898_v59 = vadd.f32 %v5848_v62, %v5374_v50  ;;  %v7359_v43 = vunpack.c.h.bf16 %v5469_v27  ;;  %v2387_v30 = vmul.f32 %v2323_v38, %v2323_v38  ;;  %v6034_v62 = vpop.f32.mrb[153].mxu1  ;;  %v6040_v16 = vpop.f32.mrb[154].mxu0 }
 0x40c   :  { %vm6012_vm0 = vcmp.ne.f32.partialorder %v7356_v0, 0.0  ;;  %v3161_v26 = vmul.f32 %v3097_v61, %v3097_v61  ;;  %v7362_v2 = vmov %v7348_v53  ;;  %v7363_v49 = vmov %v7351_v48  ;;  %v6042_v38 = vpop.f32.mrb[154].mxu1  ;;  %v6044_v0 = vpop.f32.mrb[155].mxu0 }
 0x40d   :  { %vm6020_vm1 = vcmp.ne.f32.partialorder %v7359_v43, 0.0  ;;  %v2324_v7 = vsub.f32 %v7362_v2, %v2260_v12  ;;  %v3098_v9 = vsub.f32 %v7363_v49, %v3034_v56  ;;  %v2578_v6 = vsel %vm5930_vm10, %v2514_v34, %v2386_v28  ;;  %v6046_v43 = vpop.f32.mrb[155].mxu1  ;;  %v6092_v5 = vpop.f32.mrb[156].mxu0 }
 0x40e   :  { %v3352_v53 = vsel %vm5936_vm11, %v3288_v55, %v3160_v63  ;;  %v2261_v1 = vmax.f32 %v2124_v35, 0.0  ;;  %v3035_v48 = vmax.f32 %v2898_v59, 0.0  ;;  %v2641_v36 = vadd.f32 %v2640_v32, %v2578_v6 }
 0x40f   :  { %v3415_v61 = vadd.f32 %v3414_v40, %v3352_v53  ;;  %v2515_v12 = vmul.f32 25.0, %v2387_v30  ;;  %v3289_v56 = vmul.f32 25.0, %v3161_v26  ;;  %v2388_v2 = vmul.f32 %v2324_v7, %v2324_v7 }
 0x410   :  { %v3162_v15 = vmul.f32 %v3098_v9, %v3098_v9  ;;  %v7364_v28 = vunpack.c.h.bf16 %v5463_v25  ;;  %v7365_v63 = vunpack.c.h.bf16 %v5469_v27  ;;  %v2128_v40 = vadd.f32 %v5892_v24, %v5357_v44 }
 0x411   :  { %v2579_v55 = vsel %vm5956_vm12, %v2515_v12, %v2387_v30  ;;  %v3353_v32 = vsel %vm5964_vm13, %v3289_v56, %v3161_v26  ;;  %v7366_v35 = vunpack.c.l.bf16 %v5477_v31  ;;  %v2902_v25 = vadd.f32 %v5894_v18, %v5360_v45  ;;  %v6094_v56 = vpop.f32.mrb[156].mxu1 }
 0x412   :  { %v2325_v3 = vsub.f32 %v7364_v28, %v2261_v1  ;;  %v3099_v34 = vsub.f32 %v7365_v63, %v3035_v48  ;;  %v7369_v27 = vunpack.c.l.bf16 %v5483_v33  ;;  %v2642_v51 = vadd.f32 %v2641_v36, %v2579_v55  ;;  %v6098_v63 = vpop.f32.mrb[157].mxu1 }
 0x413   :  { %vm6060_vm2 = vcmp.ne.f32.partialorder %v7366_v35, 0.0  ;;  %v3416_v30 = vadd.f32 %v3415_v61, %v3353_v32  ;;  %v2516_v26 = vmul.f32 25.0, %v2388_v2  ;;  %v3290_v7 = vmul.f32 25.0, %v3162_v15 }
 0x414   :  { %vm6068_vm3 = vcmp.ne.f32.partialorder %v7369_v27, 0.0  ;;  %v2389_v24 = vmul.f32 %v2325_v3, %v2325_v3  ;;  %v3163_v49 = vmul.f32 %v3099_v34, %v3099_v34  ;;  %v2262_v9 = vmax.f32 %v2128_v40, 0.0  ;;  %v6096_v3 = vpop.f32.mrb[157].mxu0 }
 0x415   :  { %v3036_v6 = vmax.f32 %v2902_v25, 0.0  ;;  %v2580_v53 = vsel %vm5992_vm14, %v2516_v26, %v2388_v2  ;;  %v3354_v18 = vsel %vm6000_vm15, %v3290_v7, %v3162_v15  ;;  %v2130_v1 = vadd.f32 %v5900_v19, %v5363_v46  ;;  %v6104_v25 = vpop.f32.mrb[158].mxu0 }
 0x416   :  { %v7372_v48 = vunpack.c.h.bf16 %v5477_v31  ;;  %v2904_v61 = vadd.f32 %v5902_v60, %v5374_v50  ;;  %v7375_v12 = vunpack.c.h.bf16 %v5483_v33  ;;  %v2643_v19 = vadd.f32 %v2642_v51, %v2580_v53  ;;  %v6128_v22 = vpop.f32.mrb[159].mxu0 }
 0x417   :  { %v3417_v2 = vadd.f32 %v3416_v30, %v3354_v18  ;;  %v2517_v15 = vmul.f32 25.0, %v2389_v24  ;;  %v3291_v28 = vmul.f32 25.0, %v3163_v49  ;;  %v7378_v60 = vmov %v7366_v35 }
 0x418   :  { %vm6080_vm4 = vcmp.ne.f32.partialorder %v7372_v48, 0.0  ;;  %vm6088_vm5 = vcmp.ne.f32.partialorder %v7375_v12, 0.0  ;;  %v2326_v34 = vsub.f32 %v7378_v60, %v2262_v9  ;;  %v7379_v55 = vmov %v7369_v27  ;;  %v6106_v27 = vpop.f32.mrb[158].mxu1 }
 0x419   :  { %v3100_v32 = vsub.f32 %v7379_v55, %v3036_v6  ;;  %v2263_v40 = vmax.f32 %v2130_v1, 0.0  ;;  %v3037_v35 = vmax.f32 %v2904_v61, 0.0  ;;  %v2581_v51 = vsel %vm6012_vm0, %v2517_v15, %v2389_v24  ;;  %v6130_v24 = vpop.f32.mrb[159].mxu1 }
 0x41a   :  { %v3355_v30 = vsel %vm6020_vm1, %v3291_v28, %v3163_v49  ;;  %v2132_v26 = vadd.f32 %v5904_v54, %v5357_v44  ;;  %v7380_v7 = vunpack.c.l.bf16 %v5491_v37  ;;  %v2906_v6 = vadd.f32 %v5906_v41, %v5360_v45 }
 0x41b   :  { %v7383_v53 = vunpack.c.l.bf16 %v5497_v39  ;;  %v2644_v54 = vadd.f32 %v2643_v19, %v2581_v51  ;;  %v3418_v49 = vadd.f32 %v3417_v2, %v3355_v30  ;;  %v2390_v18 = vmul.f32 %v2326_v34, %v2326_v34 }
 0x41c   :  { %vm6116_vm6 = vcmp.ne.f32.partialorder %v7380_v7, 0.0  ;;  %v3164_v1 = vmul.f32 %v3100_v32, %v3100_v32  ;;  %v2327_v61 = vsub.f32 %v7372_v48, %v2263_v40  ;;  %v3101_v41 = vsub.f32 %v7375_v12, %v3037_v35  ;;  %v6160_v48 = vpop.f32.mrb[160].mxu0  ;;  %v6162_v12 = vpop.f32.mrb[160].mxu1 }
 0x41d   :  { %vm6124_vm7 = vcmp.ne.f32.partialorder %v7383_v53, 0.0  ;;  %v2264_v15 = vmax.f32 %v2132_v26, 0.0  ;;  %v3038_v28 = vmax.f32 %v2906_v6, 0.0  ;;  %v2518_v60 = vmul.f32 25.0, %v2390_v18 }
 0x41e   :  { %v3292_v55 = vmul.f32 25.0, %v3164_v1  ;;  %v2134_v7 = vadd.f32 %v5908_v58, %v5363_v46  ;;  %v7386_v53 = vunpack.c.h.bf16 %v5491_v37  ;;  %v2908_v31 = vadd.f32 %v5910_v13, %v5374_v50 }
 0x41f   :  { %v7389_v2 = vunpack.c.h.bf16 %v5497_v39  ;;  %v2391_v34 = vmul.f32 %v2327_v61, %v2327_v61  ;;  %v3165_v32 = vmul.f32 %v3101_v41, %v3101_v41  ;;  %v7392_v40 = vunpack.c.l.bf16 %v5491_v37 }
 0x420   :  { %vm6140_vm8 = vcmp.ne.f32.partialorder %v7386_v53, 0.0  ;;  %v7393_v35 = vunpack.c.l.bf16 %v5497_v39  ;;  %v2582_v30 = vsel %vm6060_vm2, %v2518_v60, %v2390_v18  ;;  %v3356_v13 = vsel %vm6068_vm3, %v3292_v55, %v3164_v1 }
 0x421   :  { %vm6148_vm9 = vcmp.ne.f32.partialorder %v7389_v2, 0.0  ;;  %v2328_v58 = vsub.f32 %v7392_v40, %v2264_v15  ;;  %v2265_v26 = vmax.f32 %v2134_v7, 0.0  ;;  %v3039_v6 = vmax.f32 %v2908_v31, 0.0  ;;  %v6164_v15 = vpop.f32.mrb[161].mxu0  ;;  %v6166_v40 = vpop.f32.mrb[161].mxu1 }
 0x422   :  { %v3102_v51 = vsub.f32 %v7393_v35, %v3038_v28  ;;  %v2645_v61 = vadd.f32 %v2644_v54, %v2582_v30  ;;  %v3419_v41 = vadd.f32 %v3418_v49, %v3356_v13  ;;  %v2519_v53 = vmul.f32 25.0, %v2391_v34  ;;  %v6172_v55 = vpop.f32.mrb[162].mxu0  ;;  %v6174_v7 = vpop.f32.mrb[162].mxu1 }
 0x423   :  { %v3293_v2 = vmul.f32 25.0, %v3165_v32  ;;  %v2392_v28 = vmul.f32 %v2328_v58, %v2328_v58  ;;  %v7394_v18 = vunpack.c.h.bf16 %v5491_v37  ;;  %v7395_v1 = vunpack.c.h.bf16 %v5497_v39  ;;  %v7396_v58 = vld [vmem:[#allocation15_spill] sm:$0xff]  ;;  %v6196_v20 = vpop.f32.mrb[163].mxu0 }
 0x424   :  { %v3166_v59 = vmul.f32 %v3102_v51, %v3102_v51  ;;  %v2583_v54 = vsel %vm6080_vm4, %v2519_v53, %v2391_v34  ;;  %v2138_v31 = vadd.f32 %v5944_v14, %v5357_v44  ;;  %v7397_v35 = vunpack.c.l.bf16 %v7396_v58  ;;  %v7400_v51 = vld [vmem:[#allocation16_spill] sm:$0xff]  ;;  %v6198_v34 = vpop.f32.mrb[163].mxu1 }
 0x425   :  { %v2329_v47 = vsub.f32 %v7394_v18, %v2265_v26  ;;  %v3103_v60 = vsub.f32 %v7395_v1, %v3039_v6  ;;  %v3357_v49 = vsel %vm6088_vm5, %v3293_v2, %v3165_v32  ;;  %v2912_v39 = vadd.f32 %v5946_v52, %v5360_v45  ;;  %7404 = vst [vmem:[#allocation15_spill] sm:$0xff] %v6198_v34 }
 0x426   :  { %vm6184_vm10 = vcmp.ne.f32.partialorder %v7397_v35, 0.0  ;;  %v7401_v30 = vunpack.c.l.bf16 %v7400_v51  ;;  %v2646_v14 = vadd.f32 %v2645_v61, %v2583_v54  ;;  %v3420_v32 = vadd.f32 %v3419_v41, %v3357_v49 }
 0x427   :  { %v2520_v13 = vmul.f32 25.0, %v2392_v28  ;;  %v3294_v26 = vmul.f32 25.0, %v3166_v59  ;;  %v2393_v6 = vmul.f32 %v2329_v47, %v2329_v47  ;;  %v3167_v53 = vmul.f32 %v3103_v60, %v3103_v60 }
 0x428   :  { %vm6192_vm11 = vcmp.ne.f32.partialorder %v7401_v30, 0.0  ;;  %v2266_v2 = vmax.f32 %v2138_v31, 0.0  ;;  %v3040_v18 = vmax.f32 %v2912_v39, 0.0  ;;  %v2140_v35 = vadd.f32 %v5948_v21, %v5363_v46 }
 0x429   :  { %v2584_v52 = vsel %vm6116_vm6, %v2520_v13, %v2392_v28  ;;  %v3358_v1 = vsel %vm6124_vm7, %v3294_v26, %v3166_v59  ;;  %v7405_v30 = vunpack.c.h.bf16 %v7396_v58  ;;  %v2914_v41 = vadd.f32 %v5950_v57, %v5374_v50  ;;  %v6224_v26 = vpop.f32.mrb[164].mxu0  ;;  %v6226_v57 = vpop.f32.mrb[164].mxu1 }
 0x42a   :  { %v7408_v47 = vunpack.c.h.bf16 %v7400_v51  ;;  %v2647_v23 = vadd.f32 %v2646_v14, %v2584_v52  ;;  %v3421_v28 = vadd.f32 %v3420_v32, %v3358_v1  ;;  %v2521_v59 = vmul.f32 25.0, %v2393_v6  ;;  %7413 = vst [vmem:[#allocation16_spill] sm:$0xff] %v6224_v26  ;;  %7414 = vst [vmem:[#allocation33_spill] sm:$0xff] %v6226_v57  ;;  %v7415_v52 = vld [vmem:[#allocation17_spill] sm:$0xff]  ;;  %v6248_v33 = vpop.f32.mrb[165].mxu0 }
 0x42b   :  { %vm6208_vm12 = vcmp.ne.f32.partialorder %v7405_v30, 0.0  ;;  %v3295_v60 = vmul.f32 25.0, %v3167_v53  ;;  %v7411_v21 = vunpack.c.l.bf16 %v7396_v58  ;;  %v7412_v49 = vunpack.c.l.bf16 %v7400_v51  ;;  %7423 = vst [vmem:[#allocation17_spill] sm:$0xff] %v6248_v33 }
 0x42c   :  { %vm6216_vm13 = vcmp.ne.f32.partialorder %v7408_v47, 0.0  ;;  %v2267_v39 = vmax.f32 %v2140_v35, 0.0  ;;  %v3041_v13 = vmax.f32 %v2914_v41, 0.0  ;;  %v2585_v30 = vsel %vm6140_vm8, %v2521_v59, %v2393_v6  ;;  %v7419_v35 = vld [vmem:[#allocation18_spill] sm:$0xff]  ;;  %v6250_v6 = vpop.f32.mrb[165].mxu1 }
 0x42d   :  { %v2330_v54 = vsub.f32 %v7411_v21, %v2266_v2  ;;  %v3104_v31 = vsub.f32 %v7412_v49, %v3040_v18  ;;  %v3359_v14 = vsel %vm6148_vm9, %v3295_v60, %v3167_v53  ;;  %v2142_v32 = vadd.f32 %v5968_v11, %v5357_v44  ;;  %7424 = vst [vmem:[#allocation18_spill] sm:$0xff] %v6250_v6  ;;  %v6252_v60 = vpop.f32.mrb[166].mxu0  ;;  %v6254_v21 = vpop.f32.mrb[166].mxu1 }
 0x42e   :  { %v7416_v2 = vunpack.c.l.bf16 %v7415_v52  ;;  %v2916_v18 = vadd.f32 %v5970_v4, %v5360_v45  ;;  %v7420_v41 = vunpack.c.l.bf16 %v7419_v35  ;;  %v2648_v11 = vadd.f32 %v2647_v23, %v2585_v30  ;;  %7425 = vst [vmem:[#allocation34_spill] sm:$0xff] %v6252_v60  ;;  %7426 = vst [vmem:[#allocation35_spill] sm:$0xff] %v6254_v21  ;;  %v6260_v34 = vpop.f32.mrb[167].mxu0  ;;  %v6262_v33 = vpop.f32.mrb[167].mxu1 }
 0x42f   :  { %v3422_v53 = vadd.f32 %v3421_v28, %v3359_v14  ;;  %v2394_v47 = vmul.f32 %v2330_v54, %v2330_v54  ;;  %v3168_v59 = vmul.f32 %v3104_v31, %v3104_v31  ;;  %v7427_v4 = vunpack.c.h.bf16 %v7396_v58  ;;  %7429 = vst [vmem:[#allocation36_spill] sm:$0xff] %v6260_v34  ;;  %7430 = vst [vmem:[#allocation37_spill] sm:$0xff] %v6262_v33  ;;  %v6294_v37 = vpop.f32.mrb[168].mxu1 }
 0x430   :  { %vm6236_vm14 = vcmp.ne.f32.partialorder %v7416_v2, 0.0  ;;  %vm6244_vm15 = vcmp.ne.f32.partialorder %v7420_v41, 0.0  ;;  %v7428_v2 = vunpack.c.h.bf16 %v7400_v51  ;;  %v2268_v57 = vmax.f32 %v2142_v32, 0.0 }
 0x431   :  { %v2331_v49 = vsub.f32 %v7427_v4, %v2267_v39  ;;  %v3042_v26 = vmax.f32 %v2916_v18, 0.0  ;;  %v2522_v23 = vmul.f32 25.0, %v2394_v47  ;;  %v3296_v28 = vmul.f32 25.0, %v3168_v59 }
 0x432   :  { %v3105_v41 = vsub.f32 %v7428_v2, %v3041_v13  ;;  %v2144_v54 = vadd.f32 %v5980_v29, %v5363_v46  ;;  %v7431_v31 = vunpack.c.h.bf16 %v7415_v52  ;;  %v2918_v58 = vadd.f32 %v5982_v10, %v5374_v50 }
 0x433   :  { %v7434_v51 = vunpack.c.h.bf16 %v7419_v35  ;;  %v2395_v13 = vmul.f32 %v2331_v49, %v2331_v49  ;;  %v7437_v32 = vunpack.c.l.bf16 %v7415_v52  ;;  %v7438_v18 = vunpack.c.l.bf16 %v7419_v35 }
 0x434   :  { %vm6268_vm0 = vcmp.ne.f32.partialorder %v7431_v31, 0.0  ;;  %v3169_v14 = vmul.f32 %v3105_v41, %v3105_v41  ;;  %v2586_v2 = vsel %vm6184_vm10, %v2522_v23, %v2394_v47  ;;  %v3360_v10 = vsel %vm6192_vm11, %v3296_v28, %v3168_v59  ;;  %v7441_v47 = vld [vmem:[#allocation19_spill] sm:$0xff] }
 0x435   :  { %vm6276_vm1 = vcmp.ne.f32.partialorder %v7434_v51, 0.0  ;;  %v2332_v29 = vsub.f32 %v7437_v32, %v2268_v57  ;;  %v3106_v4 = vsub.f32 %v7438_v18, %v3042_v26  ;;  %v2269_v31 = vmax.f32 %v2144_v54, 0.0  ;;  %v6292_v18 = vpop.f32.mrb[168].mxu0 }
 0x436   :  { %v3043_v33 = vmax.f32 %v2918_v58, 0.0  ;;  %v2649_v51 = vadd.f32 %v2648_v11, %v2586_v2  ;;  %v3423_v34 = vadd.f32 %v3422_v53, %v3360_v10  ;;  %v2523_v21 = vmul.f32 25.0, %v2395_v13  ;;  %v6316_v9 = vpop.f32.mrb[169].mxu0 }
 0x437   :  { %v3297_v60 = vmul.f32 25.0, %v3169_v14  ;;  %v2396_v49 = vmul.f32 %v2332_v29, %v2332_v29  ;;  %v3170_v41 = vmul.f32 %v3106_v4, %v3106_v4  ;;  %v7439_v6 = vunpack.c.h.bf16 %v7415_v52  ;;  %v6320_v54 = vpop.f32.mrb[170].mxu0 }
 0x438   :  { %v7440_v32 = vunpack.c.h.bf16 %v7419_v35  ;;  %v2587_v36 = vsel %vm6208_vm12, %v2523_v21, %v2395_v13  ;;  %v2148_v53 = vadd.f32 %v6024_v42, %v5357_v44  ;;  %v7442_v59 = vunpack.c.l.bf16 %v7441_v47  ;;  %v6324_v4 = vpop.f32.mrb[171].mxu0 }
 0x439   :  { %v2333_v57 = vsub.f32 %v7439_v6, %v2269_v31  ;;  %v3361_v11 = vsel %vm6216_vm13, %v3297_v60, %v3169_v14  ;;  %v2922_v35 = vadd.f32 %v6026_v17, %v5360_v45  ;;  %v6318_v60 = vpop.f32.mrb[169].mxu1  ;;  %v2650_v42 = vadd.f32 %v2649_v51, %v2587_v36 }
 0x43a   :  { %v3107_v26 = vsub.f32 %v7440_v32, %v3043_v33  ;;  %vm6304_vm2 = vcmp.ne.f32.partialorder %v7442_v59, 0.0  ;;  %v7445_v33 = vld [vmem:[#allocation20_spill] sm:$0xff]  ;;  %v3424_v21 = vadd.f32 %v3423_v34, %v3361_v11  ;;  %v2524_v23 = vmul.f32 25.0, %v2396_v49  ;;  %v6322_v58 = vpop.f32.mrb[170].mxu1 }
 0x43b   :  { %v7446_v6 = vunpack.c.l.bf16 %v7445_v33  ;;  %v3298_v28 = vmul.f32 25.0, %v3170_v41  ;;  %v2397_v13 = vmul.f32 %v2333_v57, %v2333_v57  ;;  %v2270_v14 = vmax.f32 %v2148_v53, 0.0  ;;  %v6326_v2 = vpop.f32.mrb[171].mxu1 }
 0x43c   :  { %v3171_v17 = vmul.f32 %v3107_v26, %v3107_v26  ;;  %v3044_v29 = vmax.f32 %v2922_v35, 0.0  ;;  %v2588_v10 = vsel %vm6236_vm14, %v2524_v23, %v2396_v49  ;;  %v2150_v31 = vadd.f32 %v6032_v8, %v5363_v46 }
 0x43d   :  { %vm6312_vm3 = vcmp.ne.f32.partialorder %v7446_v6, 0.0  ;;  %v3362_v34 = vsel %vm6244_vm15, %v3298_v28, %v3170_v41  ;;  %v7449_v51 = vunpack.c.h.bf16 %v7441_v47  ;;  %v2924_v32 = vadd.f32 %v6034_v62, %v5374_v50 }
 0x43e   :  { %v7452_v26 = vunpack.c.h.bf16 %v7445_v33  ;;  %v2651_v19 = vadd.f32 %v2650_v42, %v2588_v10  ;;  %v3425_v49 = vadd.f32 %v3424_v21, %v3362_v34  ;;  %v2525_v41 = vmul.f32 25.0, %v2397_v13  ;;  %v7457_v21 = vld [vmem:[#allocation21_spill] sm:$0xff] }
 0x43f   :  { %vm6336_vm4 = vcmp.ne.f32.partialorder %v7449_v51, 0.0  ;;  %v3299_v36 = vmul.f32 25.0, %v3171_v17  ;;  %v7455_v8 = vmov %v7442_v59  ;;  %v7456_v53 = vmov %v7446_v6  ;;  %v6374_v51 = vpop.f32.mrb[172].mxu1 }
 0x440   :  { %vm6344_vm5 = vcmp.ne.f32.partialorder %v7452_v26, 0.0  ;;  %v2334_v11 = vsub.f32 %v7455_v8, %v2270_v14  ;;  %v3108_v59 = vsub.f32 %v7456_v53, %v3044_v29  ;;  %v2271_v35 = vmax.f32 %v2150_v31, 0.0  ;;  %v7461_v29 = vld [vmem:[#allocation22_spill] sm:$0xff]  ;;  %7465 = vst [vmem:[#allocation19_spill] sm:$0xff] %v6374_v51 }
 0x441   :  { %v3045_v6 = vmax.f32 %v2924_v32, 0.0  ;;  %v2589_v62 = vsel %vm6268_vm0, %v2525_v41, %v2397_v13  ;;  %v3363_v23 = vsel %vm6276_vm1, %v3299_v36, %v3171_v17  ;;  %v2152_v42 = vadd.f32 %v6040_v16, %v5357_v44  ;;  %v6372_v16 = vpop.f32.mrb[172].mxu0 }
 0x442   :  { %v7458_v28 = vunpack.c.l.bf16 %v7457_v21  ;;  %v2926_v14 = vadd.f32 %v6042_v38, %v5360_v45  ;;  %v7462_v34 = vunpack.c.l.bf16 %v7461_v29  ;;  %v2652_v39 = vadd.f32 %v2651_v19, %v2589_v62  ;;  %v6380_v53 = vpop.f32.mrb[173].mxu0 }
 0x443   :  { %v3426_v13 = vadd.f32 %v3425_v49, %v3363_v23  ;;  %v2398_v17 = vmul.f32 %v2334_v11, %v2334_v11  ;;  %v3172_v31 = vmul.f32 %v3108_v59, %v3108_v59  ;;  %v7466_v32 = vunpack.c.h.bf16 %v7441_v47  ;;  %7468 = vst [vmem:[#allocation20_spill] sm:$0xff] %v6380_v53 }
 0x444   :  { %vm6360_vm6 = vcmp.ne.f32.partialorder %v7458_v28, 0.0  ;;  %vm6368_vm7 = vcmp.ne.f32.partialorder %v7462_v34, 0.0  ;;  %v7467_v41 = vunpack.c.h.bf16 %v7445_v33  ;;  %v2272_v36 = vmax.f32 %v2152_v42, 0.0  ;;  %v6382_v28 = vpop.f32.mrb[173].mxu1 }
 0x445   :  { %v2335_v26 = vsub.f32 %v7466_v32, %v2271_v35  ;;  %v3046_v8 = vmax.f32 %v2926_v14, 0.0  ;;  %7469 = vst [vmem:[#allocation21_spill] sm:$0xff] %v6382_v28  ;;  %v2526_v19 = vmul.f32 25.0, %v2398_v17  ;;  %v3300_v49 = vmul.f32 25.0, %v3172_v31  ;;  %v6402_v23 = vpop.f32.mrb[174].mxu1 }
 0x446   :  { %v3109_v38 = vsub.f32 %v7467_v41, %v3045_v6  ;;  %v2154_v11 = vadd.f32 %v6044_v0, %v5363_v46  ;;  %v7470_v59 = vunpack.c.h.bf16 %v7457_v21  ;;  %v2928_v47 = vadd.f32 %v6046_v43, %v5374_v50  ;;  %v6400_v6 = vpop.f32.mrb[174].mxu0  ;;  %7477 = vst [vmem:[#allocation38_spill] sm:$0xff] %v6402_v23  ;;  %v6410_v43 = vpop.f32.mrb[175].mxu1 }
 0x447   :  { %v7473_v33 = vunpack.c.h.bf16 %v7461_v29  ;;  %7476 = vst [vmem:[#allocation22_spill] sm:$0xff] %v6400_v6  ;;  %v2399_v0 = vmul.f32 %v2335_v26, %v2335_v26  ;;  %v7478_v14 = vunpack.c.l.bf16 %v7457_v21  ;;  %v7479_v32 = vunpack.c.l.bf16 %v7461_v29  ;;  %7481 = vst [vmem:[#allocation40_spill] sm:$0xff] %v6410_v43 }
 0x448   :  { %vm6388_vm8 = vcmp.ne.f32.partialorder %v7470_v59, 0.0  ;;  %v3173_v42 = vmul.f32 %v3109_v38, %v3109_v38  ;;  %v6408_v59 = vpop.f32.mrb[175].mxu0  ;;  %v3364_v6 = vsel %vm6312_vm3, %v3300_v49, %v3172_v31  ;;  %v2273_v28 = vmax.f32 %v2154_v11, 0.0  ;;  %v6442_v49 = vpop.f32.mrb[176].mxu1 }
 0x449   :  { %vm6396_vm9 = vcmp.ne.f32.partialorder %v7473_v33, 0.0  ;;  %v2336_v34 = vsub.f32 %v7478_v14, %v2272_v36  ;;  %v3110_v41 = vsub.f32 %v7479_v32, %v3046_v8  ;;  %7480 = vst [vmem:[#allocation39_spill] sm:$0xff] %v6408_v59  ;;  %v2590_v33 = vsel %vm6304_vm2, %v2526_v19, %v2398_v17 }
 0x44a   :  { %v3047_v23 = vmax.f32 %v2928_v47, 0.0  ;;  %v2653_v26 = vadd.f32 %v2652_v39, %v2590_v33  ;;  %v3427_v38 = vadd.f32 %v3426_v13, %v3364_v6  ;;  %v2527_v53 = vmul.f32 25.0, %v2399_v0  ;;  %v7484_v13 = vld [vmem:[#allocation23_spill] sm:$0xff] }
 0x44b   :  { %v3301_v51 = vmul.f32 25.0, %v3173_v42  ;;  %v2400_v36 = vmul.f32 %v2336_v34, %v2336_v34  ;;  %v3174_v14 = vmul.f32 %v3110_v41, %v3110_v41  ;;  %v7482_v8 = vunpack.c.h.bf16 %v7457_v21 }
 0x44c   :  { %v7483_v59 = vunpack.c.h.bf16 %v7461_v29  ;;  %v2591_v52 = vsel %vm6336_vm4, %v2527_v53, %v2399_v0  ;;  %v2158_v39 = vadd.f32 %v6092_v5, %v5357_v44  ;;  %v7485_v17 = vunpack.c.l.bf16 %v7484_v13  ;;  %v7488_v29 = vld [vmem:[#allocation24_spill] sm:$0xff]  ;;  %v6440_v5 = vpop.f32.mrb[176].mxu0 }
 0x44d   :  { %v2337_v32 = vsub.f32 %v7482_v8, %v2273_v28  ;;  %v3365_v61 = vsel %vm6344_vm5, %v3301_v51, %v3173_v42  ;;  %v2932_v21 = vadd.f32 %v6094_v56, %v5360_v45  ;;  %v7489_v28 = vunpack.c.l.bf16 %v7488_v29  ;;  %v6444_v0 = vpop.f32.mrb[177].mxu0  ;;  %v6446_v56 = vpop.f32.mrb[177].mxu1 }
 0x44e   :  { %v3111_v43 = vsub.f32 %v7483_v59, %v3047_v23  ;;  %vm6428_vm10 = vcmp.ne.f32.partialorder %v7485_v17, 0.0  ;;  %v2654_v1 = vadd.f32 %v2653_v26, %v2591_v52  ;;  %v3428_v51 = vadd.f32 %v3427_v38, %v3365_v61  ;;  %v6468_v30 = vpop.f32.mrb[178].mxu0  ;;  %v6470_v38 = vpop.f32.mrb[178].mxu1 }
 0x44f   :  { %vm6436_vm11 = vcmp.ne.f32.partialorder %v7489_v28, 0.0  ;;  %v2528_v53 = vmul.f32 25.0, %v2400_v36  ;;  %v3302_v19 = vmul.f32 25.0, %v3174_v14  ;;  %v2401_v11 = vmul.f32 %v2337_v32, %v2337_v32  ;;  %v6472_v32 = vpop.f32.mrb[179].mxu0  ;;  %v6474_v52 = vpop.f32.mrb[179].mxu1 }
 0x450   :  { %v3175_v47 = vmul.f32 %v3111_v43, %v3111_v43  ;;  %v2274_v6 = vmax.f32 %v2158_v39, 0.0  ;;  %v3048_v23 = vmax.f32 %v2932_v21, 0.0  ;;  %v2160_v41 = vadd.f32 %v6096_v3, %v5363_v46 }
 0x451   :  { %v2592_v42 = vsel %vm6360_vm6, %v2528_v53, %v2400_v36  ;;  %v3366_v34 = vsel %vm6368_vm7, %v3302_v19, %v3174_v14  ;;  %v7492_v59 = vunpack.c.h.bf16 %v7484_v13  ;;  %v2934_v43 = vadd.f32 %v6098_v63, %v5374_v50  ;;  %v7500_v19 = vld [vmem:[#allocation25_spill] sm:$0xff] }
 0x452   :  { %v7495_v26 = vunpack.c.h.bf16 %v7488_v29  ;;  %v2655_v3 = vadd.f32 %v2654_v1, %v2592_v42  ;;  %v3429_v36 = vadd.f32 %v3428_v51, %v3366_v34  ;;  %v2529_v14 = vmul.f32 25.0, %v2401_v11 }
 0x453   :  { %vm6456_vm12 = vcmp.ne.f32.partialorder %v7492_v59, 0.0  ;;  %v3303_v8 = vmul.f32 25.0, %v3175_v47  ;;  %v7498_v63 = vmov %v7485_v17  ;;  %v7499_v39 = vmov %v7489_v28 }
 0x454   :  { %vm6464_vm13 = vcmp.ne.f32.partialorder %v7495_v26, 0.0  ;;  %v2338_v61 = vsub.f32 %v7498_v63, %v2274_v6  ;;  %v3112_v17 = vsub.f32 %v7499_v39, %v3048_v23  ;;  %v2275_v21 = vmax.f32 %v2160_v41, 0.0  ;;  %v7504_v23 = vld [vmem:[#allocation26_spill] sm:$0xff] }
 0x455   :  { %v3049_v28 = vmax.f32 %v2934_v43, 0.0  ;;  %v2593_v53 = vsel %vm6388_vm8, %v2529_v14, %v2401_v11  ;;  %v3367_v1 = vsel %vm6396_vm9, %v3303_v8, %v3175_v47  ;;  %v2162_v51 = vadd.f32 %v6104_v25, %v5357_v44 }
 0x456   :  { %v7501_v42 = vunpack.c.l.bf16 %v7500_v19  ;;  %v2936_v6 = vadd.f32 %v6106_v27, %v5360_v45  ;;  %v7505_v41 = vunpack.c.l.bf16 %v7504_v23  ;;  %v2656_v35 = vadd.f32 %v2655_v3, %v2593_v53 }
 0x457   :  { %v3430_v11 = vadd.f32 %v3429_v36, %v3367_v1  ;;  %v2402_v47 = vmul.f32 %v2338_v61, %v2338_v61  ;;  %v3176_v59 = vmul.f32 %v3112_v17, %v3112_v17  ;;  %v7508_v25 = vunpack.c.h.bf16 %v7484_v13  ;;  %v6520_v61 = vpop.f32.mrb[180].mxu0  ;;  %v6522_v17 = vpop.f32.mrb[180].mxu1 }
 0x458   :  { %vm6488_vm14 = vcmp.ne.f32.partialorder %v7501_v42, 0.0  ;;  %vm6496_vm15 = vcmp.ne.f32.partialorder %v7505_v41, 0.0  ;;  %v3113_v14 = vsub.f32 %v7495_v26, %v3049_v28  ;;  %v2276_v8 = vmax.f32 %v2162_v51, 0.0  ;;  %7515 = vst [vmem:[#allocation23_spill] sm:$0xff] %v6522_v17 }
 0x459   :  { %v2339_v43 = vsub.f32 %v7508_v25, %v2275_v21  ;;  %v3050_v63 = vmax.f32 %v2936_v6, 0.0  ;;  %v2530_v39 = vmul.f32 25.0, %v2402_v47  ;;  %v3304_v27 = vmul.f32 25.0, %v3176_v59  ;;  %v6528_v6 = vpop.f32.mrb[181].mxu0 }
 0x45a   :  { %v2164_v42 = vadd.f32 %v6128_v22, %v5363_v46  ;;  %v7509_v41 = vunpack.c.h.bf16 %v7500_v19  ;;  %v2938_v13 = vadd.f32 %v6130_v24, %v5374_v50  ;;  %v7512_v36 = vunpack.c.h.bf16 %v7504_v23  ;;  %7518 = vst [vmem:[#allocation24_spill] sm:$0xff] %v6528_v6  ;;  %v6530_v24 = vpop.f32.mrb[181].mxu1 }
 0x45b   :  { %v2403_v22 = vmul.f32 %v2339_v43, %v2339_v43  ;;  %v3177_v21 = vmul.f32 %v3113_v14, %v3113_v14  ;;  %v7516_v28 = vunpack.c.l.bf16 %v7500_v19  ;;  %v7517_v1 = vunpack.c.l.bf16 %v7504_v23  ;;  %7519 = vst [vmem:[#allocation25_spill] sm:$0xff] %v6530_v24  ;;  %v6536_v43 = vpop.f32.mrb[182].mxu0  ;;  %v6538_v14 = vpop.f32.mrb[182].mxu1 }
 0x45c   :  { %vm6508_vm0 = vcmp.ne.f32.partialorder %v7509_v41, 0.0  ;;  %vm6516_vm1 = vcmp.ne.f32.partialorder %v7512_v36, 0.0  ;;  %v2594_v25 = vsel %vm6428_vm10, %v2530_v39, %v2402_v47  ;;  %v3368_v26 = vsel %vm6436_vm11, %v3304_v27, %v3176_v59  ;;  %v6542_v6 = vpop.f32.mrb[183].mxu1 }
 0x45d   :  { %v2340_v53 = vsub.f32 %v7516_v28, %v2276_v8  ;;  %v3114_v51 = vsub.f32 %v7517_v1, %v3050_v63  ;;  %v2277_v41 = vmax.f32 %v2164_v42, 0.0  ;;  %v3051_v36 = vmax.f32 %v2938_v13, 0.0  ;;  %v6540_v1 = vpop.f32.mrb[183].mxu0  ;;  %v7522_v42 = vld [vmem:[#allocation27_spill] sm:$0xff] }
 0x45e   :  { %v2657_v8 = vadd.f32 %v2656_v35, %v2594_v25  ;;  %v3431_v28 = vadd.f32 %v3430_v11, %v3368_v26  ;;  %v2531_v17 = vmul.f32 25.0, %v2403_v22  ;;  %v3305_v63 = vmul.f32 25.0, %v3177_v21  ;;  %v6588_v62 = vpop.f32.mrb[184].mxu0 }
 0x45f   :  { %v2404_v24 = vmul.f32 %v2340_v53, %v2340_v53  ;;  %v3178_v31 = vmul.f32 %v3114_v51, %v3114_v51  ;;  %v7520_v47 = vunpack.c.h.bf16 %v7500_v19  ;;  %v7521_v59 = vunpack.c.h.bf16 %v7504_v23  ;;  %v7526_v23 = vld [vmem:[#allocation28_spill] sm:$0xff] }
 0x460   :  { %v2595_v27 = vsel %vm6456_vm12, %v2531_v17, %v2403_v22  ;;  %v3369_v35 = vsel %vm6464_vm13, %v3305_v63, %v3177_v21  ;;  %v2168_v11 = vadd.f32 %v6160_v48, %v5357_v44  ;;  %v7523_v13 = vunpack.c.l.bf16 %v7522_v42 }
 0x461   :  { %v2341_v57 = vsub.f32 %v7520_v47, %v2277_v41  ;;  %v3115_v39 = vsub.f32 %v7521_v59, %v3051_v36  ;;  %v2942_v19 = vadd.f32 %v6162_v12, %v5360_v45  ;;  %v7527_v51 = vunpack.c.l.bf16 %v7526_v23 }
 0x462   :  { %vm6556_vm2 = vcmp.ne.f32.partialorder %v7523_v13, 0.0  ;;  %v2658_v10 = vadd.f32 %v2657_v8, %v2595_v27  ;;  %v3432_v17 = vadd.f32 %v3431_v28, %v3369_v35  ;;  %v2532_v22 = vmul.f32 25.0, %v2404_v24  ;;  %v6592_v27 = vpop.f32.mrb[185].mxu0 }
 0x463   :  { %vm6564_vm3 = vcmp.ne.f32.partialorder %v7527_v51, 0.0  ;;  %v3306_v21 = vmul.f32 25.0, %v3178_v31  ;;  %v2405_v48 = vmul.f32 %v2341_v57, %v2341_v57  ;;  %v3179_v25 = vmul.f32 %v3115_v39, %v3115_v39  ;;  %7536 = vst [vmem:[#allocation26_spill] sm:$0xff] %v6592_v27 }
 0x464   :  { %v2278_v26 = vmax.f32 %v2168_v11, 0.0  ;;  %v3052_v41 = vmax.f32 %v2942_v19, 0.0  ;;  %v2596_v36 = vsel %vm6488_vm14, %v2532_v22, %v2404_v24  ;;  %v2170_v63 = vadd.f32 %v6164_v15, %v5363_v46  ;;  %v6590_v24 = vpop.f32.mrb[184].mxu1 }
 0x465   :  { %v3370_v12 = vsel %vm6496_vm15, %v3306_v21, %v3178_v31  ;;  %v7530_v47 = vunpack.c.h.bf16 %v7522_v42  ;;  %v2944_v28 = vadd.f32 %v6166_v40, %v5374_v50  ;;  %v7533_v57 = vunpack.c.h.bf16 %v7526_v23  ;;  %v6594_v35 = vpop.f32.mrb[185].mxu1  ;;  %v6600_v21 = vpop.f32.mrb[186].mxu0 }
 0x466   :  { %v2659_v15 = vadd.f32 %v2658_v10, %v2596_v36  ;;  %v3433_v31 = vadd.f32 %v3432_v17, %v3370_v12  ;;  %v2533_v59 = vmul.f32 25.0, %v2405_v48  ;;  %v3307_v39 = vmul.f32 25.0, %v3179_v25  ;;  %7537 = vst [vmem:[#allocation27_spill] sm:$0xff] %v6594_v35  ;;  %7540 = vst [vmem:[#allocation28_spill] sm:$0xff] %v6600_v21  ;;  %v7542_v12 = vld [vmem:[#allocation29_spill] sm:$0xff]  ;;  %v6624_v29 = vpop.f32.mrb[187].mxu0 }
 0x467   :  { %vm6576_vm4 = vcmp.ne.f32.partialorder %v7530_v47, 0.0  ;;  %vm6584_vm5 = vcmp.ne.f32.partialorder %v7533_v57, 0.0  ;;  %v7538_v40 = vmov %v7523_v13  ;;  %v7539_v13 = vmov %v7527_v51  ;;  %v6602_v47 = vpop.f32.mrb[186].mxu1  ;;  %7550 = vst [vmem:[#allocation29_spill] sm:$0xff] %v6624_v29 }
 0x468   :  { %v2342_v11 = vsub.f32 %v7538_v40, %v2278_v26  ;;  %v3116_v19 = vsub.f32 %v7539_v13, %v3052_v41  ;;  %v2279_v51 = vmax.f32 %v2170_v63, 0.0  ;;  %v3053_v22 = vmax.f32 %v2944_v28, 0.0  ;;  %7541 = vst [vmem:[#allocation41_spill] sm:$0xff] %v6602_v47  ;;  %v7546_v63 = vld [vmem:[#allocation30_spill] sm:$0xff] }
 0x469   :  { %v2597_v10 = vsel %vm6508_vm0, %v2533_v59, %v2405_v48  ;;  %v3371_v17 = vsel %vm6516_vm1, %v3307_v39, %v3179_v25  ;;  %v2172_v36 = vadd.f32 %v6172_v55, %v5357_v44  ;;  %v7543_v26 = vunpack.c.l.bf16 %v7542_v12  ;;  %v6626_v48 = vpop.f32.mrb[187].mxu1 }
 0x46a   :  { %v2946_v41 = vadd.f32 %v6174_v7, %v5360_v45  ;;  %v7547_v28 = vunpack.c.l.bf16 %v7546_v63  ;;  %7551 = vst [vmem:[#allocation30_spill] sm:$0xff] %v6626_v48  ;;  %v2660_v55 = vadd.f32 %v2659_v15, %v2597_v10  ;;  %v3434_v25 = vadd.f32 %v3433_v31, %v3371_v17  ;;  %v7557_v31 = vld [vmem:[#allocation15_spill] sm:$0xff] }
 0x46b   :  { %vm6612_vm6 = vcmp.ne.f32.partialorder %v7543_v26, 0.0  ;;  %v2406_v59 = vmul.f32 %v2342_v11, %v2342_v11  ;;  %v3180_v39 = vmul.f32 %v3116_v19, %v3116_v19  ;;  %v7552_v40 = vunpack.c.h.bf16 %v7522_v42 }
 0x46c   :  { %vm6620_vm7 = vcmp.ne.f32.partialorder %v7547_v28, 0.0  ;;  %v7553_v26 = vunpack.c.h.bf16 %v7526_v23  ;;  %v2280_v47 = vmax.f32 %v2172_v36, 0.0  ;;  %v3054_v21 = vmax.f32 %v2946_v41, 0.0  ;;  %v4474_v23 = vld [vmem:[%s7171_s0 + $0x98] sm:$0xff] }
 0x46d   :  { %v2343_v13 = vsub.f32 %v7552_v40, %v2279_v51  ;;  %v2534_v28 = vmul.f32 25.0, %v2406_v59  ;;  %v3308_v35 = vmul.f32 25.0, %v3180_v39  ;;  %v2174_v27 = vadd.f32 %v6196_v20, %v5363_v46 }
 0x46e   :  { %v3117_v7 = vsub.f32 %v7553_v26, %v3053_v22  ;;  %v7554_v29 = vunpack.c.h.bf16 %v7542_v12  ;;  %v2948_v42 = vadd.f32 %v7557_v31, %v5374_v50  ;;  %v7558_v11 = vunpack.c.h.bf16 %v7546_v63  ;;  %v6656_v26 = vpop.f32.mrb[188].mxu0  ;;  %v6658_v31 = vpop.f32.mrb[188].mxu1 }
 0x46f   :  { %v2407_v19 = vmul.f32 %v2343_v13, %v2343_v13  ;;  %v7561_v22 = vunpack.c.l.bf16 %v7542_v12  ;;  %v7562_v10 = vunpack.c.l.bf16 %v7546_v63  ;;  %v2598_v36 = vsel %vm6556_vm2, %v2534_v28, %v2406_v59 }
 0x470   :  { %vm6636_vm8 = vcmp.ne.f32.partialorder %v7554_v29, 0.0  ;;  %vm6644_vm9 = vcmp.ne.f32.partialorder %v7558_v11, 0.0  ;;  %v3181_v51 = vmul.f32 %v3117_v7, %v3117_v7  ;;  %v3372_v41 = vsel %vm6564_vm3, %v3308_v35, %v3180_v39 }
 0x471   :  { %v2344_v20 = vsub.f32 %v7561_v22, %v2280_v47  ;;  %v3118_v17 = vsub.f32 %v7562_v10, %v3054_v21  ;;  %v2281_v29 = vmax.f32 %v2174_v27, 0.0  ;;  %v3055_v40 = vmax.f32 %v2948_v42, 0.0  ;;  %v6660_v47 = vpop.f32.mrb[189].mxu0  ;;  %v6662_v22 = vpop.f32.mrb[189].mxu1  ;;  %v7566_v42 = vld [vmem:[#allocation16_spill] sm:$0xff]  ;;  %v7567_v10 = vld [vmem:[#allocation33_spill] sm:$0xff] }
 0x472   :  { %v2661_v13 = vadd.f32 %v2660_v55, %v2598_v36  ;;  %v3435_v7 = vadd.f32 %v3434_v25, %v3372_v41  ;;  %v2535_v11 = vmul.f32 25.0, %v2407_v19  ;;  %v3309_v48 = vmul.f32 25.0, %v3181_v51  ;;  %v6668_v39 = vpop.f32.mrb[190].mxu0  ;;  %v6670_v28 = vpop.f32.mrb[190].mxu1 }
 0x473   :  { %v2408_v21 = vmul.f32 %v2344_v20, %v2344_v20  ;;  %v3182_v53 = vmul.f32 %v3118_v17, %v3118_v17  ;;  %v7563_v59 = vunpack.c.h.bf16 %v7542_v12  ;;  %v7564_v27 = vunpack.c.h.bf16 %v7546_v63  ;;  %7565 = vst [vmem:[#allocation15_spill] sm:$0xff] %v6670_v28  ;;  %v6680_v17 = vpop.f32.mrb[191].mxu0  ;;  %v6682_v63 = vpop.f32.mrb[191].mxu1 }
 0x474   :  { %v2599_v55 = vsel %vm6576_vm4, %v2535_v11, %v2407_v19  ;;  %v3373_v25 = vsel %vm6584_vm5, %v3309_v48, %v3181_v51  ;;  %v2178_v20 = vadd.f32 %v7566_v42, %v5357_v44  ;;  %v2952_v12 = vadd.f32 %v7567_v10, %v5360_v45  ;;  %7568 = vst [vmem:[#allocation16_spill] sm:$0xff] %v6680_v17  ;;  %v7570_v51 = vld [vmem:[#allocation31_spill] sm:$0xff] }
 0x475   :  { %v2345_v33 = vsub.f32 %v7563_v59, %v2281_v29  ;;  %v3119_v35 = vsub.f32 %v7564_v27, %v3055_v40  ;;  %7569 = vst [vmem:[#allocation33_spill] sm:$0xff] %v6682_v63  ;;  %v2662_v36 = vadd.f32 %v2661_v13, %v2599_v55  ;;  %v3436_v41 = vadd.f32 %v3435_v7, %v3373_v25  ;;  %v7574_v13 = vld [vmem:[#allocation17_spill] sm:$0xff] }
 0x476   :  { %v2536_v29 = vmul.f32 25.0, %v2408_v21  ;;  %v3310_v40 = vmul.f32 25.0, %v3182_v53  ;;  %v2282_v19 = vmax.f32 %v2178_v20, 0.0  ;;  %v3056_v11 = vmax.f32 %v2952_v12, 0.0 }
 0x477   :  { %v2409_v59 = vmul.f32 %v2345_v33, %v2345_v33  ;;  %v3183_v8 = vmul.f32 %v3119_v35, %v3119_v35  ;;  %v7571_v27 = vunpack.c.l.bf16 %v7570_v51  ;;  %v2180_v7 = vadd.f32 %v7574_v13, %v5363_v46 }
 0x478   :  { %v2600_v34 = vsel %vm6612_vm6, %v2536_v29, %v2408_v21  ;;  %v3374_v48 = vsel %vm6620_vm7, %v3310_v40, %v3182_v53  ;;  %v7576_v21 = vld [vmem:[#allocation32_spill] sm:$0xff]  ;;  %v1920_v17 = vunpack.c.h.bf16 %v4474_v23 }
 0x479   :  { %vm6690_vm10 = vcmp.ne.f32.partialorder %v7571_v27, 0.0  ;;  %v2663_v55 = vadd.f32 %v2662_v36, %v2600_v34  ;;  %v3437_v33 = vadd.f32 %v3436_v41, %v3374_v48  ;;  %v2537_v35 = vmul.f32 25.0, %v2409_v59 }
 0x47a   :  { %v3311_v25 = vmul.f32 25.0, %v3183_v8  ;;  %v7575_v20 = vmov %v7571_v27  ;;  %v7577_v10 = vunpack.c.l.bf16 %v7576_v21  ;;  %v2283_v29 = vmax.f32 %v2180_v7, 0.0 }
 0x47b   :  { %v2346_v57 = vsub.f32 %v7575_v20, %v2282_v19  ;;  %v2601_v40 = vsel %vm6636_vm8, %v2537_v35, %v2409_v59  ;;  %v7581_v41 = vunpack.c.h.bf16 %v7570_v51  ;;  %v7586_v35 = vld [vmem:[#allocation34_spill] sm:$0xff]  ;;  %vm6758_vm0 = vcmp.ne.f32.partialorder %v1920_v17, 0.0 }
 0x47c   :  { %v3120_v3 = vsub.f32 %v7577_v10, %v3056_v11  ;;  %v7578_v53 = vmov %v7577_v10  ;;  %v3375_v36 = vsel %vm6644_vm9, %v3311_v25, %v3183_v8  ;;  %v7584_v11 = vld [vmem:[#allocation18_spill] sm:$0xff]  ;;  %v2664_v48 = vadd.f32 %v2663_v55, %v2601_v40 }
 0x47d   :  { %vm6702_vm11 = vcmp.ne.f32.partialorder %v7578_v53, 0.0  ;;  %vm6712_vm12 = vcmp.ne.f32.partialorder %v7581_v41, 0.0  ;;  %v2954_v34 = vadd.f32 %v7584_v11, %v5374_v50  ;;  %v3438_v27 = vadd.f32 %v3437_v33, %v3375_v36  ;;  %v4475_v55 = vld [vmem:[%s7172_s1 + $0x98] sm:$0xff] }
 0x47e   :  { %v2410_v13 = vmul.f32 %v2346_v57, %v2346_v57  ;;  %v3184_v20 = vmul.f32 %v3120_v3, %v3120_v3  ;;  %v7585_v7 = vmov %v7581_v41  ;;  %v1919_v8 = vunpack.c.l.bf16 %v4474_v23  ;;  %v7587_v57 = vld [vmem:[#allocation35_spill] sm:$0xff] }
 0x47f   :  { %v2347_v15 = vsub.f32 %v7585_v7, %v2283_v29  ;;  %v3057_v59 = vmax.f32 %v2954_v34, 0.0  ;;  %v2182_v25 = vadd.f32 %v7586_v35, %v5357_v44  ;;  %v2741_v33 = vunpack.c.l.bf16 %v4475_v55  ;;  %v4477_v41 = vld [vmem:[%s7172_s1 + $0xa0] sm:$0xff] }
 0x480   :  { %v2538_v10 = vmul.f32 25.0, %v2410_v13  ;;  %v3312_v53 = vmul.f32 25.0, %v3184_v20  ;;  %v2956_v51 = vadd.f32 %v7587_v57, %v5360_v45  ;;  %v7588_v29 = vunpack.c.h.bf16 %v7576_v21 }
 0x481   :  { %v2411_v3 = vmul.f32 %v2347_v15, %v2347_v15  ;;  %v2284_v11 = vmax.f32 %v2182_v25, 0.0  ;;  %vm6742_vm14 = vcmp.ne.f32.partialorder %v1919_v8, 0.0  ;;  %v7594_v25 = vld [vmem:[#allocation36_spill] sm:$0xff]  ;;  %vm6754_vm15 = vcmp.ne.f32.partialorder %v2741_v33, 0.0 }
 0x482   :  { %v3121_v40 = vsub.f32 %v7588_v29, %v3057_v59  ;;  %v7589_v36 = vmov %v7588_v29  ;;  %v2602_v34 = vsel %vm6690_vm10, %v2538_v10, %v2410_v13  ;;  %v3376_v7 = vsel %vm6702_vm11, %v3312_v53, %v3184_v20  ;;  %v7595_v20 = vld [vmem:[#allocation37_spill] sm:$0xff] }
 0x483   :  { %vm6734_vm13 = vcmp.ne.f32.partialorder %v7589_v36, 0.0  ;;  %v3058_v15 = vmax.f32 %v2956_v51, 0.0  ;;  %v2665_v57 = vadd.f32 %v2664_v48, %v2602_v34  ;;  %v3439_v59 = vadd.f32 %v3438_v27, %v3376_v7 }
 0x484   :  { %v2539_v29 = vmul.f32 25.0, %v2411_v3  ;;  %v3185_v21 = vmul.f32 %v3121_v40, %v3121_v40  ;;  %v2348_v36 = vsub.f32 %v1919_v8, %v2284_v11  ;;  %v2184_v28 = vadd.f32 %v7594_v25, %v5363_v46 }
 0x485   :  { %v3122_v63 = vsub.f32 %v2741_v33, %v3058_v15  ;;  %v2742_v13 = vunpack.c.h.bf16 %v4475_v55  ;;  %v2958_v10 = vadd.f32 %v7595_v20, %v5374_v50  ;;  %v2188_v33 = vadd.f32 %v6292_v18, %v5357_v44 }
 0x486   :  { %v2603_v42 = vsel %vm6712_vm12, %v2539_v29, %v2411_v3  ;;  %v3313_v12 = vmul.f32 25.0, %v3185_v21  ;;  %v2412_v51 = vmul.f32 %v2348_v36, %v2348_v36  ;;  %v2285_v27 = vmax.f32 %v2184_v28, 0.0  ;;  %v4476_v28 = vld [vmem:[%s7171_s0 + $0xa0] sm:$0xff] }
 0x487   :  { %v2666_v53 = vadd.f32 %v2665_v57, %v2603_v42  ;;  %v3186_v48 = vmul.f32 %v3122_v63, %v3122_v63  ;;  %v3059_v19 = vmax.f32 %v2958_v10, 0.0  ;;  %v1921_v63 = vunpack.c.l.bf16 %v4476_v28 }
 0x488   :  { %v3377_v8 = vsel %vm6734_vm13, %v3313_v12, %v3185_v21  ;;  %v2540_v3 = vmul.f32 25.0, %v2412_v51  ;;  %v2349_v34 = vsub.f32 %v1920_v17, %v2285_v27  ;;  %v2743_v15 = vunpack.c.l.bf16 %v4477_v41 }
 0x489   :  { %v3440_v55 = vadd.f32 %v3439_v59, %v3377_v8  ;;  %v3314_v11 = vmul.f32 25.0, %v3186_v48  ;;  %v3123_v7 = vsub.f32 %v2742_v13, %v3059_v19  ;;  %v2962_v29 = vadd.f32 %v6294_v37, %v5360_v45 }
 0x48a   :  { %v2604_v57 = vsel %vm6742_vm14, %v2540_v3, %v2412_v51  ;;  %v2413_v59 = vmul.f32 %v2349_v34, %v2349_v34  ;;  %v2286_v42 = vmax.f32 %v2188_v33, 0.0  ;;  %vm3251_vm1 = vcmp.ne.f32.partialorder %v2742_v13, 0.0 }
 0x48b   :  { %v3378_v17 = vsel %vm6754_vm15, %v3314_v11, %v3186_v48  ;;  %v2667_v21 = vadd.f32 %v2666_v53, %v2604_v57  ;;  %v3187_v25 = vmul.f32 %v3123_v7, %v3123_v7  ;;  %v3060_v12 = vmax.f32 %v2962_v29, 0.0 }
 0x48c   :  { %v3441_v36 = vadd.f32 %v3440_v55, %v3378_v17  ;;  %v2541_v18 = vmul.f32 25.0, %v2413_v59  ;;  %v2350_v10 = vsub.f32 %v1921_v63, %v2286_v42  ;;  %v1922_v27 = vunpack.c.h.bf16 %v4476_v28 }
 0x48d   :  { %v3315_v20 = vmul.f32 25.0, %v3187_v25  ;;  %v2190_v35 = vadd.f32 %v6316_v9, %v5363_v46  ;;  %v3124_v48 = vsub.f32 %v2743_v15, %v3060_v12  ;;  %v2744_v8 = vunpack.c.h.bf16 %v4477_v41 }
 0x48e   :  { %v2605_v51 = vsel %vm6758_vm0, %v2541_v18, %v2413_v59  ;;  %v2964_v37 = vadd.f32 %v6318_v60, %v5374_v50  ;;  %v2414_v19 = vmul.f32 %v2350_v10, %v2350_v10  ;;  %vm6782_vm2 = vcmp.ne.f32.partialorder %v1921_v63, 0.0  ;;  %v4478_v63 = vld [vmem:[%s7171_s0 + $0xa8] sm:$0xff] }
 0x48f   :  { %v2668_v53 = vadd.f32 %v2667_v21, %v2605_v51  ;;  %v3379_v23 = vsel %vm3251_vm1, %v3315_v20, %v3187_v25  ;;  %v2287_v55 = vmax.f32 %v2190_v35, 0.0  ;;  %v3188_v11 = vmul.f32 %v3124_v48, %v3124_v48  ;;  %v4479_v59 = vld [vmem:[%s7172_s1 + $0xa8] sm:$0xff] }
 0x490   :  { %v3442_v13 = vadd.f32 %v3441_v36, %v3379_v23  ;;  %v3061_v34 = vmax.f32 %v2964_v37, 0.0  ;;  %v2542_v9 = vmul.f32 25.0, %v2414_v19  ;;  %vm6786_vm3 = vcmp.ne.f32.partialorder %v2743_v15, 0.0 }
 0x491   :  { %v2351_v7 = vsub.f32 %v1922_v27, %v2287_v55  ;;  %vm6790_vm4 = vcmp.ne.f32.partialorder %v1922_v27, 0.0  ;;  %v3316_v60 = vmul.f32 25.0, %v3188_v11  ;;  %v1923_v41 = vunpack.c.l.bf16 %v4478_v63 }
 0x492   :  { %v3125_v33 = vsub.f32 %v2744_v8, %v3061_v34  ;;  %v2192_v57 = vadd.f32 %v6320_v54, %v5357_v44  ;;  %v2606_v15 = vsel %vm6782_vm2, %v2542_v9, %v2414_v19  ;;  %v2745_v29 = vunpack.c.l.bf16 %v4479_v59 }
 0x493   :  { %v2415_v17 = vmul.f32 %v2351_v7, %v2351_v7  ;;  %v2966_v21 = vadd.f32 %v6322_v58, %v5360_v45  ;;  %v2669_v36 = vadd.f32 %v2668_v53, %v2606_v15  ;;  %v3380_v25 = vsel %vm6786_vm3, %v3316_v60, %v3188_v11  ;;  %v4480_v60 = vld [vmem:[%s7171_s0 + $0xb0] sm:$0xff] }
 0x494   :  { %v3189_v42 = vmul.f32 %v3125_v33, %v3125_v33  ;;  %v2288_v18 = vmax.f32 %v2192_v57, 0.0  ;;  %v3443_v12 = vadd.f32 %v3442_v13, %v3380_v25  ;;  %vm3253_vm5 = vcmp.ne.f32.partialorder %v2744_v8, 0.0  ;;  %v4481_v15 = vld [vmem:[%s7172_s1 + $0xb0] sm:$0xff] }
 0x495   :  { %v2543_v54 = vmul.f32 25.0, %v2415_v17  ;;  %v3062_v20 = vmax.f32 %v2966_v21, 0.0  ;;  %v1924_v35 = vunpack.c.h.bf16 %v4478_v63  ;;  %v2194_v51 = vadd.f32 %v6324_v4, %v5363_v46 }
 0x496   :  { %v3317_v10 = vmul.f32 25.0, %v3189_v42  ;;  %v2352_v27 = vsub.f32 %v1923_v41, %v2288_v18  ;;  %v2746_v37 = vunpack.c.h.bf16 %v4479_v59  ;;  %v2968_v53 = vadd.f32 %v6326_v2, %v5374_v50  ;;  %v7612_v59 = vld [vmem:[#allocation19_spill] sm:$0xff] }
 0x497   :  { %v2607_v48 = vsel %vm6790_vm4, %v2543_v54, %v2415_v17  ;;  %v3126_v58 = vsub.f32 %v2745_v29, %v3062_v20  ;;  %v2289_v13 = vmax.f32 %v2194_v51, 0.0  ;;  %vm6814_vm6 = vcmp.ne.f32.partialorder %v1923_v41, 0.0 }
 0x498   :  { %v2670_v23 = vadd.f32 %v2669_v36, %v2607_v48  ;;  %v3381_v19 = vsel %vm3253_vm5, %v3317_v10, %v3189_v42  ;;  %v2416_v55 = vmul.f32 %v2352_v27, %v2352_v27  ;;  %v3063_v34 = vmax.f32 %v2968_v53, 0.0  ;;  %v7613_v27 = vld [vmem:[#allocation20_spill] sm:$0xff]  ;;  %v7614_v53 = vld [vmem:[#allocation21_spill] sm:$0xff] }
 0x499   :  { %v3444_v8 = vadd.f32 %v3443_v12, %v3381_v19  ;;  %v3190_v11 = vmul.f32 %v3126_v58, %v3126_v58  ;;  %vm6818_vm7 = vcmp.ne.f32.partialorder %v2745_v29, 0.0  ;;  %v2353_v40 = vsub.f32 %v1924_v35, %v2289_v13 }
 0x49a   :  { %v2544_v4 = vmul.f32 25.0, %v2416_v55  ;;  %vm6822_vm8 = vcmp.ne.f32.partialorder %v1924_v35, 0.0  ;;  %v3127_v28 = vsub.f32 %v2746_v37, %v3063_v34  ;;  %v1925_v33 = vunpack.c.l.bf16 %v4480_v60 }
 0x49b   :  { %v3318_v2 = vmul.f32 25.0, %v3190_v11  ;;  %v2198_v63 = vadd.f32 %v6372_v16, %v5357_v44  ;;  %v2417_v57 = vmul.f32 %v2353_v40, %v2353_v40  ;;  %v2747_v17 = vunpack.c.l.bf16 %v4481_v15 }
 0x49c   :  { %v2608_v41 = vsel %vm6814_vm6, %v2544_v4, %v2416_v55  ;;  %v2972_v29 = vadd.f32 %v7612_v59, %v5360_v45  ;;  %v3191_v25 = vmul.f32 %v3127_v28, %v3127_v28  ;;  %vm3255_vm9 = vcmp.ne.f32.partialorder %v2746_v37, 0.0 }
 0x49d   :  { %v2671_v21 = vadd.f32 %v2670_v23, %v2608_v41  ;;  %v3382_v36 = vsel %vm6818_vm7, %v3318_v2, %v3190_v11  ;;  %v2290_v42 = vmax.f32 %v2198_v63, 0.0  ;;  %v2545_v16 = vmul.f32 25.0, %v2417_v57  ;;  %v7621_v63 = vld [vmem:[#allocation22_spill] sm:$0xff] }
 0x49e   :  { %v3445_v18 = vadd.f32 %v3444_v8, %v3382_v36  ;;  %v3064_v12 = vmax.f32 %v2972_v29, 0.0  ;;  %v3319_v54 = vmul.f32 25.0, %v3191_v25  ;;  %v1926_v10 = vunpack.c.h.bf16 %v4480_v60  ;;  %v4482_v60 = vld [vmem:[%s7171_s0 + $0xb8] sm:$0xff] }
 0x49f   :  { %v2354_v20 = vsub.f32 %v1925_v33, %v2290_v42  ;;  %v2200_v35 = vadd.f32 %v7613_v27, %v5363_v46  ;;  %v2609_v51 = vsel %vm6822_vm8, %v2545_v16, %v2417_v57  ;;  %v2748_v58 = vunpack.c.h.bf16 %v4481_v15  ;;  %v7622_v29 = vld [vmem:[#allocation38_spill] sm:$0xff] }
 0x4a0   :  { %v3128_v48 = vsub.f32 %v2747_v17, %v3064_v12  ;;  %v2974_v23 = vadd.f32 %v7614_v53, %v5374_v50  ;;  %v2672_v19 = vadd.f32 %v2671_v21, %v2609_v51  ;;  %v3383_v55 = vsel %vm3255_vm9, %v3319_v54, %v3191_v25 }
 0x4a1   :  { %v2418_v13 = vmul.f32 %v2354_v20, %v2354_v20  ;;  %v2291_v8 = vmax.f32 %v2200_v35, 0.0  ;;  %v3446_v37 = vadd.f32 %v3445_v18, %v3383_v55  ;;  %vm6846_vm10 = vcmp.ne.f32.partialorder %v1925_v33, 0.0  ;;  %v7623_v35 = vld [vmem:[#allocation39_spill] sm:$0xff] }
 0x4a2   :  { %v3192_v11 = vmul.f32 %v3128_v48, %v3128_v48  ;;  %v3065_v34 = vmax.f32 %v2974_v23, 0.0  ;;  %vm6850_vm11 = vcmp.ne.f32.partialorder %v2747_v17, 0.0  ;;  %vm6854_vm12 = vcmp.ne.f32.partialorder %v1926_v10, 0.0  ;;  %v4483_v17 = vld [vmem:[%s7172_s1 + $0xb8] sm:$0xff] }
 0x4a3   :  { %v2546_v4 = vmul.f32 25.0, %v2418_v13  ;;  %v2355_v40 = vsub.f32 %v1926_v10, %v2291_v8  ;;  %v1927_v33 = vunpack.c.l.bf16 %v4482_v60  ;;  %v2202_v41 = vadd.f32 %v7621_v63, %v5357_v44 }
 0x4a4   :  { %v3320_v2 = vmul.f32 25.0, %v3192_v11  ;;  %v3129_v28 = vsub.f32 %v2748_v58, %v3065_v34  ;;  %v2749_v59 = vunpack.c.l.bf16 %v4483_v17  ;;  %v2976_v21 = vadd.f32 %v7622_v29, %v5360_v45 }
 0x4a5   :  { %v2610_v57 = vsel %vm6846_vm10, %v2546_v4, %v2418_v13  ;;  %v2419_v15 = vmul.f32 %v2355_v40, %v2355_v40  ;;  %v2292_v18 = vmax.f32 %v2202_v41, 0.0  ;;  %vm3257_vm13 = vcmp.ne.f32.partialorder %v2748_v58, 0.0 }
 0x4a6   :  { %v2673_v36 = vadd.f32 %v2672_v19, %v2610_v57  ;;  %v3384_v25 = vsel %vm6850_vm11, %v3320_v2, %v3192_v11  ;;  %v3193_v42 = vmul.f32 %v3129_v28, %v3129_v28  ;;  %v3066_v54 = vmax.f32 %v2976_v21, 0.0  ;;  %v7624_v19 = vld [vmem:[#allocation40_spill] sm:$0xff] }
 0x4a7   :  { %v3447_v16 = vadd.f32 %v3446_v37, %v3384_v25  ;;  %v2547_v12 = vmul.f32 25.0, %v2419_v15  ;;  %v2356_v10 = vsub.f32 %v1927_v33, %v2292_v18  ;;  %v1928_v27 = vunpack.c.h.bf16 %v4482_v60 }
 0x4a8   :  { %v3321_v20 = vmul.f32 25.0, %v3193_v42  ;;  %v2204_v51 = vadd.f32 %v7623_v35, %v5363_v46  ;;  %v3130_v53 = vsub.f32 %v2749_v59, %v3066_v54  ;;  %v2750_v23 = vunpack.c.h.bf16 %v4483_v17  ;;  %v4485_v17 = vld [vmem:[%s7172_s1 + $0xc0] sm:$0xff] }
 0x4a9   :  { %v2611_v48 = vsel %vm6854_vm12, %v2547_v12, %v2419_v15  ;;  %v2978_v55 = vadd.f32 %v7624_v19, %v5374_v50  ;;  %v2420_v37 = vmul.f32 %v2356_v10, %v2356_v10  ;;  %vm6878_vm14 = vcmp.ne.f32.partialorder %v1927_v33, 0.0  ;;  %v4484_v33 = vld [vmem:[%s7171_s0 + $0xc0] sm:$0xff] }
 0x4aa   :  { %v2674_v13 = vadd.f32 %v2673_v36, %v2611_v48  ;;  %v3385_v8 = vsel %vm3257_vm13, %v3321_v20, %v3193_v42  ;;  %v2293_v3 = vmax.f32 %v2204_v51, 0.0  ;;  %v3194_v34 = vmul.f32 %v3130_v53, %v3130_v53 }
 0x4ab   :  { %v3448_v58 = vadd.f32 %v3447_v16, %v3385_v8  ;;  %v3067_v4 = vmax.f32 %v2978_v55, 0.0  ;;  %v2548_v9 = vmul.f32 25.0, %v2420_v37  ;;  %vm6882_vm15 = vcmp.ne.f32.partialorder %v2749_v59, 0.0 }
 0x4ac   :  { %v2357_v7 = vsub.f32 %v1928_v27, %v2293_v3  ;;  %vm6886_vm0 = vcmp.ne.f32.partialorder %v1928_v27, 0.0  ;;  %v3322_v28 = vmul.f32 25.0, %v3194_v34  ;;  %v1929_v63 = vunpack.c.l.bf16 %v4484_v33 }
 0x4ad   :  { %v3131_v60 = vsub.f32 %v2750_v23, %v3067_v4  ;;  %v2208_v41 = vadd.f32 %v6440_v5, %v5357_v44  ;;  %v2612_v57 = vsel %vm6878_vm14, %v2548_v9, %v2420_v37  ;;  %v2751_v59 = vunpack.c.l.bf16 %v4485_v17  ;;  %v4486_v4 = vld [vmem:[%s7171_s0 + $0xc8] sm:$0xff] }
 0x4ae   :  { %v2421_v15 = vmul.f32 %v2357_v7, %v2357_v7  ;;  %v2982_v29 = vadd.f32 %v6442_v49, %v5360_v45  ;;  %v2675_v21 = vadd.f32 %v2674_v13, %v2612_v57  ;;  %v3386_v36 = vsel %vm6882_vm15, %v3322_v28, %v3194_v34  ;;  %v4487_v28 = vld [vmem:[%s7172_s1 + $0xc8] sm:$0xff] }
 0x4af   :  { %v3195_v25 = vmul.f32 %v3131_v60, %v3131_v60  ;;  %v2294_v42 = vmax.f32 %v2208_v41, 0.0  ;;  %v3449_v18 = vadd.f32 %v3448_v58, %v3386_v36  ;;  %vm3259_vm1 = vcmp.ne.f32.partialorder %v2750_v23, 0.0 }
 0x4b0   :  { %v2549_v5 = vmul.f32 25.0, %v2421_v15  ;;  %v3068_v16 = vmax.f32 %v2982_v29, 0.0  ;;  %v1930_v20 = vunpack.c.h.bf16 %v4484_v33  ;;  %v2210_v10 = vadd.f32 %v6444_v0, %v5363_v46 }
 0x4b1   :  { %v3323_v12 = vmul.f32 25.0, %v3195_v25  ;;  %v2358_v54 = vsub.f32 %v1929_v63, %v2294_v42  ;;  %v2752_v35 = vunpack.c.h.bf16 %v4485_v17  ;;  %v2984_v51 = vadd.f32 %v6446_v56, %v5374_v50 }
 0x4b2   :  { %v2613_v27 = vsel %vm6886_vm0, %v2549_v5, %v2421_v15  ;;  %v3132_v49 = vsub.f32 %v2751_v59, %v3068_v16  ;;  %v2295_v55 = vmax.f32 %v2210_v10, 0.0  ;;  %vm6910_vm2 = vcmp.ne.f32.partialorder %v1929_v63, 0.0 }
 0x4b3   :  { %v2676_v48 = vadd.f32 %v2675_v21, %v2613_v27  ;;  %v3387_v53 = vsel %vm3259_vm1, %v3323_v12, %v3195_v25  ;;  %v2422_v19 = vmul.f32 %v2358_v54, %v2358_v54  ;;  %v3069_v37 = vmax.f32 %v2984_v51, 0.0  ;;  %v4490_v27 = vld [vmem:[%s7171_s0 + $0xd8] sm:$0xff] }
 0x4b4   :  { %v3450_v23 = vadd.f32 %v3449_v18, %v3387_v53  ;;  %v3196_v8 = vmul.f32 %v3132_v49, %v3132_v49  ;;  %vm6914_vm3 = vcmp.ne.f32.partialorder %v2751_v59, 0.0  ;;  %v2359_v58 = vsub.f32 %v1930_v20, %v2295_v55  ;;  %v4488_v55 = vld [vmem:[%s7171_s0 + $0xd0] sm:$0xff] }
 0x4b5   :  { %v2550_v0 = vmul.f32 25.0, %v2422_v19  ;;  %vm6918_vm4 = vcmp.ne.f32.partialorder %v1930_v20, 0.0  ;;  %v3133_v34 = vsub.f32 %v2752_v35, %v3069_v37  ;;  %v1931_v9 = vunpack.c.l.bf16 %v4486_v4 }
 0x4b6   :  { %v3324_v56 = vmul.f32 25.0, %v3196_v8  ;;  %v2212_v40 = vadd.f32 %v6468_v30, %v5357_v44  ;;  %v2423_v2 = vmul.f32 %v2359_v58, %v2359_v58  ;;  %v2753_v60 = vunpack.c.l.bf16 %v4487_v28  ;;  %v7643_v58 = vld [vmem:[#allocation23_spill] sm:$0xff] }
 0x4b7   :  { %v2614_v7 = vsel %vm6910_vm2, %v2550_v0, %v2422_v19  ;;  %v2986_v33 = vadd.f32 %v6470_v38, %v5360_v45  ;;  %v3197_v57 = vmul.f32 %v3133_v34, %v3133_v34  ;;  %vm3261_vm5 = vcmp.ne.f32.partialorder %v2752_v35, 0.0  ;;  %v4489_v0 = vld [vmem:[%s7172_s1 + $0xd0] sm:$0xff] }
 0x4b8   :  { %v2677_v63 = vadd.f32 %v2676_v48, %v2614_v7  ;;  %v3388_v41 = vsel %vm6914_vm3, %v3324_v56, %v3196_v8  ;;  %v2296_v15 = vmax.f32 %v2212_v40, 0.0  ;;  %v2551_v30 = vmul.f32 25.0, %v2423_v2 }
 0x4b9   :  { %v3451_v17 = vadd.f32 %v3450_v23, %v3388_v41  ;;  %v3070_v59 = vmax.f32 %v2986_v33, 0.0  ;;  %v3325_v29 = vmul.f32 25.0, %v3197_v57  ;;  %v1932_v36 = vunpack.c.h.bf16 %v4486_v4  ;;  %v7644_v33 = vld [vmem:[#allocation24_spill] sm:$0xff] }
 0x4ba   :  { %v2360_v21 = vsub.f32 %v1931_v9, %v2296_v15  ;;  %v2214_v25 = vadd.f32 %v6472_v32, %v5363_v46  ;;  %v2615_v42 = vsel %vm6918_vm4, %v2551_v30, %v2423_v2  ;;  %v2754_v18 = vunpack.c.h.bf16 %v4487_v28 }
 0x4bb   :  { %v3134_v38 = vsub.f32 %v2753_v60, %v3070_v59  ;;  %v2988_v5 = vadd.f32 %v6474_v52, %v5374_v50  ;;  %v2678_v16 = vadd.f32 %v2677_v63, %v2615_v42  ;;  %v3389_v12 = vsel %vm3261_vm5, %v3325_v29, %v3197_v57 }
 0x4bc   :  { %v2424_v54 = vmul.f32 %v2360_v21, %v2360_v21  ;;  %v2297_v20 = vmax.f32 %v2214_v25, 0.0  ;;  %v3452_v10 = vadd.f32 %v3451_v17, %v3389_v12  ;;  %vm6942_vm6 = vcmp.ne.f32.partialorder %v1931_v9, 0.0  ;;  %v7645_v17 = vld [vmem:[#allocation25_spill] sm:$0xff] }
 0x4bd   :  { %v3198_v49 = vmul.f32 %v3134_v38, %v3134_v38  ;;  %v3071_v35 = vmax.f32 %v2988_v5, 0.0  ;;  %vm6946_vm7 = vcmp.ne.f32.partialorder %v2753_v60, 0.0  ;;  %vm6950_vm8 = vcmp.ne.f32.partialorder %v1932_v36, 0.0 }
 0x4be   :  { %v2552_v32 = vmul.f32 25.0, %v2424_v54  ;;  %v2361_v48 = vsub.f32 %v1932_v36, %v2297_v20  ;;  %v1933_v23 = vunpack.c.l.bf16 %v4488_v55  ;;  %v2218_v13 = vadd.f32 %v6520_v61, %v5357_v44 }
 0x4bf   :  { %v3326_v52 = vmul.f32 25.0, %v3198_v49  ;;  %v3135_v19 = vsub.f32 %v2754_v18, %v3071_v35  ;;  %v2755_v3 = vunpack.c.l.bf16 %v4489_v0  ;;  %v2992_v11 = vadd.f32 %v7643_v58, %v5360_v45 }
 0x4c0   :  { %v2616_v8 = vsel %vm6942_vm6, %v2552_v32, %v2424_v54  ;;  %v2425_v37 = vmul.f32 %v2361_v48, %v2361_v48  ;;  %v2298_v9 = vmax.f32 %v2218_v13, 0.0  ;;  %vm3263_vm9 = vcmp.ne.f32.partialorder %v2754_v18, 0.0  ;;  %v4491_v48 = vld [vmem:[%s7172_s1 + $0xd8] sm:$0xff] }
 0x4c1   :  { %v2679_v56 = vadd.f32 %v2678_v16, %v2616_v8  ;;  %v3390_v34 = vsel %vm6946_vm7, %v3326_v52, %v3198_v49  ;;  %v3199_v4 = vmul.f32 %v3135_v19, %v3135_v19  ;;  %v3072_v7 = vmax.f32 %v2992_v11, 0.0 }
 0x4c2   :  { %v3453_v40 = vadd.f32 %v3452_v10, %v3390_v34  ;;  %v2553_v61 = vmul.f32 25.0, %v2425_v37  ;;  %v2362_v28 = vsub.f32 %v1933_v23, %v2298_v9  ;;  %v1934_v60 = vunpack.c.h.bf16 %v4488_v55 }
 0x4c3   :  { %v3327_v2 = vmul.f32 25.0, %v3199_v4  ;;  %v2220_v63 = vadd.f32 %v7644_v33, %v5363_v46  ;;  %v3136_v57 = vsub.f32 %v2755_v3, %v3072_v7  ;;  %v2756_v15 = vunpack.c.h.bf16 %v4489_v0 }
 0x4c4   :  { %v2617_v41 = vsel %vm6950_vm8, %v2553_v61, %v2425_v37  ;;  %v2994_v30 = vadd.f32 %v7645_v17, %v5374_v50  ;;  %v2426_v21 = vmul.f32 %v2362_v28, %v2362_v28  ;;  %vm6974_vm10 = vcmp.ne.f32.partialorder %v1933_v23, 0.0  ;;  %v4492_v17 = vld [vmem:[%s7171_s0 + $0xe0] sm:$0xff] }
 0x4c5   :  { %v2680_v59 = vadd.f32 %v2679_v56, %v2617_v41  ;;  %v3391_v29 = vsel %vm3263_vm9, %v3327_v2, %v3199_v4  ;;  %v2299_v36 = vmax.f32 %v2220_v63, 0.0  ;;  %v3200_v38 = vmul.f32 %v3136_v57, %v3136_v57 }
 0x4c6   :  { %v3454_v25 = vadd.f32 %v3453_v40, %v3391_v29  ;;  %v3073_v18 = vmax.f32 %v2994_v30, 0.0  ;;  %v2554_v5 = vmul.f32 25.0, %v2426_v21  ;;  %vm6978_vm11 = vcmp.ne.f32.partialorder %v2755_v3, 0.0 }
 0x4c7   :  { %v2363_v12 = vsub.f32 %v1934_v60, %v2299_v36  ;;  %vm6982_vm12 = vcmp.ne.f32.partialorder %v1934_v60, 0.0  ;;  %v3328_v20 = vmul.f32 25.0, %v3200_v38  ;;  %v1935_v49 = vunpack.c.l.bf16 %v4490_v27  ;;  %v4493_v36 = vld [vmem:[%s7172_s1 + $0xe0] sm:$0xff] }
 0x4c8   :  { %v3137_v10 = vsub.f32 %v2756_v15, %v3073_v18  ;;  %v2222_v35 = vadd.f32 %v6536_v43, %v5357_v44  ;;  %v2618_v32 = vsel %vm6974_vm10, %v2554_v5, %v2426_v21  ;;  %v2757_v53 = vunpack.c.l.bf16 %v4491_v48 }
 0x4c9   :  { %v2427_v51 = vmul.f32 %v2363_v12, %v2363_v12  ;;  %v2996_v52 = vadd.f32 %v6538_v14, %v5360_v45  ;;  %v2681_v19 = vadd.f32 %v2680_v59, %v2618_v32  ;;  %v3392_v55 = vsel %vm6978_vm11, %v3328_v20, %v3200_v38 }
 0x4ca   :  { %v3201_v23 = vmul.f32 %v3137_v10, %v3137_v10  ;;  %v2300_v13 = vmax.f32 %v2222_v35, 0.0  ;;  %v3455_v8 = vadd.f32 %v3454_v25, %v3392_v55  ;;  %vm3265_vm13 = vcmp.ne.f32.partialorder %v2756_v15, 0.0 }
 0x4cb   :  { %v2555_v43 = vmul.f32 25.0, %v2427_v51  ;;  %v3074_v37 = vmax.f32 %v2996_v52, 0.0  ;;  %v1936_v58 = vunpack.c.h.bf16 %v4490_v27  ;;  %v2224_v11 = vadd.f32 %v6540_v1, %v5363_v46 }
 0x4cc   :  { %v3329_v0 = vmul.f32 25.0, %v3201_v23  ;;  %v2364_v3 = vsub.f32 %v1935_v49, %v2300_v13  ;;  %v2758_v34 = vunpack.c.h.bf16 %v4491_v48  ;;  %v2998_v4 = vadd.f32 %v6542_v6, %v5374_v50  ;;  %v7659_v48 = vld [vmem:[#allocation27_spill] sm:$0xff] }
 0x4cd   :  { %v2619_v56 = vsel %vm6982_vm12, %v2555_v43, %v2427_v51  ;;  %v3138_v14 = vsub.f32 %v2757_v53, %v3074_v37  ;;  %v2301_v7 = vmax.f32 %v2224_v11, 0.0  ;;  %vm7006_vm14 = vcmp.ne.f32.partialorder %v1935_v49, 0.0  ;;  %v7658_v49 = vld [vmem:[#allocation26_spill] sm:$0xff] }
 0x4ce   :  { %v2682_v9 = vadd.f32 %v2681_v19, %v2619_v56  ;;  %v3393_v40 = vsel %vm3265_vm13, %v3329_v0, %v3201_v23  ;;  %v2428_v61 = vmul.f32 %v2364_v3, %v2364_v3  ;;  %v3075_v33 = vmax.f32 %v2998_v4, 0.0 }
 0x4cf   :  { %v3456_v2 = vadd.f32 %v3455_v8, %v3393_v40  ;;  %v3202_v60 = vmul.f32 %v3138_v14, %v3138_v14  ;;  %vm7010_vm15 = vcmp.ne.f32.partialorder %v2757_v53, 0.0  ;;  %v2365_v41 = vsub.f32 %v1936_v58, %v2301_v7  ;;  %v4497_v8 = vld [vmem:[%s7172_s1 + $0xf0] sm:$0xff] }
 0x4d0   :  { %v2556_v1 = vmul.f32 25.0, %v2428_v61  ;;  %vm7014_vm0 = vcmp.ne.f32.partialorder %v1936_v58, 0.0  ;;  %v3139_v15 = vsub.f32 %v2758_v34, %v3075_v33  ;;  %v1937_v30 = vunpack.c.l.bf16 %v4492_v17 }
 0x4d1   :  { %v3330_v6 = vmul.f32 25.0, %v3202_v60  ;;  %v2228_v59 = vadd.f32 %v6588_v62, %v5357_v44  ;;  %v2429_v21 = vmul.f32 %v2365_v41, %v2365_v41  ;;  %v2759_v25 = vunpack.c.l.bf16 %v4493_v36 }
 0x4d2   :  { %v2620_v29 = vsel %vm7006_vm14, %v2556_v1, %v2428_v61  ;;  %v3002_v42 = vadd.f32 %v6590_v24, %v5360_v45  ;;  %v3203_v5 = vmul.f32 %v3139_v15, %v3139_v15  ;;  %vm3267_vm1 = vcmp.ne.f32.partialorder %v2758_v34, 0.0  ;;  %v4494_v34 = vld [vmem:[%s7171_s0 + $0xe8] sm:$0xff] }
 0x4d3   :  { %v2683_v38 = vadd.f32 %v2682_v9, %v2620_v29  ;;  %v3394_v18 = vsel %vm7010_vm15, %v3330_v6, %v3202_v60  ;;  %v2302_v16 = vmax.f32 %v2228_v59, 0.0  ;;  %v2557_v62 = vmul.f32 25.0, %v2429_v21  ;;  %v7666_v9 = vld [vmem:[#allocation28_spill] sm:$0xff]  ;;  %v7667_v60 = vld [vmem:[#allocation41_spill] sm:$0xff] }
 0x4d4   :  { %v3457_v12 = vadd.f32 %v3456_v2, %v3394_v18  ;;  %v3076_v54 = vmax.f32 %v3002_v42, 0.0  ;;  %v3331_v20 = vmul.f32 25.0, %v3203_v5  ;;  %v1938_v27 = vunpack.c.h.bf16 %v4492_v17  ;;  %v4495_v2 = vld [vmem:[%s7172_s1 + $0xe8] sm:$0xff]  ;;  %v7669_v18 = vld [vmem:[#allocation30_spill] sm:$0xff] }
 0x4d5   :  { %v2366_v10 = vsub.f32 %v1937_v30, %v2302_v16  ;;  %v2230_v35 = vadd.f32 %v7658_v49, %v5363_v46  ;;  %v2621_v32 = vsel %vm7014_vm0, %v2557_v62, %v2429_v21  ;;  %v2760_v51 = vunpack.c.h.bf16 %v4493_v36  ;;  %v7668_v21 = vld [vmem:[#allocation29_spill] sm:$0xff] }
 0x4d6   :  { %v3140_v24 = vsub.f32 %v2759_v25, %v3076_v54  ;;  %v3004_v53 = vadd.f32 %v7659_v48, %v5374_v50  ;;  %v2684_v52 = vadd.f32 %v2683_v38, %v2621_v32  ;;  %v3395_v19 = vsel %vm3267_vm1, %v3331_v20, %v3203_v5 }
 0x4d7   :  { %v2430_v55 = vmul.f32 %v2366_v10, %v2366_v10  ;;  %v2303_v23 = vmax.f32 %v2230_v35, 0.0  ;;  %v3458_v13 = vadd.f32 %v3457_v12, %v3395_v19  ;;  %vm7038_vm2 = vcmp.ne.f32.partialorder %v1937_v30, 0.0 }
 0x4d8   :  { %v3204_v43 = vmul.f32 %v3140_v24, %v3140_v24  ;;  %v3077_v37 = vmax.f32 %v3004_v53, 0.0  ;;  %vm7042_vm3 = vcmp.ne.f32.partialorder %v2759_v25, 0.0  ;;  %vm7046_vm4 = vcmp.ne.f32.partialorder %v1938_v27, 0.0 }
 0x4d9   :  { %v2558_v0 = vmul.f32 25.0, %v2430_v55  ;;  %v2367_v58 = vsub.f32 %v1938_v27, %v2303_v23  ;;  %v1939_v4 = vunpack.c.l.bf16 %v4494_v34  ;;  %v2232_v40 = vadd.f32 %v7666_v9, %v5357_v44 }
 0x4da   :  { %v3332_v56 = vmul.f32 25.0, %v3204_v43  ;;  %v3141_v14 = vsub.f32 %v2760_v51, %v3077_v37  ;;  %v2761_v28 = vunpack.c.l.bf16 %v4495_v2  ;;  %v3006_v33 = vadd.f32 %v7667_v60, %v5360_v45 }
 0x4db   :  { %v2622_v61 = vsel %vm7038_vm2, %v2558_v0, %v2430_v55  ;;  %v2431_v7 = vmul.f32 %v2367_v58, %v2367_v58  ;;  %v2304_v57 = vmax.f32 %v2232_v40, 0.0  ;;  %vm3269_vm5 = vcmp.ne.f32.partialorder %v2760_v51, 0.0 }
 0x4dc   :  { %v2685_v1 = vadd.f32 %v2684_v52, %v2622_v61  ;;  %v3396_v63 = vsel %vm7042_vm3, %v3332_v56, %v3204_v43  ;;  %v3205_v41 = vmul.f32 %v3141_v14, %v3141_v14  ;;  %v3078_v17 = vmax.f32 %v3006_v33, 0.0  ;;  %v4496_v52 = vld [vmem:[%s7171_s0 + $0xf0] sm:$0xff] }
 0x4dd   :  { %v3459_v6 = vadd.f32 %v3458_v13, %v3396_v63  ;;  %v2559_v15 = vmul.f32 25.0, %v2431_v7  ;;  %v2368_v59 = vsub.f32 %v1939_v4, %v2304_v57  ;;  %v1940_v29 = vunpack.c.h.bf16 %v4494_v34 }
 0x4de   :  { %v3333_v30 = vmul.f32 25.0, %v3205_v41  ;;  %v2234_v36 = vadd.f32 %v7668_v21, %v5363_v46  ;;  %v3142_v42 = vsub.f32 %v2761_v28, %v3078_v17  ;;  %v2762_v38 = vunpack.c.h.bf16 %v4495_v2  ;;  %v4498_v17 = vld [vmem:[%s7171_s0 + $0xf8] sm:$0xff]  ;;  %s4625_s0 = smov [#allocation8]  }
 0x4df   :  { %v2623_v25 = vsel %vm7046_vm4, %v2559_v15, %v2431_v7  ;;  %v3008_v5 = vadd.f32 %v7669_v18, %v5374_v50  ;;  %v2432_v62 = vmul.f32 %v2368_v59, %v2368_v59  ;;  %vm7070_vm6 = vcmp.ne.f32.partialorder %v1939_v4, 0.0  ;;  %v4499_v21 = vld [vmem:[%s7172_s1 + $0xf8] sm:$0xff]  ;;  %s3727_s1 = sshll.u32 %s4625_s0, 4  ;;  %s3728_s1 = int_to_ptr.vmem [resolvable:$true] %s3727_s1 }
 0x4e0   :  { %v2686_v16 = vadd.f32 %v2685_v1, %v2623_v25  ;;  %v3397_v12 = vsel %vm3269_vm5, %v3333_v30, %v3205_v41  ;;  %v2305_v54 = vmax.f32 %v2234_v36, 0.0  ;;  %v3206_v27 = vmul.f32 %v3142_v42, %v3142_v42  ;;  %v7680_v25 = vld [vmem:[#allocation15_spill] sm:$0xff]  ;;  %s4566_s4 = scalar_lea.vmem %s3728_s1, 32  ;;  %p4571_p11 = scmp.lt.s32.totalorder %s3728_s1, %s3728_s1 }
 0x4e1   :  { %v3460_v20 = vadd.f32 %v3459_v6, %v3397_v12  ;;  %v3079_v49 = vmax.f32 %v3008_v5, 0.0  ;;  %v2560_v35 = vmul.f32 25.0, %v2432_v62  ;;  %vm7074_vm7 = vcmp.ne.f32.partialorder %v2761_v28, 0.0  ;;  %p4567_p10 = scmp.ne.s32.totalorder %s3728_s1, %s4566_s4  ;;  %p4572_p12 = scmp.lt.s32.totalorder %s4566_s4, %s4566_s4 }
 0x4e2   :  { %v2369_v24 = vsub.f32 %v1940_v29, %v2305_v54  ;;  %vm7078_vm8 = vcmp.ne.f32.partialorder %v1940_v29, 0.0  ;;  %v3334_v48 = vmul.f32 25.0, %v3206_v27  ;;  %v1941_v19 = vunpack.c.l.bf16 %v4496_v52 }
 0x4e3   :  { %v3143_v53 = vsub.f32 %v2762_v38, %v3079_v49  ;;  %v2238_v55 = vadd.f32 %v6656_v26, %v5357_v44  ;;  %v2624_v23 = vsel %vm7070_vm6, %v2560_v35, %v2432_v62  ;;  %v2763_v43 = vunpack.c.l.bf16 %v4497_v8  ;;  %v7684_v49 = vld [vmem:[#allocation33_spill] sm:$0xff]  ;;  %p4573_p13 = por %p4572_p12, %p4571_p11 }
 0x4e4   :  { %v2433_v13 = vmul.f32 %v2369_v24, %v2369_v24  ;;  %v3012_v37 = vadd.f32 %v6658_v31, %v5360_v45  ;;  %v2687_v0 = vadd.f32 %v2686_v16, %v2624_v23  ;;  %v3398_v3 = vsel %vm7074_vm7, %v3334_v48, %v3206_v27  ;;  %v7681_v16 = vld [vmem:[#allocation16_spill] sm:$0xff] }
 0x4e5   :  { %v3207_v58 = vmul.f32 %v3143_v53, %v3143_v53  ;;  %v2306_v11 = vmax.f32 %v2238_v55, 0.0  ;;  %v3461_v56 = vadd.f32 %v3460_v20, %v3398_v3  ;;  %vm3271_vm9 = vcmp.ne.f32.partialorder %v2762_v38, 0.0  ;;  %p4574_p0 = pnand %p4573_p13, %p4567_p10 }
 0x4e6   :  { %v2561_v26 = vmul.f32 25.0, %v2433_v13  ;;  %v3080_v14 = vmax.f32 %v3012_v37, 0.0  ;;  %v1942_v9 = vunpack.c.h.bf16 %v4496_v52  ;;  %v2240_v40 = vadd.f32 %v6660_v47, %v5363_v46 }
 0x4e7   :  { %v3335_v34 = vmul.f32 25.0, %v3207_v58  ;;  %v2370_v4 = vsub.f32 %v1941_v19, %v2306_v11  ;;  %vm7098_vm10 = vcmp.ne.f32.partialorder %v1941_v19, 0.0  ;;  %v2764_v7 = vunpack.c.h.bf16 %v4497_v8 }
 0x4e8   :  { %v3144_v31 = vsub.f32 %v2763_v43, %v3080_v14  ;;  %v3014_v2 = vadd.f32 %v6662_v22, %v5374_v50  ;;  %vm7104_vm11 = vcmp.ne.f32.partialorder %v2763_v43, 0.0  ;;  %v2307_v1 = vmax.f32 %v2240_v40, 0.0 }
 0x4e9   :  { %v3399_v28 = vsel %vm3271_vm9, %v3335_v34, %v3207_v58  ;;  %v2434_v60 = vmul.f32 %v2370_v4, %v2370_v4  ;;  %v2625_v63 = vsel %vm7078_vm8, %v2561_v26, %v2433_v13  ;;  %v1943_v22 = vunpack.c.l.bf16 %v4498_v17 }
 0x4ea   :  { %v3462_v47 = vadd.f32 %v3461_v56, %v3399_v28  ;;  %v3208_v41 = vmul.f32 %v3144_v31, %v3144_v31  ;;  %v3081_v57 = vmax.f32 %v3014_v2, 0.0  ;;  %v2371_v15 = vsub.f32 %v1942_v9, %v2307_v1 }
 0x4eb   :  { %v2562_v6 = vmul.f32 25.0, %v2434_v60  ;;  %v2242_v30 = vadd.f32 %v6668_v39, %v5357_v44  ;;  %v2765_v36 = vunpack.c.l.bf16 %v4499_v21  ;;  %v3016_v42 = vadd.f32 %v7680_v25, %v5360_v45 }
 0x4ec   :  { %v3336_v59 = vmul.f32 25.0, %v3208_v41  ;;  %v3145_v29 = vsub.f32 %v2764_v7, %v3081_v57  ;;  %v2435_v38 = vmul.f32 %v2371_v15, %v2371_v15  ;;  %v1944_v5 = vunpack.c.h.bf16 %v4498_v17 }
 0x4ed   :  { %v2308_v18 = vmax.f32 %v2242_v30, 0.0  ;;  %v2244_v12 = vadd.f32 %v7681_v16, %v5363_v46  ;;  %vm7122_vm12 = vcmp.ne.f32.partialorder %v1942_v9, 0.0  ;;  %v3082_v39 = vmax.f32 %v3016_v42, 0.0 }
 0x4ee   :  { %v3209_v44 = vmul.f32 %v3145_v29, %v3145_v29  ;;  %v2766_v54 = vunpack.c.h.bf16 %v4499_v21  ;;  %v2563_v20 = vmul.f32 25.0, %v2435_v38  ;;  %v3018_v35 = vadd.f32 %v7684_v49, %v5374_v50 }
 0x4ef   :  { %v2372_v10 = vsub.f32 %v1943_v22, %v2308_v18  ;;  %v2309_v27 = vmax.f32 %v2244_v12, 0.0  ;;  %v3400_v45 = vsel %vm7104_vm11, %v3336_v59, %v3208_v41  ;;  %vm7130_vm13 = vcmp.ne.f32.partialorder %v2764_v7, 0.0 }
 0x4f0   :  { %v3337_v46 = vmul.f32 25.0, %v3209_v44  ;;  %v3146_v24 = vsub.f32 %v2765_v36, %v3082_v39  ;;  %v3083_v53 = vmax.f32 %v3018_v35, 0.0  ;;  %v2626_v52 = vsel %vm7098_vm10, %v2562_v6, %v2434_v60 }
 0x4f1   :  { %v2436_v51 = vmul.f32 %v2372_v10, %v2372_v10  ;;  %v2373_v48 = vsub.f32 %v1944_v5, %v2309_v27  ;;  %vm7136_vm14 = vcmp.ne.f32.partialorder %v1943_v22, 0.0  ;;  %v2627_v50 = vsel %vm7122_vm12, %v2563_v20, %v2435_v38 }
 0x4f2   :  { %v3210_v19 = vmul.f32 %v3146_v24, %v3146_v24  ;;  %v2688_v23 = vadd.f32 %v2687_v0, %v2625_v63  ;;  %v3147_v43 = vsub.f32 %v2766_v54, %v3083_v53  ;;  %vm3274_vm15 = vcmp.ne.f32.partialorder %v2765_v36, 0.0 }
 0x4f3   :  { %v2564_v13 = vmul.f32 25.0, %v2436_v51  ;;  %v2437_v8 = vmul.f32 %v2373_v48, %v2373_v48  ;;  %v3401_v58 = vsel %vm7130_vm13, %v3337_v46, %v3209_v44  ;;  %v3463_v11 = vadd.f32 %v3462_v47, %v3400_v45 }
 0x4f4   :  { %v3338_v37 = vmul.f32 25.0, %v3210_v19  ;;  %v2689_v3 = vadd.f32 %v2688_v23, %v2626_v52  ;;  %v3211_v56 = vmul.f32 %v3147_v43, %v3147_v43  ;;  %vm2501_vm0 = vcmp.ne.f32.partialorder %v1944_v5, 0.0 }
 0x4f5   :  { %v2565_v26 = vmul.f32 25.0, %v2437_v8  ;;  %vm3275_vm1 = vcmp.ne.f32.partialorder %v2766_v54, 0.0  ;;  %v3464_v34 = vadd.f32 %v3463_v11, %v3401_v58  ;;  %v2628_v0 = vsel %vm7136_vm14, %v2564_v13, %v2436_v51 }
 0x4f6   :  { %v2690_v14 = vadd.f32 %v2689_v3, %v2627_v50  ;;  %v3339_v4 = vmul.f32 25.0, %v3211_v56  ;;  %v3402_v9 = vsel %vm3274_vm15, %v3338_v37, %v3210_v19 }
 0x4f7   :  { %v3465_v61 = vadd.f32 %v3464_v34, %v3402_v9  ;;  %v2629_v31 = vsel %vm2501_vm0, %v2565_v26, %v2437_v8 }
 0x4f8   :  { %v2691_v40 = vadd.f32 %v2690_v14, %v2628_v0  ;;  %v3403_v7 = vsel %vm3275_vm1, %v3339_v4, %v3211_v56 }
 0x4f9   :  { %v3466_v28 = vadd.f32 %v3465_v61, %v3403_v7 }
 0x4fa   :  { %v2692_v2 = vadd.f32 %v2691_v40, %v2629_v31 }
 0x4fc   :  { %2693 = vadd.xlane.f32.xlu0 %v2692_v2 }
 0x500   :  { %3467 = vadd.xlane.f32.xlu0 %v3466_v28 }
 0x501   :  { %4577 = shalt.err (!%p4574_p0)
}
 0x502   :  { %s4578_s8 = scalar_lea.hbm %s7184_s13, 32 }
 0x503   :  { %p4579_p1 = scmp.ne.s32.totalorder %s7184_s13, %s4578_s8  ;;  %p4582_p2 = scmp.lt.u32.totalorder %s4578_s8, %s7184_s13 }
 0x505   :  { %p4584_p3 = pnand %p4582_p2, %p4579_p1 }
 0x507   :  { %4587 = shalt.err (!%p4584_p3)
}
 0x508   :  { %3730 = dma.vmem_to_hbm [thread:$0]  %s3728_s1, 32, %s7184_s13, [#allocation4]   ;;  %v3606_v60 = vpop.xlane.xlu1 %3605  ;;  %v7689_v16 = vlaneseq }
 0x509   :  { %v3607_v33 = vrot.slane %v3606_v60, 4  ;;  %s4626_s25 = smov [#allocation9]  }
 0x50a   :  { %v3712_v12 = vand.u32 127, %v7689_v16  ;;  %s3737_s26 = sshll.u32 %s4626_s25, 4  ;;  %s3738_s26 = int_to_ptr.vmem [resolvable:$true] %s3737_s26 }
 0x50b   :  { %v3608_v1 = vadd.f32 %v3607_v33, %v3606_v60  ;;  %s4588_s24 = scalar_lea.vmem %s3738_s26, 16  ;;  %s4592_s29 = scalar_lea.vmem %s3738_s26, 32 }
 0x50c   :  { %vm3713_vm2 = vcmp.eq.s32.totalorder %v3712_v12, 0  ;;  %vm3716_vm3 = vcmp.eq.s32.totalorder %v3712_v12, 1  ;;  %p4589_p4 = scmp.ne.s32.totalorder %s3738_s26, %s4588_s24  ;;  %p4593_p5 = scmp.lt.s32.totalorder %s3738_s26, %s3738_s26 }
 0x50d   :  { %v3609_v57 = vrot.slane %v3608_v1, 2  ;;  %p4594_p6 = scmp.lt.s32.totalorder %s4592_s29, %s4588_s24 }
 0x50f   :  { %v3610_v59 = vadd.f32 %v3609_v57, %v3608_v1  ;;  %p4595_p7 = por %p4594_p6, %p4593_p5 }
 0x511   :  { %v3611_v42 = vrot.slane %v3610_v59, 1  ;;  %p4596_p8 = pnand %p4595_p7, %p4589_p4 }
 0x513   :  { %v3612_v5 = vadd.f32 %v3611_v42, %v3610_v59 }
 0x589   :  { %v2694_v63 = vpop.xlane.xlu0 %2693 }
 0x58a   :  { %v2695_v47 = vrot.slane %v2694_v63, 4 }
 0x58c   :  { %v2696_v41 = vadd.f32 %v2695_v47, %v2694_v63 }
 0x58d   :  { %v3468_v6 = vpop.xlane.xlu0 %3467 }
 0x58e   :  { %v2697_v15 = vrot.slane %v2696_v41, 2  ;;  %v3469_v17 = vrot.slane %v3468_v6, 4 }
 0x590   :  { %v3470_v22 = vadd.f32 %v3469_v17, %v3468_v6  ;;  %v2698_v30 = vadd.f32 %v2697_v15, %v2696_v41 }
 0x592   :  { %v3471_v29 = vrot.slane %v3470_v22, 2  ;;  %v2699_v21 = vrot.slane %v2698_v30, 1 }
 0x594   :  { %v3472_v36 = vadd.f32 %v3471_v29, %v3470_v22  ;;  %v2700_v25 = vadd.f32 %v2699_v21, %v2698_v30 }
 0x596   :  { %4273 = vpush %v2700_v25  ;;  %v3473_v38 = vrot.slane %v3472_v36, 1 }
 0x598   :  { %v3474_v18 = vadd.f32 %v3473_v38, %v3472_v36 }
 0x59a   :  { %4275 = vpush %v3474_v18 }
 0x59b   :  { %4277 = vpush %v3612_v5 }
 0x5c7   :  { %s4274_s13 = spop %4273 }
 0x5cb   :  { %s4276_s28 = spop %4275 }
 0x5cc   :  { %s3477_s12 = sadd.f32 %s4276_s28, %s4274_s13  ;;  %s4278_s10 = spop %4277 }
 0x5cd   :  { %v3717_v62 = vstv %s4278_s10 }
 0x5ce   :  { %v3714_v44 = vstv %s3477_s12  ;;  %v3718_v54 = vsel %vm3716_vm3, %v3717_v62, 0.0 }
 0x5cf   :  { %v3715_v39 = vsel %vm3713_vm2, %v3714_v44, 0.0 }
 0x5d0   :  { %v3719_v20 = vadd.f32 %v3718_v54, %v3715_v39 }
 0x5d2   :  { %3720 = vst [vmem:[#allocation9] sm:$0x1] %v3719_v20 }
 0x5d3   :  { %4599 = shalt.err (!%p4596_p8)
}
 0x5d4   :  { %s4600_s17 = scalar_lea.hbm %s7185_s14, 16 }
 0x5d5   :  { %p4601_p9 = scmp.ne.s32.totalorder %s7185_s14, %s4600_s17  ;;  %p4604_p10 = scmp.lt.u32.totalorder %s4600_s17, %s7185_s14 }
 0x5d7   :  { %p4606_p11 = pnand %p4604_p10, %p4601_p9 }
 0x5d9   :  { %4609 = shalt.err (!%p4606_p11)
}
 0x5da   :  { %3740 = dma.vmem_to_hbm [thread:$0]  %s3738_s26, 16, %s7185_s14, [#allocation10]  }
 0x5db   :  { %4614 = dma.done.wait [#allocation4], 32  }
 0x5dc   :  { %4615 = vsyncadd [#allocation4], 4294967264 }
 0x5dd   :  { %4616 = dma.done.wait [#allocation10], 16  }
 0x5de   :  { %4617 = vsyncadd [#allocation10], 4294967280 }
 0x5df   :  { %3747 = vsyncpa [#allocation3], 1 }
 0x5e0   :  { %3748 = vsyncpa [#allocation6], 1 }
 0x5e1   :  { %3749 = vsyncpa [#allocation4], 1 }
 0x5e2   :  { %3750 = vsyncpa [#allocation10], 1 }

</bundles_post_ra>
